<compile_context>
chip_gen: v6e
topology: v6e:2x2x1
jax: 0.10.0
libtpu: 0.0.40
codegen_flags: <defaults>
</compile_context>

<pallas_src>
import functools

import jax
import jax.numpy as jnp
from jax.experimental import pallas as pl
from jax.experimental.pallas import tpu as pltpu


# ------------------------- Pallas kernel -------------------------

def _drug_mlp_kernel(x_ref, w1q_ref, s1_ref, b1_ref, w2_ref, b2_ref,
                     w3_ref, b3_ref, out_ref, acc_ref):
    """Fused fc1 (int8 weights, K-tiled) + dequant + ReLU + fc2 + ReLU + fc3.

    Grid: (K1 // tk,) -- reduction axis of fc1, marked "arbitrary".
    x/w2/w3 are bf16, w1 is int8, scale/biases/accumulator are f32.
    acc_ref: (B, 1024) f32 accumulator holding the *unscaled* int8-unit sum of
    fc1; it persists across the grid and is dequantized in the last step.
    """
    k = pl.program_id(0)

    @pl.when(k == 0)
    def _():
        acc_ref[...] = jnp.zeros_like(acc_ref)

    # int8 -> bf16 upconvert on the VPU (free filler: kernel is HBM-bound),
    # then MXU dot with f32 accumulation.  int8 values are exact in bf16.
    w1_bf16 = w1q_ref[...].astype(jnp.bfloat16)
    acc_ref[...] += jnp.dot(x_ref[...], w1_bf16,
                            preferred_element_type=jnp.float32)

    @pl.when(k == pl.num_programs(0) - 1)
    def _():
        # dequantize fc1 (per-output-column scale), add bias, ReLU
        h1 = acc_ref[...] * s1_ref[...] + b1_ref[...]
        h1 = jnp.maximum(h1, 0.0).astype(w2_ref.dtype)
        h2 = jnp.dot(h1, w2_ref[...],
                     preferred_element_type=jnp.float32) + b2_ref[...]
        h2 = jnp.maximum(h2, 0.0).astype(w3_ref.dtype)
        h3 = jnp.dot(h2, w3_ref[...],
                     preferred_element_type=jnp.float32) + b3_ref[...]
        out_ref[...] = h3.astype(out_ref.dtype)


def drug_mlp(x, w1_q, s1, b1, w2, b2, w3, b3, *, tk=3200):
    """x: (B, 12800) bf16 -> (B, 32) f32 via int8-fc1/relu/fc2/relu/fc3.

    tk=3200 -> grid of 4 K-steps; double-buffered int8 w1 tile is 2 x 3.2 MiB,
    total VMEM footprint ~13 MiB (safe on v5e/v6e/v7x).
    """
    B, K1 = x.shape
    N1 = w1_q.shape[1]        # 1024
    N2 = w2.shape[1]          # 256
    N3 = w3.shape[1]          # 32
    assert K1 % tk == 0
    nk = K1 // tk

    # Resident operands: constant index map, fetched once -> single buffer.
    resident = dict(pipeline_mode=pl.Buffered(1))

    grid_spec = pltpu.PrefetchScalarGridSpec(
        num_scalar_prefetch=0,
        grid=(nk,),
        in_specs=[
            pl.BlockSpec((B, tk), lambda k: (0, k)),                 # x (bf16)
            pl.BlockSpec((tk, N1), lambda k: (k, 0)),                # w1 (int8)
            pl.BlockSpec((1, N1), lambda k: (0, 0), **resident),     # s1 (f32)
            pl.BlockSpec((1, N1), lambda k: (0, 0), **resident),     # b1 (f32)
            pl.BlockSpec((N1, N2), lambda k: (0, 0), **resident),    # w2 (bf16)
            pl.BlockSpec((1, N2), lambda k: (0, 0), **resident),     # b2 (f32)
            pl.BlockSpec((N2, N3), lambda k: (0, 0), **resident),    # w3 (bf16)
            pl.BlockSpec((1, N3), lambda k: (0, 0), **resident),     # b3 (f32)
        ],
        out_specs=pl.BlockSpec((B, N3), lambda k: (0, 0)),
        scratch_shapes=[pltpu.VMEM((B, N1), jnp.float32)],
    )

    return pl.pallas_call(
        _drug_mlp_kernel,
        out_shape=jax.ShapeDtypeStruct((B, N3), jnp.float32),
        grid_spec=grid_spec,
        compiler_params=pltpu.CompilerParams(
            dimension_semantics=("arbitrary",),
            vmem_limit_bytes=32 << 20,   # footprint ~13 MiB; headroom on v7x
        ),
    )(x, w1_q, s1, b1, w2, b2, w3, b3)


# ------------------------- parameters & prep -------------------------

def init_params(key, drug_dict_len, embedding_size):
    """Deterministic synthetic f32 parameters matching the nn.Module shapes.

    w1 rows are indexed exactly as PyTorch's permute(0,2,1)+view implies:
    row index = e * seq_len + s.
    """
    ks = jax.random.split(key, 7)

    def dense(kw, kb, fan_in, fan_out):
        lim = 1.0 / jnp.sqrt(fan_in)
        w = jax.random.uniform(kw, (fan_in, fan_out), jnp.float32, -lim, lim)
        b = jax.random.uniform(kb, (1, fan_out), jnp.float32, -lim, lim)
        return w, b

    emb = jax.random.normal(ks[0], (drug_dict_len, embedding_size), jnp.float32)
    w1, b1 = dense(ks[1], ks[2], 12800, 1024)
    w2, b2 = dense(ks[3], ks[4], 1024, 256)
    w3, b3 = dense(ks[5], ks[6], 256, 32)
    return dict(emb=emb, w1=w1, b1=b1, w2=w2, b2=b2, w3=w3, b3=b3)


def _quantize_w1_int8(w1):
    """Per-output-column symmetric int8 quantization; returns (q, scale)."""
    absmax = jnp.max(jnp.abs(w1), axis=0, keepdims=True)            # (1, N1)
    scale = jnp.where(absmax > 0, absmax / 127.0, 1.0).astype(jnp.float32)
    q = jnp.clip(jnp.round(w1 / scale), -127.0, 127.0).astype(jnp.int8)
    return q, scale


def prepare_params(params, embedding_size, seq_len):
    """One-time prep for the kernel path:
      * re-permute w1 rows from (e*seq + s) to (s*emb + e) so the runtime
        transpose of the embedding output disappears;
      * quantize w1 to int8 with per-output-column f32 scale;
      * cast w2/w3 to bf16 (biases stay f32)."""
    n1 = params["w1"].shape[1]
    w1 = params["w1"].reshape(embedding_size, seq_len, n1)
    w1 = jnp.transpose(w1, (1, 0, 2)).reshape(embedding_size * seq_len, n1)
    w1_q, s1 = _quantize_w1_int8(w1)
    return dict(
        emb=params["emb"],
        w1_q=w1_q, s1=s1, b1=params["b1"],
        w2=params["w2"].astype(jnp.bfloat16), b2=params["b2"],
        w3=params["w3"].astype(jnp.bfloat16), b3=params["b3"],
    )


# ------------------------- DrugBlock forward -------------------------

@functools.partial(jax.jit, static_argnames=("batch_size",))
def drug_block_forward(prepared, batch_size, drug_feature):
    # Embedding lookup (glue, plain JAX gather): (B, S) -> (B, S, E)
    enc = jnp.take(prepared["emb"], drug_feature, axis=0)
    # No transpose needed: w1 was pre-permuted to (s*emb + e) row order.
    x = enc.reshape((batch_size, -1)).astype(jnp.bfloat16)   # (B, 12800)
    # Fused quantized MLP hot path in Pallas
    return drug_mlp(x, prepared["w1_q"], prepared["s1"], prepared["b1"],
                    prepared["w2"], prepared["b2"],
                    prepared["w3"], prepared["b3"])


# ------------------------- references -------------------------

def drug_block_reference_f32(params, batch_size, drug_feature):
    """Exact PyTorch semantics (f32, with the permute) — loose check."""
    enc = jnp.take(params["emb"], drug_feature, axis=0)
    enc = jnp.transpose(enc, (0, 2, 1)).reshape((batch_size, -1))
    h = jnp.maximum(enc @ params["w1"] + params["b1"], 0.0)
    h = jnp.maximum(h @ params["w2"] + params["b2"], 0.0)
    return h @ params["w3"] + params["b3"]


def drug_block_reference_quant(prepared, batch_size, drug_feature):
    """Same int8-w1 / bf16 / f32-accumulation math as the kernel — tight check
    (only fc1 f32 summation order differs)."""
    enc = jnp.take(prepared["emb"], drug_feature, axis=0)
    x = enc.reshape((batch_size, -1)).astype(jnp.bfloat16)
    h1 = jnp.dot(x, prepared["w1_q"].astype(jnp.bfloat16),
                 preferred_element_type=jnp.float32)
    h1 = h1 * prepared["s1"] + prepared["b1"]
    h1 = jnp.maximum(h1, 0.0).astype(jnp.bfloat16)
    h2 = jnp.dot(h1, prepared["w2"],
                 preferred_element_type=jnp.float32) + prepared["b2"]
    h2 = jnp.maximum(h2, 0.0).astype(jnp.bfloat16)
    return jnp.dot(h2, prepared["w3"],
                   preferred_element_type=jnp.float32) + prepared["b3"]


if __name__ == "__main__":
    # fc1.in_features = 12800 = embedding_size * seq_len  ->  128 * 100
    drug_dict_len = 64
    embedding_size = 128
    seq_len = 100
    batch_size = 8   # small, but wider than 2 for a more meaningful accuracy check

    key = jax.random.PRNGKey(0)
    k_params, k_tok = jax.random.split(key)
    params = init_params(k_params, drug_dict_len, embedding_size)
    prepared = prepare_params(params, embedding_size, seq_len)
    drug_feature = jax.random.randint(
        k_tok, (batch_size, seq_len), 0, drug_dict_len, dtype=jnp.int32)

    out = jax.block_until_ready(
        drug_block_forward(prepared, batch_size, drug_feature))

    ref_q = jax.block_until_ready(
        drug_block_reference_quant(prepared, batch_size, drug_feature))
    ref_f32 = jax.block_until_ready(
        drug_block_reference_f32(params, batch_size, drug_feature))

    assert out.shape == (batch_size, 32)
    # tight: identical int8/bf16 math as the kernel (only fc1 sum order differs)
    assert jnp.allclose(out, ref_q, atol=2e-3, rtol=2e-3)
    # loose: original f32 PyTorch semantics (int8/bf16 weight quantization error)
    assert jnp.allclose(out, ref_f32, atol=5e-2, rtol=5e-2)

    print("KERNEL_OK")
</pallas_src>

<mosaic_0001>
module attributes {stable_mosaic.version = 11 : i64} {
  func.func @_drug_mlp_kernel(%arg0: i32, %arg1: memref<8x3200xbf16, #tpu.memory_space<vmem>>, %arg2: memref<3200x1024xi8, #tpu.memory_space<vmem>>, %arg3: memref<1x1024xf32, #tpu.memory_space<vmem>>, %arg4: memref<1x1024xf32, #tpu.memory_space<vmem>>, %arg5: memref<1024x256xbf16, #tpu.memory_space<vmem>>, %arg6: memref<1x256xf32, #tpu.memory_space<vmem>>, %arg7: memref<256x32xbf16, #tpu.memory_space<vmem>>, %arg8: memref<1x32xf32, #tpu.memory_space<vmem>>, %arg9: memref<8x32xf32, #tpu.memory_space<vmem>>, %arg10: memref<8x1024xf32, #tpu.memory_space<vmem>>) attributes {dimension_semantics = [#tpu.dimension_semantics<arbitrary>], iteration_bounds = array<i64: 4>, scalar_prefetch = 0 : i64, scratch_operands = 1 : i64, tpu.core_type = #tpu.core_type<tc>, window_params = [{transform_indices = @transform_0, window_bounds = array<i64: 8, 3200>}, {transform_indices = @transform_1, window_bounds = array<i64: 3200, 1024>}, {pipeline_mode = #tpu.pipeline_mode<synchronous>, transform_indices = @transform_2, window_bounds = array<i64: 1, 1024>}, {pipeline_mode = #tpu.pipeline_mode<synchronous>, transform_indices = @transform_3, window_bounds = array<i64: 1, 1024>}, {pipeline_mode = #tpu.pipeline_mode<synchronous>, transform_indices = @transform_4, window_bounds = array<i64: 1024, 256>}, {pipeline_mode = #tpu.pipeline_mode<synchronous>, transform_indices = @transform_5, window_bounds = array<i64: 1, 256>}, {pipeline_mode = #tpu.pipeline_mode<synchronous>, transform_indices = @transform_6, window_bounds = array<i64: 256, 32>}, {pipeline_mode = #tpu.pipeline_mode<synchronous>, transform_indices = @transform_7, window_bounds = array<i64: 1, 32>}, {pipeline_mode = #tpu.pipeline_mode<synchronous>, transform_indices = @transform_8, window_bounds = array<i64: 8, 32>}]} {
    %c0_i32 = arith.constant 0 : i32
    %0 = arith.cmpi eq, %arg0, %c0_i32 : i32
    %1 = arith.extui %0 : i1 to i32
    %c0_i32_0 = arith.constant 0 : i32
    %2 = arith.cmpi ne, %1, %c0_i32_0 : i32
    scf.if %2 {
      %cst_9 = arith.constant 0.000000e+00 : f32
      %13 = vector.broadcast %cst_9 : f32 to vector<8x1024xf32>
      %c0_10 = arith.constant 0 : index
      %c0_11 = arith.constant 0 : index
      %14 = vector.load %arg10[%c0_10, %c0_11] : memref<8x1024xf32, #tpu.memory_space<vmem>>, vector<8x1024xf32>
      tpu.vector_store %arg10[%c0_10, %c0_11], %13 {strides = array<i32>} : memref<8x1024xf32, #tpu.memory_space<vmem>>, vector<8x1024xf32>,
    } else {
    }
    %c0 = arith.constant 0 : index
    %c0_1 = arith.constant 0 : index
    %3 = vector.load %arg2[%c0, %c0_1] : memref<3200x1024xi8, #tpu.memory_space<vmem>>, vector<3200x1024xi8>
    %4 = arith.sitofp %3 : vector<3200x1024xi8> to vector<3200x1024xbf16>
    %c0_2 = arith.constant 0 : index
    %c0_3 = arith.constant 0 : index
    %5 = vector.load %arg10[%c0_2, %c0_3] : memref<8x1024xf32, #tpu.memory_space<vmem>>, vector<8x1024xf32>
    %c0_4 = arith.constant 0 : index
    %c0_5 = arith.constant 0 : index
    %6 = vector.load %arg1[%c0_4, %c0_5] : memref<8x3200xbf16, #tpu.memory_space<vmem>>, vector<8x3200xbf16>
    %cst = arith.constant dense<0.000000e+00> : vector<8x1024xf32>
    %7 = tpu.matmul %6, %4, %cst {dimension_numbers = #tpu.dot_dimension_numbers<[1], [0], [0], [1], [0, 0, 1, 1], [], []>} : vector<8x3200xbf16>, vector<3200x1024xbf16>, vector<8x1024xf32> -> vector<8x1024xf32>
    %8 = arith.addf %5, %7 : vector<8x1024xf32>
    %c0_6 = arith.constant 0 : index
    %c0_7 = arith.constant 0 : index
    %9 = vector.load %arg10[%c0_6, %c0_7] : memref<8x1024xf32, #tpu.memory_space<vmem>>, vector<8x1024xf32>
    tpu.vector_store %arg10[%c0_6, %c0_7], %8 {strides = array<i32>} : memref<8x1024xf32, #tpu.memory_space<vmem>>, vector<8x1024xf32>,
    %c3_i32 = arith.constant 3 : i32
    %10 = arith.cmpi eq, %arg0, %c3_i32 : i32
    %11 = arith.extui %10 : i1 to i32
    %c0_i32_8 = arith.constant 0 : i32
    %12 = arith.cmpi ne, %11, %c0_i32_8 : i32
    scf.if %12 {
      %c0_9 = arith.constant 0 : index
      %c0_10 = arith.constant 0 : index
      %13 = vector.load %arg10[%c0_9, %c0_10] : memref<8x1024xf32, #tpu.memory_space<vmem>>, vector<8x1024xf32>
      %c0_11 = arith.constant 0 : index
      %c0_12 = arith.constant 0 : index
      %14 = vector.load %arg3[%c0_11, %c0_12] : memref<1x1024xf32, #tpu.memory_space<vmem>>, vector<1x1024xf32>
      %15 = vector.broadcast %14 : vector<1x1024xf32> to vector<8x1024xf32>
      %16 = arith.mulf %13, %15 : vector<8x1024xf32>
      %c0_13 = arith.constant 0 : index
      %c0_14 = arith.constant 0 : index
      %17 = vector.load %arg4[%c0_13, %c0_14] : memref<1x1024xf32, #tpu.memory_space<vmem>>, vector<1x1024xf32>
      %18 = vector.broadcast %17 : vector<1x1024xf32> to vector<8x1024xf32>
      %19 = arith.addf %16, %18 : vector<8x1024xf32>
      %cst_15 = arith.constant 0.000000e+00 : f32
      %20 = vector.broadcast %cst_15 : f32 to vector<8x1024xf32>
      %21 = arith.maximumf %19, %20 : vector<8x1024xf32>
      %22 = arith.truncf %21 : vector<8x1024xf32> to vector<8x1024xbf16>
      %c0_16 = arith.constant 0 : index
      %c0_17 = arith.constant 0 : index
      %23 = vector.load %arg5[%c0_16, %c0_17] : memref<1024x256xbf16, #tpu.memory_space<vmem>>, vector<1024x256xbf16>
      %cst_18 = arith.constant dense<0.000000e+00> : vector<8x256xf32>
      %24 = tpu.matmul %22, %23, %cst_18 {dimension_numbers = #tpu.dot_dimension_numbers<[1], [0], [0], [1], [0, 0, 1, 1], [], []>} : vector<8x1024xbf16>, vector<1024x256xbf16>, vector<8x256xf32> -> vector<8x256xf32>
      %c0_19 = arith.constant 0 : index
      %c0_20 = arith.constant 0 : index
      %25 = vector.load %arg6[%c0_19, %c0_20] : memref<1x256xf32, #tpu.memory_space<vmem>>, vector<1x256xf32>
      %26 = vector.broadcast %25 : vector<1x256xf32> to vector<8x256xf32>
      %27 = arith.addf %24, %26 : vector<8x256xf32>
      %cst_21 = arith.constant 0.000000e+00 : f32
      %28 = vector.broadcast %cst_21 : f32 to vector<8x256xf32>
      %29 = arith.maximumf %27, %28 : vector<8x256xf32>
      %30 = arith.truncf %29 : vector<8x256xf32> to vector<8x256xbf16>
      %c0_22 = arith.constant 0 : index
      %c0_23 = arith.constant 0 : index
      %31 = vector.load %arg7[%c0_22, %c0_23] : memref<256x32xbf16, #tpu.memory_space<vmem>>, vector<256x32xbf16>
      %cst_24 = arith.constant dense<0.000000e+00> : vector<8x32xf32>
      %32 = tpu.matmul %30, %31, %cst_24 {dimension_numbers = #tpu.dot_dimension_numbers<[1], [0], [0], [1], [0, 0, 1, 1], [], []>} : vector<8x256xbf16>, vector<256x32xbf16>, vector<8x32xf32> -> vector<8x32xf32>
      %c0_25 = arith.constant 0 : index
      %c0_26 = arith.constant 0 : index
      %33 = vector.load %arg8[%c0_25, %c0_26] : memref<1x32xf32, #tpu.memory_space<vmem>>, vector<1x32xf32>
      %34 = vector.broadcast %33 : vector<1x32xf32> to vector<8x32xf32>
      %35 = arith.addf %32, %34 : vector<8x32xf32>
      %c0_27 = arith.constant 0 : index
      %c0_28 = arith.constant 0 : index
      %36 = vector.load %arg9[%c0_27, %c0_28] : memref<8x32xf32, #tpu.memory_space<vmem>>, vector<8x32xf32>
      tpu.vector_store %arg9[%c0_27, %c0_28], %35 {strides = array<i32>} : memref<8x32xf32, #tpu.memory_space<vmem>>, vector<8x32xf32>,
    } else {
    }
    return
  }
  func.func @transform_0(%arg0: i32) -> (i32, i32) {
    %c0_i32 = arith.constant 0 : i32
    %c0_i32_0 = arith.constant 0 : i32
    return %c0_i32, %arg0 : i32, i32
  }
  func.func @transform_1(%arg0: i32) -> (i32, i32) {
    %c0_i32 = arith.constant 0 : i32
    %c0_i32_0 = arith.constant 0 : i32
    return %arg0, %c0_i32 : i32, i32
  }
  func.func @transform_2(%arg0: i32) -> (i32, i32) {
    %c0_i32 = arith.constant 0 : i32
    %c0_i32_0 = arith.constant 0 : i32
    %c0_i32_1 = arith.constant 0 : i32
    return %c0_i32, %c0_i32_0 : i32, i32
  }
  func.func @transform_3(%arg0: i32) -> (i32, i32) {
    %c0_i32 = arith.constant 0 : i32
    %c0_i32_0 = arith.constant 0 : i32
    %c0_i32_1 = arith.constant 0 : i32
    return %c0_i32, %c0_i32_0 : i32, i32
  }
  func.func @transform_4(%arg0: i32) -> (i32, i32) {
    %c0_i32 = arith.constant 0 : i32
    %c0_i32_0 = arith.constant 0 : i32
    %c0_i32_1 = arith.constant 0 : i32
    return %c0_i32, %c0_i32_0 : i32, i32
  }
  func.func @transform_5(%arg0: i32) -> (i32, i32) {
    %c0_i32 = arith.constant 0 : i32
    %c0_i32_0 = arith.constant 0 : i32
    %c0_i32_1 = arith.constant 0 : i32
    return %c0_i32, %c0_i32_0 : i32, i32
  }
  func.func @transform_6(%arg0: i32) -> (i32, i32) {
    %c0_i32 = arith.constant 0 : i32
    %c0_i32_0 = arith.constant 0 : i32
    %c0_i32_1 = arith.constant 0 : i32
    return %c0_i32, %c0_i32_0 : i32, i32
  }
  func.func @transform_7(%arg0: i32) -> (i32, i32) {
    %c0_i32 = arith.constant 0 : i32
    %c0_i32_0 = arith.constant 0 : i32
    %c0_i32_1 = arith.constant 0 : i32
    return %c0_i32, %c0_i32_0 : i32, i32
  }
  func.func @transform_8(%arg0: i32) -> (i32, i32) {
    %c0_i32 = arith.constant 0 : i32
    %c0_i32_0 = arith.constant 0 : i32
    %c0_i32_1 = arith.constant 0 : i32
    return %c0_i32, %c0_i32_0 : i32, i32
  }
}

</mosaic_0001>

<bundles_post_ra>
// kernel: drug_block_forward.1
= control target key start
LH: loop header
LB: loop body
LE: loop exit
PB: predicated region body
PF: predicated region fallthrough
CT: control target
= control target key end

     0   :  { %13 = vsyncpa [#allocation4], 0  ;;  %s8818_s0 = inlined_call_operand.vmem [shape: bf16[8,12800], index: 0, kind: input, shape index: {}]   ;;  %s8819_s1 = inlined_call_operand.hbm [shape: s8[12800,1024], index: 1, kind: input, shape index: {}]   ;;  %s8820_s2 = inlined_call_operand.hbm [shape: f32[1,1024], index: 2, kind: input, shape index: {}]   ;;  %s8821_s3 = inlined_call_operand.hbm [shape: f32[1,1024], index: 3, kind: input, shape index: {}]   ;;  %s8822_s4 = inlined_call_operand.hbm [shape: bf16[1024,256], index: 4, kind: input, shape index: {}]   ;;  %s8823_s5 = inlined_call_operand.hbm [shape: f32[1,256], index: 5, kind: input, shape index: {}]   ;;  %s8824_s6 = inlined_call_operand.vmem [shape: bf16[256,32], index: 6, kind: input, shape index: {}]   ;;  %s8825_s7 = inlined_call_operand.hbm [shape: f32[1,32], index: 7, kind: input, shape index: {}]   ;;  %s8826_s8 = inlined_call_operand.hbm [shape: f32[8,32], index: 8, kind: output, shape index: {}]  }
   0x1   :  { %15 = vsyncpa [#allocation4 + $0x1], 0 }
   0x2   :  { %16 = vsyncpa [#allocation7], 0 }
   0x3   :  { %17 = vsyncpa [#allocation10], 0 }
   0x4   :  { %18 = vsyncpa [#allocation13], 0 }
   0x5   :  { %19 = vsyncpa [#allocation5], 0  ;;  %s7292_s27 = smov 0   ;;  %s7294_s28 = smov 0  }
   0x6   :  { %s7296_s29 = smov 0   ;;  %s7298_s30 = smov 0  }
   0x7 LB: > { %s7234_s9 = smov [#allocation6]   ;;  %s7313_s11 = sadd.s32 4294967295, %s7232_s30   ;;  %s7232_s30 = sphi %s7298_s30, %s8848_s30   ;;  %s7228_s29 = sphi %s7296_s29, %s8847_s29   ;;  %s7224_s28 = sphi %s7294_s28, %s8846_s28   ;;  %s7220_s27 = sphi %s7292_s27, %s8845_s27  }
   0x8   : > { %s242_s10 = sshll.u32 %s7234_s9, 4  ;;  %p6442_p0 = scmp.ge.s32.totalorder %s7232_s30, 1  ;;  %s243_s10 = int_to_ptr.vmem [resolvable:$true] %s242_s10 }
   0x9   : > { %p8827_p1 = scmp.eq.s32.totalorder %s7313_s11, 0  ;;  %p229_p2 = scmp.lt.s32.totalorder %s7232_s30, 5 }
   0xa   : > { %s7235_s13 = smov [#allocation9]   ;;  %s7236_s16 = smov [#allocation8]  }
   0xb   : > { %p7319_p4 = pnand %p6442_p0, %p229_p2  ;;  %s263_s14 = sshll.u32 %s7235_s13, 4  ;;  %s7325_s14 = int_to_ptr.vmem [resolvable:$true] %s263_s14 }
   0xc   : > { %s253_s17 = sshll.u32 %s7236_s16, 4  ;;  %s7011_s19 = scalar_lea.vmem %s243_s10, 128  ;;  %s7333_s17 = int_to_ptr.vmem [resolvable:$true] %s253_s17 }
   0xd   : > { %s8830_s12 = scalar_select %p7319_p4, 1, 0 }
   0xe   : > { %p6687_p5 = pneg %p7319_p4  ;;  %p7012_p8 = scmp.ne.s32.totalorder %s243_s10, %s7011_s19 }
   0xf   : > { %p7019_p11 = scmp.lt.s32.totalorder %s243_s10, %s243_s10  ;;  %p7020_p12 = scmp.lt.s32.totalorder %s7011_s19, %s7011_s19 }
  0x10   : > { %p7329_p6 = pnand %p6687_p5, %p8827_p1 }
  0x11   : > { %p7021_p13 = por %p7020_p12, %p7019_p11 }
  0x12   : > { %p7337_p7 = pneg %p7329_p6 }
  0x14   : > { %p7014_p9 = pnand %p7012_p8, %p7337_p7 }
  0x16   : > { %p7015_p10 = pneg %p7014_p9 }
  0x18   : > { %p7022_p0 = pnand %p7021_p13, %p7015_p10 }
  0x1a   : > { %7025 = shalt.err (!%p7022_p0)
}
  0x1b   : > { %6690 = dma.hbm_to_vmem [thread:$0]  (!%p7329_p6), %s8820_s2, 128, %s243_s10, [#allocation7]  }
  0x1c   : > { %s7037_s22 = scalar_lea.vmem %s7325_s14, 16384  ;;  %p7045_p9 = scmp.lt.s32.totalorder %s7325_s14, %s7325_s14 }
  0x1d   : > { %p7038_p2 = scmp.ne.s32.totalorder %s7325_s14, %s7037_s22  ;;  %p7046_p11 = scmp.lt.s32.totalorder %s7037_s22, %s7037_s22 }
  0x1f   : > { %p7040_p5 = pnand %p7038_p2, %p7337_p7  ;;  %p7047_p10 = por %p7046_p11, %p7045_p9 }
  0x21   : > { %p7041_p8 = pneg %p7040_p5 }
  0x23   : > { %p7048_p12 = pnand %p7047_p10, %p7041_p8 }
  0x25   : > { %7051 = shalt.err (!%p7048_p12)
}
  0x26   : > { %s7237_s23 = smov 128   ;;  %s7238_s24 = smov 8  }
  0x27   : > { %6696 = dma.hbm_to_vmem [thread:$0]  (!%p7329_p6), %s8822_s4, 16384, %s7325_s14, [#allocation10], %s7237_s23, %s7237_s23, %s7238_s24  }
  0x28   : > { %s7063_s9 = scalar_lea.vmem %s7333_s17, 128  ;;  %p7071_p5 = scmp.lt.s32.totalorder %s7333_s17, %s7333_s17 }
  0x29   : > { %p7064_p13 = scmp.ne.s32.totalorder %s7333_s17, %s7063_s9  ;;  %p7072_p8 = scmp.lt.s32.totalorder %s7063_s9, %s7063_s9 }
  0x2b   : > { %p7066_p0 = pnand %p7064_p13, %p7337_p7  ;;  %p7073_p9 = por %p7072_p8, %p7071_p5 }
  0x2d   : > { %p7067_p2 = pneg %p7066_p0 }
  0x2f   : > { %p7074_p11 = pnand %p7073_p9, %p7067_p2 }
  0x31   : > { %7077 = shalt.err (!%p7074_p11)
}
  0x32   : > { %6693 = dma.hbm_to_vmem [thread:$0]  (!%p7329_p6), %s8821_s3, 128, %s7333_s17, [#allocation7]  }
  0x33   : > { %s7239_s14 = smov [#allocation11]   ;;  %s7240_s19 = smov [#allocation12]  }
  0x34   : > { %s277_s16 = sshll.u32 %s7239_s14, 4  ;;  %s291_s20 = sshll.u32 %s7240_s19, 4  ;;  %s278_s16 = int_to_ptr.vmem [resolvable:$true] %s277_s16  ;;  %s292_s20 = int_to_ptr.vmem [resolvable:$true] %s291_s20 }
  0x35   : > { %s7089_s21 = scalar_lea.vmem %s278_s16, 32  ;;  %p7097_p0 = scmp.lt.s32.totalorder %s278_s16, %s278_s16 }
  0x36   : > { %p7090_p10 = scmp.ne.s32.totalorder %s278_s16, %s7089_s21  ;;  %p7098_p2 = scmp.lt.s32.totalorder %s7089_s21, %s7089_s21 }
  0x38   : > { %p7092_p12 = pnand %p7090_p10, %p7337_p7  ;;  %p7099_p5 = por %p7098_p2, %p7097_p0 }
  0x3a   : > { %p7093_p13 = pneg %p7092_p12 }
  0x3c   : > { %p7100_p8 = pnand %p7099_p5, %p7093_p13 }
  0x3e   : > { %7103 = shalt.err (!%p7100_p8)
}
  0x3f   : > { %6699 = dma.hbm_to_vmem [thread:$0]  (!%p7329_p6), %s8823_s5, 32, %s278_s16, [#allocation10]  }
  0x40   : > { %s7115_s17 = scalar_lea.vmem %s292_s20, 16  ;;  %s7122_s24 = scalar_lea.vmem %s292_s20, 32 }
  0x41   : > { %p7116_p9 = scmp.ne.s32.totalorder %s292_s20, %s7115_s17  ;;  %p7123_p10 = scmp.lt.s32.totalorder %s292_s20, %s292_s20 }
  0x42   : > { %p7124_p12 = scmp.lt.s32.totalorder %s7122_s24, %s7115_s17 }
  0x43   : > { %p7118_p11 = pnand %p7116_p9, %p7337_p7 }
  0x44   : > { %p7125_p1 = por %p7124_p12, %p7123_p10 }
  0x45   : > { %p7119_p3 = pneg %p7118_p11 }
  0x47   : > { %p7126_p0 = pnand %p7125_p1, %p7119_p3 }
  0x49   : > { %7129 = shalt.err (!%p7126_p0)
}
  0x4a   : > { %6702 = dma.hbm_to_vmem [thread:$0]  (!%p7329_p6), %s8825_s7, 16, %s292_s20, [#allocation13]  }
  0x4b   : > { %s7387_s18 = sadd.s32 1, %s7232_s30   ;;  %s58_s9 = sadd.s32 1, %s7228_s29 }
  0x4c   : > { %s55_s15 = ssub.s32 %s7232_s30, %s7387_s18  ;;  %p65_p3 = scmp.ne.s32.totalorder %s7228_s29, %s7224_s28 }
  0x4d   : > { %p56_p1 = scmp.eq.s32.totalorder %s55_s15, 0  ;;  %p66_p7 = scmp.eq.s32.totalorder %s7232_s30, 0 }
  0x4e   : > { %p71_p13 = scmp.ne.s32.totalorder %s7224_s28, %s7220_s27  ;;  %p8833_p5 = scmp.eq.s32.totalorder %s7313_s11, 0 }
  0x4f   : > { %s7398_s10 = scalar_select %p56_p1, %s7228_s29, %s58_s9  }
  0x50   : > { %p67_p2 = por %p66_p7, %p65_p3  ;;  %p7402_p8 = por %p8833_p5, %p71_p13 }
  0x51   : > { %p6712_p9 = scmp.lt.s32.totalorder %s7232_s30, 4  ;;  %s311_s14 = sand.u32 1, %s7228_s29  }
  0x52   : > { %s8834_s13 = scalar_select %p7402_p8, 1, 0 }
  0x53   : > { %s6659_s16 = smul.u32 6400, %s311_s14  ;;  %p7409_p6 = pnand %p6712_p9, %p67_p2 }
  0x54   : > { %s6636_s19 = smul.u32 102400, %s7232_s30  ;;  %s7420_s24 = scalar_lea.sflag [#allocation4], %s311_s14 }
  0x55   : > { %s315_s23 = scalar_lea.vmem [#allocation3], %s6659_s16  ;;  %p7132_p10 = pneg %p7409_p6 }
  0x56   : > { %s7416_s27 = scalar_lea.hbm %s8819_s1, %s6636_s19  ;;  %s323_s17 = sshll.u32 %s315_s23, 4  ;;  %s7418_s17 = int_to_ptr.vmem [resolvable:$true] %s323_s17 }
  0x57   : > { %s7130_s30 = scalar_lea.hbm %s7416_s27, 102400  ;;  %s7135_s15 = scalar_lea.hbm %s8819_s1, 409600 }
  0x58   : > { %p7131_p11 = scmp.ne.s32.totalorder %s7416_s27, %s7130_s30  ;;  %p7136_p1 = scmp.lt.s32.totalorder %s7416_s27, %s8819_s1 }
  0x59   : > { %p7137_p3 = scmp.lt.s32.totalorder %s7135_s15, %s7130_s30 }
  0x5a   : > { %p7133_p12 = pnand %p7132_p10, %p7131_p11 }
  0x5b   : > { %p7138_p7 = por %p7137_p3, %p7136_p1 }
  0x5c   : > { %p7134_p0 = pneg %p7133_p12 }
  0x5e   : > { %p7139_p13 = pnand %p7138_p7, %p7134_p0 }
  0x60   : > { %7142 = shalt.err (!%p7139_p13)
}
  0x61   : > { %s7143_s14 = scalar_lea.vmem %s7418_s17, 102400  ;;  %s7241_s16 = smov [#allocation3]  }
  0x62   : > { %p7144_p2 = scmp.ne.s32.totalorder %s7418_s17, %s7143_s14  ;;  %s7148_s21 = sshll.u32 %s7241_s16, 4  ;;  %s7149_s21 = int_to_ptr.vmem [resolvable:$false] %s7148_s21 }
  0x63   : > { %s7150_s22 = scalar_lea.vmem %s7149_s21, 204800  ;;  %p7151_p11 = scmp.lt.s32.totalorder %s7418_s17, %s7149_s21 }
  0x64   : > { %p7146_p5 = pnand %p7144_p2, %p7132_p10  ;;  %p7152_p12 = scmp.lt.s32.totalorder %s7150_s22, %s7143_s14 }
  0x66   : > { %p7147_p9 = pneg %p7146_p5  ;;  %p7153_p8 = por %p7152_p12, %p7151_p11 }
  0x68   : > { %p7154_p4 = pnand %p7153_p8, %p7147_p9 }
  0x6a   : > { %7157 = shalt.err (!%p7154_p4)
}
  0x6b   : > { %s7242_s23 = smov 1024   ;;  %s7243_s30 = smov 64  }
  0x6c   : > { %6706 = dma.hbm_to_vmem [thread:$0]  (!%p7409_p6), %s7416_s27, 102400, %s7418_s17, %s7420_s24, %s7242_s23, %s7242_s23, %s7243_s30  }
  0x6d   : > { %p8836_p10 = scmp.ne.s32.totalorder %s8830_s12, 0 }
  0x6e   : > { %s337_s25 = sand.u32 (!%p8836_p10), 1, %s7224_s28   ;;  %p8837_p8 = scmp.ne.s32.totalorder (!%p8836_p10), %s8834_s13, 0 }
  0x6f   : > { %335 = sbr.rel (%p8836_p10) target bundleno = 2491 (0x9bb), region = 52  ;;  %s338_s15 = scalar_lea.sflag (!%p8836_p10), [#allocation4], %s337_s25 }
  0x70   : > { %s6660_s26 = smul.u32 (!%p8836_p10), 6400, %s337_s25 }
  0x72   : > { %s7444_s9 = scalar_lea.vmem (!%p8836_p10), [#allocation3], %s6660_s26 }
  0x74   : > { %7199 = dma.done.wait (%p8837_p8), %s338_s15, 102400  }
  0x75   : > { %7201 = vsyncadd (%p8837_p8), %s338_s15, 4294864896  ;;  %p8838_p4 = scmp.eq.s32.totalorder %s7313_s11, 0 }
  0x77   : > { %7203 = dma.done.wait (%p8838_p4), [#allocation7], 256   ;;  %p8839_p6 = pmov %p8838_p4 }
  0x78   : > { %p8840_p0 = pmov %p8838_p4 }
  0x79   : > { %7205 = vsyncadd (%p8839_p6), [#allocation7], 4294967040 }
  0x7a   : > { %7207 = dma.done.wait (%p8840_p0), [#allocation10], 16416   ;;  %p8841_p1 = pmov %p8840_p0 }
  0x7b   : > { %p8842_p3 = pmov %p8840_p0 }
  0x7c   : > { %7209 = vsyncadd (%p8841_p1), [#allocation10], 4294950880 }
  0x7d   : > { %7211 = dma.done.wait (%p8842_p3), [#allocation13], 16   ;;  %p8843_p7 = pmov %p8840_p0 }
  0x7e   : > { %s394_s12 = smul.u32 25, %s7313_s11  ;;  %p8844_p2 = scmp.ne.s32.totalorder %s7313_s11, 0 }
  0x7f   : > { %7213 = vsyncadd (%p8843_p7), [#allocation13], 4294967280 }
  0x80   : > { %p395_p13 = scmp.lt.s32.totalorder %s394_s12, 99  ;;  %405 = sbr.rel (%p8844_p2) target bundleno = 138 (0x8a), region = 80 }
  0x82   : > { %s8850_s12 = smov (!%p395_p13, %s394_s12), 99 }
  0x83   : > { %s6457_s13 = sshll.u32 %s8850_s12, 2 }
  0x84   : > { %s7466_s17 = scalar_lea.vmem %s8818_s0, %s6457_s13 }
  0x85   : > { %v7244_v0 = vmov 0.0  }
  0x86   : > { %406 = vst [vmem:[#allocation2 + $0x30] sm:$0xff] %v7244_v0  ;;  %407 = vst [vmem:[#allocation2] sm:$0xff] %v7244_v0 }
  0x87   : > { %408 = vst [vmem:[#allocation2 + $0x18] sm:$0xff] %v7244_v0  ;;  %409 = vst [vmem:[#allocation2 + $0x10] sm:$0xff] %v7244_v0 }
  0x88   : > { %410 = vst [vmem:[#allocation2 + $0x8] sm:$0xff] %v7244_v0  ;;  %411 = vst [vmem:[#allocation2 + $0x20] sm:$0xff] %v7244_v0 }
  0x89   : > { %412 = vst [vmem:[#allocation2 + $0x28] sm:$0xff] %v7244_v0  ;;  %413 = vst [vmem:[#allocation2 + $0x38] sm:$0xff] %v7244_v0 }
  0x8a PF: > { %v439_v1 = vld [vmem:[%s7444_s9 + $0xc8] sm:$0xff]  ;;  %v438_v3 = vld [vmem:[%s7444_s9 + $0xc0] sm:$0xff]  ;;  %p6484_p5 = scmp.ne.s32.totalorder %s7313_s11, 3 }
  0x8b   : > { %v503_v2 = vld [vmem:[%s7444_s9 + $0x2c8] sm:$0xff]  ;;  %v1263_v4 = vunpack.c.l.s8.bf16 %v439_v1  ;;  %v1271_v5 = vunpack.c.h.s8.bf16 %v439_v1  ;;  %v502_v8 = vld [vmem:[%s7444_s9 + $0x2c0] sm:$0xff]  ;;  %v1270_v9 = vunpack.c.h.s8.bf16 %v438_v3  ;;  %v1262_v13 = vunpack.c.l.s8.bf16 %v438_v3 }
  0x8c   : > { %v1391_v6 = vunpack.c.l.s8.bf16 %v503_v2  ;;  %v1399_v7 = vunpack.c.h.s8.bf16 %v503_v2  ;;  %v1398_v10 = vunpack.c.h.s8.bf16 %v502_v8  ;;  %v431_v11 = vld [vmem:[%s7444_s9 + $0x88] sm:$0xff]  ;;  %v1390_v14 = vunpack.c.l.s8.bf16 %v502_v8  ;;  %v430_v17 = vld [vmem:[%s7444_s9 + $0x80] sm:$0xff] }
  0x8d   : > { %v495_v12 = vld [vmem:[%s7444_s9 + $0x288] sm:$0xff]  ;;  %2923 = vmatprep.subr.bf16.mxu0 %v1271_v5  ;;  %v1255_v15 = vunpack.c.h.s8.bf16 %v431_v11  ;;  %v494_v18 = vld [vmem:[%s7444_s9 + $0x280] sm:$0xff]  ;;  %v1254_v19 = vunpack.c.h.s8.bf16 %v430_v17  ;;  %v1247_v21 = vunpack.c.l.s8.bf16 %v431_v11  ;;  %v1246_v25 = vunpack.c.l.s8.bf16 %v430_v17 }
  0x8e   : > { %2964 = vmatprep.subr.bf16.mxu1 %v1399_v7  ;;  %2924 = vmatpush1.bf16.msra.mxu0 %v1270_v9  ;;  %v1383_v16 = vunpack.c.h.s8.bf16 %v495_v12  ;;  %v1382_v20 = vunpack.c.h.s8.bf16 %v494_v18  ;;  %v1375_v22 = vunpack.c.l.s8.bf16 %v495_v12  ;;  %v423_v23 = vld [vmem:[%s7444_s9 + $0x48] sm:$0xff]  ;;  %v1374_v26 = vunpack.c.l.s8.bf16 %v494_v18  ;;  %v422_v29 = vld [vmem:[%s7444_s9 + $0x40] sm:$0xff] }
  0x8f   : > { %2965 = vmatpush1.bf16.msra.mxu1 %v1398_v10  ;;  %2925 = vmatprep.subr.bf16.mxu0 %v1263_v4  ;;  %v487_v24 = vld [vmem:[%s7444_s9 + $0x248] sm:$0xff]  ;;  %v1239_v27 = vunpack.c.h.s8.bf16 %v423_v23  ;;  %v486_v30 = vld [vmem:[%s7444_s9 + $0x240] sm:$0xff]  ;;  %v1238_v33 = vunpack.c.h.s8.bf16 %v422_v29  ;;  %v1231_v35 = vunpack.c.l.s8.bf16 %v423_v23  ;;  %v1230_v41 = vunpack.c.l.s8.bf16 %v422_v29 }
  0x90   : > { %2966 = vmatprep.subr.bf16.mxu1 %v1391_v6  ;;  %v1367_v28 = vunpack.c.h.s8.bf16 %v487_v24  ;;  %v7483_v31 = vld [vmem:[%s7466_s17] sm:$0xff]  ;;  %v7486_v32 = vld [vmem:[%s7466_s17 + $0x8] sm:$0xff]  ;;  %v1366_v34 = vunpack.c.h.s8.bf16 %v486_v30  ;;  %v1359_v36 = vunpack.c.l.s8.bf16 %v487_v24  ;;  %v1358_v42 = vunpack.c.l.s8.bf16 %v486_v30 }
  0x91   : > { %v7490_v37 = vcombine.high %v7483_v31, %v7483_v31  ;;  %v7494_v38 = vcombine.high %v7486_v32, %v7486_v32  ;;  %v415_v39 = vld [vmem:[%s7444_s9 + $0x8] sm:$0xff]  ;;  %v414_v45 = vld [vmem:[%s7444_s9] sm:$0xff] }
  0x92   : > { %2926 = vmatpush1.bf16.msra.mxu0 %v1262_v13  ;;  %v479_v40 = vld [vmem:[%s7444_s9 + $0x208] sm:$0xff]  ;;  %v1223_v43 = vunpack.c.h.s8.bf16 %v415_v39  ;;  %v478_v46 = vld [vmem:[%s7444_s9 + $0x200] sm:$0xff]  ;;  %v1222_v47 = vunpack.c.h.s8.bf16 %v414_v45  ;;  %v1215_v49 = vunpack.c.l.s8.bf16 %v415_v39  ;;  %v1214_v53 = vunpack.c.l.s8.bf16 %v414_v45 }
  0x93   : > { %2967 = vmatpush1.bf16.msra.mxu1 %v1390_v14  ;;  %2927 = vmatprep.subr.bf16.mxu0 %v1255_v15  ;;  %v1351_v44 = vunpack.c.h.s8.bf16 %v479_v40  ;;  %v1350_v48 = vunpack.c.h.s8.bf16 %v478_v46  ;;  %v1343_v50 = vunpack.c.l.s8.bf16 %v479_v40  ;;  %v471_v51 = vld [vmem:[%s7444_s9 + $0x1c8] sm:$0xff]  ;;  %v1342_v54 = vunpack.c.l.s8.bf16 %v478_v46  ;;  %v470_v57 = vld [vmem:[%s7444_s9 + $0x1c0] sm:$0xff] }
  0x94   : > { %2968 = vmatprep.subr.bf16.mxu1 %v1383_v16  ;;  %2955 = vmatprep.mubr.bf16.mxu0 %v7490_v37  ;;  %v535_v52 = vld [vmem:[%s7444_s9 + $0x3c8] sm:$0xff]  ;;  %v1335_v55 = vunpack.c.h.s8.bf16 %v471_v51  ;;  %v534_v58 = vld [vmem:[%s7444_s9 + $0x3c0] sm:$0xff]  ;;  %v1334_v59 = vunpack.c.h.s8.bf16 %v470_v57  ;;  %v1327_v61 = vunpack.c.l.s8.bf16 %v471_v51  ;;  %v1326_v1 = vunpack.c.l.s8.bf16 %v470_v57 }
  0x95   : > { %2996 = vmatprep.mubr.bf16.mxu1 %v7494_v38  ;;  %v1463_v56 = vunpack.c.h.s8.bf16 %v535_v52  ;;  %v1462_v60 = vunpack.c.h.s8.bf16 %v534_v58  ;;  %v1455_v62 = vunpack.c.l.s8.bf16 %v535_v52  ;;  %v463_v63 = vld [vmem:[%s7444_s9 + $0x188] sm:$0xff]  ;;  %v1454_v2 = vunpack.c.l.s8.bf16 %v534_v58  ;;  %v462_v5 = vld [vmem:[%s7444_s9 + $0x180] sm:$0xff] }
  0x96   : > { %2928 = vmatpush1.bf16.msra.mxu0 %v1254_v19  ;;  %v527_v0 = vld [vmem:[%s7444_s9 + $0x388] sm:$0xff]  ;;  %v1319_v3 = vunpack.c.h.s8.bf16 %v463_v63  ;;  %v526_v6 = vld [vmem:[%s7444_s9 + $0x380] sm:$0xff]  ;;  %v1318_v7 = vunpack.c.h.s8.bf16 %v462_v5  ;;  %v1311_v9 = vunpack.c.l.s8.bf16 %v463_v63  ;;  %v1310_v13 = vunpack.c.l.s8.bf16 %v462_v5 }
  0x97   : > { %2969 = vmatpush1.bf16.msra.mxu1 %v1382_v20  ;;  %2929 = vmatprep.subr.bf16.mxu0 %v1247_v21  ;;  %v1447_v4 = vunpack.c.h.s8.bf16 %v527_v0  ;;  %v1446_v8 = vunpack.c.h.s8.bf16 %v526_v6  ;;  %v1439_v10 = vunpack.c.l.s8.bf16 %v527_v0  ;;  %v455_v11 = vld [vmem:[%s7444_s9 + $0x148] sm:$0xff]  ;;  %v1438_v14 = vunpack.c.l.s8.bf16 %v526_v6  ;;  %v454_v17 = vld [vmem:[%s7444_s9 + $0x140] sm:$0xff] }
  0x98   : > { %2970 = vmatprep.subr.bf16.mxu1 %v1375_v22  ;;  %v519_v12 = vld [vmem:[%s7444_s9 + $0x348] sm:$0xff]  ;;  %v1303_v15 = vunpack.c.h.s8.bf16 %v455_v11  ;;  %v518_v18 = vld [vmem:[%s7444_s9 + $0x340] sm:$0xff]  ;;  %v1302_v19 = vunpack.c.h.s8.bf16 %v454_v17  ;;  %v1295_v21 = vunpack.c.l.s8.bf16 %v455_v11 }
  0x99   : > { %v1431_v16 = vunpack.c.h.s8.bf16 %v519_v12  ;;  %v1430_v20 = vunpack.c.h.s8.bf16 %v518_v18  ;;  %v1423_v22 = vunpack.c.l.s8.bf16 %v519_v12  ;;  %v447_v23 = vld [vmem:[%s7444_s9 + $0x108] sm:$0xff]  ;;  %v446_v29 = vld [vmem:[%s7444_s9 + $0x100] sm:$0xff] }
  0x9a   : > { %2930 = vmatpush1.bf16.msra.mxu0 %v1246_v25  ;;  %v511_v24 = vld [vmem:[%s7444_s9 + $0x308] sm:$0xff]  ;;  %v1294_v25 = vunpack.c.l.s8.bf16 %v454_v17  ;;  %v510_v30 = vld [vmem:[%s7444_s9 + $0x300] sm:$0xff] }
  0x9b   : > { %2971 = vmatpush1.bf16.msra.mxu1 %v1374_v26  ;;  %2931 = vmatprep.subr.bf16.mxu0 %v1239_v27  ;;  %v1422_v26 = vunpack.c.l.s8.bf16 %v518_v18  ;;  %v1287_v27 = vunpack.c.h.s8.bf16 %v447_v23  ;;  %v567_v39 = vld [vmem:[%s7444_s9 + $0x4c8] sm:$0xff]  ;;  %v566_v45 = vld [vmem:[%s7444_s9 + $0x4c0] sm:$0xff] }
  0x9c   : > { %2972 = vmatprep.subr.bf16.mxu1 %v1367_v28  ;;  %v1415_v28 = vunpack.c.h.s8.bf16 %v511_v24  ;;  %v631_v40 = vld [vmem:[%s7444_s9 + $0x6c8] sm:$0xff]  ;;  %v630_v46 = vld [vmem:[%s7444_s9 + $0x6c0] sm:$0xff]  ;;  %v1526_v51 = vunpack.c.h.s8.bf16 %v566_v45  ;;  %v1518_v57 = vunpack.c.l.s8.bf16 %v566_v45 }
  0x9d   : > { %v1654_v52 = vunpack.c.h.s8.bf16 %v630_v46  ;;  %v1646_v58 = vunpack.c.l.s8.bf16 %v630_v46 }
  0x9e   : > { %2932 = vmatpush1.bf16.msra.mxu0 %v1238_v33  ;;  %v1286_v33 = vunpack.c.h.s8.bf16 %v446_v29 }
  0x9f   : > { %2973 = vmatpush1.bf16.msra.mxu1 %v1366_v34  ;;  %2933 = vmatprep.subr.bf16.mxu0 %v1231_v35  ;;  %v1414_v34 = vunpack.c.h.s8.bf16 %v510_v30  ;;  %v1279_v35 = vunpack.c.l.s8.bf16 %v447_v23 }
  0xa0   : > { %2974 = vmatprep.subr.bf16.mxu1 %v1359_v36  ;;  %v1407_v36 = vunpack.c.l.s8.bf16 %v511_v24 }
  0xa2   : > { %2934 = vmatpush1.bf16.msra.mxu0 %v1230_v41  ;;  %v1278_v41 = vunpack.c.l.s8.bf16 %v446_v29 }
  0xa3   : > { %2975 = vmatpush1.bf16.msra.mxu1 %v1358_v42  ;;  %2935 = vmatprep.subr.bf16.mxu0 %v1223_v43  ;;  %v1406_v42 = vunpack.c.l.s8.bf16 %v510_v30  ;;  %v1527_v43 = vunpack.c.h.s8.bf16 %v567_v39 }
  0xa4   : > { %2976 = vmatprep.subr.bf16.mxu1 %v1351_v44  ;;  %v1655_v44 = vunpack.c.h.s8.bf16 %v631_v40 }
  0xa6   : > { %2936 = vmatpush1.bf16.msra.mxu0 %v1222_v47  ;;  %v7524_v47 = vcombine.low %v7483_v31, %v7483_v31  ;;  %v559_v31 = vld [vmem:[%s7444_s9 + $0x488] sm:$0xff] }
  0xa7   : > { %2977 = vmatpush1.bf16.msra.mxu1 %v1350_v48  ;;  %2937 = vmatprep.subr.bf16.mxu0 %v1215_v49  ;;  %v7528_v48 = vcombine.low %v7486_v32, %v7486_v32  ;;  %v7531_v49 = vld [vmem:[%s7466_s17 + $0x10] sm:$0xff] }
  0xa8   : > { %2978 = vmatprep.subr.bf16.mxu1 %v1343_v50  ;;  %v7534_v50 = vld [vmem:[%s7466_s17 + $0x18] sm:$0xff]  ;;  %v7540_v32 = vcombine.high %v7531_v49, %v7531_v49 }
  0xaa   : > { %2938 = vmatpush1.bf16.msra.mxu0 %v1214_v53  ;;  %v1519_v53 = vunpack.c.l.s8.bf16 %v567_v39 }
  0xab   : > { %2979 = vmatpush1.bf16.msra.mxu1 %v1342_v54  ;;  %2939 = vmatprep.subr.bf16.mxu0 %v1335_v55  ;;  %v1647_v54 = vunpack.c.l.s8.bf16 %v631_v40  ;;  %v623_v55 = vld [vmem:[%s7444_s9 + $0x688] sm:$0xff] }
  0xac   : > { %2980 = vmatprep.subr.bf16.mxu1 %v1463_v56  ;;  %v7544_v56 = vcombine.high %v7534_v50, %v7534_v50 }
  0xae   : > { %2940 = vmatpush2.bf16.msra.mxu0 %v1334_v59  ;;  %v1511_v59 = vunpack.c.h.s8.bf16 %v559_v31 }
  0xaf   : > { %2981 = vmatpush2.bf16.msra.mxu1 %v1462_v60  ;;  %2941 = vmatprep.subr.bf16.mxu0 %v1327_v61  ;;  %v1639_v60 = vunpack.c.h.s8.bf16 %v623_v55  ;;  %v558_v61 = vld [vmem:[%s7444_s9 + $0x480] sm:$0xff] }
  0xb0   : > { %2982 = vmatprep.subr.bf16.mxu1 %v1455_v62  ;;  %v622_v62 = vld [vmem:[%s7444_s9 + $0x680] sm:$0xff]  ;;  %v1510_v63 = vunpack.c.h.s8.bf16 %v558_v61  ;;  %v1502_v5 = vunpack.c.l.s8.bf16 %v558_v61 }
  0xb1   : > { %v1638_v0 = vunpack.c.h.s8.bf16 %v622_v62  ;;  %v1630_v6 = vunpack.c.l.s8.bf16 %v622_v62 }
  0xb2   : > { %2942 = vmatpush2.bf16.msra.mxu0 %v1326_v1  ;;  %v1503_v1 = vunpack.c.l.s8.bf16 %v559_v31 }
  0xb3   : > { %2983 = vmatpush2.bf16.msra.mxu1 %v1454_v2  ;;  %2943 = vmatprep.subr.bf16.mxu0 %v1319_v3  ;;  %v1631_v2 = vunpack.c.l.s8.bf16 %v623_v55  ;;  %v551_v3 = vld [vmem:[%s7444_s9 + $0x448] sm:$0xff] }
  0xb4   : > { %2984 = vmatprep.subr.bf16.mxu1 %v1447_v4  ;;  %v615_v4 = vld [vmem:[%s7444_s9 + $0x648] sm:$0xff] }
  0xb6   : > { %2944 = vmatpush2.bf16.msra.mxu0 %v1318_v7  ;;  %v1495_v7 = vunpack.c.h.s8.bf16 %v551_v3 }
  0xb7   : > { %2985 = vmatpush2.bf16.msra.mxu1 %v1446_v8  ;;  %2945 = vmatprep.subr.bf16.mxu0 %v1311_v9  ;;  %v1623_v8 = vunpack.c.h.s8.bf16 %v615_v4  ;;  %v550_v9 = vld [vmem:[%s7444_s9 + $0x440] sm:$0xff] }
  0xb8   : > { %2986 = vmatprep.subr.bf16.mxu1 %v1439_v10  ;;  %v614_v10 = vld [vmem:[%s7444_s9 + $0x640] sm:$0xff]  ;;  %v1494_v11 = vunpack.c.h.s8.bf16 %v550_v9  ;;  %v1486_v17 = vunpack.c.l.s8.bf16 %v550_v9 }
  0xb9   : > { %v1622_v12 = vunpack.c.h.s8.bf16 %v614_v10  ;;  %v1614_v18 = vunpack.c.l.s8.bf16 %v614_v10 }
  0xba   : > { %2946 = vmatpush2.bf16.msra.mxu0 %v1310_v13  ;;  %v1487_v13 = vunpack.c.l.s8.bf16 %v551_v3 }
  0xbb   : > { %2987 = vmatpush2.bf16.msra.mxu1 %v1438_v14  ;;  %2947 = vmatprep.subr.bf16.mxu0 %v1303_v15  ;;  %v1615_v14 = vunpack.c.l.s8.bf16 %v615_v4  ;;  %v543_v15 = vld [vmem:[%s7444_s9 + $0x408] sm:$0xff] }
  0xbc   : > { %2988 = vmatprep.subr.bf16.mxu1 %v1431_v16  ;;  %v607_v16 = vld [vmem:[%s7444_s9 + $0x608] sm:$0xff] }
  0xbe   : > { %2948 = vmatpush2.bf16.msra.mxu0 %v1302_v19  ;;  %v1479_v19 = vunpack.c.h.s8.bf16 %v543_v15 }
  0xbf   : > { %2989 = vmatpush2.bf16.msra.mxu1 %v1430_v20  ;;  %2949 = vmatprep.subr.bf16.mxu0 %v1295_v21  ;;  %v1607_v20 = vunpack.c.h.s8.bf16 %v607_v16  ;;  %v542_v21 = vld [vmem:[%s7444_s9 + $0x400] sm:$0xff] }
  0xc0   : > { %2990 = vmatprep.subr.bf16.mxu1 %v1423_v22  ;;  %v606_v22 = vld [vmem:[%s7444_s9 + $0x600] sm:$0xff]  ;;  %v1478_v23 = vunpack.c.h.s8.bf16 %v542_v21  ;;  %v1470_v29 = vunpack.c.l.s8.bf16 %v542_v21 }
  0xc1   : > { %v1606_v24 = vunpack.c.h.s8.bf16 %v606_v22  ;;  %v1598_v30 = vunpack.c.l.s8.bf16 %v606_v22 }
  0xc2   : > { %2950 = vmatpush2.bf16.msra.mxu0 %v1294_v25  ;;  %v1471_v25 = vunpack.c.l.s8.bf16 %v543_v15 }
  0xc3   : > { %2991 = vmatpush2.bf16.msra.mxu1 %v1422_v26  ;;  %2951 = vmatprep.subr.bf16.mxu0 %v1287_v27  ;;  %v1599_v26 = vunpack.c.l.s8.bf16 %v607_v16  ;;  %v599_v27 = vld [vmem:[%s7444_s9 + $0x5c8] sm:$0xff] }
  0xc4   : > { %2992 = vmatprep.subr.bf16.mxu1 %v1415_v28  ;;  %v663_v28 = vld [vmem:[%s7444_s9 + $0x7c8] sm:$0xff] }
  0xc6   : > { %2952 = vmatpush2.bf16.msra.mxu0 %v1286_v33  ;;  %v1591_v33 = vunpack.c.h.s8.bf16 %v599_v27 }
  0xc7   : > { %2993 = vmatpush2.bf16.msra.mxu1 %v1414_v34  ;;  %2953 = vmatprep.subr.bf16.mxu0 %v1279_v35  ;;  %v1719_v34 = vunpack.c.h.s8.bf16 %v663_v28  ;;  %v598_v35 = vld [vmem:[%s7444_s9 + $0x5c0] sm:$0xff] }
  0xc8   : > { %2994 = vmatprep.subr.bf16.mxu1 %v1407_v36  ;;  %v662_v36 = vld [vmem:[%s7444_s9 + $0x7c0] sm:$0xff]  ;;  %v1590_v39 = vunpack.c.h.s8.bf16 %v598_v35  ;;  %v1582_v45 = vunpack.c.l.s8.bf16 %v598_v35 }
  0xc9   : > { %v1718_v40 = vunpack.c.h.s8.bf16 %v662_v36  ;;  %v1710_v46 = vunpack.c.l.s8.bf16 %v662_v36 }
  0xca   : > { %2954 = vmatpush2.bf16.msra.mxu0 %v1278_v41  ;;  %v1583_v41 = vunpack.c.l.s8.bf16 %v599_v27  ;;  %v7582_v27 = vcombine.low %v7531_v49, %v7531_v49  ;;  %v687_v49 = vld [vmem:[%s7444_s9 + $0x888] sm:$0xff] }
  0xcb   : > { %2995 = vmatpush2.bf16.msra.mxu1 %v1406_v42  ;;  %3005 = vmatprep.subr.bf16.mxu0 %v1527_v43  ;;  %v1711_v42 = vunpack.c.l.s8.bf16 %v663_v28  ;;  %v591_v43 = vld [vmem:[%s7444_s9 + $0x588] sm:$0xff]  ;;  %v7586_v28 = vcombine.low %v7534_v50, %v7534_v50 }
  0xcc   : > { %3046 = vmatprep.subr.bf16.mxu1 %v1655_v44  ;;  %v655_v44 = vld [vmem:[%s7444_s9 + $0x788] sm:$0xff] }
  0xcd   : > { %2956 = vmatmul.mubr.bf16.vlgmr.msra.gmra.mxu0 %v7524_v47 }
  0xce   : > { %2997 = vmatmul.mubr.bf16.vlgmr.msra.gmra.mxu1 %v7528_v48  ;;  %3006 = vmatpush1.bf16.msra.mxu0 %v1526_v51  ;;  %v1575_v51 = vunpack.c.h.s8.bf16 %v591_v43 }
  0xcf   : > { %3047 = vmatpush1.bf16.msra.mxu1 %v1654_v52  ;;  %3007 = vmatprep.subr.bf16.mxu0 %v1519_v53  ;;  %v1703_v52 = vunpack.c.h.s8.bf16 %v655_v44  ;;  %v590_v53 = vld [vmem:[%s7444_s9 + $0x580] sm:$0xff] }
  0xd0   : > { %3048 = vmatprep.subr.bf16.mxu1 %v1647_v54  ;;  %3037 = vmatprep.mubr.bf16.mxu0 %v7540_v32  ;;  %v654_v54 = vld [vmem:[%s7444_s9 + $0x780] sm:$0xff]  ;;  %v1574_v31 = vunpack.c.h.s8.bf16 %v590_v53  ;;  %v1566_v61 = vunpack.c.l.s8.bf16 %v590_v53  ;;  %v1759_v53 = vunpack.c.l.s8.bf16 %v687_v49 }
  0xd1   : > { %3078 = vmatprep.mubr.bf16.mxu1 %v7544_v56  ;;  %v1702_v55 = vunpack.c.h.s8.bf16 %v654_v54  ;;  %v1694_v62 = vunpack.c.l.s8.bf16 %v654_v54 }
  0xd2   : > { %3008 = vmatpush1.bf16.msra.mxu0 %v1518_v57  ;;  %v1567_v57 = vunpack.c.l.s8.bf16 %v591_v43  ;;  %v1767_v43 = vunpack.c.h.s8.bf16 %v687_v49 }
  0xd3   : > { %3049 = vmatpush1.bf16.msra.mxu1 %v1646_v58  ;;  %3009 = vmatprep.subr.bf16.mxu0 %v1511_v59  ;;  %v1695_v58 = vunpack.c.l.s8.bf16 %v655_v44  ;;  %v583_v59 = vld [vmem:[%s7444_s9 + $0x548] sm:$0xff] }
  0xd4   : > { %3050 = vmatprep.subr.bf16.mxu1 %v1639_v60  ;;  %v647_v60 = vld [vmem:[%s7444_s9 + $0x748] sm:$0xff] }
  0xd6   : > { %3010 = vmatpush1.bf16.msra.mxu0 %v1510_v63  ;;  %v1559_v63 = vunpack.c.h.s8.bf16 %v583_v59 }
  0xd7   : > { %3051 = vmatpush1.bf16.msra.mxu1 %v1638_v0  ;;  %3011 = vmatprep.subr.bf16.mxu0 %v1503_v1  ;;  %v1687_v0 = vunpack.c.h.s8.bf16 %v647_v60  ;;  %v582_v1 = vld [vmem:[%s7444_s9 + $0x540] sm:$0xff] }
  0xd8   : > { %3052 = vmatprep.subr.bf16.mxu1 %v1631_v2  ;;  %v646_v2 = vld [vmem:[%s7444_s9 + $0x740] sm:$0xff]  ;;  %v1558_v3 = vunpack.c.h.s8.bf16 %v582_v1  ;;  %v1550_v9 = vunpack.c.l.s8.bf16 %v582_v1 }
  0xd9   : > { %v1686_v4 = vunpack.c.h.s8.bf16 %v646_v2  ;;  %v1678_v10 = vunpack.c.l.s8.bf16 %v646_v2 }
  0xda   : > { %3012 = vmatpush1.bf16.msra.mxu0 %v1502_v5  ;;  %v1551_v5 = vunpack.c.l.s8.bf16 %v583_v59 }
  0xdb   : > { %3053 = vmatpush1.bf16.msra.mxu1 %v1630_v6  ;;  %3013 = vmatprep.subr.bf16.mxu0 %v1495_v7  ;;  %v1679_v6 = vunpack.c.l.s8.bf16 %v647_v60  ;;  %v575_v7 = vld [vmem:[%s7444_s9 + $0x508] sm:$0xff] }
  0xdc   : > { %3054 = vmatprep.subr.bf16.mxu1 %v1623_v8  ;;  %v639_v8 = vld [vmem:[%s7444_s9 + $0x708] sm:$0xff] }
  0xde   : > { %3014 = vmatpush1.bf16.msra.mxu0 %v1494_v11  ;;  %v1543_v11 = vunpack.c.h.s8.bf16 %v575_v7 }
  0xdf   : > { %3055 = vmatpush1.bf16.msra.mxu1 %v1622_v12  ;;  %3015 = vmatprep.subr.bf16.mxu0 %v1487_v13  ;;  %v1671_v12 = vunpack.c.h.s8.bf16 %v639_v8  ;;  %v574_v13 = vld [vmem:[%s7444_s9 + $0x500] sm:$0xff] }
  0xe0   : > { %3056 = vmatprep.subr.bf16.mxu1 %v1615_v14  ;;  %v638_v14 = vld [vmem:[%s7444_s9 + $0x700] sm:$0xff]  ;;  %v1542_v15 = vunpack.c.h.s8.bf16 %v574_v13  ;;  %v1534_v21 = vunpack.c.l.s8.bf16 %v574_v13 }
  0xe1   : > { %v1670_v16 = vunpack.c.h.s8.bf16 %v638_v14  ;;  %v1662_v22 = vunpack.c.l.s8.bf16 %v638_v14 }
  0xe2   : > { %3016 = vmatpush1.bf16.msra.mxu0 %v1486_v17  ;;  %v1535_v17 = vunpack.c.l.s8.bf16 %v575_v7 }
  0xe3   : > { %3057 = vmatpush1.bf16.msra.mxu1 %v1614_v18  ;;  %3017 = vmatprep.subr.bf16.mxu0 %v1479_v19  ;;  %v1663_v18 = vunpack.c.l.s8.bf16 %v639_v8  ;;  %v695_v19 = vld [vmem:[%s7444_s9 + $0x8c8] sm:$0xff] }
  0xe4   : > { %3058 = vmatprep.subr.bf16.mxu1 %v1607_v20  ;;  %v759_v20 = vld [vmem:[%s7444_s9 + $0xac8] sm:$0xff]  ;;  %v1775_v35 = vunpack.c.l.s8.bf16 %v695_v19 }
  0xe5   : > { %v1903_v36 = vunpack.c.l.s8.bf16 %v759_v20 }
  0xe6   : > { %3018 = vmatpush1.bf16.msra.mxu0 %v1478_v23  ;;  %v1783_v23 = vunpack.c.h.s8.bf16 %v695_v19 }
  0xe7   : > { %3059 = vmatpush1.bf16.msra.mxu1 %v1606_v24  ;;  %3019 = vmatprep.subr.bf16.mxu0 %v1471_v25  ;;  %v1911_v24 = vunpack.c.h.s8.bf16 %v759_v20  ;;  %v694_v25 = vld [vmem:[%s7444_s9 + $0x8c0] sm:$0xff] }
  0xe8   : > { %3060 = vmatprep.subr.bf16.mxu1 %v1599_v26  ;;  %v758_v26 = vld [vmem:[%s7444_s9 + $0xac0] sm:$0xff] }
  0xea   : > { %3020 = vmatpush1.bf16.msra.mxu0 %v1470_v29  ;;  %v7589_v29 = vld [vmem:[%s7466_s17 + $0x20] sm:$0xff] }
  0xeb   : > { %3061 = vmatpush1.bf16.msra.mxu1 %v1598_v30  ;;  %3021 = vmatprep.subr.bf16.mxu0 %v1591_v33  ;;  %v7592_v30 = vld [vmem:[%s7466_s17 + $0x28] sm:$0xff]  ;;  %v1782_v33 = vunpack.c.h.s8.bf16 %v694_v25  ;;  %v7598_v50 = vcombine.high %v7589_v29, %v7589_v29 }
  0xec   : > { %3062 = vmatprep.subr.bf16.mxu1 %v1719_v34  ;;  %v1910_v34 = vunpack.c.h.s8.bf16 %v758_v26 }
  0xee   : > { %3022 = vmatpush2.bf16.msra.mxu0 %v1590_v39  ;;  %v751_v39 = vld [vmem:[%s7444_s9 + $0xa88] sm:$0xff] }
  0xef   : > { %3063 = vmatpush2.bf16.msra.mxu1 %v1718_v40  ;;  %3023 = vmatprep.subr.bf16.mxu0 %v1583_v41  ;;  %v7602_v40 = vcombine.high %v7592_v30, %v7592_v30  ;;  %v1774_v41 = vunpack.c.l.s8.bf16 %v694_v25  ;;  %v1895_v44 = vunpack.c.h.s8.bf16 %v751_v39  ;;  %v1887_v54 = vunpack.c.l.s8.bf16 %v751_v39 }
  0xf0   : > { %3064 = vmatprep.subr.bf16.mxu1 %v1711_v42  ;;  %v1902_v42 = vunpack.c.l.s8.bf16 %v758_v26 }
  0xf2   : > { %3024 = vmatpush2.bf16.msra.mxu0 %v1582_v45  ;;  %v686_v45 = vld [vmem:[%s7444_s9 + $0x880] sm:$0xff] }
  0xf3   : > { %3065 = vmatpush2.bf16.msra.mxu1 %v1710_v46  ;;  %3025 = vmatprep.subr.bf16.mxu0 %v1575_v51  ;;  %v750_v46 = vld [vmem:[%s7444_s9 + $0xa80] sm:$0xff]  ;;  %v1766_v51 = vunpack.c.h.s8.bf16 %v686_v45 }
  0xf4   : > { %3066 = vmatprep.subr.bf16.mxu1 %v1703_v52  ;;  %v1894_v52 = vunpack.c.h.s8.bf16 %v750_v46 }
  0xf6   : > { %3026 = vmatpush2.bf16.msra.mxu0 %v1574_v31  ;;  %v679_v31 = vld [vmem:[%s7444_s9 + $0x848] sm:$0xff] }
  0xf7   : > { %3067 = vmatpush2.bf16.msra.mxu1 %v1702_v55  ;;  %3027 = vmatprep.subr.bf16.mxu0 %v1567_v57  ;;  %v743_v55 = vld [vmem:[%s7444_s9 + $0xa48] sm:$0xff]  ;;  %v1758_v57 = vunpack.c.l.s8.bf16 %v686_v45  ;;  %v1751_v59 = vunpack.c.h.s8.bf16 %v679_v31  ;;  %v1743_v1 = vunpack.c.l.s8.bf16 %v679_v31 }
  0xf8   : > { %3068 = vmatprep.subr.bf16.mxu1 %v1695_v58  ;;  %v1886_v58 = vunpack.c.l.s8.bf16 %v750_v46  ;;  %v1879_v60 = vunpack.c.h.s8.bf16 %v743_v55  ;;  %v1871_v2 = vunpack.c.l.s8.bf16 %v743_v55 }
  0xfa   : > { %3028 = vmatpush2.bf16.msra.mxu0 %v1566_v61  ;;  %v678_v61 = vld [vmem:[%s7444_s9 + $0x840] sm:$0xff] }
  0xfb   : > { %3069 = vmatpush2.bf16.msra.mxu1 %v1694_v62  ;;  %3029 = vmatprep.subr.bf16.mxu0 %v1559_v63  ;;  %v742_v62 = vld [vmem:[%s7444_s9 + $0xa40] sm:$0xff]  ;;  %v1750_v63 = vunpack.c.h.s8.bf16 %v678_v61 }
  0xfc   : > { %3070 = vmatprep.subr.bf16.mxu1 %v1687_v0  ;;  %v1878_v0 = vunpack.c.h.s8.bf16 %v742_v62 }
  0xfe   : > { %3030 = vmatpush2.bf16.msra.mxu0 %v1558_v3  ;;  %v671_v3 = vld [vmem:[%s7444_s9 + $0x808] sm:$0xff] }
  0xff   : > { %3071 = vmatpush2.bf16.msra.mxu1 %v1686_v4  ;;  %3031 = vmatprep.subr.bf16.mxu0 %v1551_v5  ;;  %v735_v4 = vld [vmem:[%s7444_s9 + $0xa08] sm:$0xff]  ;;  %v1742_v5 = vunpack.c.l.s8.bf16 %v678_v61  ;;  %v1735_v7 = vunpack.c.h.s8.bf16 %v671_v3  ;;  %v1727_v13 = vunpack.c.l.s8.bf16 %v671_v3 }
 0x100   : > { %3072 = vmatprep.subr.bf16.mxu1 %v1679_v6  ;;  %v1870_v6 = vunpack.c.l.s8.bf16 %v742_v62  ;;  %v1863_v8 = vunpack.c.h.s8.bf16 %v735_v4  ;;  %v1855_v14 = vunpack.c.l.s8.bf16 %v735_v4 }
 0x102   : > { %3032 = vmatpush2.bf16.msra.mxu0 %v1550_v9  ;;  %v670_v9 = vld [vmem:[%s7444_s9 + $0x800] sm:$0xff] }
 0x103   : > { %3073 = vmatpush2.bf16.msra.mxu1 %v1678_v10  ;;  %3033 = vmatprep.subr.bf16.mxu0 %v1543_v11  ;;  %v734_v10 = vld [vmem:[%s7444_s9 + $0xa00] sm:$0xff]  ;;  %v1734_v11 = vunpack.c.h.s8.bf16 %v670_v9 }
 0x104   : > { %3074 = vmatprep.subr.bf16.mxu1 %v1671_v12  ;;  %v1862_v12 = vunpack.c.h.s8.bf16 %v734_v10 }
 0x106   : > { %3034 = vmatpush2.bf16.msra.mxu0 %v1542_v15  ;;  %v727_v15 = vld [vmem:[%s7444_s9 + $0x9c8] sm:$0xff] }
 0x107   : > { %3075 = vmatpush2.bf16.msra.mxu1 %v1670_v16  ;;  %3035 = vmatprep.subr.bf16.mxu0 %v1535_v17  ;;  %v791_v16 = vld [vmem:[%s7444_s9 + $0xbc8] sm:$0xff]  ;;  %v1726_v17 = vunpack.c.l.s8.bf16 %v670_v9  ;;  %v1847_v19 = vunpack.c.h.s8.bf16 %v727_v15  ;;  %v1839_v25 = vunpack.c.l.s8.bf16 %v727_v15 }
 0x108   : > { %3076 = vmatprep.subr.bf16.mxu1 %v1663_v18  ;;  %v1854_v18 = vunpack.c.l.s8.bf16 %v734_v10  ;;  %v1975_v20 = vunpack.c.h.s8.bf16 %v791_v16  ;;  %v1967_v26 = vunpack.c.l.s8.bf16 %v791_v16 }
 0x10a   : > { %3036 = vmatpush2.bf16.msra.mxu0 %v1534_v21  ;;  %v726_v21 = vld [vmem:[%s7444_s9 + $0x9c0] sm:$0xff] }
 0x10b   : > { %3077 = vmatpush2.bf16.msra.mxu1 %v1662_v22  ;;  %3087 = vmatprep.subr.bf16.mxu0 %v1783_v23  ;;  %v790_v22 = vld [vmem:[%s7444_s9 + $0xbc0] sm:$0xff]  ;;  %v1846_v23 = vunpack.c.h.s8.bf16 %v726_v21 }
 0x10c   : > { %3128 = vmatprep.subr.bf16.mxu1 %v1911_v24  ;;  %v1974_v24 = vunpack.c.h.s8.bf16 %v790_v22 }
 0x10d   : > { %3038 = vmatmul.mubr.bf16.vlgmr.msra.gmra.mxu0 %v7582_v27 }
 0x10e   : > { %3079 = vmatmul.mubr.bf16.vlgmr.msra.gmra.mxu1 %v7586_v28  ;;  %3088 = vmatpush1.bf16.msra.mxu0 %v1782_v33  ;;  %v719_v33 = vld [vmem:[%s7444_s9 + $0x988] sm:$0xff] }
 0x10f   : > { %3129 = vmatpush1.bf16.msra.mxu1 %v1910_v34  ;;  %3089 = vmatprep.subr.bf16.mxu0 %v1775_v35  ;;  %v783_v34 = vld [vmem:[%s7444_s9 + $0xb88] sm:$0xff]  ;;  %v1838_v35 = vunpack.c.l.s8.bf16 %v726_v21  ;;  %v1831_v49 = vunpack.c.h.s8.bf16 %v719_v33  ;;  %v1823_v45 = vunpack.c.l.s8.bf16 %v719_v33  ;;  %v7647_v21 = vld [vmem:[%s7466_s17 + $0x30] sm:$0xff] }
 0x110   : > { %3130 = vmatprep.subr.bf16.mxu1 %v1903_v36  ;;  %3119 = vmatprep.mubr.bf16.mxu0 %v7598_v50  ;;  %v1966_v36 = vunpack.c.l.s8.bf16 %v790_v22  ;;  %v1959_v39 = vunpack.c.h.s8.bf16 %v783_v34  ;;  %v1951_v46 = vunpack.c.l.s8.bf16 %v783_v34  ;;  %v7650_v22 = vld [vmem:[%s7466_s17 + $0x38] sm:$0xff]  ;;  %v879_v33 = vld [vmem:[%s7444_s9 + $0xe88] sm:$0xff] }
 0x111   : > { %3160 = vmatprep.mubr.bf16.mxu1 %v7602_v40  ;;  %v7660_v34 = vcombine.high %v7650_v22, %v7650_v22 }
 0x112   : > { %3090 = vmatpush1.bf16.msra.mxu0 %v1774_v41  ;;  %v718_v41 = vld [vmem:[%s7444_s9 + $0x980] sm:$0xff] }
 0x113   : > { %3131 = vmatpush1.bf16.msra.mxu1 %v1902_v42  ;;  %3091 = vmatprep.subr.bf16.mxu0 %v1767_v43  ;;  %v782_v42 = vld [vmem:[%s7444_s9 + $0xb80] sm:$0xff]  ;;  %v1830_v43 = vunpack.c.h.s8.bf16 %v718_v41 }
 0x114   : > { %3132 = vmatprep.subr.bf16.mxu1 %v1895_v44  ;;  %v1958_v44 = vunpack.c.h.s8.bf16 %v782_v42 }
 0x116   : > { %3092 = vmatpush1.bf16.msra.mxu0 %v1766_v51  ;;  %v711_v51 = vld [vmem:[%s7444_s9 + $0x948] sm:$0xff] }
 0x117   : > { %3133 = vmatpush1.bf16.msra.mxu1 %v1894_v52  ;;  %3093 = vmatprep.subr.bf16.mxu0 %v1759_v53  ;;  %v775_v52 = vld [vmem:[%s7444_s9 + $0xb48] sm:$0xff]  ;;  %v1822_v53 = vunpack.c.l.s8.bf16 %v718_v41  ;;  %v1815_v31 = vunpack.c.h.s8.bf16 %v711_v51  ;;  %v1807_v61 = vunpack.c.l.s8.bf16 %v711_v51  ;;  %v814_v41 = vld [vmem:[%s7444_s9 + $0xc80] sm:$0xff] }
 0x118   : > { %3134 = vmatprep.subr.bf16.mxu1 %v1887_v54  ;;  %v1950_v54 = vunpack.c.l.s8.bf16 %v782_v42  ;;  %v1943_v55 = vunpack.c.h.s8.bf16 %v775_v52  ;;  %v1935_v62 = vunpack.c.l.s8.bf16 %v775_v52  ;;  %v878_v42 = vld [vmem:[%s7444_s9 + $0xe80] sm:$0xff]  ;;  %v807_v51 = vld [vmem:[%s7444_s9 + $0xc48] sm:$0xff] }
 0x119   : > { %v871_v52 = vld [vmem:[%s7444_s9 + $0xe48] sm:$0xff] }
 0x11a   : > { %3094 = vmatpush1.bf16.msra.mxu0 %v1758_v57  ;;  %v710_v57 = vld [vmem:[%s7444_s9 + $0x940] sm:$0xff] }
 0x11b   : > { %3135 = vmatpush1.bf16.msra.mxu1 %v1886_v58  ;;  %3095 = vmatprep.subr.bf16.mxu0 %v1751_v59  ;;  %v774_v58 = vld [vmem:[%s7444_s9 + $0xb40] sm:$0xff]  ;;  %v1814_v59 = vunpack.c.h.s8.bf16 %v710_v57 }
 0x11c   : > { %3136 = vmatprep.subr.bf16.mxu1 %v1879_v60  ;;  %v1942_v60 = vunpack.c.h.s8.bf16 %v774_v58 }
 0x11e   : > { %3096 = vmatpush1.bf16.msra.mxu0 %v1750_v63  ;;  %v703_v63 = vld [vmem:[%s7444_s9 + $0x908] sm:$0xff] }
 0x11f   : > { %3137 = vmatpush1.bf16.msra.mxu1 %v1878_v0  ;;  %3097 = vmatprep.subr.bf16.mxu0 %v1743_v1  ;;  %v767_v0 = vld [vmem:[%s7444_s9 + $0xb08] sm:$0xff]  ;;  %v1806_v1 = vunpack.c.l.s8.bf16 %v710_v57  ;;  %v1799_v3 = vunpack.c.h.s8.bf16 %v703_v63  ;;  %v1791_v9 = vunpack.c.l.s8.bf16 %v703_v63  ;;  %v806_v57 = vld [vmem:[%s7444_s9 + $0xc40] sm:$0xff] }
 0x120   : > { %3138 = vmatprep.subr.bf16.mxu1 %v1871_v2  ;;  %v1934_v2 = vunpack.c.l.s8.bf16 %v774_v58  ;;  %v1927_v4 = vunpack.c.h.s8.bf16 %v767_v0  ;;  %v1919_v10 = vunpack.c.l.s8.bf16 %v767_v0  ;;  %v870_v58 = vld [vmem:[%s7444_s9 + $0xe40] sm:$0xff]  ;;  %v799_v63 = vld [vmem:[%s7444_s9 + $0xc08] sm:$0xff] }
 0x121   : > { %v863_v0 = vld [vmem:[%s7444_s9 + $0xe08] sm:$0xff] }
 0x122   : > { %3098 = vmatpush1.bf16.msra.mxu0 %v1742_v5  ;;  %v702_v5 = vld [vmem:[%s7444_s9 + $0x900] sm:$0xff] }
 0x123   : > { %3139 = vmatpush1.bf16.msra.mxu1 %v1870_v6  ;;  %3099 = vmatprep.subr.bf16.mxu0 %v1735_v7  ;;  %v766_v6 = vld [vmem:[%s7444_s9 + $0xb00] sm:$0xff]  ;;  %v1798_v7 = vunpack.c.h.s8.bf16 %v702_v5 }
 0x124   : > { %3140 = vmatprep.subr.bf16.mxu1 %v1863_v8  ;;  %v1926_v8 = vunpack.c.h.s8.bf16 %v766_v6 }
 0x126   : > { %3100 = vmatpush1.bf16.msra.mxu0 %v1734_v11  ;;  %v823_v11 = vld [vmem:[%s7444_s9 + $0xcc8] sm:$0xff] }
 0x127   : > { %3141 = vmatpush1.bf16.msra.mxu1 %v1862_v12  ;;  %3101 = vmatprep.subr.bf16.mxu0 %v1727_v13  ;;  %v887_v12 = vld [vmem:[%s7444_s9 + $0xec8] sm:$0xff]  ;;  %v1790_v13 = vunpack.c.l.s8.bf16 %v702_v5  ;;  %v2039_v15 = vunpack.c.h.s8.bf16 %v823_v11  ;;  %v798_v5 = vld [vmem:[%s7444_s9 + $0xc00] sm:$0xff] }
 0x128   : > { %3142 = vmatprep.subr.bf16.mxu1 %v1855_v14  ;;  %v1918_v14 = vunpack.c.l.s8.bf16 %v766_v6  ;;  %v2167_v16 = vunpack.c.h.s8.bf16 %v887_v12  ;;  %v862_v6 = vld [vmem:[%s7444_s9 + $0xe00] sm:$0xff] }
 0x12a   : > { %3102 = vmatpush1.bf16.msra.mxu0 %v1726_v17  ;;  %v822_v17 = vld [vmem:[%s7444_s9 + $0xcc0] sm:$0xff] }
 0x12b   : > { %3143 = vmatpush1.bf16.msra.mxu1 %v1854_v18  ;;  %3103 = vmatprep.subr.bf16.mxu0 %v1847_v19  ;;  %v886_v18 = vld [vmem:[%s7444_s9 + $0xec0] sm:$0xff]  ;;  %v7640_v19 = vcombine.low %v7589_v29, %v7589_v29  ;;  %v815_v29 = vld [vmem:[%s7444_s9 + $0xc88] sm:$0xff] }
 0x12c   : > { %3144 = vmatprep.subr.bf16.mxu1 %v1975_v20  ;;  %v7644_v20 = vcombine.low %v7592_v30, %v7592_v30  ;;  %v7656_v30 = vcombine.high %v7647_v21, %v7647_v21 }
 0x12e   : > { %3104 = vmatpush2.bf16.msra.mxu0 %v1846_v23  ;;  %v2038_v23 = vunpack.c.h.s8.bf16 %v822_v17 }
 0x12f   : > { %3145 = vmatpush2.bf16.msra.mxu1 %v1974_v24  ;;  %3105 = vmatprep.subr.bf16.mxu0 %v1839_v25  ;;  %v2166_v24 = vunpack.c.h.s8.bf16 %v886_v18  ;;  %v2031_v25 = vunpack.c.l.s8.bf16 %v823_v11  ;;  %v855_v11 = vld [vmem:[%s7444_s9 + $0xdc8] sm:$0xff] }
 0x130   : > { %3146 = vmatprep.subr.bf16.mxu1 %v1967_v26  ;;  %v2159_v26 = vunpack.c.l.s8.bf16 %v887_v12  ;;  %v919_v12 = vld [vmem:[%s7444_s9 + $0xfc8] sm:$0xff] }
 0x132   : > { %3106 = vmatpush2.bf16.msra.mxu0 %v1838_v35  ;;  %v2030_v35 = vunpack.c.l.s8.bf16 %v822_v17  ;;  %v854_v17 = vld [vmem:[%s7444_s9 + $0xdc0] sm:$0xff] }
 0x133   : > { %3147 = vmatpush2.bf16.msra.mxu1 %v1966_v36  ;;  %3107 = vmatprep.subr.bf16.mxu0 %v1831_v49  ;;  %v2158_v36 = vunpack.c.l.s8.bf16 %v886_v18  ;;  %v2023_v49 = vunpack.c.h.s8.bf16 %v815_v29  ;;  %v918_v18 = vld [vmem:[%s7444_s9 + $0xfc0] sm:$0xff] }
 0x134   : > { %3148 = vmatprep.subr.bf16.mxu1 %v1959_v39  ;;  %v2151_v39 = vunpack.c.h.s8.bf16 %v879_v33 }
 0x136   : > { %3108 = vmatpush2.bf16.msra.mxu0 %v1830_v43  ;;  %v2022_v43 = vunpack.c.h.s8.bf16 %v814_v41 }
 0x137   : > { %3149 = vmatpush2.bf16.msra.mxu1 %v1958_v44  ;;  %3109 = vmatprep.subr.bf16.mxu0 %v1823_v45  ;;  %v2150_v44 = vunpack.c.h.s8.bf16 %v878_v42  ;;  %v2015_v45 = vunpack.c.l.s8.bf16 %v815_v29  ;;  %v847_v29 = vld [vmem:[%s7444_s9 + $0xd88] sm:$0xff] }
 0x138   : > { %3150 = vmatprep.subr.bf16.mxu1 %v1951_v46  ;;  %v2143_v46 = vunpack.c.l.s8.bf16 %v879_v33  ;;  %v911_v33 = vld [vmem:[%s7444_s9 + $0xf88] sm:$0xff] }
 0x13a   : > { %3110 = vmatpush2.bf16.msra.mxu0 %v1822_v53  ;;  %v2014_v53 = vunpack.c.l.s8.bf16 %v814_v41  ;;  %v846_v41 = vld [vmem:[%s7444_s9 + $0xd80] sm:$0xff] }
 0x13b   : > { %3151 = vmatpush2.bf16.msra.mxu1 %v1950_v54  ;;  %3111 = vmatprep.subr.bf16.mxu0 %v1815_v31  ;;  %v2142_v54 = vunpack.c.l.s8.bf16 %v878_v42  ;;  %v2007_v31 = vunpack.c.h.s8.bf16 %v807_v51  ;;  %v910_v42 = vld [vmem:[%s7444_s9 + $0xf80] sm:$0xff] }
 0x13c   : > { %3152 = vmatprep.subr.bf16.mxu1 %v1943_v55  ;;  %v2135_v55 = vunpack.c.h.s8.bf16 %v871_v52 }
 0x13e   : > { %3112 = vmatpush2.bf16.msra.mxu0 %v1814_v59  ;;  %v2006_v59 = vunpack.c.h.s8.bf16 %v806_v57 }
 0x13f   : > { %3153 = vmatpush2.bf16.msra.mxu1 %v1942_v60  ;;  %3113 = vmatprep.subr.bf16.mxu0 %v1807_v61  ;;  %v2134_v60 = vunpack.c.h.s8.bf16 %v870_v58  ;;  %v1999_v61 = vunpack.c.l.s8.bf16 %v807_v51  ;;  %v839_v51 = vld [vmem:[%s7444_s9 + $0xd48] sm:$0xff] }
 0x140   : > { %3154 = vmatprep.subr.bf16.mxu1 %v1935_v62  ;;  %v2127_v62 = vunpack.c.l.s8.bf16 %v871_v52  ;;  %v903_v52 = vld [vmem:[%s7444_s9 + $0xf48] sm:$0xff] }
 0x142   : > { %3114 = vmatpush2.bf16.msra.mxu0 %v1806_v1  ;;  %v1998_v1 = vunpack.c.l.s8.bf16 %v806_v57  ;;  %v838_v57 = vld [vmem:[%s7444_s9 + $0xd40] sm:$0xff] }
 0x143   : > { %3155 = vmatpush2.bf16.msra.mxu1 %v1934_v2  ;;  %3115 = vmatprep.subr.bf16.mxu0 %v1799_v3  ;;  %v2126_v2 = vunpack.c.l.s8.bf16 %v870_v58  ;;  %v1991_v3 = vunpack.c.h.s8.bf16 %v799_v63  ;;  %v902_v58 = vld [vmem:[%s7444_s9 + $0xf40] sm:$0xff] }
 0x144   : > { %3156 = vmatprep.subr.bf16.mxu1 %v1927_v4  ;;  %v2119_v4 = vunpack.c.h.s8.bf16 %v863_v0 }
 0x146   : > { %3116 = vmatpush2.bf16.msra.mxu0 %v1798_v7  ;;  %v1990_v7 = vunpack.c.h.s8.bf16 %v798_v5 }
 0x147   : > { %3157 = vmatpush2.bf16.msra.mxu1 %v1926_v8  ;;  %3117 = vmatprep.subr.bf16.mxu0 %v1791_v9  ;;  %v2118_v8 = vunpack.c.h.s8.bf16 %v862_v6  ;;  %v1983_v9 = vunpack.c.l.s8.bf16 %v799_v63  ;;  %v831_v63 = vld [vmem:[%s7444_s9 + $0xd08] sm:$0xff] }
 0x148   : > { %3158 = vmatprep.subr.bf16.mxu1 %v1919_v10  ;;  %v2111_v10 = vunpack.c.l.s8.bf16 %v863_v0  ;;  %v895_v0 = vld [vmem:[%s7444_s9 + $0xf08] sm:$0xff] }
 0x14a   : > { %3118 = vmatpush2.bf16.msra.mxu0 %v1790_v13  ;;  %v1982_v13 = vunpack.c.l.s8.bf16 %v798_v5  ;;  %v830_v5 = vld [vmem:[%s7444_s9 + $0xd00] sm:$0xff] }
 0x14b   : > { %3159 = vmatpush2.bf16.msra.mxu1 %v1918_v14  ;;  %3169 = vmatprep.subr.bf16.mxu0 %v2039_v15  ;;  %v2110_v14 = vunpack.c.l.s8.bf16 %v862_v6  ;;  %v2103_v15 = vunpack.c.h.s8.bf16 %v855_v11  ;;  %v894_v6 = vld [vmem:[%s7444_s9 + $0xf00] sm:$0xff] }
 0x14c   : > { %3210 = vmatprep.subr.bf16.mxu1 %v2167_v16  ;;  %v2231_v16 = vunpack.c.h.s8.bf16 %v919_v12 }
 0x14d   : > { %3120 = vmatmul.mubr.bf16.vlgmr.msra.gmra.mxu0 %v7640_v19 }
 0x14e   : > { %3161 = vmatmul.mubr.bf16.vlgmr.msra.gmra.mxu1 %v7644_v20  ;;  %3170 = vmatpush1.bf16.msra.mxu0 %v2038_v23  ;;  %v2102_v23 = vunpack.c.h.s8.bf16 %v854_v17 }
 0x14f   : > { %3211 = vmatpush1.bf16.msra.mxu1 %v2166_v24  ;;  %3171 = vmatprep.subr.bf16.mxu0 %v2031_v25  ;;  %v2230_v24 = vunpack.c.h.s8.bf16 %v918_v18  ;;  %v2095_v25 = vunpack.c.l.s8.bf16 %v855_v11  ;;  %v951_v11 = vld [vmem:[%s7444_s9 + $0x10c8] sm:$0xff] }
 0x150   : > { %3212 = vmatprep.subr.bf16.mxu1 %v2159_v26  ;;  %3201 = vmatprep.mubr.bf16.mxu0 %v7656_v30  ;;  %v2223_v26 = vunpack.c.l.s8.bf16 %v919_v12  ;;  %v1015_v12 = vld [vmem:[%s7444_s9 + $0x12c8] sm:$0xff] }
 0x151   : > { %3242 = vmatprep.mubr.bf16.mxu1 %v7660_v34 }
 0x152   : > { %3172 = vmatpush1.bf16.msra.mxu0 %v2030_v35  ;;  %v2094_v35 = vunpack.c.l.s8.bf16 %v854_v17  ;;  %v950_v17 = vld [vmem:[%s7444_s9 + $0x10c0] sm:$0xff] }
 0x153   : > { %3213 = vmatpush1.bf16.msra.mxu1 %v2158_v36  ;;  %3173 = vmatprep.subr.bf16.mxu0 %v2023_v49  ;;  %v2222_v36 = vunpack.c.l.s8.bf16 %v918_v18  ;;  %v2087_v49 = vunpack.c.h.s8.bf16 %v847_v29  ;;  %v1014_v18 = vld [vmem:[%s7444_s9 + $0x12c0] sm:$0xff] }
 0x154   : > { %3214 = vmatprep.subr.bf16.mxu1 %v2151_v39  ;;  %v2215_v39 = vunpack.c.h.s8.bf16 %v911_v33 }
 0x156   : > { %3174 = vmatpush1.bf16.msra.mxu0 %v2022_v43  ;;  %v2086_v43 = vunpack.c.h.s8.bf16 %v846_v41 }
 0x157   : > { %3215 = vmatpush1.bf16.msra.mxu1 %v2150_v44  ;;  %3175 = vmatprep.subr.bf16.mxu0 %v2015_v45  ;;  %v2214_v44 = vunpack.c.h.s8.bf16 %v910_v42  ;;  %v2079_v45 = vunpack.c.l.s8.bf16 %v847_v29  ;;  %v2294_v29 = vunpack.c.h.s8.bf16 %v950_v17 }
 0x158   : > { %3216 = vmatprep.subr.bf16.mxu1 %v2143_v46  ;;  %v2207_v46 = vunpack.c.l.s8.bf16 %v911_v33  ;;  %v2422_v33 = vunpack.c.h.s8.bf16 %v1014_v18 }
 0x15a   : > { %3176 = vmatpush1.bf16.msra.mxu0 %v2014_v53  ;;  %v2078_v53 = vunpack.c.l.s8.bf16 %v846_v41 }
 0x15b   : > { %3217 = vmatpush1.bf16.msra.mxu1 %v2142_v54  ;;  %3177 = vmatprep.subr.bf16.mxu0 %v2007_v31  ;;  %v2206_v54 = vunpack.c.l.s8.bf16 %v910_v42  ;;  %v2071_v31 = vunpack.c.h.s8.bf16 %v839_v51 }
 0x15c   : > { %3218 = vmatprep.subr.bf16.mxu1 %v2135_v55  ;;  %v2199_v55 = vunpack.c.h.s8.bf16 %v903_v52 }
 0x15e   : > { %3178 = vmatpush1.bf16.msra.mxu0 %v2006_v59  ;;  %v2070_v59 = vunpack.c.h.s8.bf16 %v838_v57 }
 0x15f   : > { %3219 = vmatpush1.bf16.msra.mxu1 %v2134_v60  ;;  %3179 = vmatprep.subr.bf16.mxu0 %v1999_v61  ;;  %v2198_v60 = vunpack.c.h.s8.bf16 %v902_v58  ;;  %v2063_v61 = vunpack.c.l.s8.bf16 %v839_v51 }
 0x160   : > { %3220 = vmatprep.subr.bf16.mxu1 %v2127_v62  ;;  %v2191_v62 = vunpack.c.l.s8.bf16 %v903_v52 }
 0x162   : > { %3180 = vmatpush1.bf16.msra.mxu0 %v1998_v1  ;;  %v2062_v1 = vunpack.c.l.s8.bf16 %v838_v57 }
 0x163   : > { %3221 = vmatpush1.bf16.msra.mxu1 %v2126_v2  ;;  %3181 = vmatprep.subr.bf16.mxu0 %v1991_v3  ;;  %v2190_v2 = vunpack.c.l.s8.bf16 %v902_v58  ;;  %v2055_v3 = vunpack.c.h.s8.bf16 %v831_v63 }
 0x164   : > { %3222 = vmatprep.subr.bf16.mxu1 %v2119_v4  ;;  %v2183_v4 = vunpack.c.h.s8.bf16 %v895_v0 }
 0x166   : > { %3182 = vmatpush1.bf16.msra.mxu0 %v1990_v7  ;;  %v2054_v7 = vunpack.c.h.s8.bf16 %v830_v5 }
 0x167   : > { %3223 = vmatpush1.bf16.msra.mxu1 %v2118_v8  ;;  %3183 = vmatprep.subr.bf16.mxu0 %v1983_v9  ;;  %v2182_v8 = vunpack.c.h.s8.bf16 %v894_v6  ;;  %v2047_v9 = vunpack.c.l.s8.bf16 %v831_v63 }
 0x168   : > { %3224 = vmatprep.subr.bf16.mxu1 %v2111_v10  ;;  %v2175_v10 = vunpack.c.l.s8.bf16 %v895_v0 }
 0x16a   : > { %3184 = vmatpush1.bf16.msra.mxu0 %v1982_v13  ;;  %v2046_v13 = vunpack.c.l.s8.bf16 %v830_v5 }
 0x16b   : > { %3225 = vmatpush1.bf16.msra.mxu1 %v2110_v14  ;;  %3185 = vmatprep.subr.bf16.mxu0 %v2103_v15  ;;  %v2174_v14 = vunpack.c.l.s8.bf16 %v894_v6  ;;  %v2295_v15 = vunpack.c.h.s8.bf16 %v951_v11 }
 0x16c   : > { %3226 = vmatprep.subr.bf16.mxu1 %v2231_v16  ;;  %v2423_v16 = vunpack.c.h.s8.bf16 %v1015_v12 }
 0x16e   : > { %3186 = vmatpush2.bf16.msra.mxu0 %v2102_v23  ;;  %v7698_v23 = vcombine.low %v7647_v21, %v7647_v21 }
 0x16f   : > { %3227 = vmatpush2.bf16.msra.mxu1 %v2230_v24  ;;  %3187 = vmatprep.subr.bf16.mxu0 %v2095_v25  ;;  %v7702_v24 = vcombine.low %v7650_v22, %v7650_v22  ;;  %v7705_v25 = vld [vmem:[%s7466_s17 + $0x40] sm:$0xff] }
 0x170   : > { %3228 = vmatprep.subr.bf16.mxu1 %v2223_v26  ;;  %v7708_v26 = vld [vmem:[%s7466_s17 + $0x48] sm:$0xff]  ;;  %v7714_v21 = vcombine.high %v7705_v25, %v7705_v25 }
 0x171   : > { %v7718_v22 = vcombine.high %v7708_v26, %v7708_v26 }
 0x172   : > { %3188 = vmatpush2.bf16.msra.mxu0 %v2094_v35  ;;  %v2287_v35 = vunpack.c.l.s8.bf16 %v951_v11 }
 0x173   : > { %3229 = vmatpush2.bf16.msra.mxu1 %v2222_v36  ;;  %3189 = vmatprep.subr.bf16.mxu0 %v2087_v49  ;;  %v2415_v36 = vunpack.c.l.s8.bf16 %v1015_v12  ;;  %v943_v49 = vld [vmem:[%s7444_s9 + $0x1088] sm:$0xff] }
 0x174   : > { %3230 = vmatprep.subr.bf16.mxu1 %v2215_v39  ;;  %v1007_v39 = vld [vmem:[%s7444_s9 + $0x1288] sm:$0xff]  ;;  %v2279_v52 = vunpack.c.h.s8.bf16 %v943_v49  ;;  %v2271_v63 = vunpack.c.l.s8.bf16 %v943_v49 }
 0x175   : > { %v2399_v0 = vunpack.c.l.s8.bf16 %v1007_v39 }
 0x176   : > { %3190 = vmatpush2.bf16.msra.mxu0 %v2086_v43 }
 0x177   : > { %3231 = vmatpush2.bf16.msra.mxu1 %v2214_v44  ;;  %3191 = vmatprep.subr.bf16.mxu0 %v2079_v45  ;;  %v2286_v44 = vunpack.c.l.s8.bf16 %v950_v17  ;;  %v2414_v45 = vunpack.c.l.s8.bf16 %v1014_v18 }
 0x178   : > { %3232 = vmatprep.subr.bf16.mxu1 %v2207_v46 }
 0x17a   : > { %3192 = vmatpush2.bf16.msra.mxu0 %v2078_v53  ;;  %v2407_v53 = vunpack.c.h.s8.bf16 %v1007_v39 }
 0x17b   : > { %3233 = vmatpush2.bf16.msra.mxu1 %v2206_v54  ;;  %3193 = vmatprep.subr.bf16.mxu0 %v2071_v31  ;;  %v942_v54 = vld [vmem:[%s7444_s9 + $0x1080] sm:$0xff] }
 0x17c   : > { %3234 = vmatprep.subr.bf16.mxu1 %v2199_v55  ;;  %v1006_v31 = vld [vmem:[%s7444_s9 + $0x1280] sm:$0xff] }
 0x17e   : > { %3194 = vmatpush2.bf16.msra.mxu0 %v2070_v59  ;;  %v2278_v59 = vunpack.c.h.s8.bf16 %v942_v54 }
 0x17f   : > { %3235 = vmatpush2.bf16.msra.mxu1 %v2198_v60  ;;  %3195 = vmatprep.subr.bf16.mxu0 %v2063_v61  ;;  %v2406_v60 = vunpack.c.h.s8.bf16 %v1006_v31 }
 0x180   : > { %3236 = vmatprep.subr.bf16.mxu1 %v2191_v62 }
 0x182   : > { %3196 = vmatpush2.bf16.msra.mxu0 %v2062_v1  ;;  %v935_v1 = vld [vmem:[%s7444_s9 + $0x1048] sm:$0xff] }
 0x183   : > { %3237 = vmatpush2.bf16.msra.mxu1 %v2190_v2  ;;  %3197 = vmatprep.subr.bf16.mxu0 %v2055_v3  ;;  %v999_v2 = vld [vmem:[%s7444_s9 + $0x1248] sm:$0xff]  ;;  %v2270_v3 = vunpack.c.l.s8.bf16 %v942_v54  ;;  %v2263_v5 = vunpack.c.h.s8.bf16 %v935_v1  ;;  %v2255_v11 = vunpack.c.l.s8.bf16 %v935_v1  ;;  %v974_v1 = vld [vmem:[%s7444_s9 + $0x1180] sm:$0xff] }
 0x184   : > { %3238 = vmatprep.subr.bf16.mxu1 %v2183_v4  ;;  %v2398_v4 = vunpack.c.l.s8.bf16 %v1006_v31  ;;  %v2391_v6 = vunpack.c.h.s8.bf16 %v999_v2  ;;  %v2383_v12 = vunpack.c.l.s8.bf16 %v999_v2  ;;  %v1038_v2 = vld [vmem:[%s7444_s9 + $0x1380] sm:$0xff] }
 0x186   : > { %3198 = vmatpush2.bf16.msra.mxu0 %v2054_v7  ;;  %v934_v7 = vld [vmem:[%s7444_s9 + $0x1040] sm:$0xff] }
 0x187   : > { %3239 = vmatpush2.bf16.msra.mxu1 %v2182_v8  ;;  %3199 = vmatprep.subr.bf16.mxu0 %v2047_v9  ;;  %v998_v8 = vld [vmem:[%s7444_s9 + $0x1240] sm:$0xff]  ;;  %v2262_v9 = vunpack.c.h.s8.bf16 %v934_v7 }
 0x188   : > { %3240 = vmatprep.subr.bf16.mxu1 %v2175_v10  ;;  %v2390_v10 = vunpack.c.h.s8.bf16 %v998_v8 }
 0x18a   : > { %3200 = vmatpush2.bf16.msra.mxu0 %v2046_v13  ;;  %v927_v13 = vld [vmem:[%s7444_s9 + $0x1008] sm:$0xff] }
 0x18b   : > { %3241 = vmatpush2.bf16.msra.mxu1 %v2174_v14  ;;  %3251 = vmatprep.subr.bf16.mxu0 %v2295_v15  ;;  %v991_v14 = vld [vmem:[%s7444_s9 + $0x1208] sm:$0xff]  ;;  %v2254_v15 = vunpack.c.l.s8.bf16 %v934_v7  ;;  %v2247_v17 = vunpack.c.h.s8.bf16 %v927_v13  ;;  %v2239_v49 = vunpack.c.l.s8.bf16 %v927_v13  ;;  %v966_v13 = vld [vmem:[%s7444_s9 + $0x1140] sm:$0xff] }
 0x18c   : > { %3292 = vmatprep.subr.bf16.mxu1 %v2423_v16  ;;  %v2382_v16 = vunpack.c.l.s8.bf16 %v998_v8  ;;  %v2375_v18 = vunpack.c.h.s8.bf16 %v991_v14  ;;  %v2367_v39 = vunpack.c.l.s8.bf16 %v991_v14  ;;  %v967_v7 = vld [vmem:[%s7444_s9 + $0x1148] sm:$0xff]  ;;  %v1030_v14 = vld [vmem:[%s7444_s9 + $0x1340] sm:$0xff] }
 0x18d   : > { %v2957_v41 = vpop.f32.mrf.mxu0  ;;  %3202 = vmatmul.mubr.bf16.vlgmr.msra.gmra.mxu0 %v7698_v23  ;;  %v1031_v8 = vld [vmem:[%s7444_s9 + $0x1348] sm:$0xff] }
 0x18e   : > { %v2998_v42 = vpop.f32.mrf.mxu1  ;;  %3243 = vmatmul.mubr.bf16.vlgmr.msra.gmra.mxu1 %v7702_v24  ;;  %3252 = vmatpush1.bf16.msra.mxu0 %v2294_v29  ;;  %v926_v29 = vld [vmem:[%s7444_s9 + $0x1000] sm:$0xff] }
 0x18f   : > { %v7722_v43 = vadd.f32 %v2998_v42, %v2957_v41  ;;  %3293 = vmatpush1.bf16.msra.mxu1 %v2422_v33  ;;  %v2959_v46 = vpop.f32.mrf.mxu0  ;;  %3253 = vmatprep.subr.bf16.mxu0 %v2287_v35  ;;  %v990_v33 = vld [vmem:[%s7444_s9 + $0x1200] sm:$0xff]  ;;  %v2246_v35 = vunpack.c.h.s8.bf16 %v926_v29  ;;  %v983_v41 = vld [vmem:[%s7444_s9 + $0x11c8] sm:$0xff] }
 0x190   : > { %v3000_v51 = vpop.f32.mrf.mxu1  ;;  %3294 = vmatprep.subr.bf16.mxu1 %v2415_v36  ;;  %3283 = vmatprep.mubr.bf16.mxu0 %v7714_v21  ;;  %v2374_v36 = vunpack.c.h.s8.bf16 %v990_v33  ;;  %v1047_v42 = vld [vmem:[%s7444_s9 + $0x13c8] sm:$0xff] }
 0x191   : > { %v7726_v55 = vadd.f32 %v3000_v51, %v2959_v46  ;;  %3324 = vmatprep.mubr.bf16.mxu1 %v7718_v22  ;;  %v2961_v57 = vpop.f32.mrf.mxu0  ;;  %v2359_v46 = vunpack.c.h.s8.bf16 %v983_v41  ;;  %v2487_v51 = vunpack.c.h.s8.bf16 %v1047_v42 }
 0x192   : > { %v3002_v58 = vpop.f32.mrf.mxu1  ;;  %3254 = vmatpush1.bf16.msra.mxu0 %v2286_v44  ;;  %v2238_v44 = vunpack.c.l.s8.bf16 %v926_v29  ;;  %v2351_v57 = vunpack.c.l.s8.bf16 %v983_v41  ;;  %v959_v29 = vld [vmem:[%s7444_s9 + $0x1108] sm:$0xff]  ;;  %v958_v41 = vld [vmem:[%s7444_s9 + $0x1100] sm:$0xff] }
 0x193   : > { %3295 = vmatpush1.bf16.msra.mxu1 %v2414_v45  ;;  %v2962_v61 = vpop.f32.mrf.mxu0  ;;  %3255 = vmatprep.subr.bf16.mxu0 %v2279_v52  ;;  %v2366_v45 = vunpack.c.l.s8.bf16 %v990_v33  ;;  %v982_v52 = vld [vmem:[%s7444_s9 + $0x11c0] sm:$0xff]  ;;  %v2479_v58 = vunpack.c.l.s8.bf16 %v1047_v42  ;;  %v1023_v33 = vld [vmem:[%s7444_s9 + $0x1308] sm:$0xff] }
 0x194   : > { %v3003_v62 = vpop.f32.mrf.mxu1  ;;  %3296 = vmatprep.subr.bf16.mxu1 %v2407_v53  ;;  %v1046_v53 = vld [vmem:[%s7444_s9 + $0x13c0] sm:$0xff]  ;;  %v2358_v54 = vunpack.c.h.s8.bf16 %v982_v52  ;;  %v2350_v61 = vunpack.c.l.s8.bf16 %v982_v52  ;;  %v1079_v52 = vld [vmem:[%s7444_s9 + $0x14c8] sm:$0xff] }
 0x195   : > { %v2486_v31 = vunpack.c.h.s8.bf16 %v1046_v53  ;;  %v2478_v62 = vunpack.c.l.s8.bf16 %v1046_v53  ;;  %v1022_v42 = vld [vmem:[%s7444_s9 + $0x1300] sm:$0xff]  ;;  %v1143_v53 = vld [vmem:[%s7444_s9 + $0x16c8] sm:$0xff] }
 0x196   : > { %3256 = vmatpush1.bf16.msra.mxu0 %v2278_v59  ;;  %v975_v59 = vld [vmem:[%s7444_s9 + $0x1188] sm:$0xff] }
 0x197   : > { %3297 = vmatpush1.bf16.msra.mxu1 %v2406_v60  ;;  %3257 = vmatprep.subr.bf16.mxu0 %v2271_v63  ;;  %v1039_v60 = vld [vmem:[%s7444_s9 + $0x1388] sm:$0xff]  ;;  %v2343_v63 = vunpack.c.h.s8.bf16 %v975_v59 }
 0x198   : > { %3298 = vmatprep.subr.bf16.mxu1 %v2399_v0  ;;  %v2471_v0 = vunpack.c.h.s8.bf16 %v1039_v60 }
 0x19a   : > { %3258 = vmatpush1.bf16.msra.mxu0 %v2270_v3  ;;  %v2342_v3 = vunpack.c.h.s8.bf16 %v974_v1 }
 0x19b   : > { %3299 = vmatpush1.bf16.msra.mxu1 %v2398_v4  ;;  %3259 = vmatprep.subr.bf16.mxu0 %v2263_v5  ;;  %v2470_v4 = vunpack.c.h.s8.bf16 %v1038_v2  ;;  %v2335_v5 = vunpack.c.l.s8.bf16 %v975_v59  ;;  %v1078_v59 = vld [vmem:[%s7444_s9 + $0x14c0] sm:$0xff] }
 0x19c   : > { %3300 = vmatprep.subr.bf16.mxu1 %v2391_v6  ;;  %v2463_v6 = vunpack.c.l.s8.bf16 %v1039_v60  ;;  %v1142_v60 = vld [vmem:[%s7444_s9 + $0x16c0] sm:$0xff] }
 0x19e   : > { %3260 = vmatpush1.bf16.msra.mxu0 %v2262_v9  ;;  %v2334_v9 = vunpack.c.l.s8.bf16 %v974_v1  ;;  %v2550_v1 = vunpack.c.h.s8.bf16 %v1078_v59 }
 0x19f   : > { %3301 = vmatpush1.bf16.msra.mxu1 %v2390_v10  ;;  %3261 = vmatprep.subr.bf16.mxu0 %v2255_v11  ;;  %v2462_v10 = vunpack.c.l.s8.bf16 %v1038_v2  ;;  %v2327_v11 = vunpack.c.h.s8.bf16 %v967_v7  ;;  %v2678_v2 = vunpack.c.h.s8.bf16 %v1142_v60 }
 0x1a0   : > { %3302 = vmatprep.subr.bf16.mxu1 %v2383_v12  ;;  %v2455_v12 = vunpack.c.h.s8.bf16 %v1031_v8 }
 0x1a2   : > { %3262 = vmatpush1.bf16.msra.mxu0 %v2254_v15  ;;  %v2326_v15 = vunpack.c.h.s8.bf16 %v966_v13 }
 0x1a3   : > { %3303 = vmatpush1.bf16.msra.mxu1 %v2382_v16  ;;  %3263 = vmatprep.subr.bf16.mxu0 %v2247_v17  ;;  %v2454_v16 = vunpack.c.h.s8.bf16 %v1030_v14  ;;  %v2319_v17 = vunpack.c.l.s8.bf16 %v967_v7 }
 0x1a4   : > { %3304 = vmatprep.subr.bf16.mxu1 %v2375_v18  ;;  %v2447_v18 = vunpack.c.l.s8.bf16 %v1031_v8 }
 0x1a6   : > { %3264 = vmatpush1.bf16.msra.mxu0 %v2246_v35  ;;  %v2318_v35 = vunpack.c.l.s8.bf16 %v966_v13 }
 0x1a7   : > { %3305 = vmatpush1.bf16.msra.mxu1 %v2374_v36  ;;  %3265 = vmatprep.subr.bf16.mxu0 %v2239_v49  ;;  %v2446_v36 = vunpack.c.l.s8.bf16 %v1030_v14  ;;  %v2311_v49 = vunpack.c.h.s8.bf16 %v959_v29 }
 0x1a8   : > { %3306 = vmatprep.subr.bf16.mxu1 %v2367_v39  ;;  %v2439_v39 = vunpack.c.h.s8.bf16 %v1023_v33 }
 0x1aa   : > { %3266 = vmatpush1.bf16.msra.mxu0 %v2238_v44  ;;  %v2310_v44 = vunpack.c.h.s8.bf16 %v958_v41 }
 0x1ab   : > { %3307 = vmatpush1.bf16.msra.mxu1 %v2366_v45  ;;  %3267 = vmatprep.subr.bf16.mxu0 %v2359_v46  ;;  %v2438_v45 = vunpack.c.h.s8.bf16 %v1022_v42  ;;  %v2303_v46 = vunpack.c.l.s8.bf16 %v959_v29 }
 0x1ac   : > { %3308 = vmatprep.subr.bf16.mxu1 %v2487_v51  ;;  %v2431_v51 = vunpack.c.l.s8.bf16 %v1023_v33 }
 0x1ae   : > { %3268 = vmatpush2.bf16.msra.mxu0 %v2358_v54  ;;  %v2302_v54 = vunpack.c.l.s8.bf16 %v958_v41 }
 0x1af   : > { %3309 = vmatpush2.bf16.msra.mxu1 %v2486_v31  ;;  %3269 = vmatprep.subr.bf16.mxu0 %v2351_v57  ;;  %v2430_v31 = vunpack.c.l.s8.bf16 %v1022_v42  ;;  %v2551_v57 = vunpack.c.h.s8.bf16 %v1079_v52 }
 0x1b0   : > { %3310 = vmatprep.subr.bf16.mxu1 %v2479_v58  ;;  %v2679_v58 = vunpack.c.h.s8.bf16 %v1143_v53 }
 0x1b2   : > { %3270 = vmatpush2.bf16.msra.mxu0 %v2350_v61  ;;  %v7760_v61 = vcombine.low %v7705_v25, %v7705_v25 }
 0x1b3   : > { %3311 = vmatpush2.bf16.msra.mxu1 %v2478_v62  ;;  %3271 = vmatprep.subr.bf16.mxu0 %v2343_v63  ;;  %v7764_v62 = vcombine.low %v7708_v26, %v7708_v26  ;;  %v7767_v63 = vld [vmem:[%s7466_s17 + $0x50] sm:$0xff] }
 0x1b4   : > { %3312 = vmatprep.subr.bf16.mxu1 %v2471_v0  ;;  %v7770_v0 = vld [vmem:[%s7466_s17 + $0x58] sm:$0xff]  ;;  %v7776_v25 = vcombine.high %v7767_v63, %v7767_v63 }
 0x1b5   : > { %v7780_v26 = vcombine.high %v7770_v0, %v7770_v0 }
 0x1b6   : > { %3272 = vmatpush2.bf16.msra.mxu0 %v2342_v3  ;;  %v2543_v3 = vunpack.c.l.s8.bf16 %v1079_v52 }
 0x1b7   : > { %3313 = vmatpush2.bf16.msra.mxu1 %v2470_v4  ;;  %3273 = vmatprep.subr.bf16.mxu0 %v2335_v5  ;;  %v2671_v4 = vunpack.c.l.s8.bf16 %v1143_v53  ;;  %v1071_v5 = vld [vmem:[%s7444_s9 + $0x1488] sm:$0xff] }
 0x1b8   : > { %3314 = vmatprep.subr.bf16.mxu1 %v2463_v6  ;;  %v1135_v6 = vld [vmem:[%s7444_s9 + $0x1688] sm:$0xff]  ;;  %v2535_v14 = vunpack.c.h.s8.bf16 %v1071_v5 }
 0x1b9   : > { %v2655_v42 = vunpack.c.l.s8.bf16 %v1135_v6 }
 0x1ba   : > { %3274 = vmatpush2.bf16.msra.mxu0 %v2334_v9 }
 0x1bb   : > { %3315 = vmatpush2.bf16.msra.mxu1 %v2462_v10  ;;  %3275 = vmatprep.subr.bf16.mxu0 %v2327_v11  ;;  %v2542_v10 = vunpack.c.l.s8.bf16 %v1078_v59  ;;  %v2670_v11 = vunpack.c.l.s8.bf16 %v1142_v60 }
 0x1bc   : > { %3316 = vmatprep.subr.bf16.mxu1 %v2455_v12 }
 0x1be   : > { %3276 = vmatpush2.bf16.msra.mxu0 %v2326_v15  ;;  %v2663_v15 = vunpack.c.h.s8.bf16 %v1135_v6 }
 0x1bf   : > { %3317 = vmatpush2.bf16.msra.mxu1 %v2454_v16  ;;  %3277 = vmatprep.subr.bf16.mxu0 %v2319_v17  ;;  %v1070_v16 = vld [vmem:[%s7444_s9 + $0x1480] sm:$0xff] }
 0x1c0   : > { %3318 = vmatprep.subr.bf16.mxu1 %v2447_v18  ;;  %v1134_v17 = vld [vmem:[%s7444_s9 + $0x1680] sm:$0xff] }
 0x1c2   : > { %3278 = vmatpush2.bf16.msra.mxu0 %v2318_v35 }
 0x1c3   : > { %3319 = vmatpush2.bf16.msra.mxu1 %v2446_v36  ;;  %3279 = vmatprep.subr.bf16.mxu0 %v2311_v49  ;;  %v2534_v36 = vunpack.c.h.s8.bf16 %v1070_v16  ;;  %v2662_v49 = vunpack.c.h.s8.bf16 %v1134_v17 }
 0x1c4   : > { %3320 = vmatprep.subr.bf16.mxu1 %v2439_v39 }
 0x1c6   : > { %3280 = vmatpush2.bf16.msra.mxu0 %v2310_v44  ;;  %v1063_v44 = vld [vmem:[%s7444_s9 + $0x1448] sm:$0xff] }
 0x1c7   : > { %3321 = vmatpush2.bf16.msra.mxu1 %v2438_v45  ;;  %3281 = vmatprep.subr.bf16.mxu0 %v2303_v46  ;;  %v1127_v45 = vld [vmem:[%s7444_s9 + $0x1648] sm:$0xff]  ;;  %v2526_v46 = vunpack.c.l.s8.bf16 %v1070_v16  ;;  %v2519_v52 = vunpack.c.h.s8.bf16 %v1063_v44  ;;  %v2511_v59 = vunpack.c.l.s8.bf16 %v1063_v44 }
 0x1c8   : > { %3322 = vmatprep.subr.bf16.mxu1 %v2431_v51  ;;  %v2654_v51 = vunpack.c.l.s8.bf16 %v1134_v17  ;;  %v2647_v53 = vunpack.c.h.s8.bf16 %v1127_v45  ;;  %v2639_v60 = vunpack.c.l.s8.bf16 %v1127_v45 }
 0x1ca   : > { %3282 = vmatpush2.bf16.msra.mxu0 %v2302_v54  ;;  %v1062_v54 = vld [vmem:[%s7444_s9 + $0x1440] sm:$0xff] }
 0x1cb   : > { %3323 = vmatpush2.bf16.msra.mxu1 %v2430_v31  ;;  %3333 = vmatprep.subr.bf16.mxu0 %v2551_v57  ;;  %v1126_v31 = vld [vmem:[%s7444_s9 + $0x1640] sm:$0xff]  ;;  %v2518_v57 = vunpack.c.h.s8.bf16 %v1062_v54 }
 0x1cc   : > { %3374 = vmatprep.subr.bf16.mxu1 %v2679_v58  ;;  %v2646_v58 = vunpack.c.h.s8.bf16 %v1126_v31 }
 0x1cd   : > { %v3039_v7 = vpop.f32.mrf.mxu0  ;;  %3284 = vmatmul.mubr.bf16.vlgmr.msra.gmra.mxu0 %v7760_v61 }
 0x1ce   : > { %v3080_v8 = vpop.f32.mrf.mxu1  ;;  %3325 = vmatmul.mubr.bf16.vlgmr.msra.gmra.mxu1 %v7764_v62  ;;  %v3040_v9 = vadd.f32 %v3039_v7, %v7722_v43  ;;  %3334 = vmatpush1.bf16.msra.mxu0 %v2550_v1  ;;  %v1055_v1 = vld [vmem:[%s7444_s9 + $0x1408] sm:$0xff]  ;;  %v1054_v7 = vld [vmem:[%s7444_s9 + $0x1400] sm:$0xff] }
 0x1cf   : > { %3375 = vmatpush1.bf16.msra.mxu1 %v2678_v2  ;;  %v3041_v12 = vpop.f32.mrf.mxu0  ;;  %3335 = vmatprep.subr.bf16.mxu0 %v2543_v3  ;;  %v1119_v2 = vld [vmem:[%s7444_s9 + $0x1608] sm:$0xff]  ;;  %v2510_v3 = vunpack.c.l.s8.bf16 %v1062_v54 }
 0x1d0   : > { %v3082_v13 = vpop.f32.mrf.mxu1  ;;  %3376 = vmatprep.subr.bf16.mxu1 %v2671_v4  ;;  %v7787_v18 = vadd.f32 %v3080_v8, %v3040_v9  ;;  %v3042_v29 = vadd.f32 %v3041_v12, %v7726_v55  ;;  %3365 = vmatprep.mubr.bf16.mxu0 %v7776_v25  ;;  %v2527_v55 = vunpack.c.l.s8.bf16 %v1071_v5  ;;  %v2638_v4 = vunpack.c.l.s8.bf16 %v1126_v31  ;;  %v1118_v8 = vld [vmem:[%s7444_s9 + $0x1600] sm:$0xff] }
 0x1d1   : > { %3406 = vmatprep.mubr.bf16.mxu1 %v7780_v26  ;;  %v3043_v43 = vpop.f32.mrf.mxu0  ;;  %v2503_v5 = vunpack.c.h.s8.bf16 %v1055_v1  ;;  %v2631_v6 = vunpack.c.h.s8.bf16 %v1119_v2  ;;  %v2502_v9 = vunpack.c.h.s8.bf16 %v1054_v7  ;;  %v2623_v12 = vunpack.c.l.s8.bf16 %v1119_v2 }
 0x1d2   : > { %v3084_v33 = vpop.f32.mrf.mxu1  ;;  %v7792_v35 = vadd.f32 %v3082_v13, %v3042_v29  ;;  %3336 = vmatpush1.bf16.msra.mxu0 %v2542_v10  ;;  %v2630_v10 = vunpack.c.h.s8.bf16 %v1118_v8  ;;  %v1111_v13 = vld [vmem:[%s7444_s9 + $0x15c8] sm:$0xff]  ;;  %v2622_v16 = vunpack.c.l.s8.bf16 %v1118_v8  ;;  %v1110_v43 = vld [vmem:[%s7444_s9 + $0x15c0] sm:$0xff] }
 0x1d3   : > { %3377 = vmatpush1.bf16.msra.mxu1 %v2670_v11  ;;  %v3044_v39 = vpop.f32.mrf.mxu0  ;;  %3337 = vmatprep.subr.bf16.mxu0 %v2535_v14  ;;  %v2495_v11 = vunpack.c.l.s8.bf16 %v1055_v1  ;;  %v1175_v14 = vld [vmem:[%s7444_s9 + $0x17c8] sm:$0xff]  ;;  %v2615_v17 = vunpack.c.h.s8.bf16 %v1111_v13  ;;  %v1174_v33 = vld [vmem:[%s7444_s9 + $0x17c0] sm:$0xff]  ;;  %v2606_v44 = vunpack.c.l.s8.bf16 %v1110_v43 }
 0x1d4   : > { %v3085_v41 = vpop.f32.mrf.mxu1  ;;  %3378 = vmatprep.subr.bf16.mxu1 %v2663_v15  ;;  %v2494_v15 = vunpack.c.l.s8.bf16 %v1054_v7  ;;  %v2743_v29 = vunpack.c.h.s8.bf16 %v1175_v14  ;;  %v2607_v39 = vunpack.c.l.s8.bf16 %v1111_v13  ;;  %v2734_v45 = vunpack.c.l.s8.bf16 %v1174_v33 }
 0x1d5   : > { %v2735_v41 = vunpack.c.l.s8.bf16 %v1175_v14 }
 0x1d6   : > { %3338 = vmatpush1.bf16.msra.mxu0 %v2534_v36  ;;  %v2614_v36 = vunpack.c.h.s8.bf16 %v1110_v43 }
 0x1d7   : > { %3379 = vmatpush1.bf16.msra.mxu1 %v2662_v49  ;;  %3339 = vmatprep.subr.bf16.mxu0 %v2527_v55  ;;  %v2742_v49 = vunpack.c.h.s8.bf16 %v1174_v33  ;;  %v1103_v55 = vld [vmem:[%s7444_s9 + $0x1588] sm:$0xff] }
 0x1d8   : > { %3380 = vmatprep.subr.bf16.mxu1 %v2655_v42  ;;  %v1167_v42 = vld [vmem:[%s7444_s9 + $0x1788] sm:$0xff] }
 0x1da   : > { %3340 = vmatpush1.bf16.msra.mxu0 %v2526_v46  ;;  %v2599_v46 = vunpack.c.h.s8.bf16 %v1103_v55 }
 0x1db   : > { %3381 = vmatpush1.bf16.msra.mxu1 %v2654_v51  ;;  %3341 = vmatprep.subr.bf16.mxu0 %v2519_v52  ;;  %v2727_v51 = vunpack.c.h.s8.bf16 %v1167_v42  ;;  %v1102_v52 = vld [vmem:[%s7444_s9 + $0x1580] sm:$0xff] }
 0x1dc   : > { %3382 = vmatprep.subr.bf16.mxu1 %v2647_v53  ;;  %v1166_v53 = vld [vmem:[%s7444_s9 + $0x1780] sm:$0xff]  ;;  %v2598_v54 = vunpack.c.h.s8.bf16 %v1102_v52  ;;  %v2590_v1 = vunpack.c.l.s8.bf16 %v1102_v52  ;;  %v7824_v52 = vcombine.low %v7767_v63, %v7767_v63 }
 0x1dd   : > { %v2726_v31 = vunpack.c.h.s8.bf16 %v1166_v53  ;;  %v2718_v2 = vunpack.c.l.s8.bf16 %v1166_v53  ;;  %v7828_v53 = vcombine.low %v7770_v0, %v7770_v0 }
 0x1de   : > { %3342 = vmatpush1.bf16.msra.mxu0 %v2518_v57  ;;  %v2591_v57 = vunpack.c.l.s8.bf16 %v1103_v55 }
 0x1df   : > { %3383 = vmatpush1.bf16.msra.mxu1 %v2646_v58  ;;  %3343 = vmatprep.subr.bf16.mxu0 %v2511_v59  ;;  %v2719_v58 = vunpack.c.l.s8.bf16 %v1167_v42  ;;  %v1095_v59 = vld [vmem:[%s7444_s9 + $0x1548] sm:$0xff] }
 0x1e0   : > { %3384 = vmatprep.subr.bf16.mxu1 %v2639_v60  ;;  %v1159_v60 = vld [vmem:[%s7444_s9 + $0x1748] sm:$0xff] }
 0x1e2   : > { %3344 = vmatpush1.bf16.msra.mxu0 %v2510_v3  ;;  %v2583_v3 = vunpack.c.h.s8.bf16 %v1095_v59 }
 0x1e3   : > { %3385 = vmatpush1.bf16.msra.mxu1 %v2638_v4  ;;  %3345 = vmatprep.subr.bf16.mxu0 %v2503_v5  ;;  %v2711_v4 = vunpack.c.h.s8.bf16 %v1159_v60  ;;  %v1094_v5 = vld [vmem:[%s7444_s9 + $0x1540] sm:$0xff] }
 0x1e4   : > { %3386 = vmatprep.subr.bf16.mxu1 %v2631_v6  ;;  %v1158_v6 = vld [vmem:[%s7444_s9 + $0x1740] sm:$0xff]  ;;  %v2582_v7 = vunpack.c.h.s8.bf16 %v1094_v5  ;;  %v2574_v13 = vunpack.c.l.s8.bf16 %v1094_v5 }
 0x1e5   : > { %v2710_v8 = vunpack.c.h.s8.bf16 %v1158_v6  ;;  %v2702_v14 = vunpack.c.l.s8.bf16 %v1158_v6 }
 0x1e6   : > { %3346 = vmatpush1.bf16.msra.mxu0 %v2502_v9  ;;  %v2575_v9 = vunpack.c.l.s8.bf16 %v1095_v59  ;;  %v1199_v59 = vld [vmem:[%s7444_s9 + $0x1888] sm:$0xff] }
 0x1e7   : > { %3387 = vmatpush1.bf16.msra.mxu1 %v2630_v10  ;;  %3347 = vmatprep.subr.bf16.mxu0 %v2495_v11  ;;  %v2703_v10 = vunpack.c.l.s8.bf16 %v1159_v60  ;;  %v1087_v11 = vld [vmem:[%s7444_s9 + $0x1508] sm:$0xff]  ;;  %v433_v60 = vld [vmem:[%s7444_s9 + $0x98] sm:$0xff]  ;;  %v2791_v6 = vunpack.c.h.s8.bf16 %v1199_v59 }
 0x1e8   : > { %3388 = vmatprep.subr.bf16.mxu1 %v2623_v12  ;;  %v1151_v12 = vld [vmem:[%s7444_s9 + $0x1708] sm:$0xff] }
 0x1ea   : > { %3348 = vmatpush1.bf16.msra.mxu0 %v2494_v15  ;;  %v2567_v15 = vunpack.c.h.s8.bf16 %v1087_v11 }
 0x1eb   : > { %3389 = vmatpush1.bf16.msra.mxu1 %v2622_v16  ;;  %3349 = vmatprep.subr.bf16.mxu0 %v2615_v17  ;;  %v2695_v16 = vunpack.c.h.s8.bf16 %v1151_v12  ;;  %v1086_v17 = vld [vmem:[%s7444_s9 + $0x1500] sm:$0xff] }
 0x1ec   : > { %3390 = vmatprep.subr.bf16.mxu1 %v2743_v29  ;;  %v1150_v29 = vld [vmem:[%s7444_s9 + $0x1700] sm:$0xff]  ;;  %v2566_v43 = vunpack.c.h.s8.bf16 %v1086_v17  ;;  %v2558_v55 = vunpack.c.l.s8.bf16 %v1086_v17 }
 0x1ed   : > { %v2694_v33 = vunpack.c.h.s8.bf16 %v1150_v29  ;;  %v2686_v42 = vunpack.c.l.s8.bf16 %v1150_v29 }
 0x1ee   : > { %3350 = vmatpush2.bf16.msra.mxu0 %v2614_v36  ;;  %v2559_v36 = vunpack.c.l.s8.bf16 %v1087_v11 }
 0x1ef   : > { %3391 = vmatpush2.bf16.msra.mxu1 %v2742_v49  ;;  %3351 = vmatprep.subr.bf16.mxu0 %v2607_v39  ;;  %v2687_v49 = vunpack.c.l.s8.bf16 %v1151_v12  ;;  %v1207_v39 = vld [vmem:[%s7444_s9 + $0x18c8] sm:$0xff]  ;;  %v7245_v12 = vmov 0  }
 0x1f0   : > { %3392 = vmatprep.subr.bf16.mxu1 %v2735_v41  ;;  %v441_v41 = vld [vmem:[%s7444_s9 + $0xd8] sm:$0xff] }
 0x1f2   : > { %3352 = vmatpush2.bf16.msra.mxu0 %v2606_v44  ;;  %v2807_v44 = vunpack.c.h.s8.bf16 %v1207_v39 }
 0x1f3   : > { %3393 = vmatpush2.bf16.msra.mxu1 %v2734_v45  ;;  %3353 = vmatprep.subr.bf16.mxu0 %v2599_v46  ;;  %v1273_v45 = vunpack.c.h.s8.bf16 %v441_v41  ;;  %v1206_v46 = vld [vmem:[%s7444_s9 + $0x18c0] sm:$0xff] }
 0x1f4   : > { %3394 = vmatprep.subr.bf16.mxu1 %v2727_v51  ;;  %v440_v51 = vld [vmem:[%s7444_s9 + $0xd0] sm:$0xff]  ;;  %v2798_v0 = vunpack.c.l.s8.bf16 %v1206_v46 }
 0x1f6   : > { %3354 = vmatpush2.bf16.msra.mxu0 %v2598_v54  ;;  %v2806_v54 = vunpack.c.h.s8.bf16 %v1206_v46 }
 0x1f7   : > { %3395 = vmatpush2.bf16.msra.mxu1 %v2726_v31  ;;  %3355 = vmatprep.subr.bf16.mxu0 %v2591_v57  ;;  %v1272_v31 = vunpack.c.h.s8.bf16 %v440_v51  ;;  %v2799_v57 = vunpack.c.l.s8.bf16 %v1207_v39 }
 0x1f8   : > { %3396 = vmatprep.subr.bf16.mxu1 %v2719_v58  ;;  %v1265_v58 = vunpack.c.l.s8.bf16 %v441_v41 }
 0x1fa   : > { %3356 = vmatpush2.bf16.msra.mxu0 %v2590_v1 }
 0x1fb   : > { %3397 = vmatpush2.bf16.msra.mxu1 %v2718_v2  ;;  %3357 = vmatprep.subr.bf16.mxu0 %v2583_v3  ;;  %v1264_v3 = vunpack.c.l.s8.bf16 %v440_v51 }
 0x1fc   : > { %3398 = vmatprep.subr.bf16.mxu1 %v2711_v4 }
 0x1fe   : > { %3358 = vmatpush2.bf16.msra.mxu0 %v2582_v7  ;;  %v1257_v7 = vunpack.c.h.s8.bf16 %v433_v60 }
 0x1ff   : > { %3399 = vmatpush2.bf16.msra.mxu1 %v2710_v8  ;;  %3359 = vmatprep.subr.bf16.mxu0 %v2575_v9  ;;  %v1198_v8 = vld [vmem:[%s7444_s9 + $0x1880] sm:$0xff]  ;;  %v432_v9 = vld [vmem:[%s7444_s9 + $0x90] sm:$0xff] }
 0x200   : > { %3400 = vmatprep.subr.bf16.mxu1 %v2703_v10  ;;  %v1248_v39 = vunpack.c.l.s8.bf16 %v432_v9 }
 0x202   : > { %3360 = vmatpush2.bf16.msra.mxu0 %v2574_v13 }
 0x203   : > { %3401 = vmatpush2.bf16.msra.mxu1 %v2702_v14  ;;  %3361 = vmatprep.subr.bf16.mxu0 %v2567_v15  ;;  %v2790_v15 = vunpack.c.h.s8.bf16 %v1198_v8 }
 0x204   : > { %3402 = vmatprep.subr.bf16.mxu1 %v2695_v16  ;;  %v1256_v16 = vunpack.c.h.s8.bf16 %v432_v9 }
 0x206   : > { %3362 = vmatpush2.bf16.msra.mxu0 %v2566_v43  ;;  %v1249_v43 = vunpack.c.l.s8.bf16 %v433_v60 }
 0x207   : > { %3403 = vmatpush2.bf16.msra.mxu1 %v2694_v33  ;;  %3363 = vmatprep.subr.bf16.mxu0 %v2559_v36  ;;  %v1191_v33 = vld [vmem:[%s7444_s9 + $0x1848] sm:$0xff]  ;;  %v425_v36 = vld [vmem:[%s7444_s9 + $0x58] sm:$0xff] }
 0x208   : > { %3404 = vmatprep.subr.bf16.mxu1 %v2687_v49  ;;  %v2782_v49 = vunpack.c.l.s8.bf16 %v1198_v8  ;;  %v2775_v41 = vunpack.c.h.s8.bf16 %v1191_v33  ;;  %v2767_v51 = vunpack.c.l.s8.bf16 %v1191_v33  ;;  %v465_v33 = vld [vmem:[%s7444_s9 + $0x198] sm:$0xff] }
 0x20a   : > { %3364 = vmatpush2.bf16.msra.mxu0 %v2558_v55  ;;  %v1241_v55 = vunpack.c.h.s8.bf16 %v425_v36 }
 0x20b   : > { %3405 = vmatpush2.bf16.msra.mxu1 %v2686_v42  ;;  %3415 = vmatprep.subr.bf16.mxu0 %v2807_v44  ;;  %v1190_v42 = vld [vmem:[%s7444_s9 + $0x1840] sm:$0xff]  ;;  %v424_v44 = vld [vmem:[%s7444_s9 + $0x50] sm:$0xff] }
 0x20c   : > { %3456 = vmatprep.subr.bf16.mxu1 %v1273_v45  ;;  %v2774_v45 = vunpack.c.h.s8.bf16 %v1190_v42  ;;  %v1240_v46 = vunpack.c.h.s8.bf16 %v424_v44 }
 0x20d   : > { %v3121_v1 = vpop.f32.mrf.mxu0  ;;  %3366 = vmatmul.mubr.bf16.vlgmr.msra.gmra.mxu0 %v7824_v52 }
 0x20e   : > { %v3162_v2 = vpop.f32.mrf.mxu1  ;;  %3407 = vmatmul.mubr.bf16.vlgmr.msra.gmra.mxu1 %v7828_v53  ;;  %v3122_v63 = vadd.f32 %v3121_v1, %v7787_v18  ;;  %3416 = vmatpush1.bf16.msra.mxu0 %v2806_v54  ;;  %v1233_v54 = vunpack.c.l.s8.bf16 %v425_v36  ;;  %v497_v36 = vld [vmem:[%s7444_s9 + $0x298] sm:$0xff] }
 0x20f   : > { %3457 = vmatpush1.bf16.msra.mxu1 %v1272_v31  ;;  %v3123_v4 = vpop.f32.mrf.mxu0  ;;  %3417 = vmatprep.subr.bf16.mxu0 %v2799_v57  ;;  %v1183_v31 = vld [vmem:[%s7444_s9 + $0x1808] sm:$0xff]  ;;  %v417_v57 = vld [vmem:[%s7444_s9 + $0x18] sm:$0xff] }
 0x210   : > { %v3164_v5 = vpop.f32.mrf.mxu1  ;;  %3458 = vmatprep.subr.bf16.mxu1 %v1265_v58  ;;  %v7837_v10 = vadd.f32 %v3162_v2, %v3122_v63  ;;  %v3124_v11 = vadd.f32 %v3123_v4, %v7792_v35  ;;  %3447 = vmatprep.mubr.bf16.mxu0 %v7245_v12  ;;  %v2783_v35 = vunpack.c.l.s8.bf16 %v1199_v59  ;;  %v2766_v58 = vunpack.c.l.s8.bf16 %v1190_v42  ;;  %v1182_v2 = vld [vmem:[%s7444_s9 + $0x1800] sm:$0xff]  ;;  %v416_v63 = vld [vmem:[%s7444_s9 + $0x10] sm:$0xff] }
 0x211   : > { %3488 = vmatprep.mubr.bf16.mxu1 %v7490_v37  ;;  %v3125_v18 = vpop.f32.mrf.mxu0  ;;  %v1232_v59 = vunpack.c.l.s8.bf16 %v424_v44  ;;  %v2759_v60 = vunpack.c.h.s8.bf16 %v1183_v31  ;;  %v1225_v1 = vunpack.c.h.s8.bf16 %v417_v57  ;;  %v2751_v4 = vunpack.c.l.s8.bf16 %v1183_v31  ;;  %v464_v42 = vld [vmem:[%s7444_s9 + $0x190] sm:$0xff]  ;;  %v457_v31 = vld [vmem:[%s7444_s9 + $0x158] sm:$0xff] }
 0x212   : > { %v3166_v13 = vpop.f32.mrf.mxu1  ;;  %v7842_v14 = vadd.f32 %v3164_v5, %v3124_v11  ;;  %3418 = vmatpush1.bf16.msra.mxu0 %v2798_v0  ;;  %v2758_v0 = vunpack.c.h.s8.bf16 %v1182_v2  ;;  %v1217_v5 = vunpack.c.l.s8.bf16 %v417_v57  ;;  %v2750_v8 = vunpack.c.l.s8.bf16 %v1182_v2  ;;  %v496_v44 = vld [vmem:[%s7444_s9 + $0x290] sm:$0xff]  ;;  %v489_v57 = vld [vmem:[%s7444_s9 + $0x258] sm:$0xff] }
 0x213   : > { %3459 = vmatpush1.bf16.msra.mxu1 %v1264_v3  ;;  %v3126_v17 = vpop.f32.mrf.mxu0  ;;  %3419 = vmatprep.subr.bf16.mxu0 %v2791_v6  ;;  %v1224_v3 = vunpack.c.h.s8.bf16 %v416_v63  ;;  %v473_v6 = vld [vmem:[%s7444_s9 + $0x1d8] sm:$0xff]  ;;  %v1216_v9 = vunpack.c.l.s8.bf16 %v416_v63  ;;  %v472_v13 = vld [vmem:[%s7444_s9 + $0x1d0] sm:$0xff] }
 0x214   : > { %v3167_v29 = vpop.f32.mrf.mxu1  ;;  %3460 = vmatprep.subr.bf16.mxu1 %v1257_v7  ;;  %v505_v7 = vld [vmem:[%s7444_s9 + $0x2d8] sm:$0xff]  ;;  %v1337_v11 = vunpack.c.h.s8.bf16 %v473_v6  ;;  %v1336_v17 = vunpack.c.h.s8.bf16 %v472_v13  ;;  %v456_v2 = vld [vmem:[%s7444_s9 + $0x150] sm:$0xff] }
 0x215   : > { %v1401_v18 = vunpack.c.h.s8.bf16 %v505_v7  ;;  %v488_v63 = vld [vmem:[%s7444_s9 + $0x250] sm:$0xff] }
 0x216   : > { %3420 = vmatpush1.bf16.msra.mxu0 %v2790_v15  ;;  %v504_v15 = vld [vmem:[%s7444_s9 + $0x2d0] sm:$0xff] }
 0x217   : > { %3461 = vmatpush1.bf16.msra.mxu1 %v1256_v16  ;;  %3421 = vmatprep.subr.bf16.mxu0 %v2783_v35  ;;  %v6788_v16 = vld [vmem:[%s7466_s17 + $0x60] ss:$0 sps:$4 sm:$0xff]   ;;  %v1400_v29 = vunpack.c.h.s8.bf16 %v504_v15  ;;  %v1329_v35 = vunpack.c.l.s8.bf16 %v473_v6  ;;  %v449_v6 = vld [vmem:[%s7444_s9 + $0x118] sm:$0xff] }
 0x218   : > { %3462 = vmatprep.subr.bf16.mxu1 %v1249_v43  ;;  %v1393_v43 = vunpack.c.l.s8.bf16 %v505_v7  ;;  %v481_v7 = vld [vmem:[%s7444_s9 + $0x218] sm:$0xff] }
 0x21a   : > { %3422 = vmatpush1.bf16.msra.mxu0 %v2782_v49  ;;  %v1328_v49 = vunpack.c.l.s8.bf16 %v472_v13  ;;  %v448_v13 = vld [vmem:[%s7444_s9 + $0x110] sm:$0xff] }
 0x21b   : > { %3463 = vmatpush1.bf16.msra.mxu1 %v1248_v39  ;;  %3423 = vmatprep.subr.bf16.mxu0 %v2775_v41  ;;  %v1392_v39 = vunpack.c.l.s8.bf16 %v504_v15  ;;  %v1321_v41 = vunpack.c.h.s8.bf16 %v465_v33  ;;  %v480_v15 = vld [vmem:[%s7444_s9 + $0x210] sm:$0xff] }
 0x21c   : > { %3464 = vmatprep.subr.bf16.mxu1 %v1241_v55  ;;  %v1385_v55 = vunpack.c.h.s8.bf16 %v497_v36 }
 0x21e   : > { %3424 = vmatpush1.bf16.msra.mxu0 %v2774_v45  ;;  %v1320_v45 = vunpack.c.h.s8.bf16 %v464_v42 }
 0x21f   : > { %3465 = vmatpush1.bf16.msra.mxu1 %v1240_v46  ;;  %3425 = vmatprep.subr.bf16.mxu0 %v2767_v51  ;;  %v1384_v46 = vunpack.c.h.s8.bf16 %v496_v44  ;;  %v1313_v51 = vunpack.c.l.s8.bf16 %v465_v33  ;;  %v569_v33 = vld [vmem:[%s7444_s9 + $0x4d8] sm:$0xff] }
 0x220   : > { %3466 = vmatprep.subr.bf16.mxu1 %v1233_v54  ;;  %v1377_v54 = vunpack.c.l.s8.bf16 %v497_v36  ;;  %v1280_v36 = vunpack.c.l.s8.bf16 %v448_v13 }
 0x222   : > { %3426 = vmatpush1.bf16.msra.mxu0 %v2766_v58  ;;  %v1312_v58 = vunpack.c.l.s8.bf16 %v464_v42  ;;  %v568_v42 = vld [vmem:[%s7444_s9 + $0x4d0] sm:$0xff] }
 0x223   : > { %3467 = vmatpush1.bf16.msra.mxu1 %v1232_v59  ;;  %3427 = vmatprep.subr.bf16.mxu0 %v2759_v60  ;;  %v1376_v59 = vunpack.c.l.s8.bf16 %v496_v44  ;;  %v1305_v60 = vunpack.c.h.s8.bf16 %v457_v31 }
 0x224   : > { %3468 = vmatprep.subr.bf16.mxu1 %v1225_v1  ;;  %v1369_v1 = vunpack.c.h.s8.bf16 %v489_v57 }
 0x226   : > { %3428 = vmatpush1.bf16.msra.mxu0 %v2758_v0  ;;  %v1304_v0 = vunpack.c.h.s8.bf16 %v456_v2 }
 0x227   : > { %3469 = vmatpush1.bf16.msra.mxu1 %v1224_v3  ;;  %3429 = vmatprep.subr.bf16.mxu0 %v2751_v4  ;;  %v1368_v3 = vunpack.c.h.s8.bf16 %v488_v63  ;;  %v1297_v4 = vunpack.c.l.s8.bf16 %v457_v31  ;;  %v561_v31 = vld [vmem:[%s7444_s9 + $0x498] sm:$0xff] }
 0x228   : > { %3470 = vmatprep.subr.bf16.mxu1 %v1217_v5  ;;  %v1361_v5 = vunpack.c.l.s8.bf16 %v489_v57 }
 0x22a   : > { %3430 = vmatpush1.bf16.msra.mxu0 %v2750_v8  ;;  %v1296_v8 = vunpack.c.l.s8.bf16 %v456_v2 }
 0x22b   : > { %3471 = vmatpush1.bf16.msra.mxu1 %v1216_v9  ;;  %3497 = vmatprep.subr.bf16.mxu0 %v1401_v18  ;;  %v1360_v9 = vunpack.c.l.s8.bf16 %v488_v63  ;;  %v1353_v18 = vunpack.c.h.s8.bf16 %v481_v7 }
 0x22c   : > { %3472 = vmatprep.subr.bf16.mxu1 %v1337_v11  ;;  %v1289_v11 = vunpack.c.h.s8.bf16 %v449_v6 }
 0x22d   : > { %3448 = vmatmul.mubr.bf16.vlgmr.msra.gmra.mxu0 %v6788_v16  ;;  %v1288_v16 = vunpack.c.h.s8.bf16 %v448_v13 }
 0x22e   : > { %3498 = vmatpush1.bf16.msra.mxu0 %v1400_v29  ;;  %3529 = vmatprep.mubr.bf16.mxu0 %v7494_v38  ;;  %v1281_v29 = vunpack.c.l.s8.bf16 %v449_v6 }
 0x22f   : > { %3473 = vmatpush2.bf16.msra.mxu1 %v1336_v17  ;;  %3499 = vmatprep.subr.bf16.mxu0 %v1393_v43  ;;  %v1352_v17 = vunpack.c.h.s8.bf16 %v480_v15  ;;  %v537_v43 = vld [vmem:[%s7444_s9 + $0x3d8] sm:$0xff] }
 0x230   : > { %3474 = vmatprep.subr.bf16.mxu1 %v1329_v35  ;;  %v1345_v35 = vunpack.c.l.s8.bf16 %v481_v7 }
 0x232   : > { %3500 = vmatpush1.bf16.msra.mxu0 %v1392_v39  ;;  %v1465_v39 = vunpack.c.h.s8.bf16 %v537_v43 }
 0x233   : > { %3475 = vmatpush2.bf16.msra.mxu1 %v1328_v49  ;;  %3501 = vmatprep.subr.bf16.mxu0 %v1385_v55  ;;  %v1344_v49 = vunpack.c.l.s8.bf16 %v480_v15  ;;  %v536_v55 = vld [vmem:[%s7444_s9 + $0x3d0] sm:$0xff] }
 0x234   : > { %3476 = vmatprep.subr.bf16.mxu1 %v1321_v41  ;;  %v1529_v41 = vunpack.c.h.s8.bf16 %v569_v33  ;;  %v1464_v44 = vunpack.c.h.s8.bf16 %v536_v55 }
 0x236   : > { %3502 = vmatpush1.bf16.msra.mxu0 %v1384_v46  ;;  %v1457_v46 = vunpack.c.l.s8.bf16 %v537_v43 }
 0x237   : > { %3477 = vmatpush2.bf16.msra.mxu1 %v1320_v45  ;;  %3503 = vmatprep.subr.bf16.mxu0 %v1377_v54  ;;  %v1528_v45 = vunpack.c.h.s8.bf16 %v568_v42  ;;  %v529_v54 = vld [vmem:[%s7444_s9 + $0x398] sm:$0xff] }
 0x238   : > { %3478 = vmatprep.subr.bf16.mxu1 %v1313_v51  ;;  %v1521_v51 = vunpack.c.l.s8.bf16 %v569_v33 }
 0x23a   : > { %3504 = vmatpush1.bf16.msra.mxu0 %v1376_v59 }
 0x23b   : > { %3479 = vmatpush2.bf16.msra.mxu1 %v1312_v58  ;;  %3505 = vmatprep.subr.bf16.mxu0 %v1369_v1  ;;  %v1520_v1 = vunpack.c.l.s8.bf16 %v568_v42 }
 0x23c   : > { %3480 = vmatprep.subr.bf16.mxu1 %v1305_v60  ;;  %v1456_v60 = vunpack.c.l.s8.bf16 %v536_v55 }
 0x23e   : > { %3506 = vmatpush1.bf16.msra.mxu0 %v1368_v3  ;;  %v1513_v3 = vunpack.c.h.s8.bf16 %v561_v31 }
 0x23f   : > { %3481 = vmatpush2.bf16.msra.mxu1 %v1304_v0  ;;  %3507 = vmatprep.subr.bf16.mxu0 %v1361_v5  ;;  %v1449_v0 = vunpack.c.h.s8.bf16 %v529_v54  ;;  %v560_v5 = vld [vmem:[%s7444_s9 + $0x490] sm:$0xff] }
 0x240   : > { %3482 = vmatprep.subr.bf16.mxu1 %v1297_v4  ;;  %v528_v4 = vld [vmem:[%s7444_s9 + $0x390] sm:$0xff]  ;;  %v1504_v43 = vunpack.c.l.s8.bf16 %v560_v5 }
 0x242   : > { %3508 = vmatpush1.bf16.msra.mxu0 %v1360_v9 }
 0x243   : > { %3483 = vmatpush2.bf16.msra.mxu1 %v1296_v8  ;;  %3509 = vmatprep.subr.bf16.mxu0 %v1353_v18  ;;  %v1512_v18 = vunpack.c.h.s8.bf16 %v560_v5 }
 0x244   : > { %3484 = vmatprep.subr.bf16.mxu1 %v1289_v11  ;;  %v1448_v11 = vunpack.c.h.s8.bf16 %v528_v4 }
 0x246   : > { %3510 = vmatpush1.bf16.msra.mxu0 %v1352_v17  ;;  %v1505_v17 = vunpack.c.l.s8.bf16 %v561_v31 }
 0x247   : > { %3485 = vmatpush2.bf16.msra.mxu1 %v1288_v16  ;;  %3511 = vmatprep.subr.bf16.mxu0 %v1345_v35  ;;  %v1441_v16 = vunpack.c.l.s8.bf16 %v529_v54  ;;  %v1440_v35 = vunpack.c.l.s8.bf16 %v528_v4 }
 0x248   : > { %3486 = vmatprep.subr.bf16.mxu1 %v1281_v29  ;;  %v553_v29 = vld [vmem:[%s7444_s9 + $0x458] sm:$0xff] }
 0x24a   : > { %3512 = vmatpush1.bf16.msra.mxu0 %v1344_v49  ;;  %v520_v49 = vld [vmem:[%s7444_s9 + $0x350] sm:$0xff] }
 0x24b   : > { %3487 = vmatpush2.bf16.msra.mxu1 %v1280_v36  ;;  %3513 = vmatprep.subr.bf16.mxu0 %v1465_v39  ;;  %v1497_v36 = vunpack.c.h.s8.bf16 %v553_v29  ;;  %v552_v39 = vld [vmem:[%s7444_s9 + $0x450] sm:$0xff] }
 0x24c   : > { %3538 = vmatprep.subr.bf16.mxu1 %v1529_v41  ;;  %v1432_v41 = vunpack.c.h.s8.bf16 %v520_v49  ;;  %v1496_v55 = vunpack.c.h.s8.bf16 %v552_v39  ;;  %v1488_v54 = vunpack.c.l.s8.bf16 %v552_v39 }
 0x24d   : > { %v3203_v57 = vpop.f32.mrf.mxu0 }
 0x24e   : > { %v3244_v58 = vpop.f32.mrf.mxu1  ;;  %3489 = vmatmul.mubr.bf16.vlgmr.msra.gmra.mxu1 %v7524_v47  ;;  %v3204_v59 = vadd.f32 %v3203_v57, %v7837_v10  ;;  %3514 = vmatpush2.bf16.msra.mxu0 %v1464_v44  ;;  %v1489_v44 = vunpack.c.l.s8.bf16 %v553_v29 }
 0x24f   : > { %3539 = vmatpush1.bf16.msra.mxu1 %v1528_v45  ;;  %v3205_v2 = vpop.f32.mrf.mxu0  ;;  %3515 = vmatprep.subr.bf16.mxu0 %v1457_v46  ;;  %v513_v45 = vld [vmem:[%s7444_s9 + $0x318] sm:$0xff] }
 0x250   : > { %v3246_v63 = vpop.f32.mrf.mxu1  ;;  %3540 = vmatprep.subr.bf16.mxu1 %v1521_v51  ;;  %v7880_v6 = vadd.f32 %v3244_v58, %v3204_v59  ;;  %v3206_v7 = vadd.f32 %v3205_v2, %v7842_v14  ;;  %3570 = vmatprep.mubr.bf16.mxu1 %v7540_v32  ;;  %v521_v14 = vld [vmem:[%s7444_s9 + $0x358] sm:$0xff]  ;;  %v1424_v51 = vunpack.c.l.s8.bf16 %v520_v49  ;;  %v1417_v31 = vunpack.c.h.s8.bf16 %v513_v45  ;;  %v512_v58 = vld [vmem:[%s7444_s9 + $0x310] sm:$0xff] }
 0x251   : > { %v3207_v10 = vpop.f32.mrf.mxu0  ;;  %v1433_v33 = vunpack.c.h.s8.bf16 %v521_v14  ;;  %v1425_v42 = vunpack.c.l.s8.bf16 %v521_v14  ;;  %v545_v46 = vld [vmem:[%s7444_s9 + $0x418] sm:$0xff]  ;;  %v544_v59 = vld [vmem:[%s7444_s9 + $0x410] sm:$0xff]  ;;  %v1409_v2 = vunpack.c.l.s8.bf16 %v513_v45  ;;  %v1408_v4 = vunpack.c.l.s8.bf16 %v512_v58 }
 0x252   : > { %v3248_v8 = vpop.f32.mrf.mxu1  ;;  %v7884_v9 = vadd.f32 %v3246_v63, %v3206_v7  ;;  %3516 = vmatpush2.bf16.msra.mxu0 %v1456_v60  ;;  %v1481_v57 = vunpack.c.h.s8.bf16 %v545_v46  ;;  %v1416_v60 = vunpack.c.h.s8.bf16 %v512_v58  ;;  %v1473_v63 = vunpack.c.l.s8.bf16 %v545_v46  ;;  %v625_v14 = vld [vmem:[%s7444_s9 + $0x698] sm:$0xff]  ;;  %v624_v49 = vld [vmem:[%s7444_s9 + $0x690] sm:$0xff] }
 0x253   : > { %3541 = vmatpush1.bf16.msra.mxu1 %v1520_v1  ;;  %v3208_v13 = vpop.f32.mrf.mxu0  ;;  %3517 = vmatprep.subr.bf16.mxu0 %v1449_v0  ;;  %v1480_v1 = vunpack.c.h.s8.bf16 %v544_v59  ;;  %v601_v0 = vld [vmem:[%s7444_s9 + $0x5d8] sm:$0xff]  ;;  %v1472_v5 = vunpack.c.l.s8.bf16 %v544_v59  ;;  %v600_v8 = vld [vmem:[%s7444_s9 + $0x5d0] sm:$0xff] }
 0x254   : > { %v3249_v15 = vpop.f32.mrf.mxu1  ;;  %3542 = vmatprep.subr.bf16.mxu1 %v1513_v3  ;;  %v633_v3 = vld [vmem:[%s7444_s9 + $0x6d8] sm:$0xff]  ;;  %v1593_v7 = vunpack.c.h.s8.bf16 %v601_v0  ;;  %v1584_v29 = vunpack.c.l.s8.bf16 %v600_v8  ;;  %v616_v58 = vld [vmem:[%s7444_s9 + $0x650] sm:$0xff] }
 0x255   : > { %v1657_v10 = vunpack.c.h.s8.bf16 %v633_v3  ;;  %v1585_v15 = vunpack.c.l.s8.bf16 %v601_v0  ;;  %v617_v45 = vld [vmem:[%s7444_s9 + $0x658] sm:$0xff] }
 0x256   : > { %3518 = vmatpush2.bf16.msra.mxu0 %v1448_v11  ;;  %v632_v11 = vld [vmem:[%s7444_s9 + $0x6d0] sm:$0xff]  ;;  %v609_v0 = vld [vmem:[%s7444_s9 + $0x618] sm:$0xff] }
 0x257   : > { %3543 = vmatpush1.bf16.msra.mxu1 %v1512_v18  ;;  %3519 = vmatprep.subr.bf16.mxu0 %v1441_v16  ;;  %v1592_v18 = vunpack.c.h.s8.bf16 %v600_v8  ;;  %v1656_v13 = vunpack.c.h.s8.bf16 %v632_v11  ;;  %v1649_v16 = vunpack.c.l.s8.bf16 %v633_v3  ;;  %v608_v8 = vld [vmem:[%s7444_s9 + $0x610] sm:$0xff] }
 0x258   : > { %3544 = vmatprep.subr.bf16.mxu1 %v1505_v17  ;;  %v593_v17 = vld [vmem:[%s7444_s9 + $0x598] sm:$0xff] }
 0x25a   : > { %3520 = vmatpush2.bf16.msra.mxu0 %v1440_v35  ;;  %v1648_v35 = vunpack.c.l.s8.bf16 %v632_v11 }
 0x25b   : > { %3545 = vmatpush1.bf16.msra.mxu1 %v1504_v43  ;;  %3521 = vmatprep.subr.bf16.mxu0 %v1433_v33  ;;  %v1577_v43 = vunpack.c.h.s8.bf16 %v593_v17  ;;  %v1641_v33 = vunpack.c.h.s8.bf16 %v625_v14 }
 0x25c   : > { %3546 = vmatprep.subr.bf16.mxu1 %v1497_v36  ;;  %v592_v36 = vld [vmem:[%s7444_s9 + $0x590] sm:$0xff] }
 0x25d   : > { %v1576_v39 = vunpack.c.h.s8.bf16 %v592_v36  ;;  %v1568_v46 = vunpack.c.l.s8.bf16 %v592_v36  ;;  %v696_v36 = vld [vmem:[%s7444_s9 + $0x8d0] sm:$0xff] }
 0x25e   : > { %3522 = vmatpush2.bf16.msra.mxu0 %v1432_v41  ;;  %v1640_v41 = vunpack.c.h.s8.bf16 %v624_v49 }
 0x25f   : > { %3547 = vmatpush1.bf16.msra.mxu1 %v1496_v55  ;;  %3523 = vmatprep.subr.bf16.mxu0 %v1425_v42  ;;  %v1569_v55 = vunpack.c.l.s8.bf16 %v593_v17  ;;  %v1633_v42 = vunpack.c.l.s8.bf16 %v625_v14  ;;  %v697_v17 = vld [vmem:[%s7444_s9 + $0x8d8] sm:$0xff] }
 0x260   : > { %3548 = vmatprep.subr.bf16.mxu1 %v1489_v44  ;;  %v585_v44 = vld [vmem:[%s7444_s9 + $0x558] sm:$0xff] }
 0x262   : > { %3524 = vmatpush2.bf16.msra.mxu0 %v1424_v51  ;;  %v1632_v51 = vunpack.c.l.s8.bf16 %v624_v49 }
 0x263   : > { %3549 = vmatpush1.bf16.msra.mxu1 %v1488_v54  ;;  %3525 = vmatprep.subr.bf16.mxu0 %v1417_v31  ;;  %v1561_v54 = vunpack.c.h.s8.bf16 %v585_v44  ;;  %v1625_v31 = vunpack.c.h.s8.bf16 %v617_v45 }
 0x264   : > { %3550 = vmatprep.subr.bf16.mxu1 %v1481_v57  ;;  %v584_v57 = vld [vmem:[%s7444_s9 + $0x550] sm:$0xff] }
 0x265   : > { %v1560_v59 = vunpack.c.h.s8.bf16 %v584_v57  ;;  %v1552_v3 = vunpack.c.l.s8.bf16 %v584_v57 }
 0x266   : > { %3526 = vmatpush2.bf16.msra.mxu0 %v1416_v60  ;;  %v1624_v60 = vunpack.c.h.s8.bf16 %v616_v58 }
 0x267   : > { %3551 = vmatpush1.bf16.msra.mxu1 %v1480_v1  ;;  %3527 = vmatprep.subr.bf16.mxu0 %v1409_v2  ;;  %v1553_v1 = vunpack.c.l.s8.bf16 %v585_v44  ;;  %v1617_v2 = vunpack.c.l.s8.bf16 %v617_v45  ;;  %v689_v44 = vld [vmem:[%s7444_s9 + $0x898] sm:$0xff] }
 0x268   : > { %3552 = vmatprep.subr.bf16.mxu1 %v1473_v63  ;;  %v577_v63 = vld [vmem:[%s7444_s9 + $0x518] sm:$0xff] }
 0x26a   : > { %3528 = vmatpush2.bf16.msra.mxu0 %v1408_v4  ;;  %v1616_v4 = vunpack.c.l.s8.bf16 %v616_v58 }
 0x26b   : > { %3553 = vmatpush1.bf16.msra.mxu1 %v1472_v5  ;;  %3579 = vmatprep.subr.bf16.mxu0 %v1657_v10  ;;  %v1545_v5 = vunpack.c.h.s8.bf16 %v577_v63  ;;  %v576_v10 = vld [vmem:[%s7444_s9 + $0x510] sm:$0xff] }
 0x26c   : > { %3554 = vmatprep.subr.bf16.mxu1 %v1593_v7  ;;  %v1609_v7 = vunpack.c.h.s8.bf16 %v609_v0  ;;  %v1544_v11 = vunpack.c.h.s8.bf16 %v576_v10  ;;  %v1536_v14 = vunpack.c.l.s8.bf16 %v576_v10 }
 0x26d   : > { %3530 = vmatmul.mubr.bf16.vlgmr.msra.gmra.mxu0 %v7528_v48 }
 0x26e   : > { %3580 = vmatpush1.bf16.msra.mxu0 %v1656_v13  ;;  %3611 = vmatprep.mubr.bf16.mxu0 %v7544_v56  ;;  %v1537_v13 = vunpack.c.l.s8.bf16 %v577_v63 }
 0x26f   : > { %3555 = vmatpush2.bf16.msra.mxu1 %v1592_v18  ;;  %3581 = vmatprep.subr.bf16.mxu0 %v1649_v16  ;;  %v1608_v18 = vunpack.c.h.s8.bf16 %v608_v8  ;;  %v665_v16 = vld [vmem:[%s7444_s9 + $0x7d8] sm:$0xff] }
 0x270   : > { %3556 = vmatprep.subr.bf16.mxu1 %v1585_v15  ;;  %v1601_v15 = vunpack.c.l.s8.bf16 %v609_v0 }
 0x272   : > { %3582 = vmatpush1.bf16.msra.mxu0 %v1648_v35  ;;  %v1721_v35 = vunpack.c.h.s8.bf16 %v665_v16 }
 0x273   : > { %3557 = vmatpush2.bf16.msra.mxu1 %v1584_v29  ;;  %3583 = vmatprep.subr.bf16.mxu0 %v1641_v33  ;;  %v1600_v29 = vunpack.c.l.s8.bf16 %v608_v8  ;;  %v664_v33 = vld [vmem:[%s7444_s9 + $0x7d0] sm:$0xff] }
 0x274   : > { %3558 = vmatprep.subr.bf16.mxu1 %v1577_v43  ;;  %v1785_v43 = vunpack.c.h.s8.bf16 %v697_v17  ;;  %v1720_v49 = vunpack.c.h.s8.bf16 %v664_v33 }
 0x276   : > { %3584 = vmatpush1.bf16.msra.mxu0 %v1640_v41  ;;  %v1713_v41 = vunpack.c.l.s8.bf16 %v665_v16 }
 0x277   : > { %3559 = vmatpush2.bf16.msra.mxu1 %v1576_v39  ;;  %3585 = vmatprep.subr.bf16.mxu0 %v1633_v42  ;;  %v1784_v39 = vunpack.c.h.s8.bf16 %v696_v36  ;;  %v657_v42 = vld [vmem:[%s7444_s9 + $0x798] sm:$0xff] }
 0x278   : > { %3560 = vmatprep.subr.bf16.mxu1 %v1569_v55  ;;  %v1777_v55 = vunpack.c.l.s8.bf16 %v697_v17 }
 0x27a   : > { %3586 = vmatpush1.bf16.msra.mxu0 %v1632_v51 }
 0x27b   : > { %3561 = vmatpush2.bf16.msra.mxu1 %v1568_v46  ;;  %3587 = vmatprep.subr.bf16.mxu0 %v1625_v31  ;;  %v1776_v31 = vunpack.c.l.s8.bf16 %v696_v36 }
 0x27c   : > { %3562 = vmatprep.subr.bf16.mxu1 %v1561_v54  ;;  %v1712_v54 = vunpack.c.l.s8.bf16 %v664_v33 }
 0x27e   : > { %3588 = vmatpush1.bf16.msra.mxu0 %v1624_v60  ;;  %v1769_v60 = vunpack.c.h.s8.bf16 %v689_v44 }
 0x27f   : > { %3563 = vmatpush2.bf16.msra.mxu1 %v1560_v59  ;;  %3589 = vmatprep.subr.bf16.mxu0 %v1617_v2  ;;  %v1705_v59 = vunpack.c.h.s8.bf16 %v657_v42  ;;  %v688_v2 = vld [vmem:[%s7444_s9 + $0x890] sm:$0xff] }
 0x280   : > { %3564 = vmatprep.subr.bf16.mxu1 %v1553_v1  ;;  %v656_v1 = vld [vmem:[%s7444_s9 + $0x790] sm:$0xff]  ;;  %v1760_v16 = vunpack.c.l.s8.bf16 %v688_v2 }
 0x282   : > { %3590 = vmatpush1.bf16.msra.mxu0 %v1616_v4 }
 0x283   : > { %3565 = vmatpush2.bf16.msra.mxu1 %v1552_v3  ;;  %3591 = vmatprep.subr.bf16.mxu0 %v1609_v7  ;;  %v1768_v7 = vunpack.c.h.s8.bf16 %v688_v2 }
 0x284   : > { %3566 = vmatprep.subr.bf16.mxu1 %v1545_v5  ;;  %v1704_v5 = vunpack.c.h.s8.bf16 %v656_v1 }
 0x286   : > { %3592 = vmatpush1.bf16.msra.mxu0 %v1608_v18  ;;  %v1761_v18 = vunpack.c.l.s8.bf16 %v689_v44 }
 0x287   : > { %3567 = vmatpush2.bf16.msra.mxu1 %v1544_v11  ;;  %3593 = vmatprep.subr.bf16.mxu0 %v1601_v15  ;;  %v1697_v11 = vunpack.c.l.s8.bf16 %v657_v42  ;;  %v1696_v15 = vunpack.c.l.s8.bf16 %v656_v1 }
 0x288   : > { %3568 = vmatprep.subr.bf16.mxu1 %v1537_v13  ;;  %v681_v13 = vld [vmem:[%s7444_s9 + $0x858] sm:$0xff] }
 0x28a   : > { %3594 = vmatpush1.bf16.msra.mxu0 %v1600_v29  ;;  %v648_v29 = vld [vmem:[%s7444_s9 + $0x750] sm:$0xff] }
 0x28b   : > { %3569 = vmatpush2.bf16.msra.mxu1 %v1536_v14  ;;  %3595 = vmatprep.subr.bf16.mxu0 %v1721_v35  ;;  %v1753_v14 = vunpack.c.h.s8.bf16 %v681_v13  ;;  %v680_v35 = vld [vmem:[%s7444_s9 + $0x850] sm:$0xff] }
 0x28c   : > { %3620 = vmatprep.subr.bf16.mxu1 %v1785_v43  ;;  %v1688_v43 = vunpack.c.h.s8.bf16 %v648_v29  ;;  %v1752_v33 = vunpack.c.h.s8.bf16 %v680_v35  ;;  %v1744_v42 = vunpack.c.l.s8.bf16 %v680_v35 }
 0x28d   : > { %v3285_v45 = vpop.f32.mrf.mxu0 }
 0x28e   : > { %v3326_v46 = vpop.f32.mrf.mxu1  ;;  %3571 = vmatmul.mubr.bf16.vlgmr.msra.gmra.mxu1 %v7582_v27  ;;  %v3286_v51 = vadd.f32 %v3285_v45, %v7880_v6  ;;  %3596 = vmatpush2.bf16.msra.mxu0 %v1720_v49  ;;  %v1745_v49 = vunpack.c.l.s8.bf16 %v681_v13 }
 0x28f   : > { %3621 = vmatpush1.bf16.msra.mxu1 %v1784_v39  ;;  %v3287_v57 = vpop.f32.mrf.mxu0  ;;  %3597 = vmatprep.subr.bf16.mxu0 %v1713_v41  ;;  %v641_v39 = vld [vmem:[%s7444_s9 + $0x718] sm:$0xff] }
 0x290   : > { %v3328_v58 = vpop.f32.mrf.mxu1  ;;  %3622 = vmatprep.subr.bf16.mxu1 %v1777_v55  ;;  %v7922_v63 = vadd.f32 %v3326_v46, %v3286_v51  ;;  %v3288_v0 = vadd.f32 %v3287_v57, %v7884_v9  ;;  %3652 = vmatprep.mubr.bf16.mxu1 %v7598_v50  ;;  %v649_v9 = vld [vmem:[%s7444_s9 + $0x758] sm:$0xff]  ;;  %v1680_v55 = vunpack.c.l.s8.bf16 %v648_v29  ;;  %v1673_v44 = vunpack.c.h.s8.bf16 %v641_v39  ;;  %v640_v46 = vld [vmem:[%s7444_s9 + $0x710] sm:$0xff] }
 0x291   : > { %v3289_v6 = vpop.f32.mrf.mxu0  ;;  %v1689_v17 = vunpack.c.h.s8.bf16 %v649_v9  ;;  %v1681_v36 = vunpack.c.l.s8.bf16 %v649_v9  ;;  %v673_v41 = vld [vmem:[%s7444_s9 + $0x818] sm:$0xff]  ;;  %v672_v51 = vld [vmem:[%s7444_s9 + $0x810] sm:$0xff]  ;;  %v1665_v57 = vunpack.c.l.s8.bf16 %v641_v39  ;;  %v1664_v1 = vunpack.c.l.s8.bf16 %v640_v46 }
 0x292   : > { %v3330_v3 = vpop.f32.mrf.mxu1  ;;  %v7926_v4 = vadd.f32 %v3328_v58, %v3288_v0  ;;  %3598 = vmatpush2.bf16.msra.mxu0 %v1712_v54  ;;  %v1737_v45 = vunpack.c.h.s8.bf16 %v673_v41  ;;  %v1672_v54 = vunpack.c.h.s8.bf16 %v640_v46  ;;  %v1729_v58 = vunpack.c.l.s8.bf16 %v673_v41  ;;  %v753_v9 = vld [vmem:[%s7444_s9 + $0xa98] sm:$0xff]  ;;  %v752_v29 = vld [vmem:[%s7444_s9 + $0xa90] sm:$0xff] }
 0x293   : > { %3623 = vmatpush1.bf16.msra.mxu1 %v1776_v31  ;;  %v3290_v10 = vpop.f32.mrf.mxu0  ;;  %3599 = vmatprep.subr.bf16.mxu0 %v1705_v59  ;;  %v1736_v31 = vunpack.c.h.s8.bf16 %v672_v51  ;;  %v729_v59 = vld [vmem:[%s7444_s9 + $0x9d8] sm:$0xff]  ;;  %v1728_v2 = vunpack.c.l.s8.bf16 %v672_v51  ;;  %v728_v3 = vld [vmem:[%s7444_s9 + $0x9d0] sm:$0xff] }
 0x294   : > { %v3331_v8 = vpop.f32.mrf.mxu1  ;;  %3624 = vmatprep.subr.bf16.mxu1 %v1769_v60  ;;  %v761_v60 = vld [vmem:[%s7444_s9 + $0xad8] sm:$0xff]  ;;  %v1849_v0 = vunpack.c.h.s8.bf16 %v729_v59  ;;  %v1840_v13 = vunpack.c.l.s8.bf16 %v728_v3  ;;  %v744_v46 = vld [vmem:[%s7444_s9 + $0xa50] sm:$0xff] }
 0x295   : > { %v1913_v6 = vunpack.c.h.s8.bf16 %v761_v60  ;;  %v1841_v8 = vunpack.c.l.s8.bf16 %v729_v59  ;;  %v745_v39 = vld [vmem:[%s7444_s9 + $0xa58] sm:$0xff] }
 0x296   : > { %3600 = vmatpush2.bf16.msra.mxu0 %v1704_v5  ;;  %v760_v5 = vld [vmem:[%s7444_s9 + $0xad0] sm:$0xff]  ;;  %v737_v59 = vld [vmem:[%s7444_s9 + $0xa18] sm:$0xff] }
 0x297   : > { %3625 = vmatpush1.bf16.msra.mxu1 %v1768_v7  ;;  %3601 = vmatprep.subr.bf16.mxu0 %v1697_v11  ;;  %v1848_v7 = vunpack.c.h.s8.bf16 %v728_v3  ;;  %v1912_v10 = vunpack.c.h.s8.bf16 %v760_v5  ;;  %v1905_v11 = vunpack.c.l.s8.bf16 %v761_v60  ;;  %v736_v3 = vld [vmem:[%s7444_s9 + $0xa10] sm:$0xff] }
 0x298   : > { %3626 = vmatprep.subr.bf16.mxu1 %v1761_v18  ;;  %v721_v18 = vld [vmem:[%s7444_s9 + $0x998] sm:$0xff] }
 0x29a   : > { %3602 = vmatpush2.bf16.msra.mxu0 %v1696_v15  ;;  %v1904_v15 = vunpack.c.l.s8.bf16 %v760_v5 }
 0x29b   : > { %3627 = vmatpush1.bf16.msra.mxu1 %v1760_v16  ;;  %3603 = vmatprep.subr.bf16.mxu0 %v1689_v17  ;;  %v1833_v16 = vunpack.c.h.s8.bf16 %v721_v18  ;;  %v1897_v17 = vunpack.c.h.s8.bf16 %v753_v9 }
 0x29c   : > { %3628 = vmatprep.subr.bf16.mxu1 %v1753_v14  ;;  %v720_v14 = vld [vmem:[%s7444_s9 + $0x990] sm:$0xff] }
 0x29d   : > { %v1832_v35 = vunpack.c.h.s8.bf16 %v720_v14  ;;  %v1824_v41 = vunpack.c.l.s8.bf16 %v720_v14  ;;  %v824_v14 = vld [vmem:[%s7444_s9 + $0xcd0] sm:$0xff] }
 0x29e   : > { %3604 = vmatpush2.bf16.msra.mxu0 %v1688_v43  ;;  %v1896_v43 = vunpack.c.h.s8.bf16 %v752_v29 }
 0x29f   : > { %3629 = vmatpush1.bf16.msra.mxu1 %v1752_v33  ;;  %3605 = vmatprep.subr.bf16.mxu0 %v1681_v36  ;;  %v1825_v33 = vunpack.c.l.s8.bf16 %v721_v18  ;;  %v1889_v36 = vunpack.c.l.s8.bf16 %v753_v9  ;;  %v825_v18 = vld [vmem:[%s7444_s9 + $0xcd8] sm:$0xff] }
 0x2a0   : > { %3630 = vmatprep.subr.bf16.mxu1 %v1745_v49  ;;  %v713_v49 = vld [vmem:[%s7444_s9 + $0x958] sm:$0xff] }
 0x2a2   : > { %3606 = vmatpush2.bf16.msra.mxu0 %v1680_v55  ;;  %v1888_v55 = vunpack.c.l.s8.bf16 %v752_v29 }
 0x2a3   : > { %3631 = vmatpush1.bf16.msra.mxu1 %v1744_v42  ;;  %3607 = vmatprep.subr.bf16.mxu0 %v1673_v44  ;;  %v1817_v42 = vunpack.c.h.s8.bf16 %v713_v49  ;;  %v1881_v44 = vunpack.c.h.s8.bf16 %v745_v39 }
 0x2a4   : > { %3632 = vmatprep.subr.bf16.mxu1 %v1737_v45  ;;  %v712_v45 = vld [vmem:[%s7444_s9 + $0x950] sm:$0xff] }
 0x2a5   : > { %v1816_v51 = vunpack.c.h.s8.bf16 %v712_v45  ;;  %v1808_v60 = vunpack.c.l.s8.bf16 %v712_v45 }
 0x2a6   : > { %3608 = vmatpush2.bf16.msra.mxu0 %v1672_v54  ;;  %v1880_v54 = vunpack.c.h.s8.bf16 %v744_v46 }
 0x2a7   : > { %3633 = vmatpush1.bf16.msra.mxu1 %v1736_v31  ;;  %3609 = vmatprep.subr.bf16.mxu0 %v1665_v57  ;;  %v1809_v31 = vunpack.c.l.s8.bf16 %v713_v49  ;;  %v1873_v57 = vunpack.c.l.s8.bf16 %v745_v39  ;;  %v817_v49 = vld [vmem:[%s7444_s9 + $0xc98] sm:$0xff] }
 0x2a8   : > { %3634 = vmatprep.subr.bf16.mxu1 %v1729_v58  ;;  %v705_v58 = vld [vmem:[%s7444_s9 + $0x918] sm:$0xff] }
 0x2aa   : > { %3610 = vmatpush2.bf16.msra.mxu0 %v1664_v1  ;;  %v1872_v1 = vunpack.c.l.s8.bf16 %v744_v46 }
 0x2ab   : > { %3635 = vmatpush1.bf16.msra.mxu1 %v1728_v2  ;;  %3661 = vmatprep.subr.bf16.mxu0 %v1913_v6  ;;  %v1801_v2 = vunpack.c.h.s8.bf16 %v705_v58  ;;  %v704_v6 = vld [vmem:[%s7444_s9 + $0x910] sm:$0xff] }
 0x2ac   : > { %3636 = vmatprep.subr.bf16.mxu1 %v1849_v0  ;;  %v1865_v0 = vunpack.c.h.s8.bf16 %v737_v59  ;;  %v1800_v5 = vunpack.c.h.s8.bf16 %v704_v6  ;;  %v1792_v9 = vunpack.c.l.s8.bf16 %v704_v6  ;;  %v2017_v6 = vunpack.c.l.s8.bf16 %v817_v49 }
 0x2ad   : > { %3612 = vmatmul.mubr.bf16.vlgmr.msra.gmra.mxu0 %v7586_v28 }
 0x2ae   : > { %3662 = vmatpush1.bf16.msra.mxu0 %v1912_v10  ;;  %3693 = vmatprep.mubr.bf16.mxu0 %v7602_v40  ;;  %v1793_v10 = vunpack.c.l.s8.bf16 %v705_v58 }
 0x2af   : > { %3637 = vmatpush2.bf16.msra.mxu1 %v1848_v7  ;;  %3663 = vmatprep.subr.bf16.mxu0 %v1905_v11  ;;  %v1864_v7 = vunpack.c.h.s8.bf16 %v736_v3  ;;  %v793_v11 = vld [vmem:[%s7444_s9 + $0xbd8] sm:$0xff] }
 0x2b0   : > { %3638 = vmatprep.subr.bf16.mxu1 %v1841_v8  ;;  %v1857_v8 = vunpack.c.l.s8.bf16 %v737_v59 }
 0x2b2   : > { %3664 = vmatpush1.bf16.msra.mxu0 %v1904_v15  ;;  %v1977_v15 = vunpack.c.h.s8.bf16 %v793_v11 }
 0x2b3   : > { %3639 = vmatpush2.bf16.msra.mxu1 %v1840_v13  ;;  %3665 = vmatprep.subr.bf16.mxu0 %v1897_v17  ;;  %v1856_v13 = vunpack.c.l.s8.bf16 %v736_v3  ;;  %v792_v17 = vld [vmem:[%s7444_s9 + $0xbd0] sm:$0xff]  ;;  %v777_v3 = vld [vmem:[%s7444_s9 + $0xb58] sm:$0xff] }
 0x2b4   : > { %3640 = vmatprep.subr.bf16.mxu1 %v1833_v16  ;;  %v2041_v16 = vunpack.c.h.s8.bf16 %v825_v18  ;;  %v1976_v29 = vunpack.c.h.s8.bf16 %v792_v17 }
 0x2b6   : > { %3666 = vmatpush1.bf16.msra.mxu0 %v1896_v43  ;;  %v1969_v43 = vunpack.c.l.s8.bf16 %v793_v11 }
 0x2b7   : > { %3641 = vmatpush2.bf16.msra.mxu1 %v1832_v35  ;;  %3667 = vmatprep.subr.bf16.mxu0 %v1889_v36  ;;  %v2040_v35 = vunpack.c.h.s8.bf16 %v824_v14  ;;  %v785_v36 = vld [vmem:[%s7444_s9 + $0xb98] sm:$0xff] }
 0x2b8   : > { %3642 = vmatprep.subr.bf16.mxu1 %v1825_v33  ;;  %v2033_v33 = vunpack.c.l.s8.bf16 %v825_v18  ;;  %v1961_v46 = vunpack.c.h.s8.bf16 %v785_v36  ;;  %v776_v18 = vld [vmem:[%s7444_s9 + $0xb50] sm:$0xff] }
 0x2ba   : > { %3668 = vmatpush1.bf16.msra.mxu0 %v1888_v55  ;;  %v1968_v55 = vunpack.c.l.s8.bf16 %v792_v17 }
 0x2bb   : > { %3643 = vmatpush2.bf16.msra.mxu1 %v1824_v41  ;;  %3669 = vmatprep.subr.bf16.mxu0 %v1881_v44 }
 0x2bc   : > { %3644 = vmatprep.subr.bf16.mxu1 %v1817_v42  ;;  %v2032_v42 = vunpack.c.l.s8.bf16 %v824_v14  ;;  %v769_v14 = vld [vmem:[%s7444_s9 + $0xb18] sm:$0xff] }
 0x2be   : > { %3670 = vmatpush1.bf16.msra.mxu0 %v1880_v54  ;;  %v784_v54 = vld [vmem:[%s7444_s9 + $0xb90] sm:$0xff] }
 0x2bf   : > { %3645 = vmatpush2.bf16.msra.mxu1 %v1816_v51  ;;  %3671 = vmatprep.subr.bf16.mxu0 %v1873_v57  ;;  %v2025_v51 = vunpack.c.h.s8.bf16 %v817_v49  ;;  %v1960_v59 = vunpack.c.h.s8.bf16 %v784_v54  ;;  %v768_v49 = vld [vmem:[%s7444_s9 + $0xb10] sm:$0xff] }
 0x2c0   : > { %3646 = vmatprep.subr.bf16.mxu1 %v1809_v31  ;;  %v816_v31 = vld [vmem:[%s7444_s9 + $0xc90] sm:$0xff] }
 0x2c2   : > { %3672 = vmatpush1.bf16.msra.mxu0 %v1872_v1 }
 0x2c3   : > { %3647 = vmatpush2.bf16.msra.mxu1 %v1808_v60  ;;  %3673 = vmatprep.subr.bf16.mxu0 %v1865_v0  ;;  %v2024_v60 = vunpack.c.h.s8.bf16 %v816_v31  ;;  %v1953_v0 = vunpack.c.l.s8.bf16 %v785_v36 }
 0x2c4   : > { %3648 = vmatprep.subr.bf16.mxu1 %v1801_v2 }
 0x2c6   : > { %3674 = vmatpush1.bf16.msra.mxu0 %v1864_v7  ;;  %v1952_v7 = vunpack.c.l.s8.bf16 %v784_v54 }
 0x2c7   : > { %3649 = vmatpush2.bf16.msra.mxu1 %v1800_v5  ;;  %3675 = vmatprep.subr.bf16.mxu0 %v1857_v8  ;;  %v809_v5 = vld [vmem:[%s7444_s9 + $0xc58] sm:$0xff]  ;;  %v1945_v8 = vunpack.c.h.s8.bf16 %v777_v3 }
 0x2c8   : > { %3650 = vmatprep.subr.bf16.mxu1 %v1793_v10  ;;  %v2016_v10 = vunpack.c.l.s8.bf16 %v816_v31  ;;  %v2009_v11 = vunpack.c.h.s8.bf16 %v809_v5  ;;  %v2001_v17 = vunpack.c.l.s8.bf16 %v809_v5  ;;  %v857_v31 = vld [vmem:[%s7444_s9 + $0xdd8] sm:$0xff] }
 0x2ca   : > { %3676 = vmatpush1.bf16.msra.mxu0 %v1856_v13  ;;  %v1944_v13 = vunpack.c.h.s8.bf16 %v776_v18 }
 0x2cb   : > { %3651 = vmatpush2.bf16.msra.mxu1 %v1792_v9  ;;  %3677 = vmatprep.subr.bf16.mxu0 %v1977_v15  ;;  %v808_v9 = vld [vmem:[%s7444_s9 + $0xc50] sm:$0xff] }
 0x2cc   : > { %3702 = vmatprep.subr.bf16.mxu1 %v2041_v16  ;;  %v2008_v15 = vunpack.c.h.s8.bf16 %v808_v9  ;;  %v1937_v16 = vunpack.c.l.s8.bf16 %v777_v3 }
 0x2cd   : > { %v7960_v39 = vpop.f32.mrf.mxu0 }
 0x2ce   : > { %v7962_v41 = vpop.f32.mrf.mxu1  ;;  %3653 = vmatmul.mubr.bf16.vlgmr.msra.gmra.mxu1 %v7640_v19  ;;  %3678 = vmatpush2.bf16.msra.mxu0 %v1976_v29  ;;  %v801_v29 = vld [vmem:[%s7444_s9 + $0xc18] sm:$0xff] }
 0x2cf   : > { %3703 = vmatpush1.bf16.msra.mxu1 %v2040_v35  ;;  %v7965_v44 = vpop.f32.mrf.mxu0  ;;  %3679 = vmatprep.subr.bf16.mxu0 %v1969_v43  ;;  %v1936_v35 = vunpack.c.l.s8.bf16 %v776_v18  ;;  %v2000_v43 = vunpack.c.l.s8.bf16 %v808_v9  ;;  %v1993_v36 = vunpack.c.h.s8.bf16 %v801_v29  ;;  %v1985_v54 = vunpack.c.l.s8.bf16 %v801_v29  ;;  %v849_v18 = vld [vmem:[%s7444_s9 + $0xd98] sm:$0xff]  ;;  %v848_v29 = vld [vmem:[%s7444_s9 + $0xd90] sm:$0xff] }
 0x2d0   : > { %v7967_v45 = vpop.f32.mrf.mxu1  ;;  %3704 = vmatprep.subr.bf16.mxu1 %v2033_v33  ;;  %3734 = vmatprep.mubr.bf16.mxu1 %v7656_v30  ;;  %v1929_v33 = vunpack.c.h.s8.bf16 %v769_v14  ;;  %v3370_v3 = vadd.f32 %v7965_v44, %v7926_v4  ;;  %v881_v9 = vld [vmem:[%s7444_s9 + $0xe98] sm:$0xff] }
 0x2d1   : > { %v3371_v57 = vpop.f32.mrf.mxu0 }
 0x2d2   : > { %v3412_v58 = vpop.f32.mrf.mxu1  ;;  %3680 = vmatpush2.bf16.msra.mxu0 %v1968_v55  ;;  %v800_v55 = vld [vmem:[%s7444_s9 + $0xc10] sm:$0xff]  ;;  %v889_v57 = vld [vmem:[%s7444_s9 + $0xed8] sm:$0xff] }
 0x2d3   : > { %3705 = vmatpush1.bf16.msra.mxu1 %v2032_v42  ;;  %v3372_v1 = vpop.f32.mrf.mxu0  ;;  %3681 = vmatprep.subr.bf16.mxu0 %v1961_v46  ;;  %v1928_v42 = vunpack.c.h.s8.bf16 %v768_v49  ;;  %v1992_v46 = vunpack.c.h.s8.bf16 %v800_v55  ;;  %v1920_v58 = vunpack.c.l.s8.bf16 %v768_v49  ;;  %v2088_v49 = vunpack.c.h.s8.bf16 %v848_v29 }
 0x2d4   : > { %v3413_v2 = vpop.f32.mrf.mxu1  ;;  %3706 = vmatprep.subr.bf16.mxu1 %v2025_v51  ;;  %v1921_v51 = vunpack.c.l.s8.bf16 %v769_v14  ;;  %v2169_v1 = vunpack.c.h.s8.bf16 %v889_v57  ;;  %v2153_v14 = vunpack.c.h.s8.bf16 %v881_v9 }
 0x2d5   : > { %v856_v2 = vld [vmem:[%s7444_s9 + $0xdd0] sm:$0xff] }
 0x2d6   : > { %3682 = vmatpush2.bf16.msra.mxu0 %v1960_v59  ;;  %v1984_v59 = vunpack.c.l.s8.bf16 %v800_v55  ;;  %v2104_v5 = vunpack.c.h.s8.bf16 %v856_v2 }
 0x2d7   : > { %3707 = vmatpush1.bf16.msra.mxu1 %v2024_v60  ;;  %3683 = vmatprep.subr.bf16.mxu0 %v1953_v0  ;;  %v2105_v60 = vunpack.c.h.s8.bf16 %v857_v31  ;;  %v888_v0 = vld [vmem:[%s7444_s9 + $0xed0] sm:$0xff] }
 0x2d8   : > { %3708 = vmatprep.subr.bf16.mxu1 %v2017_v6  ;;  %v3368_v6 = vadd.f32 %v7960_v39, %v7922_v63  ;;  %v3411_v63 = vadd.f32 %v7967_v45, %v3370_v3  ;;  %v2096_v39 = vunpack.c.l.s8.bf16 %v856_v2  ;;  %v2160_v44 = vunpack.c.l.s8.bf16 %v888_v0  ;;  %v872_v2 = vld [vmem:[%s7444_s9 + $0xe50] sm:$0xff] }
 0x2da   : > { %3684 = vmatpush2.bf16.msra.mxu0 %v1952_v7  ;;  %v2168_v7 = vunpack.c.h.s8.bf16 %v888_v0 }
 0x2db   : > { %3709 = vmatpush1.bf16.msra.mxu1 %v2016_v10  ;;  %3685 = vmatprep.subr.bf16.mxu0 %v1945_v8  ;;  %v2097_v10 = vunpack.c.l.s8.bf16 %v857_v31  ;;  %v2161_v8 = vunpack.c.l.s8.bf16 %v889_v57  ;;  %v873_v31 = vld [vmem:[%s7444_s9 + $0xe58] sm:$0xff]  ;;  %v2080_v57 = vunpack.c.l.s8.bf16 %v848_v29 }
 0x2dc   : > { %3710 = vmatprep.subr.bf16.mxu1 %v2009_v11  ;;  %v3409_v11 = vadd.f32 %v7962_v41, %v3368_v6  ;;  %v2089_v41 = vunpack.c.h.s8.bf16 %v849_v18  ;;  %v2136_v6 = vunpack.c.h.s8.bf16 %v872_v2 }
 0x2de   : > { %3686 = vmatpush2.bf16.msra.mxu0 %v1944_v13  ;;  %v2814_v13 = vld [vmem:[#allocation2 + $0x30] sm:$0xff] }
 0x2df   : > { %3711 = vmatpush1.bf16.msra.mxu1 %v2008_v15  ;;  %3687 = vmatprep.subr.bf16.mxu0 %v1937_v16  ;;  %v2815_v16 = vld [vmem:[#allocation2] sm:$0xff] }
 0x2e0   : > { %3712 = vmatprep.subr.bf16.mxu1 %v2001_v17 }
 0x2e2   : > { %3688 = vmatpush2.bf16.msra.mxu0 %v1936_v35  ;;  %v880_v35 = vld [vmem:[%s7444_s9 + $0xe90] sm:$0xff] }
 0x2e3   : > { %3713 = vmatpush1.bf16.msra.mxu1 %v2000_v43  ;;  %3689 = vmatprep.subr.bf16.mxu0 %v1929_v33  ;;  %v2152_v55 = vunpack.c.h.s8.bf16 %v880_v35 }
 0x2e4   : > { %3714 = vmatprep.subr.bf16.mxu1 %v1993_v36 }
 0x2e6   : > { %3690 = vmatpush2.bf16.msra.mxu0 %v1928_v42 }
 0x2e7   : > { %3715 = vmatpush1.bf16.msra.mxu1 %v1992_v46  ;;  %3691 = vmatprep.subr.bf16.mxu0 %v1921_v51  ;;  %v2081_v46 = vunpack.c.l.s8.bf16 %v849_v18  ;;  %v2145_v51 = vunpack.c.l.s8.bf16 %v881_v9 }
 0x2e8   : > { %3716 = vmatprep.subr.bf16.mxu1 %v1985_v54  ;;  %v841_v54 = vld [vmem:[%s7444_s9 + $0xd58] sm:$0xff] }
 0x2e9   : > { %v2065_v3 = vunpack.c.l.s8.bf16 %v841_v54 }
 0x2ea   : > { %3692 = vmatpush2.bf16.msra.mxu0 %v1920_v58  ;;  %v2144_v58 = vunpack.c.l.s8.bf16 %v880_v35 }
 0x2eb   : > { %3717 = vmatpush1.bf16.msra.mxu1 %v1984_v59  ;;  %3743 = vmatprep.subr.bf16.mxu0 %v2169_v1  ;;  %v2073_v59 = vunpack.c.h.s8.bf16 %v841_v54  ;;  %v840_v1 = vld [vmem:[%s7444_s9 + $0xd50] sm:$0xff] }
 0x2ec   : > { %3718 = vmatprep.subr.bf16.mxu1 %v2105_v60  ;;  %v2137_v60 = vunpack.c.h.s8.bf16 %v873_v31  ;;  %v2072_v0 = vunpack.c.h.s8.bf16 %v840_v1 }
 0x2ed   : > { %v3449_v15 = vpop.f32.mrf.mxu0  ;;  %3694 = vmatmul.mubr.bf16.vlgmr.msra.gmra.mxu0 %v7644_v20 }
 0x2ee   : > { %v3450_v4 = vadd.f32 %v3449_v15, %v3409_v11  ;;  %3744 = vmatpush1.bf16.msra.mxu0 %v2168_v7  ;;  %3775 = vmatprep.mubr.bf16.mxu0 %v7660_v34  ;;  %v833_v7 = vld [vmem:[%s7444_s9 + $0xd18] sm:$0xff]  ;;  %v2128_v11 = vunpack.c.l.s8.bf16 %v872_v2  ;;  %v864_v15 = vld [vmem:[%s7444_s9 + $0xe10] sm:$0xff] }
 0x2ef   : > { %3719 = vmatpush2.bf16.msra.mxu1 %v2104_v5  ;;  %v3451_v17 = vpop.f32.mrf.mxu0  ;;  %3745 = vmatprep.subr.bf16.mxu0 %v2161_v8  ;;  %v2129_v5 = vunpack.c.l.s8.bf16 %v873_v31  ;;  %v2064_v8 = vunpack.c.l.s8.bf16 %v840_v1  ;;  %v2057_v18 = vunpack.c.h.s8.bf16 %v833_v7  ;;  %v944_v1 = vld [vmem:[%s7444_s9 + $0x1090] sm:$0xff] }
 0x2f0   : > { %3720 = vmatprep.subr.bf16.mxu1 %v2097_v10  ;;  %v5055_v43 = vadd.f32 %v3450_v4, %v2814_v13  ;;  %v3452_v33 = vadd.f32 %v3451_v17, %v3411_v63  ;;  %v865_v10 = vld [vmem:[%s7444_s9 + $0xe18] sm:$0xff]  ;;  %v832_v13 = vld [vmem:[%s7444_s9 + $0xd10] sm:$0xff]  ;;  %v2120_v4 = vunpack.c.h.s8.bf16 %v864_v15 }
 0x2f1   : > { %v3453_v45 = vpop.f32.mrf.mxu0  ;;  %v2121_v9 = vunpack.c.h.s8.bf16 %v865_v10  ;;  %v2056_v63 = vunpack.c.h.s8.bf16 %v832_v13  ;;  %v953_v17 = vld [vmem:[%s7444_s9 + $0x10d8] sm:$0xff] }
 0x2f2   : > { %5063 = vst [vmem:[#allocation2 + $0x30] sm:$0xff] %v5055_v43  ;;  %v5056_v36 = vadd.f32 %v3452_v33, %v2815_v16  ;;  %3746 = vmatpush1.bf16.msra.mxu0 %v2160_v44  ;;  %v2113_v44 = vunpack.c.l.s8.bf16 %v865_v10  ;;  %v921_v16 = vld [vmem:[%s7444_s9 + $0xfd8] sm:$0xff]  ;;  %v2297_v35 = vunpack.c.h.s8.bf16 %v953_v17  ;;  %v920_v43 = vld [vmem:[%s7444_s9 + $0xfd0] sm:$0xff] }
 0x2f3   : > { %3721 = vmatpush2.bf16.msra.mxu1 %v2096_v39  ;;  %v3454_v42 = vpop.f32.mrf.mxu0  ;;  %3747 = vmatprep.subr.bf16.mxu0 %v2153_v14  ;;  %v2049_v39 = vunpack.c.l.s8.bf16 %v833_v7  ;;  %v2112_v14 = vunpack.c.l.s8.bf16 %v864_v15  ;;  %v2233_v29 = vunpack.c.h.s8.bf16 %v921_v16  ;;  %v952_v33 = vld [vmem:[%s7444_s9 + $0x10d0] sm:$0xff]  ;;  %v2232_v45 = vunpack.c.h.s8.bf16 %v920_v43  ;;  %v905_v10 = vld [vmem:[%s7444_s9 + $0xf58] sm:$0xff] }
 0x2f4   : > { %3722 = vmatprep.subr.bf16.mxu1 %v2089_v41  ;;  %5064 = vst [vmem:[#allocation2] sm:$0xff] %v5056_v36  ;;  %v2048_v41 = vunpack.c.l.s8.bf16 %v832_v13  ;;  %v2296_v36 = vunpack.c.h.s8.bf16 %v952_v33  ;;  %v913_v42 = vld [vmem:[%s7444_s9 + $0xf98] sm:$0xff]  ;;  %v2224_v54 = vunpack.c.l.s8.bf16 %v920_v43  ;;  %v2288_v31 = vunpack.c.l.s8.bf16 %v952_v33  ;;  %v904_v15 = vld [vmem:[%s7444_s9 + $0xf50] sm:$0xff] }
 0x2f5   : > { %v896_v33 = vld [vmem:[%s7444_s9 + $0xf10] sm:$0xff] }
 0x2f6   : > { %3748 = vmatpush1.bf16.msra.mxu0 %v2152_v55  ;;  %v2289_v55 = vunpack.c.l.s8.bf16 %v953_v17  ;;  %v897_v17 = vld [vmem:[%s7444_s9 + $0xf18] sm:$0xff] }
 0x2f7   : > { %3723 = vmatpush2.bf16.msra.mxu1 %v2088_v49  ;;  %3749 = vmatprep.subr.bf16.mxu0 %v2145_v51  ;;  %v2225_v49 = vunpack.c.l.s8.bf16 %v921_v16 }
 0x2f8   : > { %3724 = vmatprep.subr.bf16.mxu1 %v2081_v46  ;;  %v945_v46 = vld [vmem:[%s7444_s9 + $0x1098] sm:$0xff] }
 0x2f9   : > { %v2273_v7 = vunpack.c.l.s8.bf16 %v945_v46 }
 0x2fa   : > { %3750 = vmatpush1.bf16.msra.mxu0 %v2144_v58  ;;  %v2217_v58 = vunpack.c.h.s8.bf16 %v913_v42 }
 0x2fb   : > { %3725 = vmatpush2.bf16.msra.mxu1 %v2080_v57  ;;  %3751 = vmatprep.subr.bf16.mxu0 %v2137_v60  ;;  %v912_v60 = vld [vmem:[%s7444_s9 + $0xf90] sm:$0xff] }
 0x2fc   : > { %3726 = vmatprep.subr.bf16.mxu1 %v2073_v59  ;;  %v2281_v59 = vunpack.c.h.s8.bf16 %v945_v46  ;;  %v985_v46 = vld [vmem:[%s7444_s9 + $0x11d8] sm:$0xff] }
 0x2fe   : > { %3752 = vmatpush1.bf16.msra.mxu0 %v2136_v6  ;;  %v2280_v6 = vunpack.c.h.s8.bf16 %v944_v1 }
 0x2ff   : > { %3727 = vmatpush2.bf16.msra.mxu1 %v2072_v0  ;;  %3753 = vmatprep.subr.bf16.mxu0 %v2129_v5  ;;  %v2216_v0 = vunpack.c.h.s8.bf16 %v912_v60  ;;  %v2209_v5 = vunpack.c.l.s8.bf16 %v913_v42 }
 0x300   : > { %3728 = vmatprep.subr.bf16.mxu1 %v2065_v3 }
 0x302   : > { %3754 = vmatpush1.bf16.msra.mxu0 %v2128_v11  ;;  %v2208_v11 = vunpack.c.l.s8.bf16 %v912_v60 }
 0x303   : > { %3729 = vmatpush2.bf16.msra.mxu1 %v2064_v8  ;;  %3755 = vmatprep.subr.bf16.mxu0 %v2121_v9  ;;  %v937_v8 = vld [vmem:[%s7444_s9 + $0x1058] sm:$0xff]  ;;  %v2201_v9 = vunpack.c.h.s8.bf16 %v905_v10 }
 0x304   : > { %3730 = vmatprep.subr.bf16.mxu1 %v2057_v18  ;;  %v2272_v18 = vunpack.c.l.s8.bf16 %v944_v1  ;;  %v2265_v13 = vunpack.c.h.s8.bf16 %v937_v8  ;;  %v2257_v16 = vunpack.c.l.s8.bf16 %v937_v8  ;;  %v984_v1 = vld [vmem:[%s7444_s9 + $0x11d0] sm:$0xff] }
 0x306   : > { %3756 = vmatpush1.bf16.msra.mxu0 %v2120_v4  ;;  %v2200_v4 = vunpack.c.h.s8.bf16 %v904_v15 }
 0x307   : > { %3731 = vmatpush2.bf16.msra.mxu1 %v2056_v63  ;;  %3757 = vmatprep.subr.bf16.mxu0 %v2113_v44  ;;  %v936_v63 = vld [vmem:[%s7444_s9 + $0x1050] sm:$0xff]  ;;  %v2193_v44 = vunpack.c.l.s8.bf16 %v905_v10  ;;  %v1009_v10 = vld [vmem:[%s7444_s9 + $0x1298] sm:$0xff] }
 0x308   : > { %3732 = vmatprep.subr.bf16.mxu1 %v2049_v39  ;;  %v2264_v39 = vunpack.c.h.s8.bf16 %v936_v63 }
 0x30a   : > { %3758 = vmatpush1.bf16.msra.mxu0 %v2112_v14  ;;  %v2192_v14 = vunpack.c.l.s8.bf16 %v904_v15 }
 0x30b   : > { %3733 = vmatpush2.bf16.msra.mxu1 %v2048_v41  ;;  %3759 = vmatprep.subr.bf16.mxu0 %v2233_v29  ;;  %v929_v41 = vld [vmem:[%s7444_s9 + $0x1018] sm:$0xff]  ;;  %v2256_v29 = vunpack.c.l.s8.bf16 %v936_v63  ;;  %v2409_v63 = vunpack.c.h.s8.bf16 %v1009_v10 }
 0x30c   : > { %3784 = vmatprep.subr.bf16.mxu1 %v2297_v35  ;;  %v2185_v35 = vunpack.c.h.s8.bf16 %v897_v17  ;;  %v2249_v43 = vunpack.c.h.s8.bf16 %v929_v41  ;;  %v2241_v42 = vunpack.c.l.s8.bf16 %v929_v41 }
 0x30e   : > { %v8010_v51 = vpop.f32.mrf.mxu1  ;;  %3735 = vmatmul.mubr.bf16.vlgmr.msra.gmra.mxu1 %v7698_v23  ;;  %3760 = vmatpush2.bf16.msra.mxu0 %v2232_v45  ;;  %v928_v45 = vld [vmem:[%s7444_s9 + $0x1010] sm:$0xff] }
 0x30f   : > { %3785 = vmatpush1.bf16.msra.mxu1 %v2296_v36  ;;  %3761 = vmatprep.subr.bf16.mxu0 %v2225_v49  ;;  %v2184_v36 = vunpack.c.h.s8.bf16 %v896_v33  ;;  %v2248_v49 = vunpack.c.h.s8.bf16 %v928_v45 }
 0x310   : > { %v8013_v57 = vpop.f32.mrf.mxu1  ;;  %3786 = vmatprep.subr.bf16.mxu1 %v2289_v55  ;;  %3816 = vmatprep.mubr.bf16.mxu1 %v7714_v21  ;;  %v2177_v55 = vunpack.c.l.s8.bf16 %v897_v17 }
 0x312   : > { %v3494_v2 = vpop.f32.mrf.mxu1  ;;  %3762 = vmatpush2.bf16.msra.mxu0 %v2224_v54  ;;  %v1017_v54 = vld [vmem:[%s7444_s9 + $0x12d8] sm:$0xff] }
 0x313   : > { %3787 = vmatpush1.bf16.msra.mxu1 %v2288_v31  ;;  %3763 = vmatprep.subr.bf16.mxu0 %v2217_v58  ;;  %v2176_v31 = vunpack.c.l.s8.bf16 %v896_v33  ;;  %v2240_v58 = vunpack.c.l.s8.bf16 %v928_v45  ;;  %v2425_v60 = vunpack.c.h.s8.bf16 %v1017_v54  ;;  %v1016_v2 = vld [vmem:[%s7444_s9 + $0x12d0] sm:$0xff] }
 0x314   : > { %v3495_v3 = vpop.f32.mrf.mxu1  ;;  %3788 = vmatprep.subr.bf16.mxu1 %v2281_v59  ;;  %v2361_v59 = vunpack.c.h.s8.bf16 %v985_v46 }
 0x315   : > { %v2353_v3 = vunpack.c.l.s8.bf16 %v985_v46 }
 0x316   : > { %3764 = vmatpush2.bf16.msra.mxu0 %v2216_v0  ;;  %v2360_v0 = vunpack.c.h.s8.bf16 %v984_v1 }
 0x317   : > { %3789 = vmatpush1.bf16.msra.mxu1 %v2280_v6  ;;  %3765 = vmatprep.subr.bf16.mxu0 %v2209_v5  ;;  %v2424_v6 = vunpack.c.h.s8.bf16 %v1016_v2  ;;  %v2417_v5 = vunpack.c.l.s8.bf16 %v1017_v54 }
 0x318   : > { %3790 = vmatprep.subr.bf16.mxu1 %v2273_v7  ;;  %v977_v7 = vld [vmem:[%s7444_s9 + $0x1198] sm:$0xff] }
 0x319   : > { %v2345_v15 = vunpack.c.h.s8.bf16 %v977_v7 }
 0x31a   : > { %3766 = vmatpush2.bf16.msra.mxu0 %v2208_v11 }
 0x31b   : > { %3791 = vmatpush1.bf16.msra.mxu1 %v2272_v18  ;;  %3767 = vmatprep.subr.bf16.mxu0 %v2201_v9  ;;  %v2352_v18 = vunpack.c.l.s8.bf16 %v984_v1  ;;  %v2416_v9 = vunpack.c.l.s8.bf16 %v1016_v2 }
 0x31c   : > { %3792 = vmatprep.subr.bf16.mxu1 %v2265_v13 }
 0x31e   : > { %3768 = vmatpush2.bf16.msra.mxu0 %v2200_v4  ;;  %v976_v4 = vld [vmem:[%s7444_s9 + $0x1190] sm:$0xff] }
 0x31f   : > { %3793 = vmatpush1.bf16.msra.mxu1 %v2264_v39  ;;  %3769 = vmatprep.subr.bf16.mxu0 %v2193_v44  ;;  %v1008_v39 = vld [vmem:[%s7444_s9 + $0x1290] sm:$0xff] }
 0x320   : > { %3794 = vmatprep.subr.bf16.mxu1 %v2257_v16  ;;  %v2344_v16 = vunpack.c.h.s8.bf16 %v976_v4  ;;  %v2408_v17 = vunpack.c.h.s8.bf16 %v1008_v39  ;;  %v2400_v33 = vunpack.c.l.s8.bf16 %v1008_v39  ;;  %v1048_v39 = vld [vmem:[%s7444_s9 + $0x13d0] sm:$0xff] }
 0x322   : > { %3770 = vmatpush2.bf16.msra.mxu0 %v2192_v14  ;;  %v2337_v14 = vunpack.c.l.s8.bf16 %v977_v7 }
 0x323   : > { %3795 = vmatpush1.bf16.msra.mxu1 %v2256_v29  ;;  %3771 = vmatprep.subr.bf16.mxu0 %v2185_v35  ;;  %v2401_v29 = vunpack.c.l.s8.bf16 %v1009_v10  ;;  %v969_v35 = vld [vmem:[%s7444_s9 + $0x1158] sm:$0xff] }
 0x324   : > { %3796 = vmatprep.subr.bf16.mxu1 %v2249_v43  ;;  %v1001_v43 = vld [vmem:[%s7444_s9 + $0x1258] sm:$0xff]  ;;  %v2329_v45 = vunpack.c.h.s8.bf16 %v969_v35  ;;  %v2321_v54 = vunpack.c.l.s8.bf16 %v969_v35 }
 0x325   : > { %v1073_v35 = vld [vmem:[%s7444_s9 + $0x1498] sm:$0xff] }
 0x326   : > { %3772 = vmatpush2.bf16.msra.mxu0 %v2184_v36  ;;  %v2393_v36 = vunpack.c.h.s8.bf16 %v1001_v43 }
 0x327   : > { %3797 = vmatpush1.bf16.msra.mxu1 %v2248_v49  ;;  %3773 = vmatprep.subr.bf16.mxu0 %v2177_v55  ;;  %v968_v49 = vld [vmem:[%s7444_s9 + $0x1150] sm:$0xff] }
 0x328   : > { %3798 = vmatprep.subr.bf16.mxu1 %v2241_v42  ;;  %v1000_v55 = vld [vmem:[%s7444_s9 + $0x1250] sm:$0xff]  ;;  %v2328_v42 = vunpack.c.h.s8.bf16 %v968_v49 }
 0x329   : > { %v2392_v46 = vunpack.c.h.s8.bf16 %v1000_v55  ;;  %v2384_v1 = vunpack.c.l.s8.bf16 %v1000_v55  ;;  %v2537_v55 = vunpack.c.h.s8.bf16 %v1073_v35 }
 0x32a   : > { %3774 = vmatpush2.bf16.msra.mxu0 %v2176_v31  ;;  %v2385_v31 = vunpack.c.l.s8.bf16 %v1001_v43 }
 0x32b   : > { %3799 = vmatpush1.bf16.msra.mxu1 %v2240_v58  ;;  %3825 = vmatprep.subr.bf16.mxu0 %v2425_v60  ;;  %v961_v58 = vld [vmem:[%s7444_s9 + $0x1118] sm:$0xff]  ;;  %v2320_v60 = vunpack.c.l.s8.bf16 %v968_v49 }
 0x32c   : > { %3800 = vmatprep.subr.bf16.mxu1 %v2361_v59  ;;  %v993_v59 = vld [vmem:[%s7444_s9 + $0x1218] sm:$0xff]  ;;  %v2313_v2 = vunpack.c.h.s8.bf16 %v961_v58  ;;  %v2305_v10 = vunpack.c.l.s8.bf16 %v961_v58 }
 0x32d   : > { %v3531_v8 = vpop.f32.mrf.mxu0  ;;  %3776 = vmatmul.mubr.bf16.vlgmr.msra.gmra.mxu0 %v7702_v24 }
 0x32e   : > { %v8034_v11 = vadd.f32 %v3531_v8, %v8010_v51  ;;  %3826 = vmatpush1.bf16.msra.mxu0 %v2424_v6  ;;  %3857 = vmatprep.mubr.bf16.mxu0 %v7718_v22  ;;  %v960_v6 = vld [vmem:[%s7444_s9 + $0x1110] sm:$0xff]  ;;  %v2369_v8 = vunpack.c.l.s8.bf16 %v993_v59 }
 0x32f   : > { %3801 = vmatpush2.bf16.msra.mxu1 %v2360_v0  ;;  %v3533_v13 = vpop.f32.mrf.mxu0  ;;  %3827 = vmatprep.subr.bf16.mxu0 %v2417_v5  ;;  %v2377_v0 = vunpack.c.h.s8.bf16 %v993_v59  ;;  %v2312_v5 = vunpack.c.h.s8.bf16 %v960_v6 }
 0x330   : > { %3802 = vmatprep.subr.bf16.mxu1 %v2353_v3  ;;  %v8039_v44 = vadd.f32 %v3533_v13, %v8013_v57  ;;  %v2336_v57 = vunpack.c.l.s8.bf16 %v976_v4  ;;  %v992_v3 = vld [vmem:[%s7444_s9 + $0x1210] sm:$0xff]  ;;  %v2304_v13 = vunpack.c.l.s8.bf16 %v960_v6 }
 0x331   : > { %v3535_v51 = vpop.f32.mrf.mxu0  ;;  %v2376_v7 = vunpack.c.h.s8.bf16 %v992_v3 }
 0x332   : > { %3828 = vmatpush1.bf16.msra.mxu0 %v2416_v9  ;;  %v1081_v9 = vld [vmem:[%s7444_s9 + $0x14d8] sm:$0xff]  ;;  %v1080_v51 = vld [vmem:[%s7444_s9 + $0x14d0] sm:$0xff] }
 0x333   : > { %3803 = vmatpush2.bf16.msra.mxu1 %v2352_v18  ;;  %v3536_v41 = vpop.f32.mrf.mxu0  ;;  %3829 = vmatprep.subr.bf16.mxu0 %v2409_v63  ;;  %v1049_v18 = vld [vmem:[%s7444_s9 + $0x13d8] sm:$0xff]  ;;  %v2553_v4 = vunpack.c.h.s8.bf16 %v1081_v9 }
 0x334   : > { %3804 = vmatprep.subr.bf16.mxu1 %v2345_v15  ;;  %v2368_v15 = vunpack.c.l.s8.bf16 %v992_v3  ;;  %v2489_v63 = vunpack.c.h.s8.bf16 %v1049_v18  ;;  %v2481_v41 = vunpack.c.l.s8.bf16 %v1049_v18 }
 0x336   : > { %3830 = vmatpush1.bf16.msra.mxu0 %v2408_v17  ;;  %v2552_v17 = vunpack.c.h.s8.bf16 %v1080_v51 }
 0x337   : > { %3805 = vmatpush2.bf16.msra.mxu1 %v2344_v16  ;;  %3831 = vmatprep.subr.bf16.mxu0 %v2401_v29  ;;  %v2488_v16 = vunpack.c.h.s8.bf16 %v1048_v39  ;;  %v1041_v29 = vld [vmem:[%s7444_s9 + $0x1398] sm:$0xff] }
 0x338   : > { %3806 = vmatprep.subr.bf16.mxu1 %v2337_v14  ;;  %v2545_v14 = vunpack.c.l.s8.bf16 %v1081_v9  ;;  %v2473_v49 = vunpack.c.h.s8.bf16 %v1041_v29 }
 0x33a   : > { %3832 = vmatpush1.bf16.msra.mxu0 %v2400_v33  ;;  %v2480_v33 = vunpack.c.l.s8.bf16 %v1048_v39 }
 0x33b   : > { %3807 = vmatpush2.bf16.msra.mxu1 %v2336_v57  ;;  %3833 = vmatprep.subr.bf16.mxu0 %v2393_v36 }
 0x33c   : > { %3808 = vmatprep.subr.bf16.mxu1 %v2329_v45  ;;  %v2544_v45 = vunpack.c.l.s8.bf16 %v1080_v51 }
 0x33e   : > { %3834 = vmatpush1.bf16.msra.mxu0 %v2392_v46  ;;  %v1072_v46 = vld [vmem:[%s7444_s9 + $0x1490] sm:$0xff] }
 0x33f   : > { %3809 = vmatpush2.bf16.msra.mxu1 %v2328_v42  ;;  %3835 = vmatprep.subr.bf16.mxu0 %v2385_v31  ;;  %v1040_v42 = vld [vmem:[%s7444_s9 + $0x1390] sm:$0xff]  ;;  %v2536_v58 = vunpack.c.h.s8.bf16 %v1072_v46  ;;  %v2528_v6 = vunpack.c.l.s8.bf16 %v1072_v46 }
 0x340   : > { %3810 = vmatprep.subr.bf16.mxu1 %v2321_v54  ;;  %v2472_v31 = vunpack.c.h.s8.bf16 %v1040_v42  ;;  %v1112_v46 = vld [vmem:[%s7444_s9 + $0x15d0] sm:$0xff] }
 0x342   : > { %3836 = vmatpush1.bf16.msra.mxu0 %v2384_v1  ;;  %v2529_v1 = vunpack.c.l.s8.bf16 %v1073_v35 }
 0x343   : > { %3811 = vmatpush2.bf16.msra.mxu1 %v2320_v60  ;;  %3837 = vmatprep.subr.bf16.mxu0 %v2377_v0  ;;  %v2465_v60 = vunpack.c.l.s8.bf16 %v1041_v29  ;;  %v1065_v0 = vld [vmem:[%s7444_s9 + $0x1458] sm:$0xff] }
 0x344   : > { %3812 = vmatprep.subr.bf16.mxu1 %v2313_v2  ;;  %v1033_v2 = vld [vmem:[%s7444_s9 + $0x1358] sm:$0xff] }
 0x345   : > { %v2457_v3 = vunpack.c.h.s8.bf16 %v1033_v2  ;;  %v2449_v9 = vunpack.c.l.s8.bf16 %v1033_v2  ;;  %v1137_v2 = vld [vmem:[%s7444_s9 + $0x1698] sm:$0xff] }
 0x346   : > { %3838 = vmatpush1.bf16.msra.mxu0 %v2376_v7  ;;  %v1032_v7 = vld [vmem:[%s7444_s9 + $0x1350] sm:$0xff] }
 0x347   : > { %3813 = vmatpush2.bf16.msra.mxu1 %v2312_v5  ;;  %3839 = vmatprep.subr.bf16.mxu0 %v2369_v8  ;;  %v2521_v5 = vunpack.c.h.s8.bf16 %v1065_v0  ;;  %v2456_v8 = vunpack.c.h.s8.bf16 %v1032_v7 }
 0x348   : > { %3814 = vmatprep.subr.bf16.mxu1 %v2305_v10  ;;  %v1064_v10 = vld [vmem:[%s7444_s9 + $0x1450] sm:$0xff] }
 0x349   : > { %v2520_v18 = vunpack.c.h.s8.bf16 %v1064_v10  ;;  %v2512_v39 = vunpack.c.l.s8.bf16 %v1064_v10  ;;  %v2665_v10 = vunpack.c.h.s8.bf16 %v1137_v2 }
 0x34a   : > { %3840 = vmatpush1.bf16.msra.mxu0 %v2368_v15  ;;  %v1025_v15 = vld [vmem:[%s7444_s9 + $0x1318] sm:$0xff] }
 0x34b   : > { %3815 = vmatpush2.bf16.msra.mxu1 %v2304_v13  ;;  %3841 = vmatprep.subr.bf16.mxu0 %v2489_v63  ;;  %v2513_v13 = vunpack.c.l.s8.bf16 %v1065_v0  ;;  %v1057_v63 = vld [vmem:[%s7444_s9 + $0x1418] sm:$0xff]  ;;  %v2441_v51 = vunpack.c.h.s8.bf16 %v1025_v15  ;;  %v2433_v35 = vunpack.c.l.s8.bf16 %v1025_v15 }
 0x34c   : > { %3866 = vmatprep.subr.bf16.mxu1 %v2553_v4  ;;  %v2448_v4 = vunpack.c.l.s8.bf16 %v1032_v7 }
 0x34e   : > { %v3572_v43 = vpop.f32.mrf.mxu1  ;;  %3817 = vmatmul.mubr.bf16.vlgmr.msra.gmra.mxu1 %v7760_v61  ;;  %3842 = vmatpush2.bf16.msra.mxu0 %v2488_v16  ;;  %v2505_v16 = vunpack.c.h.s8.bf16 %v1057_v63 }
 0x34f   : > { %v8058_v57 = vadd.f32 %v3572_v43, %v8034_v11  ;;  %3867 = vmatpush1.bf16.msra.mxu1 %v2552_v17  ;;  %3843 = vmatprep.subr.bf16.mxu0 %v2481_v41  ;;  %v1024_v17 = vld [vmem:[%s7444_s9 + $0x1310] sm:$0xff]  ;;  %v2497_v43 = vunpack.c.l.s8.bf16 %v1057_v63 }
 0x350   : > { %v3574_v36 = vpop.f32.mrf.mxu1  ;;  %3868 = vmatprep.subr.bf16.mxu1 %v2545_v14  ;;  %3898 = vmatprep.mubr.bf16.mxu1 %v7776_v25  ;;  %v1056_v41 = vld [vmem:[%s7444_s9 + $0x1410] sm:$0xff]  ;;  %v2440_v14 = vunpack.c.h.s8.bf16 %v1024_v17 }
 0x351   : > { %v8063_v54 = vadd.f32 %v3574_v36, %v8039_v44  ;;  %v2464_v44 = vunpack.c.l.s8.bf16 %v1040_v42  ;;  %v2504_v29 = vunpack.c.h.s8.bf16 %v1056_v41  ;;  %v2432_v36 = vunpack.c.l.s8.bf16 %v1024_v17 }
 0x352   : > { %v3576_v11 = vpop.f32.mrf.mxu1  ;;  %3844 = vmatpush2.bf16.msra.mxu0 %v2480_v33  ;;  %v1113_v33 = vld [vmem:[%s7444_s9 + $0x15d8] sm:$0xff] }
 0x353   : > { %3869 = vmatpush1.bf16.msra.mxu1 %v2544_v45  ;;  %3845 = vmatprep.subr.bf16.mxu0 %v2473_v49  ;;  %v1145_v45 = vld [vmem:[%s7444_s9 + $0x16d8] sm:$0xff]  ;;  %v2496_v49 = vunpack.c.l.s8.bf16 %v1056_v41  ;;  %v1144_v11 = vld [vmem:[%s7444_s9 + $0x16d0] sm:$0xff] }
 0x354   : > { %v3577_v59 = vpop.f32.mrf.mxu1  ;;  %3870 = vmatprep.subr.bf16.mxu1 %v2537_v55  ;;  %v2617_v55 = vunpack.c.h.s8.bf16 %v1113_v33  ;;  %v2681_v42 = vunpack.c.h.s8.bf16 %v1145_v45 }
 0x355   : > { %v2609_v59 = vunpack.c.l.s8.bf16 %v1113_v33 }
 0x356   : > { %3846 = vmatpush2.bf16.msra.mxu0 %v2472_v31  ;;  %v2616_v31 = vunpack.c.h.s8.bf16 %v1112_v46 }
 0x357   : > { %3871 = vmatpush1.bf16.msra.mxu1 %v2536_v58  ;;  %3847 = vmatprep.subr.bf16.mxu0 %v2465_v60  ;;  %v2680_v58 = vunpack.c.h.s8.bf16 %v1144_v11  ;;  %v2673_v60 = vunpack.c.l.s8.bf16 %v1145_v45 }
 0x358   : > { %3872 = vmatprep.subr.bf16.mxu1 %v2529_v1  ;;  %v1105_v1 = vld [vmem:[%s7444_s9 + $0x1598] sm:$0xff] }
 0x359   : > { %v2601_v7 = vunpack.c.h.s8.bf16 %v1105_v1 }
 0x35a   : > { %3848 = vmatpush2.bf16.msra.mxu0 %v2464_v44 }
 0x35b   : > { %3873 = vmatpush1.bf16.msra.mxu1 %v2528_v6  ;;  %3849 = vmatprep.subr.bf16.mxu0 %v2457_v3  ;;  %v2608_v6 = vunpack.c.l.s8.bf16 %v1112_v46  ;;  %v2672_v3 = vunpack.c.l.s8.bf16 %v1144_v11 }
 0x35c   : > { %3874 = vmatprep.subr.bf16.mxu1 %v2521_v5 }
 0x35e   : > { %3850 = vmatpush2.bf16.msra.mxu0 %v2456_v8  ;;  %v1104_v8 = vld [vmem:[%s7444_s9 + $0x1590] sm:$0xff] }
 0x35f   : > { %3875 = vmatpush1.bf16.msra.mxu1 %v2520_v18  ;;  %3851 = vmatprep.subr.bf16.mxu0 %v2449_v9  ;;  %v1136_v18 = vld [vmem:[%s7444_s9 + $0x1690] sm:$0xff] }
 0x360   : > { %3876 = vmatprep.subr.bf16.mxu1 %v2513_v13  ;;  %v2600_v13 = vunpack.c.h.s8.bf16 %v1104_v8  ;;  %v2664_v15 = vunpack.c.h.s8.bf16 %v1136_v18  ;;  %v2656_v17 = vunpack.c.l.s8.bf16 %v1136_v18  ;;  %v1176_v18 = vld [vmem:[%s7444_s9 + $0x17d0] sm:$0xff] }
 0x362   : > { %3852 = vmatpush2.bf16.msra.mxu0 %v2448_v4  ;;  %v2593_v4 = vunpack.c.l.s8.bf16 %v1105_v1 }
 0x363   : > { %3877 = vmatpush1.bf16.msra.mxu1 %v2512_v39  ;;  %3853 = vmatprep.subr.bf16.mxu0 %v2441_v51  ;;  %v2657_v39 = vunpack.c.l.s8.bf16 %v1137_v2  ;;  %v1097_v51 = vld [vmem:[%s7444_s9 + $0x1558] sm:$0xff] }
 0x364   : > { %3878 = vmatprep.subr.bf16.mxu1 %v2505_v16  ;;  %v1129_v16 = vld [vmem:[%s7444_s9 + $0x1658] sm:$0xff]  ;;  %v2585_v41 = vunpack.c.h.s8.bf16 %v1097_v51  ;;  %v2577_v45 = vunpack.c.l.s8.bf16 %v1097_v51 }
 0x365   : > { %v1201_v51 = vld [vmem:[%s7444_s9 + $0x1898] sm:$0xff] }
 0x366   : > { %3854 = vmatpush2.bf16.msra.mxu0 %v2440_v14  ;;  %v2649_v14 = vunpack.c.h.s8.bf16 %v1129_v16 }
 0x367   : > { %3879 = vmatpush1.bf16.msra.mxu1 %v2504_v29  ;;  %3855 = vmatprep.subr.bf16.mxu0 %v2433_v35  ;;  %v1096_v29 = vld [vmem:[%s7444_s9 + $0x1550] sm:$0xff] }
 0x368   : > { %3880 = vmatprep.subr.bf16.mxu1 %v2497_v43  ;;  %v1128_v35 = vld [vmem:[%s7444_s9 + $0x1650] sm:$0xff]  ;;  %v2584_v43 = vunpack.c.h.s8.bf16 %v1096_v29 }
 0x369   : > { %v2648_v33 = vunpack.c.h.s8.bf16 %v1128_v35  ;;  %v2640_v46 = vunpack.c.l.s8.bf16 %v1128_v35  ;;  %v2793_v35 = vunpack.c.h.s8.bf16 %v1201_v51 }
 0x36a   : > { %3856 = vmatpush2.bf16.msra.mxu0 %v2432_v36  ;;  %v2641_v36 = vunpack.c.l.s8.bf16 %v1129_v16 }
 0x36b   : > { %3881 = vmatpush1.bf16.msra.mxu1 %v2496_v49  ;;  %3907 = vmatprep.subr.bf16.mxu0 %v2681_v42  ;;  %v1089_v49 = vld [vmem:[%s7444_s9 + $0x1518] sm:$0xff]  ;;  %v2576_v42 = vunpack.c.l.s8.bf16 %v1096_v29 }
 0x36c   : > { %3882 = vmatprep.subr.bf16.mxu1 %v2617_v55  ;;  %v1121_v55 = vld [vmem:[%s7444_s9 + $0x1618] sm:$0xff]  ;;  %v2569_v11 = vunpack.c.h.s8.bf16 %v1089_v49  ;;  %v2561_v2 = vunpack.c.l.s8.bf16 %v1089_v49 }
 0x36d   : > { %v3613_v0 = vpop.f32.mrf.mxu0  ;;  %3858 = vmatmul.mubr.bf16.vlgmr.msra.gmra.mxu0 %v7764_v62 }
 0x36e   : > { %v8082_v44 = vadd.f32 %v3613_v0, %v8058_v57  ;;  %3908 = vmatpush1.bf16.msra.mxu0 %v2680_v58  ;;  %3939 = vmatprep.mubr.bf16.mxu0 %v7780_v26  ;;  %v1088_v58 = vld [vmem:[%s7444_s9 + $0x1510] sm:$0xff]  ;;  %v2625_v0 = vunpack.c.l.s8.bf16 %v1121_v55 }
 0x36f   : > { %3883 = vmatpush2.bf16.msra.mxu1 %v2616_v31  ;;  %v3615_v5 = vpop.f32.mrf.mxu0  ;;  %3909 = vmatprep.subr.bf16.mxu0 %v2673_v60  ;;  %v2633_v31 = vunpack.c.h.s8.bf16 %v1121_v55  ;;  %v2568_v60 = vunpack.c.h.s8.bf16 %v1088_v58 }
 0x370   : > { %3884 = vmatprep.subr.bf16.mxu1 %v2609_v59  ;;  %v8087_v9 = vadd.f32 %v3615_v5, %v8063_v54  ;;  %v2592_v54 = vunpack.c.l.s8.bf16 %v1104_v8  ;;  %v1120_v59 = vld [vmem:[%s7444_s9 + $0x1610] sm:$0xff]  ;;  %v2560_v5 = vunpack.c.l.s8.bf16 %v1088_v58 }
 0x371   : > { %v3617_v57 = vpop.f32.mrf.mxu0  ;;  %v2632_v1 = vunpack.c.h.s8.bf16 %v1120_v59 }
 0x372   : > { %3910 = vmatpush1.bf16.msra.mxu0 %v2672_v3  ;;  %v1209_v3 = vld [vmem:[%s7444_s9 + $0x18d8] sm:$0xff]  ;;  %v1208_v57 = vld [vmem:[%s7444_s9 + $0x18d0] sm:$0xff] }
 0x373   : > { %3885 = vmatpush2.bf16.msra.mxu1 %v2608_v6  ;;  %v3618_v63 = vpop.f32.mrf.mxu0  ;;  %3911 = vmatprep.subr.bf16.mxu0 %v2665_v10  ;;  %v1177_v6 = vld [vmem:[%s7444_s9 + $0x17d8] sm:$0xff]  ;;  %v2809_v8 = vunpack.c.h.s8.bf16 %v1209_v3 }
 0x374   : > { %3886 = vmatprep.subr.bf16.mxu1 %v2601_v7  ;;  %v2624_v7 = vunpack.c.l.s8.bf16 %v1120_v59  ;;  %v2745_v10 = vunpack.c.h.s8.bf16 %v1177_v6  ;;  %v2737_v63 = vunpack.c.l.s8.bf16 %v1177_v6 }
 0x376   : > { %3912 = vmatpush1.bf16.msra.mxu0 %v2664_v15  ;;  %v2808_v15 = vunpack.c.h.s8.bf16 %v1208_v57 }
 0x377   : > { %3887 = vmatpush2.bf16.msra.mxu1 %v2600_v13  ;;  %3913 = vmatprep.subr.bf16.mxu0 %v2657_v39  ;;  %v2744_v13 = vunpack.c.h.s8.bf16 %v1176_v18  ;;  %v1169_v39 = vld [vmem:[%s7444_s9 + $0x1798] sm:$0xff] }
 0x378   : > { %3888 = vmatprep.subr.bf16.mxu1 %v2593_v4  ;;  %v2801_v4 = vunpack.c.l.s8.bf16 %v1209_v3  ;;  %v2729_v29 = vunpack.c.h.s8.bf16 %v1169_v39 }
 0x37a   : > { %3914 = vmatpush1.bf16.msra.mxu0 %v2656_v17  ;;  %v2736_v17 = vunpack.c.l.s8.bf16 %v1176_v18 }
 0x37b   : > { %3889 = vmatpush2.bf16.msra.mxu1 %v2592_v54  ;;  %3915 = vmatprep.subr.bf16.mxu0 %v2649_v14 }
 0x37c   : > { %3890 = vmatprep.subr.bf16.mxu1 %v2585_v41  ;;  %v2800_v41 = vunpack.c.l.s8.bf16 %v1208_v57 }
 0x37e   : > { %3916 = vmatpush1.bf16.msra.mxu0 %v2648_v33  ;;  %v1200_v33 = vld [vmem:[%s7444_s9 + $0x1890] sm:$0xff] }
 0x37f   : > { %3891 = vmatpush2.bf16.msra.mxu1 %v2584_v43  ;;  %3917 = vmatprep.subr.bf16.mxu0 %v2641_v36  ;;  %v1168_v43 = vld [vmem:[%s7444_s9 + $0x1790] sm:$0xff]  ;;  %v2792_v49 = vunpack.c.h.s8.bf16 %v1200_v33  ;;  %v2784_v58 = vunpack.c.l.s8.bf16 %v1200_v33  ;;  %v442_v33 = vld [vmem:[%s7444_s9 + $0xe0] sm:$0xff] }
 0x380   : > { %3892 = vmatprep.subr.bf16.mxu1 %v2577_v45  ;;  %v2728_v36 = vunpack.c.h.s8.bf16 %v1168_v43 }
 0x382   : > { %3918 = vmatpush1.bf16.msra.mxu0 %v2640_v46  ;;  %v2785_v46 = vunpack.c.l.s8.bf16 %v1201_v51 }
 0x383   : > { %3893 = vmatpush2.bf16.msra.mxu1 %v2576_v42  ;;  %3919 = vmatprep.subr.bf16.mxu0 %v2633_v31  ;;  %v2721_v42 = vunpack.c.l.s8.bf16 %v1169_v39  ;;  %v1193_v31 = vld [vmem:[%s7444_s9 + $0x1858] sm:$0xff] }
 0x384   : > { %3894 = vmatprep.subr.bf16.mxu1 %v2569_v11  ;;  %v1161_v11 = vld [vmem:[%s7444_s9 + $0x1758] sm:$0xff] }
 0x385   : > { %v2713_v59 = vunpack.c.h.s8.bf16 %v1161_v11  ;;  %v2705_v3 = vunpack.c.l.s8.bf16 %v1161_v11  ;;  %v499_v11 = vld [vmem:[%s7444_s9 + $0x2a8] sm:$0xff] }
 0x386   : > { %3920 = vmatpush1.bf16.msra.mxu0 %v2632_v1  ;;  %v1160_v1 = vld [vmem:[%s7444_s9 + $0x1750] sm:$0xff] }
 0x387   : > { %3895 = vmatpush2.bf16.msra.mxu1 %v2568_v60  ;;  %3921 = vmatprep.subr.bf16.mxu0 %v2625_v0  ;;  %v2777_v60 = vunpack.c.h.s8.bf16 %v1193_v31  ;;  %v2712_v0 = vunpack.c.h.s8.bf16 %v1160_v1 }
 0x388   : > { %3896 = vmatprep.subr.bf16.mxu1 %v2561_v2  ;;  %v1192_v2 = vld [vmem:[%s7444_s9 + $0x1850] sm:$0xff] }
 0x389   : > { %v2776_v6 = vunpack.c.h.s8.bf16 %v1192_v2  ;;  %v2768_v18 = vunpack.c.l.s8.bf16 %v1192_v2 }
 0x38a   : > { %3922 = vmatpush1.bf16.msra.mxu0 %v2624_v7  ;;  %v1153_v7 = vld [vmem:[%s7444_s9 + $0x1718] sm:$0xff] }
 0x38b   : > { %3897 = vmatpush2.bf16.msra.mxu1 %v2560_v5  ;;  %3923 = vmatprep.subr.bf16.mxu0 %v2745_v10  ;;  %v2769_v5 = vunpack.c.l.s8.bf16 %v1193_v31  ;;  %v1185_v10 = vld [vmem:[%s7444_s9 + $0x1818] sm:$0xff]  ;;  %v2697_v57 = vunpack.c.h.s8.bf16 %v1153_v7  ;;  %v2689_v51 = vunpack.c.l.s8.bf16 %v1153_v7 }
 0x38c   : > { %3948 = vmatprep.subr.bf16.mxu1 %v2809_v8  ;;  %v2704_v8 = vunpack.c.l.s8.bf16 %v1160_v1 }
 0x38e   : > { %v3654_v16 = vpop.f32.mrf.mxu1  ;;  %3899 = vmatmul.mubr.bf16.vlgmr.msra.gmra.mxu1 %v7824_v52  ;;  %3924 = vmatpush2.bf16.msra.mxu0 %v2744_v13  ;;  %v2761_v13 = vunpack.c.h.s8.bf16 %v1185_v10 }
 0x38f   : > { %v8106_v54 = vadd.f32 %v3654_v16, %v8082_v44  ;;  %3949 = vmatpush1.bf16.msra.mxu1 %v2808_v15  ;;  %3925 = vmatprep.subr.bf16.mxu0 %v2737_v63  ;;  %v1152_v15 = vld [vmem:[%s7444_s9 + $0x1710] sm:$0xff]  ;;  %v2753_v16 = vunpack.c.l.s8.bf16 %v1185_v10 }
 0x390   : > { %v3656_v14 = vpop.f32.mrf.mxu1  ;;  %3950 = vmatprep.subr.bf16.mxu1 %v2801_v4  ;;  %3980 = vmatprep.mubr.bf16.mxu1 %v7245_v12  ;;  %v1184_v63 = vld [vmem:[%s7444_s9 + $0x1810] sm:$0xff]  ;;  %v2696_v4 = vunpack.c.h.s8.bf16 %v1152_v15 }
 0x391   : > { %v8111_v45 = vadd.f32 %v3656_v14, %v8087_v9  ;;  %v2720_v9 = vunpack.c.l.s8.bf16 %v1168_v43  ;;  %v2760_v39 = vunpack.c.h.s8.bf16 %v1184_v63  ;;  %v2688_v14 = vunpack.c.l.s8.bf16 %v1152_v15  ;;  %v491_v15 = vld [vmem:[%s7444_s9 + $0x268] sm:$0xff] }
 0x392   : > { %v3658_v44 = vpop.f32.mrf.mxu1  ;;  %3926 = vmatpush2.bf16.msra.mxu0 %v2736_v17  ;;  %v443_v17 = vld [vmem:[%s7444_s9 + $0xe8] sm:$0xff] }
 0x393   : > { %3951 = vmatpush1.bf16.msra.mxu1 %v2800_v41  ;;  %3927 = vmatprep.subr.bf16.mxu0 %v2729_v29  ;;  %v507_v41 = vld [vmem:[%s7444_s9 + $0x2e8] sm:$0xff]  ;;  %v2752_v29 = vunpack.c.l.s8.bf16 %v1184_v63  ;;  %v506_v44 = vld [vmem:[%s7444_s9 + $0x2e0] sm:$0xff] }
 0x394   : > { %v3659_v55 = vpop.f32.mrf.mxu1  ;;  %3952 = vmatprep.subr.bf16.mxu1 %v2793_v35  ;;  %v1275_v35 = vunpack.c.h.s8.bf16 %v443_v17  ;;  %v1403_v43 = vunpack.c.h.s8.bf16 %v507_v41 }
 0x395   : > { %v1267_v55 = vunpack.c.l.s8.bf16 %v443_v17 }
 0x396   : > { %3928 = vmatpush2.bf16.msra.mxu0 %v2728_v36  ;;  %v1274_v36 = vunpack.c.h.s8.bf16 %v442_v33 }
 0x397   : > { %3953 = vmatpush1.bf16.msra.mxu1 %v2792_v49  ;;  %3929 = vmatprep.subr.bf16.mxu0 %v2721_v42  ;;  %v1402_v49 = vunpack.c.h.s8.bf16 %v506_v44  ;;  %v1395_v42 = vunpack.c.l.s8.bf16 %v507_v41 }
 0x398   : > { %3954 = vmatprep.subr.bf16.mxu1 %v2785_v46  ;;  %v435_v46 = vld [vmem:[%s7444_s9 + $0xa8] sm:$0xff] }
 0x399   : > { %v1259_v2 = vunpack.c.h.s8.bf16 %v435_v46 }
 0x39a   : > { %3930 = vmatpush2.bf16.msra.mxu0 %v2720_v9  ;;  %v6789_v9 = vld [vmem:[%s7466_s17 + $0x60] ss:$0 sps:$4 sm:$0xff]  }
 0x39b   : > { %3955 = vmatpush1.bf16.msra.mxu1 %v2784_v58  ;;  %3931 = vmatprep.subr.bf16.mxu0 %v2713_v59  ;;  %v1266_v59 = vunpack.c.l.s8.bf16 %v442_v33 }
 0x39c   : > { %3956 = vmatprep.subr.bf16.mxu1 %v2777_v60  ;;  %v1394_v60 = vunpack.c.l.s8.bf16 %v506_v44 }
 0x39e   : > { %3932 = vmatpush2.bf16.msra.mxu0 %v2712_v0  ;;  %v1387_v0 = vunpack.c.h.s8.bf16 %v499_v11 }
 0x39f   : > { %3957 = vmatpush1.bf16.msra.mxu1 %v2776_v6  ;;  %3933 = vmatprep.subr.bf16.mxu0 %v2705_v3  ;;  %v434_v6 = vld [vmem:[%s7444_s9 + $0xa0] sm:$0xff] }
 0x3a0   : > { %3958 = vmatprep.subr.bf16.mxu1 %v2769_v5  ;;  %v498_v3 = vld [vmem:[%s7444_s9 + $0x2a0] sm:$0xff]  ;;  %v1258_v7 = vunpack.c.h.s8.bf16 %v434_v6 }
 0x3a1   : > { %v1386_v10 = vunpack.c.h.s8.bf16 %v498_v3  ;;  %v1378_v63 = vunpack.c.l.s8.bf16 %v498_v3  ;;  %v474_v3 = vld [vmem:[%s7444_s9 + $0x1e0] sm:$0xff] }
 0x3a2   : > { %3934 = vmatpush2.bf16.msra.mxu0 %v2704_v8 }
 0x3a3   : > { %3959 = vmatpush1.bf16.msra.mxu1 %v2768_v18  ;;  %3935 = vmatprep.subr.bf16.mxu0 %v2697_v57  ;;  %v1251_v18 = vunpack.c.l.s8.bf16 %v435_v46  ;;  %v1379_v57 = vunpack.c.l.s8.bf16 %v499_v11 }
 0x3a4   : > { %3960 = vmatprep.subr.bf16.mxu1 %v2761_v13  ;;  %v427_v13 = vld [vmem:[%s7444_s9 + $0x68] sm:$0xff] }
 0x3a6   : > { %3936 = vmatpush2.bf16.msra.mxu0 %v2696_v4  ;;  %v1243_v4 = vunpack.c.h.s8.bf16 %v427_v13 }
 0x3a7   : > { %3961 = vmatpush1.bf16.msra.mxu1 %v2760_v39  ;;  %3937 = vmatprep.subr.bf16.mxu0 %v2689_v51  ;;  %v1371_v39 = vunpack.c.h.s8.bf16 %v491_v15  ;;  %v426_v51 = vld [vmem:[%s7444_s9 + $0x60] sm:$0xff] }
 0x3a8   : > { %3962 = vmatprep.subr.bf16.mxu1 %v2753_v16  ;;  %v490_v16 = vld [vmem:[%s7444_s9 + $0x260] sm:$0xff]  ;;  %v1242_v17 = vunpack.c.h.s8.bf16 %v426_v51  ;;  %v1234_v33 = vunpack.c.l.s8.bf16 %v426_v51 }
 0x3a9   : > { %v1370_v41 = vunpack.c.h.s8.bf16 %v490_v16  ;;  %v1362_v44 = vunpack.c.l.s8.bf16 %v490_v16 }
 0x3aa   : > { %3938 = vmatpush2.bf16.msra.mxu0 %v2688_v14  ;;  %v1235_v14 = vunpack.c.l.s8.bf16 %v427_v13  ;;  %v531_v13 = vld [vmem:[%s7444_s9 + $0x3a8] sm:$0xff] }
 0x3ab   : > { %3963 = vmatpush1.bf16.msra.mxu1 %v2752_v29  ;;  %3989 = vmatprep.subr.bf16.mxu0 %v1275_v35  ;;  %v1363_v29 = vunpack.c.l.s8.bf16 %v491_v15  ;;  %v419_v35 = vld [vmem:[%s7444_s9 + $0x28] sm:$0xff]  ;;  %v1451_v16 = vunpack.c.h.s8.bf16 %v531_v13 }
 0x3ac   : > { %4030 = vmatprep.subr.bf16.mxu1 %v1403_v43  ;;  %v483_v43 = vld [vmem:[%s7444_s9 + $0x228] sm:$0xff] }
 0x3ad   : > { %v3695_v31 = vpop.f32.mrf.mxu0  ;;  %3940 = vmatmul.mubr.bf16.vlgmr.msra.gmra.mxu0 %v7828_v53 }
 0x3ae   : > { %3981 = vmatmul.mubr.bf16.vlgmr.msra.gmra.mxu1 %v6789_v9  ;;  %v8131_v58 = vadd.f32 %v3695_v31, %v8106_v54  ;;  %3990 = vmatpush1.bf16.msra.mxu0 %v1274_v36  ;;  %v1227_v36 = vunpack.c.h.s8.bf16 %v419_v35  ;;  %v1219_v31 = vunpack.c.l.s8.bf16 %v419_v35  ;;  %v1347_v9 = vunpack.c.l.s8.bf16 %v483_v43 }
 0x3af   : > { %4031 = vmatpush1.bf16.msra.mxu1 %v1402_v49  ;;  %v3697_v1 = vpop.f32.mrf.mxu0  ;;  %3991 = vmatprep.subr.bf16.mxu0 %v1267_v55  ;;  %v1355_v49 = vunpack.c.h.s8.bf16 %v483_v43  ;;  %v418_v55 = vld [vmem:[%s7444_s9 + $0x20] sm:$0xff] }
 0x3b0   : > { %4032 = vmatprep.subr.bf16.mxu1 %v1395_v42  ;;  %v8136_v5 = vadd.f32 %v3697_v1, %v8111_v45  ;;  %4021 = vmatprep.mubr.bf16.mxu0 %v7490_v37  ;;  %v1250_v45 = vunpack.c.l.s8.bf16 %v434_v6  ;;  %v482_v42 = vld [vmem:[%s7444_s9 + $0x220] sm:$0xff]  ;;  %v1226_v46 = vunpack.c.h.s8.bf16 %v418_v55  ;;  %v1218_v1 = vunpack.c.l.s8.bf16 %v418_v55 }
 0x3b1   : > { %4062 = vmatprep.mubr.bf16.mxu1 %v7494_v38  ;;  %v3699_v54 = vpop.f32.mrf.mxu0  ;;  %v1354_v11 = vunpack.c.h.s8.bf16 %v482_v42 }
 0x3b2   : > { %3992 = vmatpush1.bf16.msra.mxu0 %v1266_v59  ;;  %v475_v59 = vld [vmem:[%s7444_s9 + $0x1e8] sm:$0xff]  ;;  %v538_v54 = vld [vmem:[%s7444_s9 + $0x3e0] sm:$0xff] }
 0x3b3   : > { %4033 = vmatpush1.bf16.msra.mxu1 %v1394_v60  ;;  %v3700_v8 = vpop.f32.mrf.mxu0  ;;  %3993 = vmatprep.subr.bf16.mxu0 %v1259_v2  ;;  %v539_v60 = vld [vmem:[%s7444_s9 + $0x3e8] sm:$0xff]  ;;  %v1346_v2 = vunpack.c.l.s8.bf16 %v482_v42 }
 0x3b4   : > { %4034 = vmatprep.subr.bf16.mxu1 %v1387_v0  ;;  %v1339_v0 = vunpack.c.h.s8.bf16 %v475_v59  ;;  %v1467_v6 = vunpack.c.h.s8.bf16 %v539_v60  ;;  %v1331_v8 = vunpack.c.l.s8.bf16 %v475_v59 }
 0x3b6   : > { %3994 = vmatpush1.bf16.msra.mxu0 %v1258_v7  ;;  %v1338_v7 = vunpack.c.h.s8.bf16 %v474_v3 }
 0x3b7   : > { %4035 = vmatpush1.bf16.msra.mxu1 %v1386_v10  ;;  %3995 = vmatprep.subr.bf16.mxu0 %v1251_v18  ;;  %v1466_v10 = vunpack.c.h.s8.bf16 %v538_v54  ;;  %v1459_v18 = vunpack.c.l.s8.bf16 %v539_v60 }
 0x3b8   : > { %4036 = vmatprep.subr.bf16.mxu1 %v1379_v57  ;;  %v467_v57 = vld [vmem:[%s7444_s9 + $0x1a8] sm:$0xff] }
 0x3b9   : > { %v1323_v51 = vunpack.c.h.s8.bf16 %v467_v57 }
 0x3ba   : > { %3996 = vmatpush1.bf16.msra.mxu0 %v1250_v45 }
 0x3bb   : > { %4037 = vmatpush1.bf16.msra.mxu1 %v1378_v63  ;;  %3997 = vmatprep.subr.bf16.mxu0 %v1243_v4  ;;  %v1330_v63 = vunpack.c.l.s8.bf16 %v474_v3  ;;  %v1458_v4 = vunpack.c.l.s8.bf16 %v538_v54 }
 0x3bc   : > { %4038 = vmatprep.subr.bf16.mxu1 %v1371_v39 }
 0x3be   : > { %3998 = vmatpush1.bf16.msra.mxu0 %v1242_v17  ;;  %v466_v17 = vld [vmem:[%s7444_s9 + $0x1a0] sm:$0xff] }
 0x3bf   : > { %4039 = vmatpush1.bf16.msra.mxu1 %v1370_v41  ;;  %3999 = vmatprep.subr.bf16.mxu0 %v1235_v14  ;;  %v530_v41 = vld [vmem:[%s7444_s9 + $0x3a0] sm:$0xff]  ;;  %v1314_v55 = vunpack.c.l.s8.bf16 %v466_v17 }
 0x3c0   : > { %4040 = vmatprep.subr.bf16.mxu1 %v1363_v29  ;;  %v1450_v35 = vunpack.c.h.s8.bf16 %v530_v41 }
 0x3c2   : > { %4000 = vmatpush1.bf16.msra.mxu0 %v1234_v33  ;;  %v1315_v33 = vunpack.c.l.s8.bf16 %v467_v57 }
 0x3c3   : > { %4041 = vmatpush1.bf16.msra.mxu1 %v1362_v44  ;;  %4001 = vmatprep.subr.bf16.mxu0 %v1227_v36  ;;  %v1443_v44 = vunpack.c.l.s8.bf16 %v531_v13  ;;  %v459_v36 = vld [vmem:[%s7444_s9 + $0x168] sm:$0xff] }
 0x3c4   : > { %4042 = vmatprep.subr.bf16.mxu1 %v1355_v49  ;;  %v523_v49 = vld [vmem:[%s7444_s9 + $0x368] sm:$0xff]  ;;  %v1307_v42 = vunpack.c.h.s8.bf16 %v459_v36  ;;  %v1299_v60 = vunpack.c.l.s8.bf16 %v459_v36 }
 0x3c5   : > { %v627_v36 = vld [vmem:[%s7444_s9 + $0x6a8] sm:$0xff] }
 0x3c6   : > { %4002 = vmatpush1.bf16.msra.mxu0 %v1226_v46  ;;  %v1435_v46 = vunpack.c.h.s8.bf16 %v523_v49 }
 0x3c7   : > { %4043 = vmatpush1.bf16.msra.mxu1 %v1354_v11  ;;  %4003 = vmatprep.subr.bf16.mxu0 %v1219_v31  ;;  %v458_v11 = vld [vmem:[%s7444_s9 + $0x160] sm:$0xff] }
 0x3c8   : > { %4044 = vmatprep.subr.bf16.mxu1 %v1347_v9  ;;  %v522_v31 = vld [vmem:[%s7444_s9 + $0x360] sm:$0xff]  ;;  %v1306_v9 = vunpack.c.h.s8.bf16 %v458_v11 }
 0x3c9   : > { %v1434_v59 = vunpack.c.h.s8.bf16 %v522_v31  ;;  %v1426_v3 = vunpack.c.l.s8.bf16 %v522_v31  ;;  %v1643_v31 = vunpack.c.h.s8.bf16 %v627_v36 }
 0x3ca   : > { %4004 = vmatpush1.bf16.msra.mxu0 %v1218_v1  ;;  %v1427_v1 = vunpack.c.l.s8.bf16 %v523_v49 }
 0x3cb   : > { %4045 = vmatpush1.bf16.msra.mxu1 %v1346_v2  ;;  %4005 = vmatprep.subr.bf16.mxu0 %v1339_v0  ;;  %v451_v2 = vld [vmem:[%s7444_s9 + $0x128] sm:$0xff] }
 0x3cc   : > { %4046 = vmatprep.subr.bf16.mxu1 %v1467_v6  ;;  %v515_v0 = vld [vmem:[%s7444_s9 + $0x328] sm:$0xff]  ;;  %v1298_v6 = vunpack.c.l.s8.bf16 %v458_v11  ;;  %v1291_v54 = vunpack.c.h.s8.bf16 %v451_v2  ;;  %v1283_v13 = vunpack.c.l.s8.bf16 %v451_v2 }
 0x3ce   : > { %v3736_v15 = vpop.f32.mrf.mxu1  ;;  %4006 = vmatpush2.bf16.msra.mxu0 %v1338_v7  ;;  %v1419_v7 = vunpack.c.h.s8.bf16 %v515_v0 }
 0x3cf   : > { %v8155_v45 = vadd.f32 %v3736_v15, %v8131_v58  ;;  %4047 = vmatpush2.bf16.msra.mxu1 %v1466_v10  ;;  %4007 = vmatprep.subr.bf16.mxu0 %v1331_v8  ;;  %v1322_v58 = vunpack.c.h.s8.bf16 %v466_v17  ;;  %v450_v10 = vld [vmem:[%s7444_s9 + $0x120] sm:$0xff]  ;;  %v1411_v15 = vunpack.c.l.s8.bf16 %v515_v0 }
 0x3d0   : > { %v3738_v39 = vpop.f32.mrf.mxu1  ;;  %4048 = vmatprep.subr.bf16.mxu1 %v1459_v18  ;;  %v514_v8 = vld [vmem:[%s7444_s9 + $0x320] sm:$0xff]  ;;  %v1290_v18 = vunpack.c.h.s8.bf16 %v450_v10 }
 0x3d1   : > { %v8160_v14 = vadd.f32 %v3738_v39, %v8136_v5  ;;  %v1442_v5 = vunpack.c.l.s8.bf16 %v530_v41  ;;  %v1418_v57 = vunpack.c.h.s8.bf16 %v514_v8  ;;  %v1282_v39 = vunpack.c.l.s8.bf16 %v450_v10  ;;  %v570_v41 = vld [vmem:[%s7444_s9 + $0x4e0] sm:$0xff] }
 0x3d2   : > { %v3740_v29 = vpop.f32.mrf.mxu1  ;;  %4008 = vmatpush2.bf16.msra.mxu0 %v1330_v63  ;;  %v571_v63 = vld [vmem:[%s7444_s9 + $0x4e8] sm:$0xff] }
 0x3d3   : > { %4049 = vmatpush2.bf16.msra.mxu1 %v1458_v4  ;;  %4009 = vmatprep.subr.bf16.mxu0 %v1323_v51  ;;  %v635_v4 = vld [vmem:[%s7444_s9 + $0x6e8] sm:$0xff]  ;;  %v1410_v51 = vunpack.c.l.s8.bf16 %v514_v8  ;;  %v634_v29 = vld [vmem:[%s7444_s9 + $0x6e0] sm:$0xff] }
 0x3d4   : > { %v3741_v43 = vpop.f32.mrf.mxu1  ;;  %4050 = vmatprep.subr.bf16.mxu1 %v1451_v16  ;;  %v1531_v16 = vunpack.c.h.s8.bf16 %v571_v63  ;;  %v1659_v17 = vunpack.c.h.s8.bf16 %v635_v4 }
 0x3d5   : > { %v1523_v43 = vunpack.c.l.s8.bf16 %v571_v63 }
 0x3d6   : > { %4010 = vmatpush2.bf16.msra.mxu0 %v1322_v58  ;;  %v1530_v58 = vunpack.c.h.s8.bf16 %v570_v41 }
 0x3d7   : > { %4051 = vmatpush2.bf16.msra.mxu1 %v1450_v35  ;;  %4011 = vmatprep.subr.bf16.mxu0 %v1315_v33  ;;  %v1658_v35 = vunpack.c.h.s8.bf16 %v634_v29  ;;  %v1651_v33 = vunpack.c.l.s8.bf16 %v635_v4 }
 0x3d8   : > { %4052 = vmatprep.subr.bf16.mxu1 %v1443_v44  ;;  %v563_v44 = vld [vmem:[%s7444_s9 + $0x4a8] sm:$0xff] }
 0x3d9   : > { %v1515_v11 = vunpack.c.h.s8.bf16 %v563_v44 }
 0x3da   : > { %4012 = vmatpush2.bf16.msra.mxu0 %v1314_v55 }
 0x3db   : > { %4053 = vmatpush2.bf16.msra.mxu1 %v1442_v5  ;;  %4013 = vmatprep.subr.bf16.mxu0 %v1307_v42  ;;  %v1522_v5 = vunpack.c.l.s8.bf16 %v570_v41  ;;  %v1650_v42 = vunpack.c.l.s8.bf16 %v634_v29 }
 0x3dc   : > { %4054 = vmatprep.subr.bf16.mxu1 %v1435_v46 }
 0x3de   : > { %4014 = vmatpush2.bf16.msra.mxu0 %v1306_v9  ;;  %v562_v9 = vld [vmem:[%s7444_s9 + $0x4a0] sm:$0xff] }
 0x3df   : > { %4055 = vmatpush2.bf16.msra.mxu1 %v1434_v59  ;;  %4015 = vmatprep.subr.bf16.mxu0 %v1299_v60  ;;  %v626_v59 = vld [vmem:[%s7444_s9 + $0x6a0] sm:$0xff] }
 0x3e0   : > { %4056 = vmatprep.subr.bf16.mxu1 %v1427_v1  ;;  %v1514_v1 = vunpack.c.h.s8.bf16 %v562_v9  ;;  %v1642_v2 = vunpack.c.h.s8.bf16 %v626_v59  ;;  %v1634_v10 = vunpack.c.l.s8.bf16 %v626_v59  ;;  %v602_v59 = vld [vmem:[%s7444_s9 + $0x5e0] sm:$0xff] }
 0x3e2   : > { %4016 = vmatpush2.bf16.msra.mxu0 %v1298_v6  ;;  %v1507_v6 = vunpack.c.l.s8.bf16 %v563_v44 }
 0x3e3   : > { %4057 = vmatpush2.bf16.msra.mxu1 %v1426_v3  ;;  %4017 = vmatprep.subr.bf16.mxu0 %v1291_v54  ;;  %v1635_v3 = vunpack.c.l.s8.bf16 %v627_v36  ;;  %v555_v54 = vld [vmem:[%s7444_s9 + $0x468] sm:$0xff] }
 0x3e4   : > { %4058 = vmatprep.subr.bf16.mxu1 %v1419_v7  ;;  %v619_v7 = vld [vmem:[%s7444_s9 + $0x668] sm:$0xff]  ;;  %v1499_v8 = vunpack.c.h.s8.bf16 %v555_v54  ;;  %v1491_v4 = vunpack.c.l.s8.bf16 %v555_v54 }
 0x3e5   : > { %v659_v54 = vld [vmem:[%s7444_s9 + $0x7a8] sm:$0xff] }
 0x3e6   : > { %4018 = vmatpush2.bf16.msra.mxu0 %v1290_v18  ;;  %v1627_v18 = vunpack.c.h.s8.bf16 %v619_v7 }
 0x3e7   : > { %4059 = vmatpush2.bf16.msra.mxu1 %v1418_v57  ;;  %4019 = vmatprep.subr.bf16.mxu0 %v1283_v13  ;;  %v554_v57 = vld [vmem:[%s7444_s9 + $0x460] sm:$0xff] }
 0x3e8   : > { %4060 = vmatprep.subr.bf16.mxu1 %v1411_v15  ;;  %v618_v13 = vld [vmem:[%s7444_s9 + $0x660] sm:$0xff]  ;;  %v1498_v15 = vunpack.c.h.s8.bf16 %v554_v57 }
 0x3e9   : > { %v1626_v63 = vunpack.c.h.s8.bf16 %v618_v13  ;;  %v1618_v41 = vunpack.c.l.s8.bf16 %v618_v13  ;;  %v1707_v13 = vunpack.c.h.s8.bf16 %v659_v54 }
 0x3ea   : > { %4020 = vmatpush2.bf16.msra.mxu0 %v1282_v39  ;;  %v1619_v39 = vunpack.c.l.s8.bf16 %v619_v7 }
 0x3eb   : > { %4061 = vmatpush2.bf16.msra.mxu1 %v1410_v51  ;;  %4071 = vmatprep.subr.bf16.mxu0 %v1531_v16  ;;  %v547_v51 = vld [vmem:[%s7444_s9 + $0x428] sm:$0xff] }
 0x3ec   : > { %4112 = vmatprep.subr.bf16.mxu1 %v1659_v17  ;;  %v611_v16 = vld [vmem:[%s7444_s9 + $0x628] sm:$0xff]  ;;  %v1490_v17 = vunpack.c.l.s8.bf16 %v554_v57  ;;  %v1483_v29 = vunpack.c.h.s8.bf16 %v547_v51  ;;  %v1475_v36 = vunpack.c.l.s8.bf16 %v547_v51 }
 0x3ed   : > { %v3777_v49 = vpop.f32.mrf.mxu0  ;;  %4022 = vmatmul.mubr.bf16.vlgmr.msra.gmra.mxu0 %v7524_v47 }
 0x3ee   : > { %4063 = vmatmul.mubr.bf16.vlgmr.msra.gmra.mxu1 %v7528_v48  ;;  %v8179_v55 = vadd.f32 %v3777_v49, %v8155_v45  ;;  %4072 = vmatpush1.bf16.msra.mxu0 %v1530_v58  ;;  %v1611_v58 = vunpack.c.h.s8.bf16 %v611_v16  ;;  %v1603_v49 = vunpack.c.l.s8.bf16 %v611_v16 }
 0x3ef   : > { %4113 = vmatpush1.bf16.msra.mxu1 %v1658_v35  ;;  %v3779_v46 = vpop.f32.mrf.mxu0  ;;  %4073 = vmatprep.subr.bf16.mxu0 %v1523_v43  ;;  %v546_v35 = vld [vmem:[%s7444_s9 + $0x420] sm:$0xff] }
 0x3f0   : > { %4114 = vmatprep.subr.bf16.mxu1 %v1651_v33  ;;  %v8184_v60 = vadd.f32 %v3779_v46, %v8160_v14  ;;  %4103 = vmatprep.mubr.bf16.mxu0 %v7540_v32  ;;  %v1506_v14 = vunpack.c.l.s8.bf16 %v562_v9  ;;  %v610_v43 = vld [vmem:[%s7444_s9 + $0x620] sm:$0xff]  ;;  %v1482_v33 = vunpack.c.h.s8.bf16 %v546_v35  ;;  %v1474_v46 = vunpack.c.l.s8.bf16 %v546_v35 }
 0x3f1   : > { %4144 = vmatprep.mubr.bf16.mxu1 %v7544_v56  ;;  %v3781_v45 = vpop.f32.mrf.mxu0  ;;  %v1610_v44 = vunpack.c.h.s8.bf16 %v610_v43 }
 0x3f2   : > { %4074 = vmatpush1.bf16.msra.mxu0 %v1522_v5  ;;  %v603_v5 = vld [vmem:[%s7444_s9 + $0x5e8] sm:$0xff]  ;;  %v666_v45 = vld [vmem:[%s7444_s9 + $0x7e0] sm:$0xff] }
 0x3f3   : > { %4115 = vmatpush1.bf16.msra.mxu1 %v1650_v42  ;;  %v3782_v0 = vpop.f32.mrf.mxu0  ;;  %4075 = vmatprep.subr.bf16.mxu0 %v1515_v11  ;;  %v667_v42 = vld [vmem:[%s7444_s9 + $0x7e8] sm:$0xff]  ;;  %v1602_v11 = vunpack.c.l.s8.bf16 %v610_v43 }
 0x3f4   : > { %4116 = vmatprep.subr.bf16.mxu1 %v1643_v31  ;;  %v1595_v31 = vunpack.c.h.s8.bf16 %v603_v5  ;;  %v1723_v9 = vunpack.c.h.s8.bf16 %v667_v42  ;;  %v1587_v0 = vunpack.c.l.s8.bf16 %v603_v5 }
 0x3f6   : > { %4076 = vmatpush1.bf16.msra.mxu0 %v1514_v1  ;;  %v1594_v1 = vunpack.c.h.s8.bf16 %v602_v59 }
 0x3f7   : > { %4117 = vmatpush1.bf16.msra.mxu1 %v1642_v2  ;;  %4077 = vmatprep.subr.bf16.mxu0 %v1507_v6  ;;  %v1722_v2 = vunpack.c.h.s8.bf16 %v666_v45  ;;  %v1715_v6 = vunpack.c.l.s8.bf16 %v667_v42 }
 0x3f8   : > { %4118 = vmatprep.subr.bf16.mxu1 %v1635_v3  ;;  %v595_v3 = vld [vmem:[%s7444_s9 + $0x5a8] sm:$0xff] }
 0x3f9   : > { %v1579_v57 = vunpack.c.h.s8.bf16 %v595_v3 }
 0x3fa   : > { %4078 = vmatpush1.bf16.msra.mxu0 %v1506_v14 }
 0x3fb   : > { %4119 = vmatpush1.bf16.msra.mxu1 %v1634_v10  ;;  %4079 = vmatprep.subr.bf16.mxu0 %v1499_v8  ;;  %v1586_v10 = vunpack.c.l.s8.bf16 %v602_v59  ;;  %v1714_v8 = vunpack.c.l.s8.bf16 %v666_v45 }
 0x3fc   : > { %4120 = vmatprep.subr.bf16.mxu1 %v1627_v18 }
 0x3fe   : > { %4080 = vmatpush1.bf16.msra.mxu0 %v1498_v15  ;;  %v594_v15 = vld [vmem:[%s7444_s9 + $0x5a0] sm:$0xff] }
 0x3ff   : > { %4121 = vmatpush1.bf16.msra.mxu1 %v1626_v63  ;;  %4081 = vmatprep.subr.bf16.mxu0 %v1491_v4  ;;  %v658_v63 = vld [vmem:[%s7444_s9 + $0x7a0] sm:$0xff]  ;;  %v1570_v35 = vunpack.c.l.s8.bf16 %v594_v15 }
 0x400   : > { %4122 = vmatprep.subr.bf16.mxu1 %v1619_v39  ;;  %v1706_v51 = vunpack.c.h.s8.bf16 %v658_v63 }
 0x402   : > { %4082 = vmatpush1.bf16.msra.mxu0 %v1490_v17  ;;  %v1571_v17 = vunpack.c.l.s8.bf16 %v595_v3 }
 0x403   : > { %4123 = vmatpush1.bf16.msra.mxu1 %v1618_v41  ;;  %4083 = vmatprep.subr.bf16.mxu0 %v1483_v29  ;;  %v1699_v41 = vunpack.c.l.s8.bf16 %v659_v54  ;;  %v587_v29 = vld [vmem:[%s7444_s9 + $0x568] sm:$0xff] }
 0x404   : > { %4124 = vmatprep.subr.bf16.mxu1 %v1611_v58  ;;  %v651_v58 = vld [vmem:[%s7444_s9 + $0x768] sm:$0xff]  ;;  %v1563_v43 = vunpack.c.h.s8.bf16 %v587_v29  ;;  %v1555_v42 = vunpack.c.l.s8.bf16 %v587_v29 }
 0x405   : > { %v755_v29 = vld [vmem:[%s7444_s9 + $0xaa8] sm:$0xff] }
 0x406   : > { %4084 = vmatpush1.bf16.msra.mxu0 %v1482_v33  ;;  %v1691_v33 = vunpack.c.h.s8.bf16 %v651_v58 }
 0x407   : > { %4125 = vmatpush1.bf16.msra.mxu1 %v1610_v44  ;;  %4085 = vmatprep.subr.bf16.mxu0 %v1475_v36  ;;  %v586_v44 = vld [vmem:[%s7444_s9 + $0x560] sm:$0xff] }
 0x408   : > { %4126 = vmatprep.subr.bf16.mxu1 %v1603_v49  ;;  %v650_v36 = vld [vmem:[%s7444_s9 + $0x760] sm:$0xff]  ;;  %v1562_v49 = vunpack.c.h.s8.bf16 %v586_v44 }
 0x409   : > { %v1690_v5 = vunpack.c.h.s8.bf16 %v650_v36  ;;  %v1682_v59 = vunpack.c.l.s8.bf16 %v650_v36  ;;  %v690_v36 = vld [vmem:[%s7444_s9 + $0x8a0] sm:$0xff] }
 0x40a   : > { %4086 = vmatpush1.bf16.msra.mxu0 %v1474_v46  ;;  %v1683_v46 = vunpack.c.l.s8.bf16 %v651_v58 }
 0x40b   : > { %4127 = vmatpush1.bf16.msra.mxu1 %v1602_v11  ;;  %4087 = vmatprep.subr.bf16.mxu0 %v1595_v31  ;;  %v579_v11 = vld [vmem:[%s7444_s9 + $0x528] sm:$0xff] }
 0x40c   : > { %4128 = vmatprep.subr.bf16.mxu1 %v1723_v9  ;;  %v643_v31 = vld [vmem:[%s7444_s9 + $0x728] sm:$0xff]  ;;  %v1554_v9 = vunpack.c.l.s8.bf16 %v586_v44  ;;  %v1547_v45 = vunpack.c.h.s8.bf16 %v579_v11  ;;  %v1539_v54 = vunpack.c.l.s8.bf16 %v579_v11  ;;  %v1899_v44 = vunpack.c.h.s8.bf16 %v755_v29 }
 0x40e   : > { %v3818_v7 = vpop.f32.mrf.mxu1  ;;  %4088 = vmatpush2.bf16.msra.mxu0 %v1594_v1  ;;  %v1675_v1 = vunpack.c.h.s8.bf16 %v643_v31 }
 0x40f   : > { %v8203_v14 = vadd.f32 %v3818_v7, %v8179_v55  ;;  %4129 = vmatpush2.bf16.msra.mxu1 %v1722_v2  ;;  %4089 = vmatprep.subr.bf16.mxu0 %v1587_v0  ;;  %v1578_v55 = vunpack.c.h.s8.bf16 %v594_v15  ;;  %v578_v2 = vld [vmem:[%s7444_s9 + $0x520] sm:$0xff]  ;;  %v1667_v7 = vunpack.c.l.s8.bf16 %v643_v31 }
 0x410   : > { %v3820_v18 = vpop.f32.mrf.mxu1  ;;  %4130 = vmatprep.subr.bf16.mxu1 %v1715_v6  ;;  %v642_v0 = vld [vmem:[%s7444_s9 + $0x720] sm:$0xff]  ;;  %v1546_v6 = vunpack.c.h.s8.bf16 %v578_v2 }
 0x411   : > { %v8208_v4 = vadd.f32 %v3820_v18, %v8184_v60  ;;  %v1698_v60 = vunpack.c.l.s8.bf16 %v658_v63  ;;  %v1674_v3 = vunpack.c.h.s8.bf16 %v642_v0  ;;  %v1538_v18 = vunpack.c.l.s8.bf16 %v578_v2  ;;  %v698_v63 = vld [vmem:[%s7444_s9 + $0x8e0] sm:$0xff] }
 0x412   : > { %v3822_v39 = vpop.f32.mrf.mxu1  ;;  %4090 = vmatpush2.bf16.msra.mxu0 %v1586_v10  ;;  %v699_v10 = vld [vmem:[%s7444_s9 + $0x8e8] sm:$0xff] }
 0x413   : > { %4131 = vmatpush2.bf16.msra.mxu1 %v1714_v8  ;;  %4091 = vmatprep.subr.bf16.mxu0 %v1579_v57  ;;  %v763_v8 = vld [vmem:[%s7444_s9 + $0xae8] sm:$0xff]  ;;  %v1666_v57 = vunpack.c.l.s8.bf16 %v642_v0  ;;  %v762_v39 = vld [vmem:[%s7444_s9 + $0xae0] sm:$0xff] }
 0x414   : > { %v3823_v16 = vpop.f32.mrf.mxu1  ;;  %4132 = vmatprep.subr.bf16.mxu1 %v1707_v13  ;;  %v1787_v13 = vunpack.c.h.s8.bf16 %v699_v10  ;;  %v1915_v15 = vunpack.c.h.s8.bf16 %v763_v8 }
 0x415   : > { %v1779_v16 = vunpack.c.l.s8.bf16 %v699_v10 }
 0x416   : > { %4092 = vmatpush2.bf16.msra.mxu0 %v1578_v55  ;;  %v1786_v55 = vunpack.c.h.s8.bf16 %v698_v63 }
 0x417   : > { %4133 = vmatpush2.bf16.msra.mxu1 %v1706_v51  ;;  %4093 = vmatprep.subr.bf16.mxu0 %v1571_v17  ;;  %v1914_v51 = vunpack.c.h.s8.bf16 %v762_v39  ;;  %v1907_v17 = vunpack.c.l.s8.bf16 %v763_v8 }
 0x418   : > { %4134 = vmatprep.subr.bf16.mxu1 %v1699_v41  ;;  %v691_v41 = vld [vmem:[%s7444_s9 + $0x8a8] sm:$0xff] }
 0x419   : > { %v1763_v31 = vunpack.c.l.s8.bf16 %v691_v41 }
 0x41a   : > { %4094 = vmatpush2.bf16.msra.mxu0 %v1570_v35  ;;  %v1778_v35 = vunpack.c.l.s8.bf16 %v698_v63 }
 0x41b   : > { %4135 = vmatpush2.bf16.msra.mxu1 %v1698_v60  ;;  %4095 = vmatprep.subr.bf16.mxu0 %v1563_v43  ;;  %v1906_v60 = vunpack.c.l.s8.bf16 %v762_v39 }
 0x41c   : > { %4136 = vmatprep.subr.bf16.mxu1 %v1691_v33  ;;  %v1771_v33 = vunpack.c.h.s8.bf16 %v691_v41 }
 0x41e   : > { %4096 = vmatpush2.bf16.msra.mxu0 %v1562_v49  ;;  %v754_v49 = vld [vmem:[%s7444_s9 + $0xaa0] sm:$0xff] }
 0x41f   : > { %4137 = vmatpush2.bf16.msra.mxu1 %v1690_v5  ;;  %4097 = vmatprep.subr.bf16.mxu0 %v1555_v42  ;;  %v1770_v42 = vunpack.c.h.s8.bf16 %v690_v36  ;;  %v1890_v2 = vunpack.c.l.s8.bf16 %v754_v49 }
 0x420   : > { %4138 = vmatprep.subr.bf16.mxu1 %v1683_v46  ;;  %v1898_v46 = vunpack.c.h.s8.bf16 %v754_v49 }
 0x422   : > { %4098 = vmatpush2.bf16.msra.mxu0 %v1554_v9  ;;  %v1891_v9 = vunpack.c.l.s8.bf16 %v755_v29 }
 0x423   : > { %4139 = vmatpush2.bf16.msra.mxu1 %v1682_v59  ;;  %4099 = vmatprep.subr.bf16.mxu0 %v1547_v45  ;;  %v683_v59 = vld [vmem:[%s7444_s9 + $0x868] sm:$0xff] }
 0x424   : > { %4140 = vmatprep.subr.bf16.mxu1 %v1675_v1  ;;  %v747_v45 = vld [vmem:[%s7444_s9 + $0xa68] sm:$0xff]  ;;  %v1762_v1 = vunpack.c.l.s8.bf16 %v690_v36  ;;  %v1755_v0 = vunpack.c.h.s8.bf16 %v683_v59  ;;  %v1747_v8 = vunpack.c.l.s8.bf16 %v683_v59 }
 0x426   : > { %4100 = vmatpush2.bf16.msra.mxu0 %v1546_v6  ;;  %v1883_v6 = vunpack.c.h.s8.bf16 %v747_v45 }
 0x427   : > { %4141 = vmatpush2.bf16.msra.mxu1 %v1674_v3  ;;  %4101 = vmatprep.subr.bf16.mxu0 %v1539_v54  ;;  %v682_v3 = vld [vmem:[%s7444_s9 + $0x860] sm:$0xff] }
 0x428   : > { %4142 = vmatprep.subr.bf16.mxu1 %v1667_v7  ;;  %v746_v54 = vld [vmem:[%s7444_s9 + $0xa60] sm:$0xff]  ;;  %v1754_v7 = vunpack.c.h.s8.bf16 %v682_v3 }
 0x429   : > { %v1882_v10 = vunpack.c.h.s8.bf16 %v746_v54  ;;  %v1874_v63 = vunpack.c.l.s8.bf16 %v746_v54 }
 0x42a   : > { %4102 = vmatpush2.bf16.msra.mxu0 %v1538_v18  ;;  %v1875_v18 = vunpack.c.l.s8.bf16 %v747_v45  ;;  %v723_v45 = vld [vmem:[%s7444_s9 + $0x9a8] sm:$0xff] }
 0x42b   : > { %4143 = vmatpush2.bf16.msra.mxu1 %v1666_v57  ;;  %4153 = vmatprep.subr.bf16.mxu0 %v1787_v13  ;;  %v675_v57 = vld [vmem:[%s7444_s9 + $0x828] sm:$0xff]  ;;  %v1835_v54 = vunpack.c.h.s8.bf16 %v723_v45 }
 0x42c   : > { %4194 = vmatprep.subr.bf16.mxu1 %v1915_v15  ;;  %v739_v13 = vld [vmem:[%s7444_s9 + $0xa28] sm:$0xff]  ;;  %v1746_v15 = vunpack.c.l.s8.bf16 %v682_v3  ;;  %v1739_v39 = vunpack.c.h.s8.bf16 %v675_v57  ;;  %v1731_v29 = vunpack.c.l.s8.bf16 %v675_v57 }
 0x42d   : > { %v8224_v58 = vpop.f32.mrf.mxu0  ;;  %4104 = vmatmul.mubr.bf16.vlgmr.msra.gmra.mxu0 %v7582_v27 }
 0x42e   : > { %4145 = vmatmul.mubr.bf16.vlgmr.msra.gmra.mxu1 %v7586_v28  ;;  %4154 = vmatpush1.bf16.msra.mxu0 %v1786_v55  ;;  %v1867_v55 = vunpack.c.h.s8.bf16 %v739_v13 }
 0x42f   : > { %4195 = vmatpush1.bf16.msra.mxu1 %v1914_v51  ;;  %v8228_v43 = vpop.f32.mrf.mxu0  ;;  %4155 = vmatprep.subr.bf16.mxu0 %v1779_v16  ;;  %v674_v51 = vld [vmem:[%s7444_s9 + $0x820] sm:$0xff] }
 0x430   : > { %4196 = vmatprep.subr.bf16.mxu1 %v1907_v17  ;;  %4185 = vmatprep.mubr.bf16.mxu0 %v7598_v50  ;;  %v738_v16 = vld [vmem:[%s7444_s9 + $0xa20] sm:$0xff]  ;;  %v1738_v17 = vunpack.c.h.s8.bf16 %v674_v51 }
 0x431   : > { %4226 = vmatprep.mubr.bf16.mxu1 %v7602_v40  ;;  %v3863_v5 = vpop.f32.mrf.mxu0  ;;  %v1866_v41 = vunpack.c.h.s8.bf16 %v738_v16  ;;  %v1858_v36 = vunpack.c.l.s8.bf16 %v738_v16 }
 0x432   : > { %4156 = vmatpush1.bf16.msra.mxu0 %v1778_v35  ;;  %v1859_v35 = vunpack.c.l.s8.bf16 %v739_v13 }
 0x433   : > { %4197 = vmatpush1.bf16.msra.mxu1 %v1906_v60  ;;  %v3864_v11 = vpop.f32.mrf.mxu0  ;;  %4157 = vmatprep.subr.bf16.mxu0 %v1771_v33  ;;  %v731_v60 = vld [vmem:[%s7444_s9 + $0x9e8] sm:$0xff] }
 0x434   : > { %4198 = vmatprep.subr.bf16.mxu1 %v1899_v44  ;;  %v795_v33 = vld [vmem:[%s7444_s9 + $0xbe8] sm:$0xff]  ;;  %v1730_v44 = vunpack.c.l.s8.bf16 %v674_v51  ;;  %v1851_v49 = vunpack.c.h.s8.bf16 %v731_v60 }
 0x435   : > { %v1979_v5 = vunpack.c.h.s8.bf16 %v795_v33  ;;  %v1971_v59 = vunpack.c.l.s8.bf16 %v795_v33  ;;  %v779_v51 = vld [vmem:[%s7444_s9 + $0xb68] sm:$0xff] }
 0x436   : > { %4158 = vmatpush1.bf16.msra.mxu0 %v1770_v42  ;;  %v730_v42 = vld [vmem:[%s7444_s9 + $0x9e0] sm:$0xff] }
 0x437   : > { %4199 = vmatpush1.bf16.msra.mxu1 %v1898_v46  ;;  %4159 = vmatprep.subr.bf16.mxu0 %v1763_v31  ;;  %v794_v46 = vld [vmem:[%s7444_s9 + $0xbe0] sm:$0xff]  ;;  %v1850_v11 = vunpack.c.h.s8.bf16 %v730_v42 }
 0x438   : > { %4200 = vmatprep.subr.bf16.mxu1 %v1891_v9  ;;  %v1978_v31 = vunpack.c.h.s8.bf16 %v794_v46  ;;  %v1843_v9 = vunpack.c.l.s8.bf16 %v731_v60  ;;  %v778_v60 = vld [vmem:[%s7444_s9 + $0xb60] sm:$0xff] }
 0x43a   : > { %4160 = vmatpush1.bf16.msra.mxu0 %v1762_v1  ;;  %v787_v1 = vld [vmem:[%s7444_s9 + $0xba8] sm:$0xff] }
 0x43b   : > { %4201 = vmatpush1.bf16.msra.mxu1 %v1890_v2  ;;  %4161 = vmatprep.subr.bf16.mxu0 %v1755_v0  ;;  %v1842_v0 = vunpack.c.l.s8.bf16 %v730_v42  ;;  %v771_v42 = vld [vmem:[%s7444_s9 + $0xb28] sm:$0xff] }
 0x43c   : > { %4202 = vmatprep.subr.bf16.mxu1 %v1883_v6  ;;  %v1970_v6 = vunpack.c.l.s8.bf16 %v794_v46 }
 0x43e   : > { %4162 = vmatpush1.bf16.msra.mxu0 %v1754_v7  ;;  %v1963_v7 = vunpack.c.h.s8.bf16 %v787_v1 }
 0x43f   : > { %4203 = vmatpush1.bf16.msra.mxu1 %v1882_v10  ;;  %4163 = vmatprep.subr.bf16.mxu0 %v1747_v8  ;;  %v722_v10 = vld [vmem:[%s7444_s9 + $0x9a0] sm:$0xff] }
 0x440   : > { %4204 = vmatprep.subr.bf16.mxu1 %v1875_v18  ;;  %v786_v8 = vld [vmem:[%s7444_s9 + $0xba0] sm:$0xff]  ;;  %v1834_v57 = vunpack.c.h.s8.bf16 %v722_v10  ;;  %v1826_v16 = vunpack.c.l.s8.bf16 %v722_v10  ;;  %v891_v10 = vld [vmem:[%s7444_s9 + $0xee8] sm:$0xff] }
 0x441   : > { %v1962_v13 = vunpack.c.h.s8.bf16 %v786_v8 }
 0x442   : > { %4164 = vmatpush1.bf16.msra.mxu0 %v1746_v15 }
 0x443   : > { %4205 = vmatpush1.bf16.msra.mxu1 %v1874_v63  ;;  %4165 = vmatprep.subr.bf16.mxu0 %v1739_v39  ;;  %v1827_v63 = vunpack.c.l.s8.bf16 %v723_v45  ;;  %v1955_v39 = vunpack.c.l.s8.bf16 %v787_v1  ;;  %v770_v45 = vld [vmem:[%s7444_s9 + $0xb20] sm:$0xff] }
 0x444   : > { %4206 = vmatprep.subr.bf16.mxu1 %v1867_v55  ;;  %v715_v55 = vld [vmem:[%s7444_s9 + $0x968] sm:$0xff] }
 0x446   : > { %4166 = vmatpush1.bf16.msra.mxu0 %v1738_v17  ;;  %v1954_v17 = vunpack.c.l.s8.bf16 %v786_v8 }
 0x447   : > { %4207 = vmatpush1.bf16.msra.mxu1 %v1866_v41  ;;  %4167 = vmatprep.subr.bf16.mxu0 %v1731_v29  ;;  %v1819_v41 = vunpack.c.h.s8.bf16 %v715_v55  ;;  %v1947_v29 = vunpack.c.h.s8.bf16 %v779_v51 }
 0x448   : > { %4208 = vmatprep.subr.bf16.mxu1 %v1859_v35  ;;  %v714_v35 = vld [vmem:[%s7444_s9 + $0x960] sm:$0xff] }
 0x449   : > { %v1818_v33 = vunpack.c.h.s8.bf16 %v714_v35  ;;  %v1810_v46 = vunpack.c.l.s8.bf16 %v714_v35  ;;  %v819_v35 = vld [vmem:[%s7444_s9 + $0xca8] sm:$0xff] }
 0x44a   : > { %4168 = vmatpush1.bf16.msra.mxu0 %v1730_v44  ;;  %v1946_v44 = vunpack.c.h.s8.bf16 %v778_v60 }
 0x44b   : > { %4209 = vmatpush1.bf16.msra.mxu1 %v1858_v36  ;;  %4169 = vmatprep.subr.bf16.mxu0 %v1851_v49  ;;  %v1811_v36 = vunpack.c.l.s8.bf16 %v715_v55  ;;  %v1939_v49 = vunpack.c.l.s8.bf16 %v779_v51 }
 0x44c   : > { %4210 = vmatprep.subr.bf16.mxu1 %v1979_v5  ;;  %v707_v5 = vld [vmem:[%s7444_s9 + $0x928] sm:$0xff] }
 0x44e   : > { %v8248_v2 = vpop.f32.mrf.mxu1  ;;  %4170 = vmatpush2.bf16.msra.mxu0 %v1850_v11  ;;  %v1938_v11 = vunpack.c.l.s8.bf16 %v778_v60  ;;  %v883_v60 = vld [vmem:[%s7444_s9 + $0xea8] sm:$0xff] }
 0x44f   : > { %4211 = vmatpush2.bf16.msra.mxu1 %v1978_v31  ;;  %4171 = vmatprep.subr.bf16.mxu0 %v1843_v9  ;;  %v1803_v31 = vunpack.c.h.s8.bf16 %v707_v5  ;;  %v1931_v9 = vunpack.c.h.s8.bf16 %v771_v42 }
 0x450   : > { %v8250_v3 = vpop.f32.mrf.mxu1  ;;  %4212 = vmatprep.subr.bf16.mxu1 %v1971_v59  ;;  %v706_v59 = vld [vmem:[%s7444_s9 + $0x920] sm:$0xff] }
 0x451   : > { %v1802_v1 = vunpack.c.h.s8.bf16 %v706_v59  ;;  %v1794_v8 = vunpack.c.l.s8.bf16 %v706_v59 }
 0x452   : > { %v3904_v18 = vpop.f32.mrf.mxu1  ;;  %4172 = vmatpush2.bf16.msra.mxu0 %v1842_v0  ;;  %v1930_v0 = vunpack.c.h.s8.bf16 %v770_v45 }
 0x453   : > { %4213 = vmatpush2.bf16.msra.mxu1 %v1970_v6  ;;  %4173 = vmatprep.subr.bf16.mxu0 %v1835_v54  ;;  %v1795_v6 = vunpack.c.l.s8.bf16 %v707_v5  ;;  %v1923_v54 = vunpack.c.l.s8.bf16 %v771_v42  ;;  %v1922_v18 = vunpack.c.l.s8.bf16 %v770_v45  ;;  %v2027_v5 = vunpack.c.h.s8.bf16 %v819_v35 }
 0x454   : > { %v3905_v15 = vpop.f32.mrf.mxu1  ;;  %4214 = vmatprep.subr.bf16.mxu1 %v1963_v7  ;;  %v827_v7 = vld [vmem:[%s7444_s9 + $0xce8] sm:$0xff]  ;;  %v2155_v42 = vunpack.c.h.s8.bf16 %v883_v60 }
 0x455   : > { %v826_v15 = vld [vmem:[%s7444_s9 + $0xce0] sm:$0xff] }
 0x456   : > { %4174 = vmatpush2.bf16.msra.mxu0 %v1834_v57  ;;  %v2043_v57 = vunpack.c.h.s8.bf16 %v827_v7  ;;  %v2042_v55 = vunpack.c.h.s8.bf16 %v826_v15 }
 0x457   : > { %4215 = vmatpush2.bf16.msra.mxu1 %v1962_v13  ;;  %4175 = vmatprep.subr.bf16.mxu0 %v1827_v63  ;;  %v2171_v13 = vunpack.c.h.s8.bf16 %v891_v10  ;;  %v890_v63 = vld [vmem:[%s7444_s9 + $0xee0] sm:$0xff] }
 0x458   : > { %4216 = vmatprep.subr.bf16.mxu1 %v1955_v39  ;;  %v3860_v39 = vadd.f32 %v8224_v58, %v8203_v14  ;;  %v2170_v51 = vunpack.c.h.s8.bf16 %v890_v63 }
 0x45a   : > { %4176 = vmatpush2.bf16.msra.mxu0 %v1826_v16  ;;  %v2035_v16 = vunpack.c.l.s8.bf16 %v827_v7 }
 0x45b   : > { %4217 = vmatpush2.bf16.msra.mxu1 %v1954_v17  ;;  %4177 = vmatprep.subr.bf16.mxu0 %v1819_v41  ;;  %v2163_v17 = vunpack.c.l.s8.bf16 %v891_v10  ;;  %v3862_v41 = vadd.f32 %v8228_v43, %v8208_v4  ;;  %v2816_v4 = vld [vmem:[#allocation2 + $0x18] sm:$0xff] }
 0x45c   : > { %4218 = vmatprep.subr.bf16.mxu1 %v1947_v29  ;;  %v3901_v29 = vadd.f32 %v8248_v2, %v3860_v39 }
 0x45d   : > { %v3903_v14 = vadd.f32 %v8250_v3, %v3862_v41  ;;  %v2817_v3 = vld [vmem:[#allocation2 + $0x10] sm:$0xff] }
 0x45e   : > { %4178 = vmatpush2.bf16.msra.mxu0 %v1818_v33 }
 0x45f   : > { %4219 = vmatpush2.bf16.msra.mxu1 %v1946_v44  ;;  %4179 = vmatprep.subr.bf16.mxu0 %v1811_v36  ;;  %v2034_v36 = vunpack.c.l.s8.bf16 %v826_v15  ;;  %v875_v15 = vld [vmem:[%s7444_s9 + $0xe68] sm:$0xff] }
 0x460   : > { %4220 = vmatprep.subr.bf16.mxu1 %v1939_v49  ;;  %v2162_v49 = vunpack.c.l.s8.bf16 %v890_v63 }
 0x462   : > { %4180 = vmatpush2.bf16.msra.mxu0 %v1810_v46  ;;  %v818_v46 = vld [vmem:[%s7444_s9 + $0xca0] sm:$0xff] }
 0x463   : > { %4221 = vmatpush2.bf16.msra.mxu1 %v1938_v11  ;;  %4181 = vmatprep.subr.bf16.mxu0 %v1803_v31  ;;  %v882_v11 = vld [vmem:[%s7444_s9 + $0xea0] sm:$0xff]  ;;  %v2018_v63 = vunpack.c.l.s8.bf16 %v818_v46 }
 0x464   : > { %4222 = vmatprep.subr.bf16.mxu1 %v1931_v9  ;;  %v2146_v39 = vunpack.c.l.s8.bf16 %v882_v11 }
 0x466   : > { %4182 = vmatpush2.bf16.msra.mxu0 %v1802_v1 }
 0x467   : > { %4223 = vmatpush2.bf16.msra.mxu1 %v1930_v0  ;;  %4183 = vmatprep.subr.bf16.mxu0 %v1795_v6  ;;  %v2026_v6 = vunpack.c.h.s8.bf16 %v818_v46 }
 0x468   : > { %4224 = vmatprep.subr.bf16.mxu1 %v1923_v54  ;;  %v2154_v54 = vunpack.c.h.s8.bf16 %v882_v11  ;;  %v859_v11 = vld [vmem:[%s7444_s9 + $0xde8] sm:$0xff] }
 0x46a   : > { %4184 = vmatpush2.bf16.msra.mxu0 %v1794_v8  ;;  %v2019_v8 = vunpack.c.l.s8.bf16 %v819_v35 }
 0x46b   : > { %4225 = vmatpush2.bf16.msra.mxu1 %v1922_v18  ;;  %4235 = vmatprep.subr.bf16.mxu0 %v2043_v57  ;;  %v2147_v18 = vunpack.c.l.s8.bf16 %v883_v60  ;;  %v2131_v60 = vunpack.c.l.s8.bf16 %v875_v15 }
 0x46c   : > { %4276 = vmatprep.subr.bf16.mxu1 %v2171_v13  ;;  %v811_v13 = vld [vmem:[%s7444_s9 + $0xc68] sm:$0xff] }
 0x46d   : > { %v3941_v33 = vpop.f32.mrf.mxu0  ;;  %4186 = vmatmul.mubr.bf16.vlgmr.msra.gmra.mxu0 %v7640_v19  ;;  %v2003_v35 = vunpack.c.l.s8.bf16 %v811_v13 }
 0x46e   : > { %v3982_v44 = vpop.f32.mrf.mxu1  ;;  %4227 = vmatmul.mubr.bf16.vlgmr.msra.gmra.mxu1 %v7644_v20  ;;  %v3942_v58 = vadd.f32 %v3941_v33, %v3901_v29  ;;  %4236 = vmatpush1.bf16.msra.mxu0 %v2042_v55  ;;  %v2011_v55 = vunpack.c.h.s8.bf16 %v811_v13  ;;  %v803_v33 = vld [vmem:[%s7444_s9 + $0xc28] sm:$0xff] }
 0x46f   : > { %4277 = vmatpush1.bf16.msra.mxu1 %v2170_v51  ;;  %v3943_v43 = vpop.f32.mrf.mxu0  ;;  %4237 = vmatprep.subr.bf16.mxu0 %v2035_v16  ;;  %v2139_v51 = vunpack.c.h.s8.bf16 %v875_v15  ;;  %v810_v16 = vld [vmem:[%s7444_s9 + $0xc60] sm:$0xff] }
 0x470   : > { %v3984_v2 = vpop.f32.mrf.mxu1  ;;  %4278 = vmatprep.subr.bf16.mxu1 %v2163_v17  ;;  %v3983_v31 = vadd.f32 %v3982_v44, %v3942_v58  ;;  %v3944_v9 = vadd.f32 %v3943_v43, %v3903_v14  ;;  %4267 = vmatprep.mubr.bf16.mxu0 %v7656_v30  ;;  %v874_v17 = vld [vmem:[%s7444_s9 + $0xe60] sm:$0xff]  ;;  %v2010_v41 = vunpack.c.h.s8.bf16 %v810_v16  ;;  %v867_v44 = vld [vmem:[%s7444_s9 + $0xe28] sm:$0xff]  ;;  %v2002_v14 = vunpack.c.l.s8.bf16 %v810_v16 }
 0x471   : > { %4308 = vmatprep.mubr.bf16.mxu1 %v7660_v34  ;;  %v3945_v59 = vpop.f32.mrf.mxu0  ;;  %v2138_v29 = vunpack.c.h.s8.bf16 %v874_v17  ;;  %v2130_v58 = vunpack.c.l.s8.bf16 %v874_v17  ;;  %v866_v43 = vld [vmem:[%s7444_s9 + $0xe20] sm:$0xff]  ;;  %v2115_v46 = vunpack.c.l.s8.bf16 %v867_v44 }
 0x472   : > { %v3986_v45 = vpop.f32.mrf.mxu1  ;;  %v5057_v1 = vadd.f32 %v3983_v31, %v2816_v4  ;;  %v3985_v0 = vadd.f32 %v3984_v2, %v3944_v9  ;;  %4238 = vmatpush1.bf16.msra.mxu0 %v2034_v36  ;;  %v1995_v36 = vunpack.c.h.s8.bf16 %v803_v33  ;;  %v802_v4 = vld [vmem:[%s7444_s9 + $0xc20] sm:$0xff]  ;;  %v923_v31 = vld [vmem:[%s7444_s9 + $0xfe8] sm:$0xff]  ;;  %v2107_v59 = vunpack.c.h.s8.bf16 %v859_v11 }
 0x473   : > { %4279 = vmatpush1.bf16.msra.mxu1 %v2162_v49  ;;  %v3946_v7 = vpop.f32.mrf.mxu0  ;;  %4239 = vmatprep.subr.bf16.mxu0 %v2027_v5  ;;  %v2123_v49 = vunpack.c.h.s8.bf16 %v867_v44  ;;  %v1994_v2 = vunpack.c.h.s8.bf16 %v802_v4  ;;  %v2122_v5 = vunpack.c.h.s8.bf16 %v866_v43  ;;  %v1986_v9 = vunpack.c.l.s8.bf16 %v802_v4 }
 0x474   : > { %v3987_v10 = vpop.f32.mrf.mxu1  ;;  %4280 = vmatprep.subr.bf16.mxu1 %v2155_v42  ;;  %5065 = vst [vmem:[#allocation2 + $0x18] sm:$0xff] %v5057_v1  ;;  %v5058_v57 = vadd.f32 %v3985_v0, %v2817_v3  ;;  %v1987_v42 = vunpack.c.l.s8.bf16 %v803_v33  ;;  %v2114_v3 = vunpack.c.l.s8.bf16 %v866_v43  ;;  %v2235_v45 = vunpack.c.h.s8.bf16 %v923_v31  ;;  %v858_v1 = vld [vmem:[%s7444_s9 + $0xde0] sm:$0xff] }
 0x475   : > { %v922_v0 = vld [vmem:[%s7444_s9 + $0xfe0] sm:$0xff]  ;;  %v2099_v7 = vunpack.c.l.s8.bf16 %v859_v11  ;;  %v2227_v10 = vunpack.c.l.s8.bf16 %v923_v31 }
 0x476   : > { %5066 = vst [vmem:[#allocation2 + $0x10] sm:$0xff] %v5058_v57  ;;  %4240 = vmatpush1.bf16.msra.mxu0 %v2026_v6  ;;  %v2106_v6 = vunpack.c.h.s8.bf16 %v858_v1  ;;  %v2098_v57 = vunpack.c.l.s8.bf16 %v858_v1  ;;  %v2226_v13 = vunpack.c.l.s8.bf16 %v922_v0 }
 0x477   : > { %4281 = vmatpush1.bf16.msra.mxu1 %v2154_v54  ;;  %4241 = vmatprep.subr.bf16.mxu0 %v2019_v8  ;;  %v2234_v54 = vunpack.c.h.s8.bf16 %v922_v0  ;;  %v851_v8 = vld [vmem:[%s7444_s9 + $0xda8] sm:$0xff] }
 0x478   : > { %4282 = vmatprep.subr.bf16.mxu1 %v2147_v18  ;;  %v915_v18 = vld [vmem:[%s7444_s9 + $0xfa8] sm:$0xff]  ;;  %v2091_v15 = vunpack.c.h.s8.bf16 %v851_v8  ;;  %v2083_v17 = vunpack.c.l.s8.bf16 %v851_v8 }
 0x47a   : > { %4242 = vmatpush1.bf16.msra.mxu0 %v2018_v63  ;;  %v2219_v63 = vunpack.c.h.s8.bf16 %v915_v18 }
 0x47b   : > { %4283 = vmatpush1.bf16.msra.mxu1 %v2146_v39  ;;  %4243 = vmatprep.subr.bf16.mxu0 %v2011_v55  ;;  %v850_v39 = vld [vmem:[%s7444_s9 + $0xda0] sm:$0xff] }
 0x47c   : > { %4284 = vmatprep.subr.bf16.mxu1 %v2139_v51  ;;  %v914_v55 = vld [vmem:[%s7444_s9 + $0xfa0] sm:$0xff]  ;;  %v2090_v51 = vunpack.c.h.s8.bf16 %v850_v39 }
 0x47d   : > { %v2218_v16 = vunpack.c.h.s8.bf16 %v914_v55  ;;  %v2210_v33 = vunpack.c.l.s8.bf16 %v914_v55 }
 0x47e   : > { %4244 = vmatpush1.bf16.msra.mxu0 %v2010_v41  ;;  %v2211_v41 = vunpack.c.l.s8.bf16 %v915_v18 }
 0x47f   : > { %4285 = vmatpush1.bf16.msra.mxu1 %v2138_v29  ;;  %4245 = vmatprep.subr.bf16.mxu0 %v2003_v35  ;;  %v843_v29 = vld [vmem:[%s7444_s9 + $0xd68] sm:$0xff] }
 0x480   : > { %4286 = vmatprep.subr.bf16.mxu1 %v2131_v60  ;;  %v907_v35 = vld [vmem:[%s7444_s9 + $0xf68] sm:$0xff]  ;;  %v2082_v60 = vunpack.c.l.s8.bf16 %v850_v39  ;;  %v2075_v44 = vunpack.c.h.s8.bf16 %v843_v29  ;;  %v2067_v43 = vunpack.c.l.s8.bf16 %v843_v29 }
 0x482   : > { %4246 = vmatpush1.bf16.msra.mxu0 %v2002_v14  ;;  %v2203_v14 = vunpack.c.h.s8.bf16 %v907_v35 }
 0x483   : > { %4287 = vmatpush1.bf16.msra.mxu1 %v2130_v58  ;;  %4247 = vmatprep.subr.bf16.mxu0 %v1995_v36  ;;  %v842_v58 = vld [vmem:[%s7444_s9 + $0xd60] sm:$0xff] }
 0x484   : > { %4288 = vmatprep.subr.bf16.mxu1 %v2123_v49  ;;  %v906_v36 = vld [vmem:[%s7444_s9 + $0xf60] sm:$0xff]  ;;  %v2074_v49 = vunpack.c.h.s8.bf16 %v842_v58 }
 0x485   : > { %v2202_v4 = vunpack.c.h.s8.bf16 %v906_v36  ;;  %v2194_v11 = vunpack.c.l.s8.bf16 %v906_v36 }
 0x486   : > { %4248 = vmatpush1.bf16.msra.mxu0 %v1994_v2  ;;  %v2195_v2 = vunpack.c.l.s8.bf16 %v907_v35 }
 0x487   : > { %4289 = vmatpush1.bf16.msra.mxu1 %v2122_v5  ;;  %4249 = vmatprep.subr.bf16.mxu0 %v1987_v42  ;;  %v835_v5 = vld [vmem:[%s7444_s9 + $0xd28] sm:$0xff] }
 0x488   : > { %4290 = vmatprep.subr.bf16.mxu1 %v2115_v46  ;;  %v899_v42 = vld [vmem:[%s7444_s9 + $0xf28] sm:$0xff]  ;;  %v2066_v46 = vunpack.c.l.s8.bf16 %v842_v58  ;;  %v2059_v31 = vunpack.c.h.s8.bf16 %v835_v5  ;;  %v2051_v0 = vunpack.c.l.s8.bf16 %v835_v5 }
 0x48a   : > { %4250 = vmatpush1.bf16.msra.mxu0 %v1986_v9  ;;  %v2187_v9 = vunpack.c.h.s8.bf16 %v899_v42 }
 0x48b   : > { %4291 = vmatpush1.bf16.msra.mxu1 %v2114_v3  ;;  %4251 = vmatprep.subr.bf16.mxu0 %v2107_v59  ;;  %v834_v3 = vld [vmem:[%s7444_s9 + $0xd20] sm:$0xff] }
 0x48c   : > { %4292 = vmatprep.subr.bf16.mxu1 %v2235_v45  ;;  %v898_v59 = vld [vmem:[%s7444_s9 + $0xf20] sm:$0xff]  ;;  %v2058_v45 = vunpack.c.h.s8.bf16 %v834_v3 }
 0x48d   : > { %v2186_v1 = vunpack.c.h.s8.bf16 %v898_v59  ;;  %v2178_v8 = vunpack.c.l.s8.bf16 %v898_v59  ;;  %v939_v59 = vld [vmem:[%s7444_s9 + $0x1068] sm:$0xff] }
 0x48e   : > { %4252 = vmatpush2.bf16.msra.mxu0 %v2106_v6  ;;  %v2179_v6 = vunpack.c.l.s8.bf16 %v899_v42 }
 0x48f   : > { %4293 = vmatpush2.bf16.msra.mxu1 %v2234_v54  ;;  %4253 = vmatprep.subr.bf16.mxu0 %v2099_v7  ;;  %v955_v54 = vld [vmem:[%s7444_s9 + $0x10e8] sm:$0xff] }
 0x490   : > { %4294 = vmatprep.subr.bf16.mxu1 %v2227_v10  ;;  %v1019_v7 = vld [vmem:[%s7444_s9 + $0x12e8] sm:$0xff]  ;;  %v2050_v10 = vunpack.c.l.s8.bf16 %v834_v3  ;;  %v2299_v18 = vunpack.c.h.s8.bf16 %v955_v54  ;;  %v2291_v55 = vunpack.c.l.s8.bf16 %v955_v54 }
 0x492   : > { %4254 = vmatpush2.bf16.msra.mxu0 %v2098_v57  ;;  %v2427_v57 = vunpack.c.h.s8.bf16 %v1019_v7 }
 0x493   : > { %4295 = vmatpush2.bf16.msra.mxu1 %v2226_v13  ;;  %4255 = vmatprep.subr.bf16.mxu0 %v2091_v15  ;;  %v954_v13 = vld [vmem:[%s7444_s9 + $0x10e0] sm:$0xff] }
 0x494   : > { %4296 = vmatprep.subr.bf16.mxu1 %v2219_v63  ;;  %v1018_v15 = vld [vmem:[%s7444_s9 + $0x12e0] sm:$0xff]  ;;  %v2298_v63 = vunpack.c.h.s8.bf16 %v954_v13 }
 0x495   : > { %v2426_v39 = vunpack.c.h.s8.bf16 %v1018_v15 }
 0x496   : > { %4256 = vmatpush2.bf16.msra.mxu0 %v2090_v51  ;;  %v2419_v51 = vunpack.c.l.s8.bf16 %v1019_v7  ;;  %v938_v7 = vld [vmem:[%s7444_s9 + $0x1060] sm:$0xff] }
 0x497   : > { %4297 = vmatpush2.bf16.msra.mxu1 %v2218_v16  ;;  %4257 = vmatprep.subr.bf16.mxu0 %v2083_v17  ;;  %v947_v16 = vld [vmem:[%s7444_s9 + $0x10a8] sm:$0xff] }
 0x498   : > { %4298 = vmatprep.subr.bf16.mxu1 %v2211_v41  ;;  %v1011_v17 = vld [vmem:[%s7444_s9 + $0x12a8] sm:$0xff]  ;;  %v2283_v58 = vunpack.c.h.s8.bf16 %v947_v16 }
 0x499   : > { %v2411_v36 = vunpack.c.h.s8.bf16 %v1011_v17  ;;  %v2403_v3 = vunpack.c.l.s8.bf16 %v1011_v17  ;;  %v930_v17 = vld [vmem:[%s7444_s9 + $0x1020] sm:$0xff] }
 0x49a   : > { %4258 = vmatpush2.bf16.msra.mxu0 %v2082_v60  ;;  %v2290_v60 = vunpack.c.l.s8.bf16 %v954_v13 }
 0x49b   : > { %4299 = vmatpush2.bf16.msra.mxu1 %v2210_v33  ;;  %4259 = vmatprep.subr.bf16.mxu0 %v2075_v44  ;;  %v2418_v33 = vunpack.c.l.s8.bf16 %v1018_v15  ;;  %v931_v15 = vld [vmem:[%s7444_s9 + $0x1028] sm:$0xff] }
 0x49c   : > { %4300 = vmatprep.subr.bf16.mxu1 %v2203_v14 }
 0x49e   : > { %4260 = vmatpush2.bf16.msra.mxu0 %v2074_v49  ;;  %v946_v49 = vld [vmem:[%s7444_s9 + $0x10a0] sm:$0xff] }
 0x49f   : > { %4301 = vmatpush2.bf16.msra.mxu1 %v2202_v4  ;;  %4261 = vmatprep.subr.bf16.mxu0 %v2067_v43  ;;  %v1010_v4 = vld [vmem:[%s7444_s9 + $0x12a0] sm:$0xff]  ;;  %v2282_v42 = vunpack.c.h.s8.bf16 %v946_v49 }
 0x4a0   : > { %4302 = vmatprep.subr.bf16.mxu1 %v2195_v2 }
 0x4a2   : > { %4262 = vmatpush2.bf16.msra.mxu0 %v2066_v46  ;;  %v2410_v46 = vunpack.c.h.s8.bf16 %v1010_v4 }
 0x4a3   : > { %4303 = vmatpush2.bf16.msra.mxu1 %v2194_v11  ;;  %4263 = vmatprep.subr.bf16.mxu0 %v2059_v31 }
 0x4a4   : > { %4304 = vmatprep.subr.bf16.mxu1 %v2187_v9  ;;  %v2275_v9 = vunpack.c.l.s8.bf16 %v947_v16 }
 0x4a6   : > { %4264 = vmatpush2.bf16.msra.mxu0 %v2058_v45  ;;  %v1003_v45 = vld [vmem:[%s7444_s9 + $0x1268] sm:$0xff] }
 0x4a7   : > { %4305 = vmatpush2.bf16.msra.mxu1 %v2186_v1  ;;  %4265 = vmatprep.subr.bf16.mxu0 %v2051_v0  ;;  %v2274_v1 = vunpack.c.l.s8.bf16 %v946_v49  ;;  %v2402_v0 = vunpack.c.l.s8.bf16 %v1010_v4  ;;  %v2395_v54 = vunpack.c.h.s8.bf16 %v1003_v45  ;;  %v2387_v13 = vunpack.c.l.s8.bf16 %v1003_v45 }
 0x4a8   : > { %4306 = vmatprep.subr.bf16.mxu1 %v2179_v6  ;;  %v2267_v6 = vunpack.c.h.s8.bf16 %v939_v59 }
 0x4aa   : > { %4266 = vmatpush2.bf16.msra.mxu0 %v2050_v10  ;;  %v1002_v10 = vld [vmem:[%s7444_s9 + $0x1260] sm:$0xff] }
 0x4ab   : > { %4307 = vmatpush2.bf16.msra.mxu1 %v2178_v8  ;;  %4317 = vmatprep.subr.bf16.mxu0 %v2299_v18  ;;  %v2266_v8 = vunpack.c.h.s8.bf16 %v938_v7  ;;  %v2394_v18 = vunpack.c.h.s8.bf16 %v1002_v10 }
 0x4ac   : > { %4358 = vmatprep.subr.bf16.mxu1 %v2427_v57  ;;  %v2259_v57 = vunpack.c.l.s8.bf16 %v939_v59  ;;  %v1043_v59 = vld [vmem:[%s7444_s9 + $0x13a8] sm:$0xff] }
 0x4ad   : > { %v4023_v41 = vpop.f32.mrf.mxu0  ;;  %4268 = vmatmul.mubr.bf16.vlgmr.msra.gmra.mxu0 %v7698_v23 }
 0x4ae   : > { %v4064_v29 = vpop.f32.mrf.mxu1  ;;  %4309 = vmatmul.mubr.bf16.vlgmr.msra.gmra.mxu1 %v7702_v24  ;;  %4318 = vmatpush1.bf16.msra.mxu0 %v2298_v63  ;;  %v995_v63 = vld [vmem:[%s7444_s9 + $0x1228] sm:$0xff] }
 0x4af   : > { %v8312_v35 = vadd.f32 %v4064_v29, %v4023_v41  ;;  %4359 = vmatpush1.bf16.msra.mxu1 %v2426_v39  ;;  %v4025_v44 = vpop.f32.mrf.mxu0  ;;  %4319 = vmatprep.subr.bf16.mxu0 %v2291_v55  ;;  %v2258_v39 = vunpack.c.l.s8.bf16 %v938_v7  ;;  %v2386_v55 = vunpack.c.l.s8.bf16 %v1002_v10  ;;  %v2379_v16 = vunpack.c.h.s8.bf16 %v995_v63  ;;  %v994_v41 = vld [vmem:[%s7444_s9 + $0x1220] sm:$0xff] }
 0x4b0   : > { %v4066_v14 = vpop.f32.mrf.mxu1  ;;  %4360 = vmatprep.subr.bf16.mxu1 %v2419_v51  ;;  %4349 = vmatprep.mubr.bf16.mxu0 %v7714_v21  ;;  %v2251_v51 = vunpack.c.h.s8.bf16 %v931_v15  ;;  %v2250_v29 = vunpack.c.h.s8.bf16 %v930_v17  ;;  %v2370_v49 = vunpack.c.l.s8.bf16 %v994_v41  ;;  %v1042_v7 = vld [vmem:[%s7444_s9 + $0x13a0] sm:$0xff] }
 0x4b1   : > { %v8316_v43 = vadd.f32 %v4066_v14, %v4025_v44  ;;  %4390 = vmatprep.mubr.bf16.mxu1 %v7718_v22  ;;  %v4027_v2 = vpop.f32.mrf.mxu0  ;;  %v2371_v44 = vunpack.c.l.s8.bf16 %v995_v63  ;;  %v987_v14 = vld [vmem:[%s7444_s9 + $0x11e8] sm:$0xff] }
 0x4b2   : > { %v4068_v5 = vpop.f32.mrf.mxu1  ;;  %4320 = vmatpush1.bf16.msra.mxu0 %v2290_v60  ;;  %v2378_v60 = vunpack.c.h.s8.bf16 %v994_v41  ;;  %v2363_v4 = vunpack.c.h.s8.bf16 %v987_v14 }
 0x4b3   : > { %4361 = vmatpush1.bf16.msra.mxu1 %v2418_v33  ;;  %v4028_v11 = vpop.f32.mrf.mxu0  ;;  %4321 = vmatprep.subr.bf16.mxu0 %v2283_v58  ;;  %v2243_v33 = vunpack.c.l.s8.bf16 %v931_v15  ;;  %v1051_v58 = vld [vmem:[%s7444_s9 + $0x13e8] sm:$0xff]  ;;  %v986_v5 = vld [vmem:[%s7444_s9 + $0x11e0] sm:$0xff] }
 0x4b4   : > { %v4069_v31 = vpop.f32.mrf.mxu1  ;;  %4362 = vmatprep.subr.bf16.mxu1 %v2411_v36  ;;  %v2242_v36 = vunpack.c.l.s8.bf16 %v930_v17  ;;  %v2491_v2 = vunpack.c.h.s8.bf16 %v1051_v58  ;;  %v2354_v45 = vunpack.c.l.s8.bf16 %v986_v5  ;;  %v1035_v15 = vld [vmem:[%s7444_s9 + $0x1368] sm:$0xff]  ;;  %v1034_v17 = vld [vmem:[%s7444_s9 + $0x1360] sm:$0xff] }
 0x4b5   : > { %v2355_v31 = vunpack.c.l.s8.bf16 %v987_v14  ;;  %v1027_v14 = vld [vmem:[%s7444_s9 + $0x1328] sm:$0xff] }
 0x4b6   : > { %4322 = vmatpush1.bf16.msra.mxu0 %v2282_v42  ;;  %v1050_v42 = vld [vmem:[%s7444_s9 + $0x13e0] sm:$0xff] }
 0x4b7   : > { %4363 = vmatpush1.bf16.msra.mxu1 %v2410_v46  ;;  %4323 = vmatprep.subr.bf16.mxu0 %v2275_v9  ;;  %v2362_v46 = vunpack.c.h.s8.bf16 %v986_v5  ;;  %v2490_v11 = vunpack.c.h.s8.bf16 %v1050_v42  ;;  %v2483_v9 = vunpack.c.l.s8.bf16 %v1051_v58  ;;  %v1026_v5 = vld [vmem:[%s7444_s9 + $0x1320] sm:$0xff] }
 0x4b8   : > { %4364 = vmatprep.subr.bf16.mxu1 %v2403_v3  ;;  %v979_v3 = vld [vmem:[%s7444_s9 + $0x11a8] sm:$0xff] }
 0x4ba   : > { %4324 = vmatpush1.bf16.msra.mxu0 %v2274_v1  ;;  %v2482_v1 = vunpack.c.l.s8.bf16 %v1050_v42 }
 0x4bb   : > { %4365 = vmatpush1.bf16.msra.mxu1 %v2402_v0  ;;  %4325 = vmatprep.subr.bf16.mxu0 %v2267_v6  ;;  %v2347_v0 = vunpack.c.h.s8.bf16 %v979_v3  ;;  %v2475_v6 = vunpack.c.h.s8.bf16 %v1043_v59 }
 0x4bc   : > { %4366 = vmatprep.subr.bf16.mxu1 %v2395_v54  ;;  %v978_v54 = vld [vmem:[%s7444_s9 + $0x11a0] sm:$0xff] }
 0x4bd   : > { %v2346_v10 = vunpack.c.h.s8.bf16 %v978_v54  ;;  %v2338_v63 = vunpack.c.l.s8.bf16 %v978_v54  ;;  %v1146_v54 = vld [vmem:[%s7444_s9 + $0x16e0] sm:$0xff] }
 0x4be   : > { %4326 = vmatpush1.bf16.msra.mxu0 %v2266_v8  ;;  %v2474_v8 = vunpack.c.h.s8.bf16 %v1042_v7 }
 0x4bf   : > { %4367 = vmatpush1.bf16.msra.mxu1 %v2394_v18  ;;  %4327 = vmatprep.subr.bf16.mxu0 %v2259_v57  ;;  %v2339_v18 = vunpack.c.l.s8.bf16 %v979_v3  ;;  %v2467_v57 = vunpack.c.l.s8.bf16 %v1043_v59  ;;  %v1147_v3 = vld [vmem:[%s7444_s9 + $0x16e8] sm:$0xff] }
 0x4c0   : > { %4368 = vmatprep.subr.bf16.mxu1 %v2387_v13  ;;  %v971_v13 = vld [vmem:[%s7444_s9 + $0x1168] sm:$0xff] }
 0x4c2   : > { %4328 = vmatpush1.bf16.msra.mxu0 %v2258_v39  ;;  %v2466_v39 = vunpack.c.l.s8.bf16 %v1042_v7 }
 0x4c3   : > { %4369 = vmatpush1.bf16.msra.mxu1 %v2386_v55  ;;  %4329 = vmatprep.subr.bf16.mxu0 %v2251_v51  ;;  %v2331_v55 = vunpack.c.h.s8.bf16 %v971_v13  ;;  %v2459_v51 = vunpack.c.h.s8.bf16 %v1035_v15 }
 0x4c4   : > { %4370 = vmatprep.subr.bf16.mxu1 %v2379_v16  ;;  %v970_v16 = vld [vmem:[%s7444_s9 + $0x1160] sm:$0xff] }
 0x4c5   : > { %v2330_v41 = vunpack.c.h.s8.bf16 %v970_v16  ;;  %v2322_v58 = vunpack.c.l.s8.bf16 %v970_v16 }
 0x4c6   : > { %4330 = vmatpush1.bf16.msra.mxu0 %v2250_v29  ;;  %v2458_v29 = vunpack.c.h.s8.bf16 %v1034_v17 }
 0x4c7   : > { %4371 = vmatpush1.bf16.msra.mxu1 %v2378_v60  ;;  %4331 = vmatprep.subr.bf16.mxu0 %v2243_v33  ;;  %v2323_v60 = vunpack.c.l.s8.bf16 %v971_v13  ;;  %v2451_v33 = vunpack.c.l.s8.bf16 %v1035_v15  ;;  %v1139_v13 = vld [vmem:[%s7444_s9 + $0x16a8] sm:$0xff] }
 0x4c8   : > { %4372 = vmatprep.subr.bf16.mxu1 %v2371_v44  ;;  %v963_v44 = vld [vmem:[%s7444_s9 + $0x1128] sm:$0xff] }
 0x4ca   : > { %4332 = vmatpush1.bf16.msra.mxu0 %v2242_v36  ;;  %v2450_v36 = vunpack.c.l.s8.bf16 %v1034_v17 }
 0x4cb   : > { %4373 = vmatpush1.bf16.msra.mxu1 %v2370_v49  ;;  %4333 = vmatprep.subr.bf16.mxu0 %v2363_v4  ;;  %v2315_v49 = vunpack.c.h.s8.bf16 %v963_v44  ;;  %v2443_v4 = vunpack.c.h.s8.bf16 %v1027_v14 }
 0x4cc   : > { %4374 = vmatprep.subr.bf16.mxu1 %v2491_v2  ;;  %v962_v2 = vld [vmem:[%s7444_s9 + $0x1120] sm:$0xff] }
 0x4cd   : > { %v2314_v42 = vunpack.c.h.s8.bf16 %v962_v2  ;;  %v2306_v59 = vunpack.c.l.s8.bf16 %v962_v2 }
 0x4ce   : > { %4334 = vmatpush2.bf16.msra.mxu0 %v2362_v46  ;;  %v2442_v46 = vunpack.c.h.s8.bf16 %v1026_v5 }
 0x4cf   : > { %4375 = vmatpush2.bf16.msra.mxu1 %v2490_v11  ;;  %4335 = vmatprep.subr.bf16.mxu0 %v2355_v31  ;;  %v2307_v11 = vunpack.c.l.s8.bf16 %v963_v44  ;;  %v2435_v31 = vunpack.c.l.s8.bf16 %v1027_v14 }
 0x4d0   : > { %4376 = vmatprep.subr.bf16.mxu1 %v2483_v9  ;;  %v1083_v9 = vld [vmem:[%s7444_s9 + $0x14e8] sm:$0xff] }
 0x4d2   : > { %4336 = vmatpush2.bf16.msra.mxu0 %v2354_v45  ;;  %v2434_v45 = vunpack.c.l.s8.bf16 %v1026_v5 }
 0x4d3   : > { %4377 = vmatpush2.bf16.msra.mxu1 %v2482_v1  ;;  %4337 = vmatprep.subr.bf16.mxu0 %v2347_v0  ;;  %v2555_v1 = vunpack.c.h.s8.bf16 %v1083_v9  ;;  %v2683_v0 = vunpack.c.h.s8.bf16 %v1147_v3 }
 0x4d4   : > { %4378 = vmatprep.subr.bf16.mxu1 %v2475_v6  ;;  %v1082_v6 = vld [vmem:[%s7444_s9 + $0x14e0] sm:$0xff] }
 0x4d5   : > { %v2554_v7 = vunpack.c.h.s8.bf16 %v1082_v6 }
 0x4d6   : > { %4338 = vmatpush2.bf16.msra.mxu0 %v2346_v10  ;;  %v2682_v10 = vunpack.c.h.s8.bf16 %v1146_v54 }
 0x4d7   : > { %4379 = vmatpush2.bf16.msra.mxu1 %v2474_v8  ;;  %4339 = vmatprep.subr.bf16.mxu0 %v2339_v18  ;;  %v2547_v8 = vunpack.c.l.s8.bf16 %v1083_v9  ;;  %v2675_v18 = vunpack.c.l.s8.bf16 %v1147_v3 }
 0x4d8   : > { %4380 = vmatprep.subr.bf16.mxu1 %v2467_v57  ;;  %v1075_v57 = vld [vmem:[%s7444_s9 + $0x14a8] sm:$0xff] }
 0x4da   : > { %4340 = vmatpush2.bf16.msra.mxu0 %v2338_v63 }
 0x4db   : > { %4381 = vmatpush2.bf16.msra.mxu1 %v2466_v39  ;;  %4341 = vmatprep.subr.bf16.mxu0 %v2331_v55  ;;  %v2546_v55 = vunpack.c.l.s8.bf16 %v1082_v6 }
 0x4dc   : > { %4382 = vmatprep.subr.bf16.mxu1 %v2459_v51  ;;  %v2674_v51 = vunpack.c.l.s8.bf16 %v1146_v54 }
 0x4de   : > { %4342 = vmatpush2.bf16.msra.mxu0 %v2330_v41  ;;  %v2539_v41 = vunpack.c.h.s8.bf16 %v1075_v57 }
 0x4df   : > { %4383 = vmatpush2.bf16.msra.mxu1 %v2458_v29  ;;  %4343 = vmatprep.subr.bf16.mxu0 %v2323_v60  ;;  %v2667_v29 = vunpack.c.h.s8.bf16 %v1139_v13  ;;  %v1074_v60 = vld [vmem:[%s7444_s9 + $0x14a0] sm:$0xff] }
 0x4e0   : > { %4384 = vmatprep.subr.bf16.mxu1 %v2451_v33  ;;  %v1138_v33 = vld [vmem:[%s7444_s9 + $0x16a0] sm:$0xff] }
 0x4e1   : > { %v2658_v9 = vunpack.c.l.s8.bf16 %v1138_v33 }
 0x4e2   : > { %4344 = vmatpush2.bf16.msra.mxu0 %v2322_v58 }
 0x4e3   : > { %4385 = vmatpush2.bf16.msra.mxu1 %v2450_v36  ;;  %4345 = vmatprep.subr.bf16.mxu0 %v2315_v49  ;;  %v2538_v49 = vunpack.c.h.s8.bf16 %v1074_v60 }
 0x4e4   : > { %4386 = vmatprep.subr.bf16.mxu1 %v2443_v4  ;;  %v2666_v4 = vunpack.c.h.s8.bf16 %v1138_v33 }
 0x4e6   : > { %4346 = vmatpush2.bf16.msra.mxu0 %v2314_v42  ;;  %v2659_v42 = vunpack.c.l.s8.bf16 %v1139_v13 }
 0x4e7   : > { %4387 = vmatpush2.bf16.msra.mxu1 %v2442_v46  ;;  %4347 = vmatprep.subr.bf16.mxu0 %v2307_v11  ;;  %v1067_v46 = vld [vmem:[%s7444_s9 + $0x1468] sm:$0xff] }
 0x4e8   : > { %4388 = vmatprep.subr.bf16.mxu1 %v2435_v31  ;;  %v1131_v11 = vld [vmem:[%s7444_s9 + $0x1668] sm:$0xff]  ;;  %v2530_v31 = vunpack.c.l.s8.bf16 %v1074_v60  ;;  %v2523_v3 = vunpack.c.h.s8.bf16 %v1067_v46  ;;  %v2515_v54 = vunpack.c.l.s8.bf16 %v1067_v46 }
 0x4e9   : > { %v1171_v46 = vld [vmem:[%s7444_s9 + $0x17a8] sm:$0xff] }
 0x4ea   : > { %4348 = vmatpush2.bf16.msra.mxu0 %v2306_v59  ;;  %v2651_v59 = vunpack.c.h.s8.bf16 %v1131_v11 }
 0x4eb   : > { %4389 = vmatpush2.bf16.msra.mxu1 %v2434_v45  ;;  %4399 = vmatprep.subr.bf16.mxu0 %v2555_v1  ;;  %v1066_v45 = vld [vmem:[%s7444_s9 + $0x1460] sm:$0xff] }
 0x4ec   : > { %4440 = vmatprep.subr.bf16.mxu1 %v2683_v0  ;;  %v1130_v1 = vld [vmem:[%s7444_s9 + $0x1660] sm:$0xff]  ;;  %v2522_v0 = vunpack.c.h.s8.bf16 %v1066_v45 }
 0x4ed   : > { %v4105_v15 = vpop.f32.mrf.mxu0  ;;  %4350 = vmatmul.mubr.bf16.vlgmr.msra.gmra.mxu0 %v7760_v61  ;;  %v2650_v6 = vunpack.c.h.s8.bf16 %v1130_v1 }
 0x4ee   : > { %v4146_v63 = vpop.f32.mrf.mxu1  ;;  %4391 = vmatmul.mubr.bf16.vlgmr.msra.gmra.mxu1 %v7764_v62  ;;  %v4106_v39 = vadd.f32 %v4105_v15, %v8312_v35  ;;  %4400 = vmatpush1.bf16.msra.mxu0 %v2554_v7  ;;  %v2643_v7 = vunpack.c.l.s8.bf16 %v1131_v11 }
 0x4ef   : > { %4441 = vmatpush1.bf16.msra.mxu1 %v2682_v10  ;;  %v4107_v16 = vpop.f32.mrf.mxu0  ;;  %4401 = vmatprep.subr.bf16.mxu0 %v2547_v8  ;;  %v1059_v10 = vld [vmem:[%s7444_s9 + $0x1428] sm:$0xff] }
 0x4f0   : > { %v4148_v17 = vpop.f32.mrf.mxu1  ;;  %4442 = vmatprep.subr.bf16.mxu1 %v2675_v18  ;;  %v8355_v44 = vadd.f32 %v4146_v63, %v4106_v39  ;;  %v4108_v14 = vadd.f32 %v4107_v16, %v8316_v43  ;;  %4431 = vmatprep.mubr.bf16.mxu0 %v7776_v25  ;;  %v2531_v43 = vunpack.c.l.s8.bf16 %v1075_v57  ;;  %v1123_v8 = vld [vmem:[%s7444_s9 + $0x1628] sm:$0xff]  ;;  %v2514_v18 = vunpack.c.l.s8.bf16 %v1066_v45  ;;  %v1058_v63 = vld [vmem:[%s7444_s9 + $0x1420] sm:$0xff] }
 0x4f1   : > { %4472 = vmatprep.mubr.bf16.mxu1 %v7780_v26  ;;  %v4109_v35 = vpop.f32.mrf.mxu0  ;;  %v2642_v57 = vunpack.c.l.s8.bf16 %v1130_v1  ;;  %v2507_v13 = vunpack.c.h.s8.bf16 %v1059_v10  ;;  %v2635_v15 = vunpack.c.h.s8.bf16 %v1123_v8  ;;  %v1122_v39 = vld [vmem:[%s7444_s9 + $0x1620] sm:$0xff]  ;;  %v2499_v16 = vunpack.c.l.s8.bf16 %v1059_v10  ;;  %v1163_v10 = vld [vmem:[%s7444_s9 + $0x1768] sm:$0xff] }
 0x4f2   : > { %v4150_v58 = vpop.f32.mrf.mxu1  ;;  %v8360_v36 = vadd.f32 %v4148_v17, %v4108_v14  ;;  %4402 = vmatpush1.bf16.msra.mxu0 %v2546_v55  ;;  %v2506_v55 = vunpack.c.h.s8.bf16 %v1058_v63  ;;  %v2627_v17 = vunpack.c.l.s8.bf16 %v1123_v8  ;;  %v2498_v60 = vunpack.c.l.s8.bf16 %v1058_v63  ;;  %v1170_v45 = vld [vmem:[%s7444_s9 + $0x17a0] sm:$0xff] }
 0x4f3   : > { %4443 = vmatpush1.bf16.msra.mxu1 %v2674_v51  ;;  %v4110_v2 = vpop.f32.mrf.mxu0  ;;  %4403 = vmatprep.subr.bf16.mxu0 %v2539_v41  ;;  %v2634_v51 = vunpack.c.h.s8.bf16 %v1122_v39  ;;  %v1115_v41 = vld [vmem:[%s7444_s9 + $0x15e8] sm:$0xff]  ;;  %v2626_v33 = vunpack.c.l.s8.bf16 %v1122_v39  ;;  %v1114_v58 = vld [vmem:[%s7444_s9 + $0x15e0] sm:$0xff] }
 0x4f4   : > { %v4151_v5 = vpop.f32.mrf.mxu1  ;;  %4444 = vmatprep.subr.bf16.mxu1 %v2667_v29  ;;  %v1179_v29 = vld [vmem:[%s7444_s9 + $0x17e8] sm:$0xff]  ;;  %v2619_v14 = vunpack.c.h.s8.bf16 %v1115_v41  ;;  %v2610_v11 = vunpack.c.l.s8.bf16 %v1114_v58  ;;  %v1162_v63 = vld [vmem:[%s7444_s9 + $0x1760] sm:$0xff] }
 0x4f5   : > { %v2747_v35 = vunpack.c.h.s8.bf16 %v1179_v29  ;;  %v2611_v5 = vunpack.c.l.s8.bf16 %v1115_v41  ;;  %v1155_v41 = vld [vmem:[%s7444_s9 + $0x1728] sm:$0xff] }
 0x4f6   : > { %4404 = vmatpush1.bf16.msra.mxu0 %v2538_v49  ;;  %v1178_v49 = vld [vmem:[%s7444_s9 + $0x17e0] sm:$0xff] }
 0x4f7   : > { %4445 = vmatpush1.bf16.msra.mxu1 %v2666_v4  ;;  %4405 = vmatprep.subr.bf16.mxu0 %v2531_v43  ;;  %v2618_v4 = vunpack.c.h.s8.bf16 %v1114_v58  ;;  %v2746_v2 = vunpack.c.h.s8.bf16 %v1178_v49  ;;  %v2739_v43 = vunpack.c.l.s8.bf16 %v1179_v29  ;;  %v1154_v58 = vld [vmem:[%s7444_s9 + $0x1720] sm:$0xff] }
 0x4f8   : > { %4446 = vmatprep.subr.bf16.mxu1 %v2659_v42  ;;  %v1107_v42 = vld [vmem:[%s7444_s9 + $0x15a8] sm:$0xff] }
 0x4fa   : > { %4406 = vmatpush1.bf16.msra.mxu0 %v2530_v31  ;;  %v2738_v31 = vunpack.c.l.s8.bf16 %v1178_v49 }
 0x4fb   : > { %4447 = vmatpush1.bf16.msra.mxu1 %v2658_v9  ;;  %4407 = vmatprep.subr.bf16.mxu0 %v2523_v3  ;;  %v2603_v9 = vunpack.c.h.s8.bf16 %v1107_v42  ;;  %v2731_v3 = vunpack.c.h.s8.bf16 %v1171_v46 }
 0x4fc   : > { %4448 = vmatprep.subr.bf16.mxu1 %v2651_v59  ;;  %v1106_v59 = vld [vmem:[%s7444_s9 + $0x15a0] sm:$0xff] }
 0x4fd   : > { %v2602_v1 = vunpack.c.h.s8.bf16 %v1106_v59  ;;  %v2594_v8 = vunpack.c.l.s8.bf16 %v1106_v59  ;;  %v444_v59 = vld [vmem:[%s7444_s9 + $0xf0] sm:$0xff] }
 0x4fe   : > { %4408 = vmatpush1.bf16.msra.mxu0 %v2522_v0  ;;  %v2730_v0 = vunpack.c.h.s8.bf16 %v1170_v45 }
 0x4ff   : > { %4449 = vmatpush1.bf16.msra.mxu1 %v2650_v6  ;;  %4409 = vmatprep.subr.bf16.mxu0 %v2515_v54  ;;  %v2595_v6 = vunpack.c.l.s8.bf16 %v1107_v42  ;;  %v2723_v54 = vunpack.c.l.s8.bf16 %v1171_v46  ;;  %v445_v42 = vld [vmem:[%s7444_s9 + $0xf8] sm:$0xff] }
 0x500   : > { %4450 = vmatprep.subr.bf16.mxu1 %v2643_v7  ;;  %v1099_v7 = vld [vmem:[%s7444_s9 + $0x1568] sm:$0xff] }
 0x502   : > { %4410 = vmatpush1.bf16.msra.mxu0 %v2514_v18  ;;  %v2722_v18 = vunpack.c.l.s8.bf16 %v1170_v45 }
 0x503   : > { %4451 = vmatpush1.bf16.msra.mxu1 %v2642_v57  ;;  %4411 = vmatprep.subr.bf16.mxu0 %v2507_v13  ;;  %v2587_v57 = vunpack.c.h.s8.bf16 %v1099_v7  ;;  %v2715_v13 = vunpack.c.h.s8.bf16 %v1163_v10 }
 0x504   : > { %4452 = vmatprep.subr.bf16.mxu1 %v2635_v15  ;;  %v1098_v15 = vld [vmem:[%s7444_s9 + $0x1560] sm:$0xff] }
 0x505   : > { %v2586_v39 = vunpack.c.h.s8.bf16 %v1098_v15  ;;  %v2578_v29 = vunpack.c.l.s8.bf16 %v1098_v15 }
 0x506   : > { %4412 = vmatpush1.bf16.msra.mxu0 %v2506_v55  ;;  %v2714_v55 = vunpack.c.h.s8.bf16 %v1162_v63 }
 0x507   : > { %4453 = vmatpush1.bf16.msra.mxu1 %v2634_v51  ;;  %4413 = vmatprep.subr.bf16.mxu0 %v2499_v16  ;;  %v2579_v51 = vunpack.c.l.s8.bf16 %v1099_v7  ;;  %v2707_v16 = vunpack.c.l.s8.bf16 %v1163_v10  ;;  %v437_v7 = vld [vmem:[%s7444_s9 + $0xb8] sm:$0xff] }
 0x508   : > { %4454 = vmatprep.subr.bf16.mxu1 %v2627_v17  ;;  %v1091_v17 = vld [vmem:[%s7444_s9 + $0x1528] sm:$0xff] }
 0x50a   : > { %4414 = vmatpush1.bf16.msra.mxu0 %v2498_v60  ;;  %v2706_v60 = vunpack.c.l.s8.bf16 %v1162_v63 }
 0x50b   : > { %4455 = vmatpush1.bf16.msra.mxu1 %v2626_v33  ;;  %4415 = vmatprep.subr.bf16.mxu0 %v2619_v14  ;;  %v2571_v33 = vunpack.c.h.s8.bf16 %v1091_v17  ;;  %v2699_v14 = vunpack.c.h.s8.bf16 %v1155_v41 }
 0x50c   : > { %4456 = vmatprep.subr.bf16.mxu1 %v2747_v35  ;;  %v1090_v35 = vld [vmem:[%s7444_s9 + $0x1520] sm:$0xff] }
 0x50d   : > { %v2570_v49 = vunpack.c.h.s8.bf16 %v1090_v35  ;;  %v2562_v46 = vunpack.c.l.s8.bf16 %v1090_v35 }
 0x50e   : > { %4416 = vmatpush2.bf16.msra.mxu0 %v2618_v4  ;;  %v2698_v4 = vunpack.c.h.s8.bf16 %v1154_v58 }
 0x50f   : > { %4457 = vmatpush2.bf16.msra.mxu1 %v2746_v2  ;;  %4417 = vmatprep.subr.bf16.mxu0 %v2611_v5  ;;  %v2563_v2 = vunpack.c.l.s8.bf16 %v1091_v17  ;;  %v2691_v5 = vunpack.c.l.s8.bf16 %v1155_v41 }
 0x510   : > { %4458 = vmatprep.subr.bf16.mxu1 %v2739_v43  ;;  %v1211_v43 = vld [vmem:[%s7444_s9 + $0x18e8] sm:$0xff] }
 0x512   : > { %4418 = vmatpush2.bf16.msra.mxu0 %v2610_v11  ;;  %v2690_v11 = vunpack.c.l.s8.bf16 %v1154_v58 }
 0x513   : > { %4459 = vmatpush2.bf16.msra.mxu1 %v2738_v31  ;;  %4419 = vmatprep.subr.bf16.mxu0 %v2603_v9  ;;  %v2811_v31 = vunpack.c.h.s8.bf16 %v1211_v43  ;;  %v1277_v9 = vunpack.c.h.s8.bf16 %v445_v42 }
 0x514   : > { %4460 = vmatprep.subr.bf16.mxu1 %v2731_v3  ;;  %v1210_v3 = vld [vmem:[%s7444_s9 + $0x18e0] sm:$0xff] }
 0x515   : > { %v2810_v45 = vunpack.c.h.s8.bf16 %v1210_v3 }
 0x516   : > { %4420 = vmatpush2.bf16.msra.mxu0 %v2602_v1  ;;  %v1276_v1 = vunpack.c.h.s8.bf16 %v444_v59 }
 0x517   : > { %4461 = vmatpush2.bf16.msra.mxu1 %v2730_v0  ;;  %4421 = vmatprep.subr.bf16.mxu0 %v2595_v6  ;;  %v2803_v0 = vunpack.c.l.s8.bf16 %v1211_v43  ;;  %v1269_v6 = vunpack.c.l.s8.bf16 %v445_v42 }
 0x518   : > { %4462 = vmatprep.subr.bf16.mxu1 %v2723_v54  ;;  %v1203_v54 = vld [vmem:[%s7444_s9 + $0x18a8] sm:$0xff] }
 0x51a   : > { %4422 = vmatpush2.bf16.msra.mxu0 %v2594_v8 }
 0x51b   : > { %4463 = vmatpush2.bf16.msra.mxu1 %v2722_v18  ;;  %4423 = vmatprep.subr.bf16.mxu0 %v2587_v57  ;;  %v2802_v57 = vunpack.c.l.s8.bf16 %v1210_v3 }
 0x51c   : > { %4464 = vmatprep.subr.bf16.mxu1 %v2715_v13  ;;  %v1268_v13 = vunpack.c.l.s8.bf16 %v444_v59 }
 0x51e   : > { %4424 = vmatpush2.bf16.msra.mxu0 %v2586_v39  ;;  %v2795_v39 = vunpack.c.h.s8.bf16 %v1203_v54 }
 0x51f   : > { %4465 = vmatpush2.bf16.msra.mxu1 %v2714_v55  ;;  %4425 = vmatprep.subr.bf16.mxu0 %v2579_v51  ;;  %v1261_v55 = vunpack.c.h.s8.bf16 %v437_v7  ;;  %v1202_v51 = vld [vmem:[%s7444_s9 + $0x18a0] sm:$0xff] }
 0x520   : > { %4466 = vmatprep.subr.bf16.mxu1 %v2707_v16  ;;  %v436_v16 = vld [vmem:[%s7444_s9 + $0xb0] sm:$0xff] }
 0x522   : > { %4426 = vmatpush2.bf16.msra.mxu0 %v2578_v29 }
 0x523   : > { %4467 = vmatpush2.bf16.msra.mxu1 %v2706_v60  ;;  %4427 = vmatprep.subr.bf16.mxu0 %v2571_v33  ;;  %v2794_v33 = vunpack.c.h.s8.bf16 %v1202_v51 }
 0x524   : > { %4468 = vmatprep.subr.bf16.mxu1 %v2699_v14  ;;  %v1260_v14 = vunpack.c.h.s8.bf16 %v436_v16 }
 0x526   : > { %4428 = vmatpush2.bf16.msra.mxu0 %v2570_v49  ;;  %v1253_v49 = vunpack.c.l.s8.bf16 %v437_v7 }
 0x527   : > { %4469 = vmatpush2.bf16.msra.mxu1 %v2698_v4  ;;  %4429 = vmatprep.subr.bf16.mxu0 %v2563_v2  ;;  %v1195_v4 = vld [vmem:[%s7444_s9 + $0x1868] sm:$0xff]  ;;  %v429_v2 = vld [vmem:[%s7444_s9 + $0x78] sm:$0xff] }
 0x528   : > { %4470 = vmatprep.subr.bf16.mxu1 %v2691_v5  ;;  %v1252_v5 = vunpack.c.l.s8.bf16 %v436_v16  ;;  %v2779_v43 = vunpack.c.h.s8.bf16 %v1195_v4  ;;  %v1245_v42 = vunpack.c.h.s8.bf16 %v429_v2  ;;  %v2771_v3 = vunpack.c.l.s8.bf16 %v1195_v4  ;;  %v6790_v4 = vld [vmem:[%s7466_s17 + $0x60] ss:$0 sps:$4 sm:$0xff]  }
 0x529   : > { %v1237_v59 = vunpack.c.l.s8.bf16 %v429_v2 }
 0x52a   : > { %4430 = vmatpush2.bf16.msra.mxu0 %v2562_v46  ;;  %v1194_v46 = vld [vmem:[%s7444_s9 + $0x1860] sm:$0xff] }
 0x52b   : > { %4471 = vmatpush2.bf16.msra.mxu1 %v2690_v11  ;;  %4481 = vmatprep.subr.bf16.mxu0 %v2811_v31  ;;  %v428_v11 = vld [vmem:[%s7444_s9 + $0x70] sm:$0xff]  ;;  %v2778_v31 = vunpack.c.h.s8.bf16 %v1194_v46 }
 0x52c   : > { %4522 = vmatprep.subr.bf16.mxu1 %v1277_v9  ;;  %v1244_v9 = vunpack.c.h.s8.bf16 %v428_v11 }
 0x52d   : > { %v4187_v10 = vpop.f32.mrf.mxu0  ;;  %4432 = vmatmul.mubr.bf16.vlgmr.msra.gmra.mxu0 %v7824_v52 }
 0x52e   : > { %v4228_v8 = vpop.f32.mrf.mxu1  ;;  %4473 = vmatmul.mubr.bf16.vlgmr.msra.gmra.mxu1 %v7828_v53  ;;  %v4188_v18 = vadd.f32 %v4187_v10, %v8355_v44  ;;  %4482 = vmatpush1.bf16.msra.mxu0 %v2810_v45  ;;  %v1187_v45 = vld [vmem:[%s7444_s9 + $0x1828] sm:$0xff]  ;;  %v1186_v10 = vld [vmem:[%s7444_s9 + $0x1820] sm:$0xff] }
 0x52f   : > { %4523 = vmatpush1.bf16.msra.mxu1 %v1276_v1  ;;  %v4189_v15 = vpop.f32.mrf.mxu0  ;;  %4483 = vmatprep.subr.bf16.mxu0 %v2803_v0  ;;  %v421_v1 = vld [vmem:[%s7444_s9 + $0x38] sm:$0xff]  ;;  %v2770_v0 = vunpack.c.l.s8.bf16 %v1194_v46  ;;  %v500_v46 = vld [vmem:[%s7444_s9 + $0x2b0] sm:$0xff] }
 0x530   : > { %v4230_v63 = vpop.f32.mrf.mxu1  ;;  %4524 = vmatprep.subr.bf16.mxu1 %v1269_v6  ;;  %v8397_v17 = vadd.f32 %v4228_v8, %v4188_v18  ;;  %v4190_v41 = vadd.f32 %v4189_v15, %v8360_v36  ;;  %4513 = vmatprep.mubr.bf16.mxu0 %v7245_v12  ;;  %v2787_v36 = vunpack.c.l.s8.bf16 %v1203_v54  ;;  %v1236_v6 = vunpack.c.l.s8.bf16 %v428_v11  ;;  %v420_v8 = vld [vmem:[%s7444_s9 + $0x30] sm:$0xff] }
 0x531   : > { %4554 = vmatprep.mubr.bf16.mxu1 %v7490_v37  ;;  %v4191_v44 = vpop.f32.mrf.mxu0  ;;  %v2786_v37 = vunpack.c.l.s8.bf16 %v1202_v51  ;;  %v2763_v54 = vunpack.c.h.s8.bf16 %v1187_v45  ;;  %v1229_v7 = vunpack.c.h.s8.bf16 %v421_v1  ;;  %v2762_v18 = vunpack.c.h.s8.bf16 %v1186_v10 }
 0x532   : > { %v4232_v29 = vpop.f32.mrf.mxu1  ;;  %v8402_v60 = vadd.f32 %v4230_v63, %v4190_v41  ;;  %4484 = vmatpush1.bf16.msra.mxu0 %v2802_v57  ;;  %v1228_v57 = vunpack.c.h.s8.bf16 %v420_v8  ;;  %v1221_v15 = vunpack.c.l.s8.bf16 %v421_v1  ;;  %v477_v63 = vld [vmem:[%s7444_s9 + $0x1f8] sm:$0xff]  ;;  %v1220_v51 = vunpack.c.l.s8.bf16 %v420_v8  ;;  %v476_v44 = vld [vmem:[%s7444_s9 + $0x1f0] sm:$0xff] }
 0x533   : > { %4525 = vmatpush1.bf16.msra.mxu1 %v1268_v13  ;;  %v4192_v35 = vpop.f32.mrf.mxu0  ;;  %4485 = vmatprep.subr.bf16.mxu0 %v2795_v39  ;;  %v2755_v13 = vunpack.c.l.s8.bf16 %v1187_v45  ;;  %v509_v39 = vld [vmem:[%s7444_s9 + $0x2f8] sm:$0xff]  ;;  %v1341_v16 = vunpack.c.h.s8.bf16 %v477_v63  ;;  %v508_v29 = vld [vmem:[%s7444_s9 + $0x2f0] sm:$0xff]  ;;  %v1332_v2 = vunpack.c.l.s8.bf16 %v476_v44 }
 0x534   : > { %v4233_v58 = vpop.f32.mrf.mxu1  ;;  %4526 = vmatprep.subr.bf16.mxu1 %v1261_v55  ;;  %v2754_v55 = vunpack.c.l.s8.bf16 %v1186_v10  ;;  %v1405_v41 = vunpack.c.h.s8.bf16 %v509_v39  ;;  %v1333_v35 = vunpack.c.l.s8.bf16 %v477_v63  ;;  %v493_v45 = vld [vmem:[%s7444_s9 + $0x278] sm:$0xff] }
 0x535   : > { %v1397_v58 = vunpack.c.l.s8.bf16 %v509_v39 }
 0x536   : > { %4486 = vmatpush1.bf16.msra.mxu0 %v2794_v33  ;;  %v1340_v33 = vunpack.c.h.s8.bf16 %v476_v44 }
 0x537   : > { %4527 = vmatpush1.bf16.msra.mxu1 %v1260_v14  ;;  %4487 = vmatprep.subr.bf16.mxu0 %v2787_v36  ;;  %v1404_v14 = vunpack.c.h.s8.bf16 %v508_v29  ;;  %v469_v36 = vld [vmem:[%s7444_s9 + $0x1b8] sm:$0xff] }
 0x538   : > { %4528 = vmatprep.subr.bf16.mxu1 %v1253_v49  ;;  %v501_v49 = vld [vmem:[%s7444_s9 + $0x2b8] sm:$0xff] }
 0x53a   : > { %4488 = vmatpush1.bf16.msra.mxu0 %v2786_v37  ;;  %v1396_v37 = vunpack.c.l.s8.bf16 %v508_v29 }
 0x53b   : > { %4529 = vmatpush1.bf16.msra.mxu1 %v1252_v5  ;;  %4489 = vmatprep.subr.bf16.mxu0 %v2779_v43  ;;  %v1325_v5 = vunpack.c.h.s8.bf16 %v469_v36  ;;  %v1389_v43 = vunpack.c.h.s8.bf16 %v501_v49 }
 0x53c   : > { %4530 = vmatprep.subr.bf16.mxu1 %v1245_v42  ;;  %v468_v42 = vld [vmem:[%s7444_s9 + $0x1b0] sm:$0xff] }
 0x53d   : > { %v1324_v11 = vunpack.c.h.s8.bf16 %v468_v42  ;;  %v1316_v1 = vunpack.c.l.s8.bf16 %v468_v42 }
 0x53e   : > { %4490 = vmatpush1.bf16.msra.mxu0 %v2778_v31  ;;  %v1388_v31 = vunpack.c.h.s8.bf16 %v500_v46 }
 0x53f   : > { %4531 = vmatpush1.bf16.msra.mxu1 %v1244_v9  ;;  %4491 = vmatprep.subr.bf16.mxu0 %v2771_v3  ;;  %v1317_v9 = vunpack.c.l.s8.bf16 %v469_v36  ;;  %v1381_v3 = vunpack.c.l.s8.bf16 %v501_v49 }
 0x540   : > { %4532 = vmatprep.subr.bf16.mxu1 %v1237_v59  ;;  %v461_v59 = vld [vmem:[%s7444_s9 + $0x178] sm:$0xff] }
 0x542   : > { %4492 = vmatpush1.bf16.msra.mxu0 %v2770_v0  ;;  %v1380_v0 = vunpack.c.l.s8.bf16 %v500_v46 }
 0x543   : > { %4533 = vmatpush1.bf16.msra.mxu1 %v1236_v6  ;;  %4493 = vmatprep.subr.bf16.mxu0 %v2763_v54  ;;  %v1373_v6 = vunpack.c.h.s8.bf16 %v493_v45  ;;  %v460_v54 = vld [vmem:[%s7444_s9 + $0x170] sm:$0xff] }
 0x544   : > { %4534 = vmatprep.subr.bf16.mxu1 %v1229_v7  ;;  %v492_v7 = vld [vmem:[%s7444_s9 + $0x270] sm:$0xff]  ;;  %v1308_v10 = vunpack.c.h.s8.bf16 %v460_v54  ;;  %v1300_v63 = vunpack.c.l.s8.bf16 %v460_v54 }
 0x545   : > { %v1372_v8 = vunpack.c.h.s8.bf16 %v492_v7  ;;  %v1364_v39 = vunpack.c.l.s8.bf16 %v492_v7 }
 0x546   : > { %4494 = vmatpush1.bf16.msra.mxu0 %v2762_v18  ;;  %v1301_v18 = vunpack.c.l.s8.bf16 %v461_v59 }
 0x547   : > { %4535 = vmatpush1.bf16.msra.mxu1 %v1228_v57  ;;  %4495 = vmatprep.subr.bf16.mxu0 %v2755_v13  ;;  %v1365_v57 = vunpack.c.l.s8.bf16 %v493_v45  ;;  %v453_v13 = vld [vmem:[%s7444_s9 + $0x138] sm:$0xff] }
 0x548   : > { %4536 = vmatprep.subr.bf16.mxu1 %v1221_v15  ;;  %v485_v15 = vld [vmem:[%s7444_s9 + $0x238] sm:$0xff] }
 0x54a   : > { %4496 = vmatpush1.bf16.msra.mxu0 %v2754_v55  ;;  %v1293_v55 = vunpack.c.h.s8.bf16 %v453_v13 }
 0x54b   : > { %4537 = vmatpush1.bf16.msra.mxu1 %v1220_v51  ;;  %4563 = vmatprep.subr.bf16.mxu0 %v1405_v41  ;;  %v1357_v51 = vunpack.c.h.s8.bf16 %v485_v15  ;;  %v484_v41 = vld [vmem:[%s7444_s9 + $0x230] sm:$0xff] }
 0x54c   : > { %4538 = vmatprep.subr.bf16.mxu1 %v1341_v16  ;;  %v452_v16 = vld [vmem:[%s7444_s9 + $0x130] sm:$0xff]  ;;  %v1356_v29 = vunpack.c.h.s8.bf16 %v484_v41  ;;  %v1348_v49 = vunpack.c.l.s8.bf16 %v484_v41  ;;  %v557_v41 = vld [vmem:[%s7444_s9 + $0x478] sm:$0xff] }
 0x54d   : > { %4514 = vmatmul.mubr.bf16.vlgmr.msra.gmra.mxu0 %v6790_v4  ;;  %v1292_v44 = vunpack.c.h.s8.bf16 %v452_v16  ;;  %v1284_v36 = vunpack.c.l.s8.bf16 %v452_v16 }
 0x54e   : > { %4564 = vmatpush1.bf16.msra.mxu0 %v1404_v14  ;;  %4595 = vmatprep.mubr.bf16.mxu0 %v7494_v38  ;;  %v1309_v38 = vunpack.c.h.s8.bf16 %v461_v59  ;;  %v1349_v14 = vunpack.c.l.s8.bf16 %v485_v15 }
 0x54f   : > { %4539 = vmatpush2.bf16.msra.mxu1 %v1340_v33  ;;  %4565 = vmatprep.subr.bf16.mxu0 %v1397_v58  ;;  %v1285_v33 = vunpack.c.l.s8.bf16 %v453_v13  ;;  %v573_v58 = vld [vmem:[%s7444_s9 + $0x4f8] sm:$0xff] }
 0x550   : > { %4540 = vmatprep.subr.bf16.mxu1 %v1333_v35  ;;  %v541_v35 = vld [vmem:[%s7444_s9 + $0x3f8] sm:$0xff] }
 0x551   : > { %v1469_v4 = vunpack.c.h.s8.bf16 %v541_v35  ;;  %v1461_v46 = vunpack.c.l.s8.bf16 %v541_v35  ;;  %v556_v35 = vld [vmem:[%s7444_s9 + $0x470] sm:$0xff] }
 0x552   : > { %4566 = vmatpush1.bf16.msra.mxu0 %v1396_v37  ;;  %v540_v37 = vld [vmem:[%s7444_s9 + $0x3f0] sm:$0xff] }
 0x553   : > { %4541 = vmatpush2.bf16.msra.mxu1 %v1332_v2  ;;  %4567 = vmatprep.subr.bf16.mxu0 %v1389_v43  ;;  %v1533_v2 = vunpack.c.h.s8.bf16 %v573_v58  ;;  %v1468_v43 = vunpack.c.h.s8.bf16 %v540_v37 }
 0x554   : > { %4542 = vmatprep.subr.bf16.mxu1 %v1325_v5  ;;  %v572_v5 = vld [vmem:[%s7444_s9 + $0x4f0] sm:$0xff] }
 0x555   : > { %v1532_v42 = vunpack.c.h.s8.bf16 %v572_v5 }
 0x556   : > { %4568 = vmatpush1.bf16.msra.mxu0 %v1388_v31  ;;  %v533_v31 = vld [vmem:[%s7444_s9 + $0x3b8] sm:$0xff] }
 0x557   : > { %4543 = vmatpush2.bf16.msra.mxu1 %v1324_v11  ;;  %4569 = vmatprep.subr.bf16.mxu0 %v1381_v3  ;;  %v1525_v11 = vunpack.c.l.s8.bf16 %v573_v58  ;;  %v1453_v54 = vunpack.c.h.s8.bf16 %v533_v31 }
 0x558   : > { %4544 = vmatprep.subr.bf16.mxu1 %v1317_v9  ;;  %v565_v9 = vld [vmem:[%s7444_s9 + $0x4b8] sm:$0xff] }
 0x559   : > { %v1517_v7 = vunpack.c.h.s8.bf16 %v565_v9  ;;  %v1509_v16 = vunpack.c.l.s8.bf16 %v565_v9 }
 0x55a   : > { %4570 = vmatpush1.bf16.msra.mxu0 %v1380_v0  ;;  %v1524_v0 = vunpack.c.l.s8.bf16 %v572_v5 }
 0x55b   : > { %4545 = vmatpush2.bf16.msra.mxu1 %v1316_v1  ;;  %4571 = vmatprep.subr.bf16.mxu0 %v1373_v6  ;;  %v1460_v1 = vunpack.c.l.s8.bf16 %v540_v37  ;;  %v549_v37 = vld [vmem:[%s7444_s9 + $0x438] sm:$0xff] }
 0x55c   : > { %4546 = vmatprep.subr.bf16.mxu1 %v1309_v38 }
 0x55e   : > { %4572 = vmatpush1.bf16.msra.mxu0 %v1372_v8  ;;  %v564_v8 = vld [vmem:[%s7444_s9 + $0x4b0] sm:$0xff] }
 0x55f   : > { %4547 = vmatpush2.bf16.msra.mxu1 %v1308_v10  ;;  %4573 = vmatprep.subr.bf16.mxu0 %v1365_v57  ;;  %v532_v10 = vld [vmem:[%s7444_s9 + $0x3b0] sm:$0xff] }
 0x560   : > { %4548 = vmatprep.subr.bf16.mxu1 %v1301_v18  ;;  %v1452_v15 = vunpack.c.h.s8.bf16 %v532_v10 }
 0x562   : > { %4574 = vmatpush1.bf16.msra.mxu0 %v1364_v39 }
 0x563   : > { %4549 = vmatpush2.bf16.msra.mxu1 %v1300_v63  ;;  %4575 = vmatprep.subr.bf16.mxu0 %v1357_v51  ;;  %v1516_v63 = vunpack.c.h.s8.bf16 %v564_v8  ;;  %v1445_v51 = vunpack.c.l.s8.bf16 %v533_v31  ;;  %v548_v31 = vld [vmem:[%s7444_s9 + $0x430] sm:$0xff] }
 0x564   : > { %4550 = vmatprep.subr.bf16.mxu1 %v1293_v55 }
 0x566   : > { %4576 = vmatpush1.bf16.msra.mxu0 %v1356_v29 }
 0x567   : > { %4551 = vmatpush2.bf16.msra.mxu1 %v1292_v44  ;;  %4577 = vmatprep.subr.bf16.mxu0 %v1349_v14  ;;  %v1508_v44 = vunpack.c.l.s8.bf16 %v564_v8  ;;  %v524_v14 = vld [vmem:[%s7444_s9 + $0x370] sm:$0xff] }
 0x568   : > { %4552 = vmatprep.subr.bf16.mxu1 %v1285_v33  ;;  %v1501_v33 = vunpack.c.h.s8.bf16 %v557_v41  ;;  %v1436_v58 = vunpack.c.h.s8.bf16 %v524_v14  ;;  %v1428_v5 = vunpack.c.l.s8.bf16 %v524_v14  ;;  %v636_v8 = vld [vmem:[%s7444_s9 + $0x6f0] sm:$0xff]  ;;  %v589_v14 = vld [vmem:[%s7444_s9 + $0x578] sm:$0xff] }
 0x56a   : > { %4578 = vmatpush1.bf16.msra.mxu0 %v1348_v49 }
 0x56b   : > { %4553 = vmatpush2.bf16.msra.mxu1 %v1284_v36  ;;  %4579 = vmatprep.subr.bf16.mxu0 %v1469_v4  ;;  %v1500_v36 = vunpack.c.h.s8.bf16 %v556_v35  ;;  %v1493_v4 = vunpack.c.l.s8.bf16 %v557_v41  ;;  %v596_v41 = vld [vmem:[%s7444_s9 + $0x5b0] sm:$0xff] }
 0x56c   : > { %4604 = vmatprep.subr.bf16.mxu1 %v1533_v2  ;;  %v517_v2 = vld [vmem:[%s7444_s9 + $0x338] sm:$0xff] }
 0x56d   : > { %v4269_v3 = vpop.f32.mrf.mxu0 }
 0x56e   : > { %v4310_v59 = vpop.f32.mrf.mxu1  ;;  %4555 = vmatmul.mubr.bf16.vlgmr.msra.gmra.mxu1 %v7524_v47  ;;  %v4270_v45 = vadd.f32 %v4269_v3, %v8397_v17  ;;  %4580 = vmatpush2.bf16.msra.mxu0 %v1468_v43  ;;  %v1492_v43 = vunpack.c.l.s8.bf16 %v556_v35  ;;  %v1484_v3 = vunpack.c.h.s8.bf16 %v548_v31  ;;  %v621_v35 = vld [vmem:[%s7444_s9 + $0x678] sm:$0xff] }
 0x56f   : > { %4605 = vmatpush1.bf16.msra.mxu1 %v1532_v42  ;;  %v4271_v38 = vpop.f32.mrf.mxu0  ;;  %4581 = vmatprep.subr.bf16.mxu0 %v1461_v46  ;;  %v1421_v42 = vunpack.c.h.s8.bf16 %v517_v2  ;;  %v1485_v46 = vunpack.c.h.s8.bf16 %v549_v37 }
 0x570   : > { %v4312_v6 = vpop.f32.mrf.mxu1  ;;  %4606 = vmatprep.subr.bf16.mxu1 %v1525_v11  ;;  %v8440_v18 = vadd.f32 %v4310_v59, %v4270_v45  ;;  %v4272_v57 = vadd.f32 %v4271_v38, %v8402_v60  ;;  %4636 = vmatprep.mubr.bf16.mxu1 %v7540_v32  ;;  %v525_v60 = vld [vmem:[%s7444_s9 + $0x378] sm:$0xff]  ;;  %v1444_v32 = vunpack.c.l.s8.bf16 %v532_v10  ;;  %v516_v11 = vld [vmem:[%s7444_s9 + $0x330] sm:$0xff]  ;;  %v1413_v59 = vunpack.c.l.s8.bf16 %v517_v2 }
 0x571   : > { %v4273_v47 = vpop.f32.mrf.mxu0  ;;  %v1437_v29 = vunpack.c.h.s8.bf16 %v525_v60  ;;  %v1429_v49 = vunpack.c.l.s8.bf16 %v525_v60  ;;  %v1420_v9 = vunpack.c.h.s8.bf16 %v516_v11  ;;  %v1477_v45 = vunpack.c.l.s8.bf16 %v549_v37  ;;  %v604_v10 = vld [vmem:[%s7444_s9 + $0x5f0] sm:$0xff] }
 0x572   : > { %v4314_v17 = vpop.f32.mrf.mxu1  ;;  %v8444_v13 = vadd.f32 %v4312_v6, %v4272_v57  ;;  %4582 = vmatpush2.bf16.msra.mxu0 %v1460_v1  ;;  %v605_v1 = vld [vmem:[%s7444_s9 + $0x5f8] sm:$0xff]  ;;  %v1412_v38 = vunpack.c.l.s8.bf16 %v516_v11  ;;  %v1476_v6 = vunpack.c.l.s8.bf16 %v548_v31  ;;  %v1596_v57 = vunpack.c.h.s8.bf16 %v604_v10  ;;  %v620_v2 = vld [vmem:[%s7444_s9 + $0x670] sm:$0xff] }
 0x573   : > { %4607 = vmatpush1.bf16.msra.mxu1 %v1524_v0  ;;  %v4274_v39 = vpop.f32.mrf.mxu0  ;;  %4583 = vmatprep.subr.bf16.mxu0 %v1453_v54  ;;  %v637_v0 = vld [vmem:[%s7444_s9 + $0x6f8] sm:$0xff]  ;;  %v1597_v54 = vunpack.c.h.s8.bf16 %v605_v1  ;;  %v1660_v47 = vunpack.c.h.s8.bf16 %v636_v8  ;;  %v1589_v17 = vunpack.c.l.s8.bf16 %v605_v1  ;;  %v612_v1 = vld [vmem:[%s7444_s9 + $0x630] sm:$0xff] }
 0x574   : > { %v4315_v55 = vpop.f32.mrf.mxu1  ;;  %4608 = vmatprep.subr.bf16.mxu1 %v1517_v7  ;;  %v1661_v7 = vunpack.c.h.s8.bf16 %v637_v0  ;;  %v629_v39 = vld [vmem:[%s7444_s9 + $0x6b8] sm:$0xff] }
 0x575   : > { %v1588_v55 = vunpack.c.l.s8.bf16 %v604_v10  ;;  %v1645_v60 = vunpack.c.h.s8.bf16 %v629_v39  ;;  %v613_v11 = vld [vmem:[%s7444_s9 + $0x638] sm:$0xff] }
 0x576   : > { %4584 = vmatpush2.bf16.msra.mxu0 %v1452_v15  ;;  %v1653_v15 = vunpack.c.l.s8.bf16 %v637_v0  ;;  %v701_v10 = vld [vmem:[%s7444_s9 + $0x8f8] sm:$0xff] }
 0x577   : > { %4609 = vmatpush1.bf16.msra.mxu1 %v1516_v63  ;;  %4585 = vmatprep.subr.bf16.mxu0 %v1445_v51  ;;  %v597_v63 = vld [vmem:[%s7444_s9 + $0x5b8] sm:$0xff]  ;;  %v1652_v51 = vunpack.c.l.s8.bf16 %v636_v8 }
 0x578   : > { %4610 = vmatprep.subr.bf16.mxu1 %v1509_v16  ;;  %v1581_v16 = vunpack.c.h.s8.bf16 %v597_v63 }
 0x57a   : > { %4586 = vmatpush2.bf16.msra.mxu0 %v1444_v32  ;;  %v628_v32 = vld [vmem:[%s7444_s9 + $0x6b0] sm:$0xff] }
 0x57b   : > { %4611 = vmatpush1.bf16.msra.mxu1 %v1508_v44  ;;  %4587 = vmatprep.subr.bf16.mxu0 %v1437_v29  ;;  %v1580_v44 = vunpack.c.h.s8.bf16 %v596_v41  ;;  %v1644_v29 = vunpack.c.h.s8.bf16 %v628_v32 }
 0x57c   : > { %4612 = vmatprep.subr.bf16.mxu1 %v1501_v33  ;;  %v1637_v33 = vunpack.c.l.s8.bf16 %v629_v39 }
 0x57e   : > { %4588 = vmatpush2.bf16.msra.mxu0 %v1436_v58  ;;  %v1572_v58 = vunpack.c.l.s8.bf16 %v596_v41  ;;  %v693_v41 = vld [vmem:[%s7444_s9 + $0x8b8] sm:$0xff] }
 0x57f   : > { %4613 = vmatpush1.bf16.msra.mxu1 %v1500_v36  ;;  %4589 = vmatprep.subr.bf16.mxu0 %v1429_v49  ;;  %v1636_v36 = vunpack.c.l.s8.bf16 %v628_v32  ;;  %v1629_v49 = vunpack.c.h.s8.bf16 %v621_v35 }
 0x580   : > { %4614 = vmatprep.subr.bf16.mxu1 %v1493_v4  ;;  %v588_v4 = vld [vmem:[%s7444_s9 + $0x570] sm:$0xff] }
 0x581   : > { %v1564_v37 = vunpack.c.h.s8.bf16 %v588_v4  ;;  %v1556_v31 = vunpack.c.l.s8.bf16 %v588_v4 }
 0x582   : > { %4590 = vmatpush2.bf16.msra.mxu0 %v1428_v5  ;;  %v1628_v5 = vunpack.c.h.s8.bf16 %v620_v2 }
 0x583   : > { %4615 = vmatpush1.bf16.msra.mxu1 %v1492_v43  ;;  %4591 = vmatprep.subr.bf16.mxu0 %v1421_v42  ;;  %v1557_v43 = vunpack.c.l.s8.bf16 %v589_v14  ;;  %v1621_v42 = vunpack.c.l.s8.bf16 %v621_v35 }
 0x584   : > { %4616 = vmatprep.subr.bf16.mxu1 %v1485_v46  ;;  %v581_v46 = vld [vmem:[%s7444_s9 + $0x538] sm:$0xff] }
 0x586   : > { %4592 = vmatpush2.bf16.msra.mxu0 %v1420_v9  ;;  %v1620_v9 = vunpack.c.l.s8.bf16 %v620_v2 }
 0x587   : > { %4617 = vmatpush1.bf16.msra.mxu1 %v1484_v3  ;;  %4593 = vmatprep.subr.bf16.mxu0 %v1413_v59  ;;  %v1549_v3 = vunpack.c.h.s8.bf16 %v581_v46  ;;  %v1613_v59 = vunpack.c.h.s8.bf16 %v613_v11 }
 0x588   : > { %4618 = vmatprep.subr.bf16.mxu1 %v1477_v45  ;;  %v580_v45 = vld [vmem:[%s7444_s9 + $0x530] sm:$0xff] }
 0x589   : > { %v1548_v0 = vunpack.c.h.s8.bf16 %v580_v45  ;;  %v1540_v8 = vunpack.c.l.s8.bf16 %v580_v45 }
 0x58a   : > { %4594 = vmatpush2.bf16.msra.mxu0 %v1412_v38  ;;  %v1612_v38 = vunpack.c.h.s8.bf16 %v612_v1 }
 0x58b   : > { %4619 = vmatpush1.bf16.msra.mxu1 %v1476_v6  ;;  %4645 = vmatprep.subr.bf16.mxu0 %v1661_v7  ;;  %v1541_v6 = vunpack.c.l.s8.bf16 %v581_v46  ;;  %v669_v7 = vld [vmem:[%s7444_s9 + $0x7f8] sm:$0xff] }
 0x58c   : > { %4620 = vmatprep.subr.bf16.mxu1 %v1597_v54  ;;  %v1605_v54 = vunpack.c.l.s8.bf16 %v613_v11 }
 0x58d   : > { %4596 = vmatmul.mubr.bf16.vlgmr.msra.gmra.mxu0 %v7528_v48  ;;  %v1573_v48 = vunpack.c.l.s8.bf16 %v597_v63  ;;  %v700_v63 = vld [vmem:[%s7444_s9 + $0x8f0] sm:$0xff] }
 0x58e   : > { %4646 = vmatpush1.bf16.msra.mxu0 %v1660_v47  ;;  %4677 = vmatprep.mubr.bf16.mxu0 %v7544_v56  ;;  %v1565_v56 = vunpack.c.h.s8.bf16 %v589_v14  ;;  %v1725_v47 = vunpack.c.h.s8.bf16 %v669_v7 }
 0x58f   : > { %4621 = vmatpush2.bf16.msra.mxu1 %v1596_v57  ;;  %4647 = vmatprep.subr.bf16.mxu0 %v1653_v15  ;;  %v1604_v57 = vunpack.c.l.s8.bf16 %v612_v1  ;;  %v668_v15 = vld [vmem:[%s7444_s9 + $0x7f0] sm:$0xff] }
 0x590   : > { %4622 = vmatprep.subr.bf16.mxu1 %v1589_v17  ;;  %v1789_v17 = vunpack.c.h.s8.bf16 %v701_v10  ;;  %v1724_v39 = vunpack.c.h.s8.bf16 %v668_v15  ;;  %v652_v1 = vld [vmem:[%s7444_s9 + $0x770] sm:$0xff] }
 0x592   : > { %4648 = vmatpush1.bf16.msra.mxu0 %v1652_v51  ;;  %v1717_v51 = vunpack.c.l.s8.bf16 %v669_v7 }
 0x593   : > { %4623 = vmatpush2.bf16.msra.mxu1 %v1588_v55  ;;  %4649 = vmatprep.subr.bf16.mxu0 %v1645_v60  ;;  %v1788_v55 = vunpack.c.h.s8.bf16 %v700_v63  ;;  %v661_v60 = vld [vmem:[%s7444_s9 + $0x7b8] sm:$0xff] }
 0x594   : > { %4624 = vmatprep.subr.bf16.mxu1 %v1581_v16  ;;  %v1781_v16 = vunpack.c.l.s8.bf16 %v701_v10  ;;  %v1701_v11 = vunpack.c.l.s8.bf16 %v661_v60  ;;  %v645_v10 = vld [vmem:[%s7444_s9 + $0x738] sm:$0xff] }
 0x596   : > { %4650 = vmatpush1.bf16.msra.mxu0 %v1644_v29 }
 0x597   : > { %4625 = vmatpush2.bf16.msra.mxu1 %v1580_v44  ;;  %4651 = vmatprep.subr.bf16.mxu0 %v1637_v33  ;;  %v1780_v33 = vunpack.c.l.s8.bf16 %v700_v63  ;;  %v644_v63 = vld [vmem:[%s7444_s9 + $0x730] sm:$0xff] }
 0x598   : > { %4626 = vmatprep.subr.bf16.mxu1 %v1573_v48  ;;  %v1716_v48 = vunpack.c.l.s8.bf16 %v668_v15 }
 0x59a   : > { %4652 = vmatpush1.bf16.msra.mxu0 %v1636_v36  ;;  %v1773_v36 = vunpack.c.h.s8.bf16 %v693_v41 }
 0x59b   : > { %4627 = vmatpush2.bf16.msra.mxu1 %v1572_v58  ;;  %4653 = vmatprep.subr.bf16.mxu0 %v1629_v49  ;;  %v1709_v58 = vunpack.c.h.s8.bf16 %v661_v60  ;;  %v692_v49 = vld [vmem:[%s7444_s9 + $0x8b0] sm:$0xff] }
 0x59c   : > { %4628 = vmatprep.subr.bf16.mxu1 %v1565_v56  ;;  %v660_v56 = vld [vmem:[%s7444_s9 + $0x7b0] sm:$0xff] }
 0x59e   : > { %4654 = vmatpush1.bf16.msra.mxu0 %v1628_v5  ;;  %v1708_v5 = vunpack.c.h.s8.bf16 %v660_v56 }
 0x59f   : > { %4629 = vmatpush2.bf16.msra.mxu1 %v1564_v37  ;;  %4655 = vmatprep.subr.bf16.mxu0 %v1621_v42 }
 0x5a0   : > { %4630 = vmatprep.subr.bf16.mxu1 %v1557_v43  ;;  %v1772_v43 = vunpack.c.h.s8.bf16 %v692_v49 }
 0x5a2   : > { %4656 = vmatpush1.bf16.msra.mxu0 %v1620_v9  ;;  %v685_v9 = vld [vmem:[%s7444_s9 + $0x878] sm:$0xff] }
 0x5a3   : > { %4631 = vmatpush2.bf16.msra.mxu1 %v1556_v31  ;;  %4657 = vmatprep.subr.bf16.mxu0 %v1613_v59  ;;  %v1765_v31 = vunpack.c.l.s8.bf16 %v693_v41  ;;  %v1757_v45 = vunpack.c.h.s8.bf16 %v685_v9  ;;  %v1749_v7 = vunpack.c.l.s8.bf16 %v685_v9  ;;  %v733_v41 = vld [vmem:[%s7444_s9 + $0x9f8] sm:$0xff] }
 0x5a4   : > { %4632 = vmatprep.subr.bf16.mxu1 %v1549_v3  ;;  %v1764_v3 = vunpack.c.l.s8.bf16 %v692_v49 }
 0x5a6   : > { %4658 = vmatpush1.bf16.msra.mxu0 %v1612_v38  ;;  %v1692_v38 = vunpack.c.h.s8.bf16 %v652_v1 }
 0x5a7   : > { %4633 = vmatpush2.bf16.msra.mxu1 %v1548_v0  ;;  %4659 = vmatprep.subr.bf16.mxu0 %v1605_v54  ;;  %v684_v0 = vld [vmem:[%s7444_s9 + $0x870] sm:$0xff] }
 0x5a8   : > { %4634 = vmatprep.subr.bf16.mxu1 %v1541_v6  ;;  %v1756_v6 = vunpack.c.h.s8.bf16 %v684_v0 }
 0x5aa   : > { %4660 = vmatpush1.bf16.msra.mxu0 %v1604_v57  ;;  %v1684_v57 = vunpack.c.l.s8.bf16 %v652_v1 }
 0x5ab   : > { %4635 = vmatpush2.bf16.msra.mxu1 %v1540_v8  ;;  %4661 = vmatprep.subr.bf16.mxu0 %v1725_v47  ;;  %v677_v8 = vld [vmem:[%s7444_s9 + $0x838] sm:$0xff]  ;;  %v1748_v47 = vunpack.c.l.s8.bf16 %v684_v0  ;;  %v716_v0 = vld [vmem:[%s7444_s9 + $0x970] sm:$0xff] }
 0x5ac   : > { %4686 = vmatprep.subr.bf16.mxu1 %v1789_v17  ;;  %v1677_v17 = vunpack.c.h.s8.bf16 %v645_v10  ;;  %v1741_v15 = vunpack.c.h.s8.bf16 %v677_v8  ;;  %v1733_v60 = vunpack.c.l.s8.bf16 %v677_v8  ;;  %v709_v8 = vld [vmem:[%s7444_s9 + $0x938] sm:$0xff] }
 0x5ad   : > { %v4351_v32 = vpop.f32.mrf.mxu0 }
 0x5ae   : > { %v4392_v44 = vpop.f32.mrf.mxu1  ;;  %4637 = vmatmul.mubr.bf16.vlgmr.msra.gmra.mxu1 %v7582_v27  ;;  %v4352_v29 = vadd.f32 %v4351_v32, %v8440_v18  ;;  %4662 = vmatpush2.bf16.msra.mxu0 %v1724_v39  ;;  %v676_v39 = vld [vmem:[%s7444_s9 + $0x830] sm:$0xff]  ;;  %v765_v32 = vld [vmem:[%s7444_s9 + $0xaf8] sm:$0xff] }
 0x5af   : > { %4687 = vmatpush1.bf16.msra.mxu1 %v1788_v55  ;;  %v4353_v14 = vpop.f32.mrf.mxu0  ;;  %4663 = vmatprep.subr.bf16.mxu0 %v1717_v51  ;;  %v1676_v55 = vunpack.c.h.s8.bf16 %v644_v63  ;;  %v1740_v51 = vunpack.c.h.s8.bf16 %v676_v39  ;;  %v1909_v49 = vunpack.c.l.s8.bf16 %v765_v32 }
 0x5b0   : > { %v4394_v35 = vpop.f32.mrf.mxu1  ;;  %4688 = vmatprep.subr.bf16.mxu1 %v1781_v16  ;;  %v8482_v4 = vadd.f32 %v4392_v44, %v4352_v29  ;;  %v4354_v2 = vadd.f32 %v4353_v14, %v8444_v13  ;;  %4718 = vmatprep.mubr.bf16.mxu1 %v7598_v50  ;;  %v653_v13 = vld [vmem:[%s7444_s9 + $0x778] sm:$0xff]  ;;  %v1700_v50 = vunpack.c.l.s8.bf16 %v660_v56  ;;  %v1669_v16 = vunpack.c.l.s8.bf16 %v645_v10  ;;  %v732_v14 = vld [vmem:[%s7444_s9 + $0x9f0] sm:$0xff] }
 0x5b1   : > { %v4355_v27 = vpop.f32.mrf.mxu0  ;;  %v1693_v59 = vunpack.c.h.s8.bf16 %v653_v13  ;;  %v1685_v54 = vunpack.c.l.s8.bf16 %v653_v13  ;;  %v1668_v44 = vunpack.c.l.s8.bf16 %v644_v63  ;;  %v1732_v29 = vunpack.c.l.s8.bf16 %v676_v39  ;;  %v708_v39 = vld [vmem:[%s7444_s9 + $0x930] sm:$0xff] }
 0x5b2   : > { %v4396_v18 = vpop.f32.mrf.mxu1  ;;  %v8486_v37 = vadd.f32 %v4394_v35, %v4354_v2  ;;  %4664 = vmatpush2.bf16.msra.mxu0 %v1716_v48  ;;  %v1853_v48 = vunpack.c.h.s8.bf16 %v733_v41  ;;  %v764_v35 = vld [vmem:[%s7444_s9 + $0xaf0] sm:$0xff]  ;;  %v1845_v56 = vunpack.c.l.s8.bf16 %v733_v41  ;;  %v725_v2 = vld [vmem:[%s7444_s9 + $0x9b8] sm:$0xff] }
 0x5b3   : > { %4689 = vmatpush1.bf16.msra.mxu1 %v1780_v33  ;;  %v4356_v42 = vpop.f32.mrf.mxu0  ;;  %4665 = vmatprep.subr.bf16.mxu0 %v1709_v58  ;;  %v1917_v33 = vunpack.c.h.s8.bf16 %v765_v32  ;;  %v1852_v58 = vunpack.c.h.s8.bf16 %v732_v14  ;;  %v757_v27 = vld [vmem:[%s7444_s9 + $0xab8] sm:$0xff]  ;;  %v1844_v18 = vunpack.c.l.s8.bf16 %v732_v14 }
 0x5b4   : > { %v4397_v46 = vpop.f32.mrf.mxu1  ;;  %4690 = vmatprep.subr.bf16.mxu1 %v1773_v36  ;;  %v1916_v36 = vunpack.c.h.s8.bf16 %v764_v35  ;;  %v1901_v42 = vunpack.c.h.s8.bf16 %v757_v27  ;;  %v1893_v9 = vunpack.c.l.s8.bf16 %v757_v27  ;;  %v797_v32 = vld [vmem:[%s7444_s9 + $0xbf8] sm:$0xff] }
 0x5b5   : > { %v724_v46 = vld [vmem:[%s7444_s9 + $0x9b0] sm:$0xff]  ;;  %v789_v27 = vld [vmem:[%s7444_s9 + $0xbb8] sm:$0xff] }
 0x5b6   : > { %4666 = vmatpush2.bf16.msra.mxu0 %v1708_v5  ;;  %v1908_v5 = vunpack.c.l.s8.bf16 %v764_v35  ;;  %v796_v35 = vld [vmem:[%s7444_s9 + $0xbf0] sm:$0xff] }
 0x5b7   : > { %4691 = vmatpush1.bf16.msra.mxu1 %v1772_v43  ;;  %4667 = vmatprep.subr.bf16.mxu0 %v1701_v11  ;;  %v1837_v43 = vunpack.c.h.s8.bf16 %v725_v2  ;;  %v756_v11 = vld [vmem:[%s7444_s9 + $0xab0] sm:$0xff] }
 0x5b8   : > { %4692 = vmatprep.subr.bf16.mxu1 %v1765_v31  ;;  %v1836_v31 = vunpack.c.h.s8.bf16 %v724_v46  ;;  %v1900_v13 = vunpack.c.h.s8.bf16 %v756_v11 }
 0x5ba   : > { %4668 = vmatpush2.bf16.msra.mxu0 %v1700_v50  ;;  %v717_v50 = vld [vmem:[%s7444_s9 + $0x978] sm:$0xff] }
 0x5bb   : > { %4693 = vmatpush1.bf16.msra.mxu1 %v1764_v3  ;;  %4669 = vmatprep.subr.bf16.mxu0 %v1693_v59  ;;  %v749_v3 = vld [vmem:[%s7444_s9 + $0xa78] sm:$0xff]  ;;  %v1828_v59 = vunpack.c.l.s8.bf16 %v724_v46 }
 0x5bc   : > { %4694 = vmatprep.subr.bf16.mxu1 %v1757_v45  ;;  %v1892_v45 = vunpack.c.l.s8.bf16 %v756_v11  ;;  %v1885_v1 = vunpack.c.h.s8.bf16 %v749_v3  ;;  %v1877_v10 = vunpack.c.l.s8.bf16 %v749_v3 }
 0x5be   : > { %4670 = vmatpush2.bf16.msra.mxu0 %v1692_v38  ;;  %v748_v38 = vld [vmem:[%s7444_s9 + $0xa70] sm:$0xff] }
 0x5bf   : > { %4695 = vmatpush1.bf16.msra.mxu1 %v1756_v6  ;;  %4671 = vmatprep.subr.bf16.mxu0 %v1685_v54  ;;  %v1820_v6 = vunpack.c.h.s8.bf16 %v716_v0  ;;  %v1884_v54 = vunpack.c.h.s8.bf16 %v748_v38 }
 0x5c0   : > { %4696 = vmatprep.subr.bf16.mxu1 %v1749_v7  ;;  %v1813_v7 = vunpack.c.l.s8.bf16 %v717_v50 }
 0x5c2   : > { %4672 = vmatpush2.bf16.msra.mxu0 %v1684_v57  ;;  %v741_v57 = vld [vmem:[%s7444_s9 + $0xa38] sm:$0xff] }
 0x5c3   : > { %4697 = vmatpush1.bf16.msra.mxu1 %v1748_v47  ;;  %4673 = vmatprep.subr.bf16.mxu0 %v1677_v17  ;;  %v1812_v47 = vunpack.c.l.s8.bf16 %v716_v0  ;;  %v1876_v17 = vunpack.c.l.s8.bf16 %v748_v38  ;;  %v1869_v63 = vunpack.c.h.s8.bf16 %v741_v57  ;;  %v1861_v41 = vunpack.c.l.s8.bf16 %v741_v57  ;;  %v780_v57 = vld [vmem:[%s7444_s9 + $0xb70] sm:$0xff] }
 0x5c4   : > { %4698 = vmatprep.subr.bf16.mxu1 %v1741_v15  ;;  %v1805_v15 = vunpack.c.h.s8.bf16 %v709_v8  ;;  %v1957_v0 = vunpack.c.l.s8.bf16 %v789_v27 }
 0x5c6   : > { %4674 = vmatpush2.bf16.msra.mxu0 %v1676_v55  ;;  %v740_v55 = vld [vmem:[%s7444_s9 + $0xa30] sm:$0xff] }
 0x5c7   : > { %4699 = vmatpush1.bf16.msra.mxu1 %v1740_v51  ;;  %4675 = vmatprep.subr.bf16.mxu0 %v1669_v16  ;;  %v1804_v51 = vunpack.c.h.s8.bf16 %v708_v39  ;;  %v1868_v16 = vunpack.c.h.s8.bf16 %v740_v55 }
 0x5c8   : > { %4700 = vmatprep.subr.bf16.mxu1 %v1733_v60  ;;  %v1797_v60 = vunpack.c.l.s8.bf16 %v709_v8 }
 0x5ca   : > { %4676 = vmatpush2.bf16.msra.mxu0 %v1668_v44  ;;  %v829_v44 = vld [vmem:[%s7444_s9 + $0xcf8] sm:$0xff] }
 0x5cb   : > { %4701 = vmatpush1.bf16.msra.mxu1 %v1732_v29  ;;  %4727 = vmatprep.subr.bf16.mxu0 %v1917_v33  ;;  %v1796_v29 = vunpack.c.l.s8.bf16 %v708_v39  ;;  %v1981_v33 = vunpack.c.h.s8.bf16 %v797_v32  ;;  %v2045_v14 = vunpack.c.h.s8.bf16 %v829_v44 }
 0x5cc   : > { %4702 = vmatprep.subr.bf16.mxu1 %v1853_v48  ;;  %v1860_v48 = vunpack.c.l.s8.bf16 %v740_v55  ;;  %v773_v55 = vld [vmem:[%s7444_s9 + $0xb38] sm:$0xff] }
 0x5cd   : > { %4678 = vmatmul.mubr.bf16.vlgmr.msra.gmra.mxu0 %v7586_v28  ;;  %v1829_v28 = vunpack.c.l.s8.bf16 %v725_v2  ;;  %v2037_v2 = vunpack.c.l.s8.bf16 %v829_v44  ;;  %v772_v44 = vld [vmem:[%s7444_s9 + $0xb30] sm:$0xff] }
 0x5ce   : > { %4728 = vmatpush1.bf16.msra.mxu0 %v1916_v36  ;;  %4759 = vmatprep.mubr.bf16.mxu0 %v7602_v40  ;;  %v1821_v40 = vunpack.c.h.s8.bf16 %v717_v50  ;;  %v1980_v36 = vunpack.c.h.s8.bf16 %v796_v35  ;;  %v820_v50 = vld [vmem:[%s7444_s9 + $0xcb0] sm:$0xff] }
 0x5cf   : > { %4703 = vmatpush2.bf16.msra.mxu1 %v1852_v58  ;;  %4729 = vmatprep.subr.bf16.mxu0 %v1909_v49  ;;  %v828_v58 = vld [vmem:[%s7444_s9 + $0xcf0] sm:$0xff]  ;;  %v1973_v49 = vunpack.c.l.s8.bf16 %v797_v32 }
 0x5d0   : > { %4704 = vmatprep.subr.bf16.mxu1 %v1845_v56  ;;  %v2044_v56 = vunpack.c.h.s8.bf16 %v828_v58  ;;  %v2036_v46 = vunpack.c.l.s8.bf16 %v828_v58  ;;  %v861_v58 = vld [vmem:[%s7444_s9 + $0xdf8] sm:$0xff] }
 0x5d2   : > { %4730 = vmatpush1.bf16.msra.mxu0 %v1908_v5 }
 0x5d3   : > { %4705 = vmatpush2.bf16.msra.mxu1 %v1844_v18  ;;  %4731 = vmatprep.subr.bf16.mxu0 %v1901_v42  ;;  %v821_v18 = vld [vmem:[%s7444_s9 + $0xcb8] sm:$0xff]  ;;  %v1972_v42 = vunpack.c.l.s8.bf16 %v796_v35 }
 0x5d4   : > { %4706 = vmatprep.subr.bf16.mxu1 %v1837_v43  ;;  %v2021_v38 = vunpack.c.l.s8.bf16 %v821_v18 }
 0x5d6   : > { %4732 = vmatpush1.bf16.msra.mxu0 %v1900_v13  ;;  %v1965_v13 = vunpack.c.h.s8.bf16 %v789_v27 }
 0x5d7   : > { %4707 = vmatpush2.bf16.msra.mxu1 %v1836_v31  ;;  %4733 = vmatprep.subr.bf16.mxu0 %v1893_v9  ;;  %v788_v9 = vld [vmem:[%s7444_s9 + $0xbb0] sm:$0xff] }
 0x5d8   : > { %4708 = vmatprep.subr.bf16.mxu1 %v1829_v28  ;;  %v2029_v28 = vunpack.c.h.s8.bf16 %v821_v18  ;;  %v860_v18 = vld [vmem:[%s7444_s9 + $0xdf0] sm:$0xff] }
 0x5da   : > { %4734 = vmatpush1.bf16.msra.mxu0 %v1892_v45  ;;  %v2028_v45 = vunpack.c.h.s8.bf16 %v820_v50 }
 0x5db   : > { %4709 = vmatpush2.bf16.msra.mxu1 %v1828_v59  ;;  %4735 = vmatprep.subr.bf16.mxu0 %v1885_v1  ;;  %v1964_v59 = vunpack.c.h.s8.bf16 %v788_v9 }
 0x5dc   : > { %4710 = vmatprep.subr.bf16.mxu1 %v1821_v40 }
 0x5de   : > { %4736 = vmatpush1.bf16.msra.mxu0 %v1884_v54  ;;  %v813_v54 = vld [vmem:[%s7444_s9 + $0xc78] sm:$0xff] }
 0x5df   : > { %4711 = vmatpush2.bf16.msra.mxu1 %v1820_v6  ;;  %4737 = vmatprep.subr.bf16.mxu0 %v1877_v10  ;;  %v781_v6 = vld [vmem:[%s7444_s9 + $0xb78] sm:$0xff]  ;;  %v2013_v8 = vunpack.c.h.s8.bf16 %v813_v54  ;;  %v2005_v39 = vunpack.c.l.s8.bf16 %v813_v54  ;;  %v852_v54 = vld [vmem:[%s7444_s9 + $0xdb0] sm:$0xff] }
 0x5e0   : > { %4712 = vmatprep.subr.bf16.mxu1 %v1813_v7  ;;  %v1956_v7 = vunpack.c.l.s8.bf16 %v788_v9  ;;  %v1949_v10 = vunpack.c.h.s8.bf16 %v781_v6 }
 0x5e2   : > { %4738 = vmatpush1.bf16.msra.mxu0 %v1876_v17  ;;  %v1948_v17 = vunpack.c.h.s8.bf16 %v780_v57 }
 0x5e3   : > { %4713 = vmatpush2.bf16.msra.mxu1 %v1812_v47  ;;  %4739 = vmatprep.subr.bf16.mxu0 %v1869_v63  ;;  %v812_v47 = vld [vmem:[%s7444_s9 + $0xc70] sm:$0xff]  ;;  %v1941_v63 = vunpack.c.l.s8.bf16 %v781_v6 }
 0x5e4   : > { %4714 = vmatprep.subr.bf16.mxu1 %v1805_v15  ;;  %v2012_v15 = vunpack.c.h.s8.bf16 %v812_v47 }
 0x5e6   : > { %4740 = vmatpush1.bf16.msra.mxu0 %v1868_v16  ;;  %v1940_v16 = vunpack.c.l.s8.bf16 %v780_v57 }
 0x5e7   : > { %4715 = vmatpush2.bf16.msra.mxu1 %v1804_v51  ;;  %4741 = vmatprep.subr.bf16.mxu0 %v1861_v41  ;;  %v805_v51 = vld [vmem:[%s7444_s9 + $0xc38] sm:$0xff]  ;;  %v1933_v41 = vunpack.c.h.s8.bf16 %v773_v55 }
 0x5e8   : > { %4716 = vmatprep.subr.bf16.mxu1 %v1797_v60  ;;  %v2004_v60 = vunpack.c.l.s8.bf16 %v812_v47  ;;  %v1997_v32 = vunpack.c.h.s8.bf16 %v805_v51  ;;  %v1989_v35 = vunpack.c.l.s8.bf16 %v805_v51 }
 0x5ea   : > { %4742 = vmatpush1.bf16.msra.mxu0 %v1860_v48  ;;  %v1932_v48 = vunpack.c.h.s8.bf16 %v772_v44 }
 0x5eb   : > { %4717 = vmatpush2.bf16.msra.mxu1 %v1796_v29  ;;  %4743 = vmatprep.subr.bf16.mxu0 %v1981_v33  ;;  %v804_v29 = vld [vmem:[%s7444_s9 + $0xc30] sm:$0xff] }
 0x5ec   : > { %4768 = vmatprep.subr.bf16.mxu1 %v2045_v14  ;;  %v1996_v33 = vunpack.c.h.s8.bf16 %v804_v29  ;;  %v1925_v14 = vunpack.c.l.s8.bf16 %v773_v55 }
 0x5ed   : > { %v8520_v5 = vpop.f32.mrf.mxu0 }
 0x5ee   : > { %v8522_v43 = vpop.f32.mrf.mxu1  ;;  %4719 = vmatmul.mubr.bf16.vlgmr.msra.gmra.mxu1 %v7640_v19  ;;  %4744 = vmatpush2.bf16.msra.mxu0 %v1980_v36  ;;  %v893_v36 = vld [vmem:[%s7444_s9 + $0xef8] sm:$0xff] }
 0x5ef   : > { %4769 = vmatpush1.bf16.msra.mxu1 %v2044_v56  ;;  %v8525_v11 = vpop.f32.mrf.mxu0  ;;  %4745 = vmatprep.subr.bf16.mxu0 %v1973_v49  ;;  %v1924_v56 = vunpack.c.l.s8.bf16 %v772_v44  ;;  %v1988_v49 = vunpack.c.l.s8.bf16 %v804_v29  ;;  %v2173_v27 = vunpack.c.h.s8.bf16 %v893_v36 }
 0x5f0   : > { %v8527_v31 = vpop.f32.mrf.mxu1  ;;  %4770 = vmatprep.subr.bf16.mxu1 %v2037_v2  ;;  %4800 = vmatprep.mubr.bf16.mxu1 %v7656_v30  ;;  %v2020_v30 = vunpack.c.l.s8.bf16 %v820_v50  ;;  %v2109_v2 = vunpack.c.h.s8.bf16 %v861_v58  ;;  %v2101_v50 = vunpack.c.l.s8.bf16 %v861_v58 }
 0x5f1   : > { %v4437_v3 = vpop.f32.mrf.mxu0 }
 0x5f2   : > { %v4478_v19 = vpop.f32.mrf.mxu1  ;;  %4746 = vmatpush2.bf16.msra.mxu0 %v1972_v42  ;;  %v892_v42 = vld [vmem:[%s7444_s9 + $0xef0] sm:$0xff]  ;;  %v2165_v3 = vunpack.c.l.s8.bf16 %v893_v36 }
 0x5f3   : > { %4771 = vmatpush1.bf16.msra.mxu1 %v2036_v46  ;;  %v4438_v40 = vpop.f32.mrf.mxu0  ;;  %4747 = vmatprep.subr.bf16.mxu0 %v1965_v13  ;;  %v4434_v46 = vadd.f32 %v8520_v5, %v8482_v4  ;;  %v4436_v13 = vadd.f32 %v8525_v11, %v8486_v37  ;;  %v2172_v9 = vunpack.c.h.s8.bf16 %v892_v42  ;;  %v2100_v5 = vunpack.c.l.s8.bf16 %v860_v18 }
 0x5f4   : > { %v4479_v1 = vpop.f32.mrf.mxu1  ;;  %4772 = vmatprep.subr.bf16.mxu1 %v2029_v28  ;;  %v2108_v28 = vunpack.c.h.s8.bf16 %v860_v18  ;;  %v2818_v40 = vld [vmem:[#allocation2 + $0x8] sm:$0xff]  ;;  %v2164_v11 = vunpack.c.l.s8.bf16 %v892_v42 }
 0x5f5   : > { %v4475_v19 = vadd.f32 %v8522_v43, %v4434_v46  ;;  %v4477_v4 = vadd.f32 %v8527_v31, %v4436_v13  ;;  %v925_v13 = vld [vmem:[%s7444_s9 + $0xff8] sm:$0xff] }
 0x5f6   : > { %4748 = vmatpush2.bf16.msra.mxu0 %v1964_v59  ;;  %v853_v59 = vld [vmem:[%s7444_s9 + $0xdb8] sm:$0xff] }
 0x5f7   : > { %4773 = vmatpush1.bf16.msra.mxu1 %v2028_v45  ;;  %4749 = vmatprep.subr.bf16.mxu0 %v1957_v0  ;;  %v885_v45 = vld [vmem:[%s7444_s9 + $0xeb8] sm:$0xff]  ;;  %v2819_v0 = vld [vmem:[#allocation2 + $0x20] sm:$0xff]  ;;  %v2093_v43 = vunpack.c.h.s8.bf16 %v853_v59 }
 0x5f8   : > { %4774 = vmatprep.subr.bf16.mxu1 %v2021_v38  ;;  %v2157_v6 = vunpack.c.h.s8.bf16 %v885_v45 }
 0x5fa   : > { %4750 = vmatpush2.bf16.msra.mxu0 %v1956_v7  ;;  %v884_v7 = vld [vmem:[%s7444_s9 + $0xeb0] sm:$0xff] }
 0x5fb   : > { %4775 = vmatpush1.bf16.msra.mxu1 %v2020_v30  ;;  %4751 = vmatprep.subr.bf16.mxu0 %v1949_v10  ;;  %v2156_v57 = vunpack.c.h.s8.bf16 %v884_v7  ;;  %v2148_v55 = vunpack.c.l.s8.bf16 %v884_v7 }
 0x5fc   : > { %4776 = vmatprep.subr.bf16.mxu1 %v2013_v8  ;;  %v2092_v8 = vunpack.c.h.s8.bf16 %v852_v54 }
 0x5fe   : > { %4752 = vmatpush2.bf16.msra.mxu0 %v1948_v17  ;;  %v2085_v17 = vunpack.c.l.s8.bf16 %v853_v59  ;;  %v924_v59 = vld [vmem:[%s7444_s9 + $0xff0] sm:$0xff] }
 0x5ff   : > { %4777 = vmatpush1.bf16.msra.mxu1 %v2012_v15  ;;  %4753 = vmatprep.subr.bf16.mxu0 %v1941_v63  ;;  %v2149_v15 = vunpack.c.l.s8.bf16 %v885_v45  ;;  %v845_v63 = vld [vmem:[%s7444_s9 + $0xd78] sm:$0xff]  ;;  %v956_v45 = vld [vmem:[%s7444_s9 + $0x10f0] sm:$0xff] }
 0x600   : > { %4778 = vmatprep.subr.bf16.mxu1 %v2005_v39  ;;  %v877_v39 = vld [vmem:[%s7444_s9 + $0xe78] sm:$0xff]  ;;  %v2077_v51 = vunpack.c.h.s8.bf16 %v845_v63  ;;  %v2069_v29 = vunpack.c.l.s8.bf16 %v845_v63 }
 0x602   : > { %4754 = vmatpush2.bf16.msra.mxu0 %v1940_v16  ;;  %v2141_v16 = vunpack.c.h.s8.bf16 %v877_v39 }
 0x603   : > { %4779 = vmatpush1.bf16.msra.mxu1 %v2004_v60  ;;  %4755 = vmatprep.subr.bf16.mxu0 %v1933_v41  ;;  %v844_v60 = vld [vmem:[%s7444_s9 + $0xd70] sm:$0xff] }
 0x604   : > { %4780 = vmatprep.subr.bf16.mxu1 %v1997_v32  ;;  %v876_v41 = vld [vmem:[%s7444_s9 + $0xe70] sm:$0xff]  ;;  %v2076_v32 = vunpack.c.h.s8.bf16 %v844_v60 }
 0x605   : > { %v2140_v44 = vunpack.c.h.s8.bf16 %v876_v41  ;;  %v2132_v58 = vunpack.c.l.s8.bf16 %v876_v41 }
 0x606   : > { %4756 = vmatpush2.bf16.msra.mxu0 %v1932_v48  ;;  %v2133_v48 = vunpack.c.l.s8.bf16 %v877_v39 }
 0x607   : > { %4781 = vmatpush1.bf16.msra.mxu1 %v1996_v33  ;;  %4757 = vmatprep.subr.bf16.mxu0 %v1925_v14  ;;  %v837_v33 = vld [vmem:[%s7444_s9 + $0xd38] sm:$0xff] }
 0x608   : > { %4782 = vmatprep.subr.bf16.mxu1 %v1989_v35  ;;  %v869_v14 = vld [vmem:[%s7444_s9 + $0xe38] sm:$0xff]  ;;  %v2068_v35 = vunpack.c.l.s8.bf16 %v844_v60  ;;  %v2061_v36 = vunpack.c.h.s8.bf16 %v837_v33  ;;  %v2053_v42 = vunpack.c.l.s8.bf16 %v837_v33 }
 0x609   : > { %v2117_v46 = vunpack.c.l.s8.bf16 %v869_v14 }
 0x60a   : > { %4758 = vmatpush2.bf16.msra.mxu0 %v1924_v56  ;;  %v2125_v56 = vunpack.c.h.s8.bf16 %v869_v14 }
 0x60b   : > { %4783 = vmatpush1.bf16.msra.mxu1 %v1988_v49  ;;  %4809 = vmatprep.subr.bf16.mxu0 %v2173_v27  ;;  %v836_v49 = vld [vmem:[%s7444_s9 + $0xd30] sm:$0xff] }
 0x60c   : > { %4784 = vmatprep.subr.bf16.mxu1 %v2109_v2  ;;  %v868_v2 = vld [vmem:[%s7444_s9 + $0xe30] sm:$0xff]  ;;  %v2060_v27 = vunpack.c.h.s8.bf16 %v836_v49 }
 0x60d   : > { %v4515_v1 = vpop.f32.mrf.mxu0  ;;  %4760 = vmatmul.mubr.bf16.vlgmr.msra.gmra.mxu0 %v7644_v20  ;;  %v2124_v18 = vunpack.c.h.s8.bf16 %v868_v2 }
 0x60e   : > { %v4516_v37 = vadd.f32 %v4515_v1, %v4475_v19  ;;  %4810 = vmatpush1.bf16.msra.mxu0 %v2172_v9  ;;  %4841 = vmatprep.mubr.bf16.mxu0 %v7660_v34  ;;  %v2084_v34 = vunpack.c.l.s8.bf16 %v852_v54  ;;  %v2052_v9 = vunpack.c.l.s8.bf16 %v836_v49  ;;  %v2300_v1 = vunpack.c.h.s8.bf16 %v956_v45 }
 0x60f   : > { %4785 = vmatpush2.bf16.msra.mxu1 %v2108_v28  ;;  %v4517_v38 = vpop.f32.mrf.mxu0  ;;  %4811 = vmatprep.subr.bf16.mxu0 %v2165_v3  ;;  %v957_v28 = vld [vmem:[%s7444_s9 + $0x10f8] sm:$0xff]  ;;  %v2237_v3 = vunpack.c.h.s8.bf16 %v925_v13 }
 0x610   : > { %4786 = vmatprep.subr.bf16.mxu1 %v2101_v50  ;;  %v5059_v30 = vadd.f32 %v4516_v37, %v2818_v40  ;;  %v4518_v10 = vadd.f32 %v4517_v38, %v4477_v4  ;;  %v2116_v50 = vunpack.c.l.s8.bf16 %v868_v2  ;;  %v2301_v19 = vunpack.c.h.s8.bf16 %v957_v28 }
 0x611   : > { %v4519_v20 = vpop.f32.mrf.mxu0  ;;  %v2236_v40 = vunpack.c.h.s8.bf16 %v924_v59  ;;  %v2229_v4 = vunpack.c.l.s8.bf16 %v925_v13  ;;  %v2293_v37 = vunpack.c.l.s8.bf16 %v957_v28  ;;  %v2228_v38 = vunpack.c.l.s8.bf16 %v924_v59 }
 0x612   : > { %5067 = vst [vmem:[#allocation2 + $0x8] sm:$0xff] %v5059_v30  ;;  %v5060_v31 = vadd.f32 %v4518_v10, %v2819_v0  ;;  %4812 = vmatpush1.bf16.msra.mxu0 %v2164_v11  ;;  %v949_v11 = vld [vmem:[%s7444_s9 + $0x10b8] sm:$0xff]  ;;  %v916_v30 = vld [vmem:[%s7444_s9 + $0xfb0] sm:$0xff] }
 0x613   : > { %4787 = vmatpush2.bf16.msra.mxu1 %v2100_v5  ;;  %v4520_v47 = vpop.f32.mrf.mxu0  ;;  %4813 = vmatprep.subr.bf16.mxu0 %v2157_v6  ;;  %v917_v5 = vld [vmem:[%s7444_s9 + $0xfb8] sm:$0xff]  ;;  %v2285_v7 = vunpack.c.h.s8.bf16 %v949_v11  ;;  %v948_v10 = vld [vmem:[%s7444_s9 + $0x10b0] sm:$0xff]  ;;  %v2212_v63 = vunpack.c.l.s8.bf16 %v916_v30 }
 0x614   : > { %4788 = vmatprep.subr.bf16.mxu1 %v2093_v43  ;;  %5068 = vst [vmem:[#allocation2 + $0x20] sm:$0xff] %v5060_v31  ;;  %v2292_v43 = vunpack.c.l.s8.bf16 %v956_v45  ;;  %v2221_v54 = vunpack.c.h.s8.bf16 %v917_v5  ;;  %v2284_v31 = vunpack.c.h.s8.bf16 %v948_v10  ;;  %v2277_v47 = vunpack.c.l.s8.bf16 %v949_v11 }
 0x615   : > { %v2276_v39 = vunpack.c.l.s8.bf16 %v948_v10  ;;  %v1012_v10 = vld [vmem:[%s7444_s9 + $0x12b0] sm:$0xff] }
 0x616   : > { %4814 = vmatpush1.bf16.msra.mxu0 %v2156_v57  ;;  %v2213_v57 = vunpack.c.l.s8.bf16 %v917_v5 }
 0x617   : > { %4789 = vmatpush2.bf16.msra.mxu1 %v2092_v8  ;;  %4815 = vmatprep.subr.bf16.mxu0 %v2149_v15  ;;  %v941_v15 = vld [vmem:[%s7444_s9 + $0x1078] sm:$0xff] }
 0x618   : > { %4790 = vmatprep.subr.bf16.mxu1 %v2085_v17  ;;  %v909_v17 = vld [vmem:[%s7444_s9 + $0xf78] sm:$0xff] }
 0x619   : > { %v2197_v41 = vunpack.c.l.s8.bf16 %v909_v17 }
 0x61a   : > { %4816 = vmatpush1.bf16.msra.mxu0 %v2148_v55  ;;  %v908_v55 = vld [vmem:[%s7444_s9 + $0xf70] sm:$0xff] }
 0x61b   : > { %4791 = vmatpush2.bf16.msra.mxu1 %v2084_v34  ;;  %4817 = vmatprep.subr.bf16.mxu0 %v2141_v16  ;;  %v2269_v34 = vunpack.c.h.s8.bf16 %v941_v15  ;;  %v2204_v16 = vunpack.c.h.s8.bf16 %v908_v55 }
 0x61c   : > { %4792 = vmatprep.subr.bf16.mxu1 %v2077_v51  ;;  %v940_v51 = vld [vmem:[%s7444_s9 + $0x1070] sm:$0xff] }
 0x61d   : > { %v2268_v60 = vunpack.c.h.s8.bf16 %v940_v51  ;;  %v2260_v33 = vunpack.c.l.s8.bf16 %v940_v51 }
 0x61e   : > { %4818 = vmatpush1.bf16.msra.mxu0 %v2140_v44  ;;  %v901_v44 = vld [vmem:[%s7444_s9 + $0xf38] sm:$0xff] }
 0x61f   : > { %4793 = vmatpush2.bf16.msra.mxu1 %v2076_v32  ;;  %4819 = vmatprep.subr.bf16.mxu0 %v2133_v48  ;;  %v2261_v32 = vunpack.c.l.s8.bf16 %v941_v15  ;;  %v2196_v48 = vunpack.c.l.s8.bf16 %v908_v55  ;;  %v2189_v14 = vunpack.c.h.s8.bf16 %v901_v44  ;;  %v2181_v2 = vunpack.c.l.s8.bf16 %v901_v44 }
 0x620   : > { %4794 = vmatprep.subr.bf16.mxu1 %v2069_v29  ;;  %v933_v29 = vld [vmem:[%s7444_s9 + $0x1038] sm:$0xff]  ;;  %v2404_v15 = vunpack.c.l.s8.bf16 %v1012_v10 }
 0x622   : > { %4820 = vmatpush1.bf16.msra.mxu0 %v2132_v58  ;;  %v900_v58 = vld [vmem:[%s7444_s9 + $0xf30] sm:$0xff] }
 0x623   : > { %4795 = vmatpush2.bf16.msra.mxu1 %v2068_v35  ;;  %4821 = vmatprep.subr.bf16.mxu0 %v2125_v56  ;;  %v2253_v35 = vunpack.c.h.s8.bf16 %v933_v29  ;;  %v2188_v56 = vunpack.c.h.s8.bf16 %v900_v58 }
 0x624   : > { %4796 = vmatprep.subr.bf16.mxu1 %v2061_v36  ;;  %v932_v36 = vld [vmem:[%s7444_s9 + $0x1030] sm:$0xff] }
 0x625   : > { %v2252_v49 = vunpack.c.h.s8.bf16 %v932_v36  ;;  %v2244_v13 = vunpack.c.l.s8.bf16 %v932_v36 }
 0x626   : > { %4822 = vmatpush1.bf16.msra.mxu0 %v2124_v18  ;;  %v989_v18 = vld [vmem:[%s7444_s9 + $0x11f8] sm:$0xff] }
 0x627   : > { %4797 = vmatpush2.bf16.msra.mxu1 %v2060_v27  ;;  %4823 = vmatprep.subr.bf16.mxu0 %v2117_v46  ;;  %v2245_v27 = vunpack.c.l.s8.bf16 %v933_v29  ;;  %v2180_v46 = vunpack.c.l.s8.bf16 %v900_v58  ;;  %v2365_v28 = vunpack.c.h.s8.bf16 %v989_v18  ;;  %v2357_v45 = vunpack.c.l.s8.bf16 %v989_v18 }
 0x628   : > { %4798 = vmatprep.subr.bf16.mxu1 %v2053_v42  ;;  %v1021_v42 = vld [vmem:[%s7444_s9 + $0x12f8] sm:$0xff] }
 0x62a   : > { %4824 = vmatpush1.bf16.msra.mxu0 %v2116_v50  ;;  %v988_v50 = vld [vmem:[%s7444_s9 + $0x11f0] sm:$0xff] }
 0x62b   : > { %4799 = vmatpush2.bf16.msra.mxu1 %v2052_v9  ;;  %4825 = vmatprep.subr.bf16.mxu0 %v2237_v3  ;;  %v2429_v9 = vunpack.c.h.s8.bf16 %v1021_v42  ;;  %v1020_v3 = vld [vmem:[%s7444_s9 + $0x12f0] sm:$0xff]  ;;  %v2356_v11 = vunpack.c.l.s8.bf16 %v988_v50 }
 0x62c   : > { %4850 = vmatprep.subr.bf16.mxu1 %v2301_v19  ;;  %v2364_v19 = vunpack.c.h.s8.bf16 %v988_v50  ;;  %v2428_v59 = vunpack.c.h.s8.bf16 %v1020_v3 }
 0x62e   : > { %v8570_v0 = vpop.f32.mrf.mxu1  ;;  %4801 = vmatmul.mubr.bf16.vlgmr.msra.gmra.mxu1 %v7698_v23  ;;  %4826 = vmatpush2.bf16.msra.mxu0 %v2236_v40  ;;  %v2220_v23 = vunpack.c.h.s8.bf16 %v916_v30  ;;  %v2421_v40 = vunpack.c.l.s8.bf16 %v1021_v42  ;;  %v980_v30 = vld [vmem:[%s7444_s9 + $0x11b0] sm:$0xff] }
 0x62f   : > { %4851 = vmatpush1.bf16.msra.mxu1 %v2300_v1  ;;  %4827 = vmatprep.subr.bf16.mxu0 %v2229_v4  ;;  %v981_v1 = vld [vmem:[%s7444_s9 + $0x11b8] sm:$0xff] }
 0x630   : > { %v8573_v6 = vpop.f32.mrf.mxu1  ;;  %4852 = vmatprep.subr.bf16.mxu1 %v2293_v37  ;;  %4882 = vmatprep.mubr.bf16.mxu1 %v7714_v21  ;;  %v2205_v21 = vunpack.c.h.s8.bf16 %v909_v17  ;;  %v1013_v4 = vld [vmem:[%s7444_s9 + $0x12b8] sm:$0xff] }
 0x631   : > { %v1005_v17 = vld [vmem:[%s7444_s9 + $0x1278] sm:$0xff] }
 0x632   : > { %v4560_v20 = vpop.f32.mrf.mxu1  ;;  %4828 = vmatpush2.bf16.msra.mxu0 %v2228_v38  ;;  %v2420_v38 = vunpack.c.l.s8.bf16 %v1020_v3 }
 0x633   : > { %4853 = vmatpush1.bf16.msra.mxu1 %v2292_v43  ;;  %4829 = vmatprep.subr.bf16.mxu0 %v2221_v54  ;;  %v2349_v54 = vunpack.c.h.s8.bf16 %v981_v1 }
 0x634   : > { %v4561_v8 = vpop.f32.mrf.mxu1  ;;  %4854 = vmatprep.subr.bf16.mxu1 %v2285_v7  ;;  %v2413_v7 = vunpack.c.h.s8.bf16 %v1013_v4 }
 0x635   : > { %v2341_v8 = vunpack.c.l.s8.bf16 %v981_v1 }
 0x636   : > { %4830 = vmatpush2.bf16.msra.mxu0 %v2220_v23  ;;  %v2412_v23 = vunpack.c.h.s8.bf16 %v1012_v10 }
 0x637   : > { %4855 = vmatpush1.bf16.msra.mxu1 %v2284_v31  ;;  %4831 = vmatprep.subr.bf16.mxu0 %v2213_v57  ;;  %v2405_v57 = vunpack.c.l.s8.bf16 %v1013_v4 }
 0x638   : > { %4856 = vmatprep.subr.bf16.mxu1 %v2277_v47  ;;  %v973_v47 = vld [vmem:[%s7444_s9 + $0x1178] sm:$0xff] }
 0x639   : > { %v2325_v51 = vunpack.c.l.s8.bf16 %v973_v47 }
 0x63a   : > { %4832 = vmatpush2.bf16.msra.mxu0 %v2212_v63  ;;  %v2397_v63 = vunpack.c.h.s8.bf16 %v1005_v17 }
 0x63b   : > { %4857 = vmatpush1.bf16.msra.mxu1 %v2276_v39  ;;  %4833 = vmatprep.subr.bf16.mxu0 %v2205_v21  ;;  %v972_v39 = vld [vmem:[%s7444_s9 + $0x1170] sm:$0xff] }
 0x63c   : > { %4858 = vmatprep.subr.bf16.mxu1 %v2269_v34  ;;  %v1004_v21 = vld [vmem:[%s7444_s9 + $0x1270] sm:$0xff]  ;;  %v2332_v34 = vunpack.c.h.s8.bf16 %v972_v39 }
 0x63d   : > { %v2396_v55 = vunpack.c.h.s8.bf16 %v1004_v21  ;;  %v2388_v44 = vunpack.c.l.s8.bf16 %v1004_v21  ;;  %v1029_v21 = vld [vmem:[%s7444_s9 + $0x1338] sm:$0xff] }
 0x63e   : > { %4834 = vmatpush2.bf16.msra.mxu0 %v2204_v16  ;;  %v2389_v16 = vunpack.c.l.s8.bf16 %v1005_v17  ;;  %v1036_v17 = vld [vmem:[%s7444_s9 + $0x1370] sm:$0xff] }
 0x63f   : > { %4859 = vmatpush1.bf16.msra.mxu1 %v2268_v60  ;;  %4835 = vmatprep.subr.bf16.mxu0 %v2197_v41  ;;  %v965_v60 = vld [vmem:[%s7444_s9 + $0x1138] sm:$0xff] }
 0x640   : > { %4860 = vmatprep.subr.bf16.mxu1 %v2261_v32  ;;  %v997_v41 = vld [vmem:[%s7444_s9 + $0x1238] sm:$0xff]  ;;  %v2324_v32 = vunpack.c.l.s8.bf16 %v972_v39  ;;  %v2317_v29 = vunpack.c.h.s8.bf16 %v965_v60  ;;  %v2309_v36 = vunpack.c.l.s8.bf16 %v965_v60 }
 0x642   : > { %4836 = vmatpush2.bf16.msra.mxu0 %v2196_v48  ;;  %v2381_v48 = vunpack.c.h.s8.bf16 %v997_v41 }
 0x643   : > { %4861 = vmatpush1.bf16.msra.mxu1 %v2260_v33  ;;  %4837 = vmatprep.subr.bf16.mxu0 %v2189_v14  ;;  %v964_v33 = vld [vmem:[%s7444_s9 + $0x1130] sm:$0xff] }
 0x644   : > { %4862 = vmatprep.subr.bf16.mxu1 %v2253_v35  ;;  %v996_v14 = vld [vmem:[%s7444_s9 + $0x1230] sm:$0xff]  ;;  %v2316_v35 = vunpack.c.h.s8.bf16 %v964_v33 }
 0x645   : > { %v2380_v58 = vunpack.c.h.s8.bf16 %v996_v14  ;;  %v2372_v18 = vunpack.c.l.s8.bf16 %v996_v14  ;;  %v1117_v14 = vld [vmem:[%s7444_s9 + $0x15f8] sm:$0xff] }
 0x646   : > { %4838 = vmatpush2.bf16.msra.mxu0 %v2188_v56  ;;  %v2373_v56 = vunpack.c.l.s8.bf16 %v997_v41  ;;  %v1028_v41 = vld [vmem:[%s7444_s9 + $0x1330] sm:$0xff] }
 0x647   : > { %4863 = vmatpush1.bf16.msra.mxu1 %v2252_v49  ;;  %4839 = vmatprep.subr.bf16.mxu0 %v2181_v2  ;;  %v1053_v49 = vld [vmem:[%s7444_s9 + $0x13f8] sm:$0xff] }
 0x648   : > { %4864 = vmatprep.subr.bf16.mxu1 %v2245_v27  ;;  %v1085_v2 = vld [vmem:[%s7444_s9 + $0x14f8] sm:$0xff]  ;;  %v2308_v27 = vunpack.c.l.s8.bf16 %v964_v33  ;;  %v2493_v42 = vunpack.c.h.s8.bf16 %v1053_v49  ;;  %v2485_v3 = vunpack.c.l.s8.bf16 %v1053_v49 }
 0x64a   : > { %4840 = vmatpush2.bf16.msra.mxu0 %v2180_v46  ;;  %v2557_v46 = vunpack.c.h.s8.bf16 %v1085_v2 }
 0x64b   : > { %4865 = vmatpush1.bf16.msra.mxu1 %v2244_v13  ;;  %4891 = vmatprep.subr.bf16.mxu0 %v2429_v9  ;;  %v1052_v13 = vld [vmem:[%s7444_s9 + $0x13f0] sm:$0xff] }
 0x64c   : > { %4866 = vmatprep.subr.bf16.mxu1 %v2365_v28  ;;  %v1084_v28 = vld [vmem:[%s7444_s9 + $0x14f0] sm:$0xff]  ;;  %v2492_v9 = vunpack.c.h.s8.bf16 %v1052_v13  ;;  %v2484_v4 = vunpack.c.l.s8.bf16 %v1052_v13 }
 0x64d   : > { %v4597_v37 = vpop.f32.mrf.mxu0  ;;  %4842 = vmatmul.mubr.bf16.vlgmr.msra.gmra.mxu0 %v7702_v24  ;;  %v2556_v50 = vunpack.c.h.s8.bf16 %v1084_v28 }
 0x64e   : > { %v8594_v5 = vadd.f32 %v4597_v37, %v8570_v0  ;;  %4892 = vmatpush1.bf16.msra.mxu0 %v2428_v59  ;;  %4923 = vmatprep.mubr.bf16.mxu0 %v7718_v22  ;;  %v2348_v0 = vunpack.c.h.s8.bf16 %v980_v30  ;;  %v2333_v22 = vunpack.c.h.s8.bf16 %v973_v47  ;;  %v1045_v59 = vld [vmem:[%s7444_s9 + $0x13b8] sm:$0xff]  ;;  %v2548_v37 = vunpack.c.l.s8.bf16 %v1084_v28 }
 0x64f   : > { %4867 = vmatpush2.bf16.msra.mxu1 %v2364_v19  ;;  %v4599_v43 = vpop.f32.mrf.mxu0  ;;  %4893 = vmatprep.subr.bf16.mxu0 %v2421_v40  ;;  %v2549_v19 = vunpack.c.l.s8.bf16 %v1085_v2  ;;  %v1116_v2 = vld [vmem:[%s7444_s9 + $0x15f0] sm:$0xff]  ;;  %v1109_v28 = vld [vmem:[%s7444_s9 + $0x15b8] sm:$0xff] }
 0x650   : > { %4868 = vmatprep.subr.bf16.mxu1 %v2357_v45  ;;  %v8599_v20 = vadd.f32 %v4599_v43, %v8573_v6  ;;  %v2340_v6 = vunpack.c.l.s8.bf16 %v980_v30  ;;  %v1077_v45 = vld [vmem:[%s7444_s9 + $0x14b8] sm:$0xff] }
 0x651   : > { %v4601_v24 = vpop.f32.mrf.mxu0  ;;  %v2541_v43 = vunpack.c.h.s8.bf16 %v1077_v45 }
 0x652   : > { %4894 = vmatpush1.bf16.msra.mxu0 %v2420_v38  ;;  %v2477_v38 = vunpack.c.h.s8.bf16 %v1045_v59 }
 0x653   : > { %4869 = vmatpush2.bf16.msra.mxu1 %v2356_v11  ;;  %v4602_v31 = vpop.f32.mrf.mxu0  ;;  %4895 = vmatprep.subr.bf16.mxu0 %v2413_v7  ;;  %v1076_v7 = vld [vmem:[%s7444_s9 + $0x14b0] sm:$0xff] }
 0x654   : > { %4870 = vmatprep.subr.bf16.mxu1 %v2349_v54  ;;  %v1044_v54 = vld [vmem:[%s7444_s9 + $0x13b0] sm:$0xff]  ;;  %v2540_v10 = vunpack.c.h.s8.bf16 %v1076_v7  ;;  %v1037_v31 = vld [vmem:[%s7444_s9 + $0x1378] sm:$0xff] }
 0x656   : > { %4896 = vmatpush1.bf16.msra.mxu0 %v2412_v23  ;;  %v2533_v23 = vunpack.c.l.s8.bf16 %v1077_v45 }
 0x657   : > { %4871 = vmatpush2.bf16.msra.mxu1 %v2348_v0  ;;  %4897 = vmatprep.subr.bf16.mxu0 %v2405_v57  ;;  %v2469_v0 = vunpack.c.l.s8.bf16 %v1045_v59  ;;  %v2532_v57 = vunpack.c.l.s8.bf16 %v1076_v7  ;;  %v2597_v7 = vunpack.c.l.s8.bf16 %v1109_v28 }
 0x658   : > { %4872 = vmatprep.subr.bf16.mxu1 %v2341_v8  ;;  %v1069_v8 = vld [vmem:[%s7444_s9 + $0x1478] sm:$0xff] }
 0x659   : > { %v2525_v47 = vunpack.c.h.s8.bf16 %v1069_v8  ;;  %v2517_v39 = vunpack.c.l.s8.bf16 %v1069_v8 }
 0x65a   : > { %4898 = vmatpush1.bf16.msra.mxu0 %v2404_v15  ;;  %v2460_v15 = vunpack.c.h.s8.bf16 %v1036_v17 }
 0x65b   : > { %4873 = vmatpush2.bf16.msra.mxu1 %v2340_v6  ;;  %4899 = vmatprep.subr.bf16.mxu0 %v2397_v63  ;;  %v1068_v6 = vld [vmem:[%s7444_s9 + $0x1470] sm:$0xff]  ;;  %v2453_v63 = vunpack.c.l.s8.bf16 %v1037_v31 }
 0x65c   : > { %4874 = vmatprep.subr.bf16.mxu1 %v2333_v22  ;;  %v2524_v22 = vunpack.c.h.s8.bf16 %v1068_v6 }
 0x65e   : > { %4900 = vmatpush1.bf16.msra.mxu0 %v2396_v55  ;;  %v2452_v55 = vunpack.c.l.s8.bf16 %v1036_v17  ;;  %v1125_v17 = vld [vmem:[%s7444_s9 + $0x1638] sm:$0xff] }
 0x65f   : > { %4875 = vmatpush2.bf16.msra.mxu1 %v2332_v34  ;;  %4901 = vmatprep.subr.bf16.mxu0 %v2389_v16  ;;  %v1061_v34 = vld [vmem:[%s7444_s9 + $0x1438] sm:$0xff]  ;;  %v2445_v16 = vunpack.c.h.s8.bf16 %v1029_v21 }
 0x660   : > { %4876 = vmatprep.subr.bf16.mxu1 %v2325_v51  ;;  %v2516_v51 = vunpack.c.l.s8.bf16 %v1068_v6  ;;  %v2509_v60 = vunpack.c.h.s8.bf16 %v1061_v34  ;;  %v2501_v33 = vunpack.c.l.s8.bf16 %v1061_v34 }
 0x662   : > { %4902 = vmatpush1.bf16.msra.mxu0 %v2388_v44  ;;  %v2444_v44 = vunpack.c.h.s8.bf16 %v1028_v41 }
 0x663   : > { %4877 = vmatpush2.bf16.msra.mxu1 %v2324_v32  ;;  %4903 = vmatprep.subr.bf16.mxu0 %v2381_v48  ;;  %v1060_v32 = vld [vmem:[%s7444_s9 + $0x1430] sm:$0xff]  ;;  %v2437_v48 = vunpack.c.l.s8.bf16 %v1029_v21 }
 0x664   : > { %4878 = vmatprep.subr.bf16.mxu1 %v2317_v29  ;;  %v2508_v29 = vunpack.c.h.s8.bf16 %v1060_v32  ;;  %v1124_v21 = vld [vmem:[%s7444_s9 + $0x1630] sm:$0xff] }
 0x666   : > { %4904 = vmatpush1.bf16.msra.mxu0 %v2380_v58  ;;  %v2436_v58 = vunpack.c.l.s8.bf16 %v1028_v41  ;;  %v1213_v41 = vld [vmem:[%s7444_s9 + $0x18f8] sm:$0xff] }
 0x667   : > { %4879 = vmatpush2.bf16.msra.mxu1 %v2316_v35  ;;  %4905 = vmatprep.subr.bf16.mxu0 %v2373_v56  ;;  %v1149_v35 = vld [vmem:[%s7444_s9 + $0x16f8] sm:$0xff]  ;;  %v2621_v56 = vunpack.c.h.s8.bf16 %v1117_v14 }
 0x668   : > { %4880 = vmatprep.subr.bf16.mxu1 %v2309_v36  ;;  %v2500_v36 = vunpack.c.l.s8.bf16 %v1060_v32  ;;  %v2685_v49 = vunpack.c.h.s8.bf16 %v1149_v35  ;;  %v2677_v13 = vunpack.c.l.s8.bf16 %v1149_v35 }
 0x66a   : > { %4906 = vmatpush1.bf16.msra.mxu0 %v2372_v18  ;;  %v2620_v18 = vunpack.c.h.s8.bf16 %v1116_v2 }
 0x66b   : > { %4881 = vmatpush2.bf16.msra.mxu1 %v2308_v27  ;;  %4907 = vmatprep.subr.bf16.mxu0 %v2493_v42  ;;  %v1148_v27 = vld [vmem:[%s7444_s9 + $0x16f0] sm:$0xff] }
 0x66c   : > { %4932 = vmatprep.subr.bf16.mxu1 %v2557_v46  ;;  %v2684_v42 = vunpack.c.h.s8.bf16 %v1148_v27  ;;  %v2613_v46 = vunpack.c.l.s8.bf16 %v1117_v14  ;;  %v2676_v59 = vunpack.c.l.s8.bf16 %v1148_v27  ;;  %v1212_v14 = vld [vmem:[%s7444_s9 + $0x18f0] sm:$0xff] }
 0x66e   : > { %v4638_v40 = vpop.f32.mrf.mxu1  ;;  %4883 = vmatmul.mubr.bf16.vlgmr.msra.gmra.mxu1 %v7760_v61  ;;  %4908 = vmatpush2.bf16.msra.mxu0 %v2492_v9  ;;  %v1141_v9 = vld [vmem:[%s7444_s9 + $0x16b8] sm:$0xff] }
 0x66f   : > { %v8618_v1 = vadd.f32 %v4638_v40, %v8594_v5  ;;  %4933 = vmatpush1.bf16.msra.mxu1 %v2556_v50  ;;  %4909 = vmatprep.subr.bf16.mxu0 %v2485_v3  ;;  %v2476_v5 = vunpack.c.h.s8.bf16 %v1044_v54  ;;  %v2605_v40 = vunpack.c.h.s8.bf16 %v1109_v28 }
 0x670   : > { %v4640_v11 = vpop.f32.mrf.mxu1  ;;  %4934 = vmatprep.subr.bf16.mxu1 %v2549_v19  ;;  %4964 = vmatprep.mubr.bf16.mxu1 %v7776_v25  ;;  %v2461_v25 = vunpack.c.h.s8.bf16 %v1037_v31  ;;  %v2612_v19 = vunpack.c.l.s8.bf16 %v1116_v2  ;;  %v1132_v31 = vld [vmem:[%s7444_s9 + $0x1670] sm:$0xff]  ;;  %v1205_v2 = vld [vmem:[%s7444_s9 + $0x18b8] sm:$0xff] }
 0x671   : > { %v8623_v30 = vadd.f32 %v4640_v11, %v8599_v20  ;;  %v2468_v20 = vunpack.c.l.s8.bf16 %v1044_v54  ;;  %v1140_v11 = vld [vmem:[%s7444_s9 + $0x16b0] sm:$0xff] }
 0x672   : > { %v4642_v61 = vpop.f32.mrf.mxu1  ;;  %4910 = vmatpush2.bf16.msra.mxu0 %v2484_v4  ;;  %v2669_v4 = vunpack.c.h.s8.bf16 %v1141_v9 }
 0x673   : > { %4935 = vmatpush1.bf16.msra.mxu1 %v2548_v37  ;;  %4911 = vmatprep.subr.bf16.mxu0 %v2477_v38  ;;  %v1108_v37 = vld [vmem:[%s7444_s9 + $0x15b0] sm:$0xff]  ;;  %v2661_v61 = vunpack.c.l.s8.bf16 %v1141_v9  ;;  %v2797_v9 = vunpack.c.h.s8.bf16 %v1205_v2 }
 0x674   : > { %v4643_v24 = vpop.f32.mrf.mxu1  ;;  %4936 = vmatprep.subr.bf16.mxu1 %v2541_v43  ;;  %v2668_v43 = vunpack.c.h.s8.bf16 %v1140_v11 }
 0x675   : > { %v2660_v24 = vunpack.c.l.s8.bf16 %v1140_v11  ;;  %v1165_v11 = vld [vmem:[%s7444_s9 + $0x1778] sm:$0xff] }
 0x676   : > { %4912 = vmatpush2.bf16.msra.mxu0 %v2476_v5  ;;  %v1101_v5 = vld [vmem:[%s7444_s9 + $0x1578] sm:$0xff] }
 0x677   : > { %4937 = vmatpush1.bf16.msra.mxu1 %v2540_v10  ;;  %4913 = vmatprep.subr.bf16.mxu0 %v2469_v0  ;;  %v1133_v10 = vld [vmem:[%s7444_s9 + $0x1678] sm:$0xff] }
 0x678   : > { %4938 = vmatprep.subr.bf16.mxu1 %v2533_v23  ;;  %v2653_v0 = vunpack.c.h.s8.bf16 %v1133_v10  ;;  %v1100_v23 = vld [vmem:[%s7444_s9 + $0x1570] sm:$0xff] }
 0x679   : > { %v2588_v8 = vunpack.c.h.s8.bf16 %v1100_v23  ;;  %v2580_v6 = vunpack.c.l.s8.bf16 %v1100_v23 }
 0x67a   : > { %4914 = vmatpush2.bf16.msra.mxu0 %v2468_v20  ;;  %v2652_v20 = vunpack.c.h.s8.bf16 %v1132_v31 }
 0x67b   : > { %4939 = vmatpush1.bf16.msra.mxu1 %v2532_v57  ;;  %4915 = vmatprep.subr.bf16.mxu0 %v2461_v25  ;;  %v2581_v57 = vunpack.c.l.s8.bf16 %v1101_v5  ;;  %v2645_v25 = vunpack.c.l.s8.bf16 %v1133_v10  ;;  %v2709_v10 = vunpack.c.l.s8.bf16 %v1165_v11 }
 0x67c   : > { %4940 = vmatprep.subr.bf16.mxu1 %v2525_v47  ;;  %v1093_v47 = vld [vmem:[%s7444_s9 + $0x1538] sm:$0xff] }
 0x67e   : > { %4916 = vmatpush2.bf16.msra.mxu0 %v2460_v15  ;;  %v2644_v15 = vunpack.c.l.s8.bf16 %v1132_v31 }
 0x67f   : > { %4941 = vmatpush1.bf16.msra.mxu1 %v2524_v22  ;;  %4917 = vmatprep.subr.bf16.mxu0 %v2453_v63  ;;  %v2573_v22 = vunpack.c.h.s8.bf16 %v1093_v47  ;;  %v2637_v63 = vunpack.c.h.s8.bf16 %v1125_v17 }
 0x680   : > { %4942 = vmatprep.subr.bf16.mxu1 %v2517_v39  ;;  %v1092_v39 = vld [vmem:[%s7444_s9 + $0x1530] sm:$0xff] }
 0x681   : > { %v2572_v34 = vunpack.c.h.s8.bf16 %v1092_v39  ;;  %v2564_v32 = vunpack.c.l.s8.bf16 %v1092_v39  ;;  %v6791_v39 = vld [vmem:[%s7466_s17 + $0x60] ss:$0 sps:$4 sm:$0xff]  }
 0x682   : > { %4918 = vmatpush2.bf16.msra.mxu0 %v2452_v55  ;;  %v2636_v55 = vunpack.c.h.s8.bf16 %v1124_v21 }
 0x683   : > { %4943 = vmatpush1.bf16.msra.mxu1 %v2516_v51  ;;  %4919 = vmatprep.subr.bf16.mxu0 %v2445_v16  ;;  %v2565_v51 = vunpack.c.l.s8.bf16 %v1093_v47  ;;  %v2629_v16 = vunpack.c.l.s8.bf16 %v1125_v17 }
 0x684   : > { %4944 = vmatprep.subr.bf16.mxu1 %v2509_v60  ;;  %v1181_v60 = vld [vmem:[%s7444_s9 + $0x17f8] sm:$0xff] }
 0x686   : > { %4920 = vmatpush2.bf16.msra.mxu0 %v2444_v44  ;;  %v2628_v44 = vunpack.c.l.s8.bf16 %v1124_v21 }
 0x687   : > { %4945 = vmatpush1.bf16.msra.mxu1 %v2508_v29  ;;  %4921 = vmatprep.subr.bf16.mxu0 %v2437_v48  ;;  %v2749_v29 = vunpack.c.h.s8.bf16 %v1181_v60  ;;  %v2813_v48 = vunpack.c.h.s8.bf16 %v1213_v41 }
 0x688   : > { %4946 = vmatprep.subr.bf16.mxu1 %v2501_v33  ;;  %v1180_v33 = vld [vmem:[%s7444_s9 + $0x17f0] sm:$0xff] }
 0x689   : > { %v2748_v35 = vunpack.c.h.s8.bf16 %v1180_v33 }
 0x68a   : > { %4922 = vmatpush2.bf16.msra.mxu0 %v2436_v58  ;;  %v2812_v58 = vunpack.c.h.s8.bf16 %v1212_v14 }
 0x68b   : > { %4947 = vmatpush1.bf16.msra.mxu1 %v2500_v36  ;;  %4973 = vmatprep.subr.bf16.mxu0 %v2685_v49  ;;  %v2741_v36 = vunpack.c.l.s8.bf16 %v1181_v60  ;;  %v1173_v49 = vld [vmem:[%s7444_s9 + $0x17b8] sm:$0xff] }
 0x68c   : > { %4948 = vmatprep.subr.bf16.mxu1 %v2621_v56  ;;  %v2805_v56 = vunpack.c.l.s8.bf16 %v1213_v41  ;;  %v2733_v28 = vunpack.c.h.s8.bf16 %v1173_v49 }
 0x68d   : > { %v4679_v50 = vpop.f32.mrf.mxu0  ;;  %4924 = vmatmul.mubr.bf16.vlgmr.msra.gmra.mxu0 %v7764_v62 }
 0x68e   : > { %v8642_v3 = vadd.f32 %v4679_v50, %v8618_v1  ;;  %4974 = vmatpush1.bf16.msra.mxu0 %v2684_v42  ;;  %5005 = vmatprep.mubr.bf16.mxu0 %v7780_v26  ;;  %v2604_v1 = vunpack.c.h.s8.bf16 %v1108_v37  ;;  %v2589_v26 = vunpack.c.h.s8.bf16 %v1101_v5  ;;  %v2740_v42 = vunpack.c.l.s8.bf16 %v1180_v33  ;;  %v1172_v50 = vld [vmem:[%s7444_s9 + $0x17b0] sm:$0xff] }
 0x68f   : > { %4949 = vmatpush2.bf16.msra.mxu1 %v2620_v18  ;;  %v4681_v45 = vpop.f32.mrf.mxu0  ;;  %4975 = vmatprep.subr.bf16.mxu0 %v2677_v13 }
 0x690   : > { %4950 = vmatprep.subr.bf16.mxu1 %v2613_v46  ;;  %v8647_v38 = vadd.f32 %v4681_v45, %v8623_v30  ;;  %v2596_v30 = vunpack.c.l.s8.bf16 %v1108_v37  ;;  %v2804_v46 = vunpack.c.l.s8.bf16 %v1212_v14  ;;  %v2789_v37 = vunpack.c.l.s8.bf16 %v1205_v2 }
 0x691   : > { %v4683_v62 = vpop.f32.mrf.mxu0 }
 0x692   : > { %4976 = vmatpush1.bf16.msra.mxu0 %v2676_v59  ;;  %v1197_v62 = vld [vmem:[%s7444_s9 + $0x1878] sm:$0xff] }
 0x693   : > { %4951 = vmatpush2.bf16.msra.mxu1 %v2612_v19  ;;  %v4684_v54 = vpop.f32.mrf.mxu0  ;;  %4977 = vmatprep.subr.bf16.mxu0 %v2669_v4  ;;  %v1204_v19 = vld [vmem:[%s7444_s9 + $0x18b0] sm:$0xff]  ;;  %v2725_v4 = vunpack.c.l.s8.bf16 %v1173_v49 }
 0x694   : > { %4952 = vmatprep.subr.bf16.mxu1 %v2605_v40  ;;  %v2796_v45 = vunpack.c.h.s8.bf16 %v1204_v19  ;;  %v1164_v54 = vld [vmem:[%s7444_s9 + $0x1770] sm:$0xff] }
 0x696   : > { %4978 = vmatpush1.bf16.msra.mxu0 %v2668_v43  ;;  %v2781_v43 = vunpack.c.h.s8.bf16 %v1197_v62 }
 0x697   : > { %4953 = vmatpush2.bf16.msra.mxu1 %v2604_v1  ;;  %4979 = vmatprep.subr.bf16.mxu0 %v2661_v61  ;;  %v2788_v1 = vunpack.c.l.s8.bf16 %v1204_v19  ;;  %v2716_v61 = vunpack.c.h.s8.bf16 %v1164_v54 }
 0x698   : > { %4954 = vmatprep.subr.bf16.mxu1 %v2597_v7  ;;  %v1196_v7 = vld [vmem:[%s7444_s9 + $0x1870] sm:$0xff] }
 0x699   : > { %v2780_v5 = vunpack.c.h.s8.bf16 %v1196_v7  ;;  %v2772_v23 = vunpack.c.l.s8.bf16 %v1196_v7  ;;  %v2821_v7 = vld [vmem:[#allocation2 + $0x38] sm:$0xff] }
 0x69a   : > { %4980 = vmatpush1.bf16.msra.mxu0 %v2660_v24  ;;  %v1157_v24 = vld [vmem:[%s7444_s9 + $0x1738] sm:$0xff] }
 0x69b   : > { %4955 = vmatpush2.bf16.msra.mxu1 %v2596_v30  ;;  %4981 = vmatprep.subr.bf16.mxu0 %v2653_v0  ;;  %v2773_v30 = vunpack.c.l.s8.bf16 %v1197_v62  ;;  %v2708_v0 = vunpack.c.l.s8.bf16 %v1164_v54  ;;  %v2701_v31 = vunpack.c.h.s8.bf16 %v1157_v24  ;;  %v2693_v17 = vunpack.c.l.s8.bf16 %v1157_v24 }
 0x69c   : > { %4956 = vmatprep.subr.bf16.mxu1 %v2589_v26  ;;  %v1189_v26 = vld [vmem:[%s7444_s9 + $0x1838] sm:$0xff] }
 0x69e   : > { %4982 = vmatpush1.bf16.msra.mxu0 %v2652_v20  ;;  %v1156_v20 = vld [vmem:[%s7444_s9 + $0x1730] sm:$0xff] }
 0x69f   : > { %4957 = vmatpush2.bf16.msra.mxu1 %v2588_v8  ;;  %4983 = vmatprep.subr.bf16.mxu0 %v2645_v25  ;;  %v2765_v8 = vunpack.c.h.s8.bf16 %v1189_v26  ;;  %v2700_v25 = vunpack.c.h.s8.bf16 %v1156_v20 }
 0x6a0   : > { %4958 = vmatprep.subr.bf16.mxu1 %v2581_v57  ;;  %v1188_v57 = vld [vmem:[%s7444_s9 + $0x1830] sm:$0xff] }
 0x6a1   : > { %v2764_v47 = vunpack.c.h.s8.bf16 %v1188_v57 }
 0x6a2   : > { %4984 = vmatpush1.bf16.msra.mxu0 %v2644_v15  ;;  %v2692_v15 = vunpack.c.l.s8.bf16 %v1156_v20 }
 0x6a3   : > { %4959 = vmatpush2.bf16.msra.mxu1 %v2580_v6  ;;  %4985 = vmatprep.subr.bf16.mxu0 %v2637_v63  ;;  %v2757_v6 = vunpack.c.l.s8.bf16 %v1189_v26 }
 0x6a4   : > { %4960 = vmatprep.subr.bf16.mxu1 %v2573_v22  ;;  %v2756_v22 = vunpack.c.l.s8.bf16 %v1188_v57 }
 0x6a6   : > { %4986 = vmatpush1.bf16.msra.mxu0 %v2636_v55 }
 0x6a7   : > { %4961 = vmatpush2.bf16.msra.mxu1 %v2572_v34  ;;  %4987 = vmatprep.subr.bf16.mxu0 %v2629_v16 }
 0x6a8   : > { %4962 = vmatprep.subr.bf16.mxu1 %v2565_v51 }
 0x6aa   : > { %4988 = vmatpush1.bf16.msra.mxu0 %v2628_v44 }
 0x6ab   : > { %4963 = vmatpush2.bf16.msra.mxu1 %v2564_v32  ;;  %4989 = vmatprep.subr.bf16.mxu0 %v2749_v29 }
 0x6ac   : > { %5014 = vmatprep.subr.bf16.mxu1 %v2813_v48 }
 0x6ae   : > { %v4720_v27 = vpop.f32.mrf.mxu1  ;;  %4965 = vmatmul.mubr.bf16.vlgmr.msra.gmra.mxu1 %v7824_v52  ;;  %4990 = vmatpush2.bf16.msra.mxu0 %v2748_v35 }
 0x6af   : > { %v8666_v18 = vadd.f32 %v4720_v27, %v8642_v3  ;;  %5015 = vmatpush1.bf16.msra.mxu1 %v2812_v58  ;;  %4991 = vmatprep.subr.bf16.mxu0 %v2741_v36  ;;  %v2732_v3 = vunpack.c.h.s8.bf16 %v1172_v50 }
 0x6b0   : > { %v4722_v13 = vpop.f32.mrf.mxu1  ;;  %5016 = vmatprep.subr.bf16.mxu1 %v2805_v56  ;;  %5046 = vmatprep.mubr.bf16.mxu1 %v7245_v12  ;;  %v2717_v12 = vunpack.c.h.s8.bf16 %v1165_v11 }
 0x6b1   : > { %v8671_v59 = vadd.f32 %v4722_v13, %v8647_v38  ;;  %v2724_v38 = vunpack.c.l.s8.bf16 %v1172_v50 }
 0x6b2   : > { %v4724_v52 = vpop.f32.mrf.mxu1  ;;  %4992 = vmatpush2.bf16.msra.mxu0 %v2740_v42 }
 0x6b3   : > { %5017 = vmatpush1.bf16.msra.mxu1 %v2804_v46  ;;  %4993 = vmatprep.subr.bf16.mxu0 %v2733_v28 }
 0x6b4   : > { %v4725_v40 = vpop.f32.mrf.mxu1  ;;  %5018 = vmatprep.subr.bf16.mxu1 %v2797_v9 }
 0x6b6   : > { %4994 = vmatpush2.bf16.msra.mxu0 %v2732_v3 }
 0x6b7   : > { %5019 = vmatpush1.bf16.msra.mxu1 %v2796_v45  ;;  %4995 = vmatprep.subr.bf16.mxu0 %v2725_v4 }
 0x6b8   : > { %5020 = vmatprep.subr.bf16.mxu1 %v2789_v37 }
 0x6ba   : > { %4996 = vmatpush2.bf16.msra.mxu0 %v2724_v38  ;;  %v2820_v38 = vld [vmem:[#allocation2 + $0x28] sm:$0xff] }
 0x6bb   : > { %5021 = vmatpush1.bf16.msra.mxu1 %v2788_v1  ;;  %4997 = vmatprep.subr.bf16.mxu0 %v2717_v12 }
 0x6bc   : > { %5022 = vmatprep.subr.bf16.mxu1 %v2781_v43 }
 0x6be   : > { %4998 = vmatpush2.bf16.msra.mxu0 %v2716_v61 }
 0x6bf   : > { %5023 = vmatpush1.bf16.msra.mxu1 %v2780_v5  ;;  %4999 = vmatprep.subr.bf16.mxu0 %v2709_v10 }
 0x6c0   : > { %5024 = vmatprep.subr.bf16.mxu1 %v2773_v30 }
 0x6c2   : > { %5000 = vmatpush2.bf16.msra.mxu0 %v2708_v0 }
 0x6c3   : > { %5025 = vmatpush1.bf16.msra.mxu1 %v2772_v23  ;;  %5001 = vmatprep.subr.bf16.mxu0 %v2701_v31 }
 0x6c4   : > { %5026 = vmatprep.subr.bf16.mxu1 %v2765_v8 }
 0x6c6   : > { %5002 = vmatpush2.bf16.msra.mxu0 %v2700_v25 }
 0x6c7   : > { %5027 = vmatpush1.bf16.msra.mxu1 %v2764_v47  ;;  %5003 = vmatprep.subr.bf16.mxu0 %v2693_v17 }
 0x6c8   : > { %5028 = vmatprep.subr.bf16.mxu1 %v2757_v6 }
 0x6ca   : > { %5004 = vmatpush2.bf16.msra.mxu0 %v2692_v15 }
 0x6cb   : > { %5029 = vmatpush1.bf16.msra.mxu1 %v2756_v22 }
 0x6cd   : > { %v4761_v63 = vpop.f32.mrf.mxu0  ;;  %5006 = vmatmul.mubr.bf16.vlgmr.msra.gmra.mxu0 %v7828_v53 }
 0x6ce   : > { %5047 = vmatmul.mubr.bf16.vlgmr.msra.gmra.mxu1 %v6791_v39  ;;  %v4762_v21 = vadd.f32 %v4761_v63, %v8666_v18 }
 0x6cf   : > { %v4763_v34 = vpop.f32.mrf.mxu0 }
 0x6d0   : > { %v4764_v55 = vadd.f32 %v4763_v34, %v8671_v59 }
 0x6d1   : > { %v4765_v51 = vpop.f32.mrf.mxu0 }
 0x6d3   : > { %v4766_v16 = vpop.f32.mrf.mxu0 }
 0x6ee   : > { %v4802_v60 = vpop.f32.mrf.mxu1 }
 0x6ef   : > { %v4803_v41 = vadd.f32 %v4802_v60, %v4762_v21 }
 0x6f0   : > { %v4804_v32 = vpop.f32.mrf.mxu1 }
 0x6f1   : > { %v4805_v44 = vadd.f32 %v4804_v32, %v4764_v55 }
 0x6f2   : > { %v4806_v29 = vpop.f32.mrf.mxu1 }
 0x6f4   : > { %v4807_v48 = vpop.f32.mrf.mxu1 }
 0x70d   : > { %v4843_v33 = vpop.f32.mrf.mxu0 }
 0x70e   : > { %v4844_v14 = vadd.f32 %v4843_v33, %v4803_v41 }
 0x70f   : > { %v4845_v35 = vpop.f32.mrf.mxu0 }
 0x710   : > { %v4846_v58 = vadd.f32 %v4845_v35, %v4805_v44 }
 0x711   : > { %v4847_v53 = vpop.f32.mrf.mxu0 }
 0x713   : > { %v4848_v36 = vpop.f32.mrf.mxu0 }
 0x72e   : > { %v4884_v56 = vpop.f32.mrf.mxu1 }
 0x72f   : > { %v4885_v49 = vadd.f32 %v4884_v56, %v4844_v14 }
 0x730   : > { %v4886_v2 = vpop.f32.mrf.mxu1 }
 0x731   : > { %v4887_v27 = vadd.f32 %v4886_v2, %v4846_v58 }
 0x732   : > { %v4888_v18 = vpop.f32.mrf.mxu1 }
 0x734   : > { %v4889_v42 = vpop.f32.mrf.mxu1 }
 0x74d   : > { %v4925_v46 = vpop.f32.mrf.mxu0 }
 0x74e   : > { %v4926_v3 = vadd.f32 %v4925_v46, %v4885_v49 }
 0x74f   : > { %v4927_v13 = vpop.f32.mrf.mxu0 }
 0x750   : > { %v4928_v45 = vadd.f32 %v4927_v13, %v4887_v27 }
 0x751   : > { %v4929_v28 = vpop.f32.mrf.mxu0 }
 0x753   : > { %v4930_v9 = vpop.f32.mrf.mxu0 }
 0x76e   : > { %v4966_v50 = vpop.f32.mrf.mxu1 }
 0x76f   : > { %v4967_v40 = vadd.f32 %v4966_v50, %v4926_v3 }
 0x770   : > { %v4968_v19 = vpop.f32.mrf.mxu1 }
 0x771   : > { %v4969_v11 = vadd.f32 %v4968_v19, %v4928_v45 }
 0x772   : > { %v4970_v59 = vpop.f32.mrf.mxu1 }
 0x774   : > { %v4971_v52 = vpop.f32.mrf.mxu1 }
 0x78d   : > { %v5007_v4 = vpop.f32.mrf.mxu0 }
 0x78e   : > { %v5048_v37 = vpop.f32.mrf.mxu1  ;;  %v5008_v62 = vadd.f32 %v5007_v4, %v4967_v40 }
 0x78f   : > { %v5009_v1 = vpop.f32.mrf.mxu0 }
 0x790   : > { %v5050_v12 = vpop.f32.mrf.mxu1  ;;  %v5049_v43 = vadd.f32 %v5048_v37, %v5008_v62  ;;  %v5010_v54 = vadd.f32 %v5009_v1, %v4969_v11 }
 0x791   : > { %v5011_v61 = vpop.f32.mrf.mxu0 }
 0x792   : > { %v5052_v5 = vpop.f32.mrf.mxu1  ;;  %v5061_v10 = vadd.f32 %v5049_v43, %v2820_v38  ;;  %v5051_v30 = vadd.f32 %v5050_v12, %v5010_v54  ;;  %5074 = sbr.rel (%p6484_p5) target bundleno = 2476 (0x9ac), region = 84 }
 0x793   : > { %v5012_v24 = vpop.f32.mrf.mxu0 }
 0x794   : > { %v5053_v26 = vpop.f32.mrf.mxu1  ;;  %5069 = vst [vmem:[#allocation2 + $0x28] sm:$0xff] %v5061_v10  ;;  %v5062_v0 = vadd.f32 %v5051_v30, %v2821_v7 }
 0x796   : > { %5070 = vst [vmem:[#allocation2 + $0x38] sm:$0xff] %v5062_v0 }
 0x797   : > { %v6792_v23 = vld [vmem:[#allocation9 + $0x74] ss:$8 sps:$4 sm:$0xff]   ;;  %v6796_v8 = vld [vmem:[#allocation9 + $0x70] ss:$8 sps:$4 sm:$0xff]   ;;  %v6798_v57 = vld [vmem:[#allocation9 + $0x64] ss:$8 sps:$4 sm:$0xff]   ;;  %v5085_v13 = vlaneseq }
 0x798   : > { %v6794_v31 = vld [vmem:[#allocation9 + $0x174] ss:$8 sps:$4 sm:$0xff]   ;;  %5979 = vmatprep.subr.bf16.mxu0 %v6792_v23  ;;  %v6797_v20 = vld [vmem:[#allocation9 + $0x170] ss:$8 sps:$4 sm:$0xff]   ;;  %v6800_v25 = vld [vmem:[#allocation9 + $0x164] ss:$8 sps:$4 sm:$0xff]  }
 0x799   : > { %6020 = vmatprep.subr.bf16.mxu1 %v6794_v31  ;;  %5980 = vmatpush1.bf16.msra.mxu0 %v6796_v8  ;;  %v6802_v47 = vld [vmem:[#allocation9 + $0x60] ss:$8 sps:$4 sm:$0xff]   ;;  %v6804_v6 = vld [vmem:[#allocation9 + $0x54] ss:$8 sps:$4 sm:$0xff]   ;;  %v6808_v22 = vld [vmem:[#allocation9 + $0x50] ss:$8 sps:$4 sm:$0xff]  }
 0x79a   : > { %6021 = vmatpush1.bf16.msra.mxu1 %v6797_v20  ;;  %5981 = vmatprep.subr.bf16.mxu0 %v6798_v57  ;;  %v6803_v17 = vld [vmem:[#allocation9 + $0x160] ss:$8 sps:$4 sm:$0xff]   ;;  %v6806_v15 = vld [vmem:[#allocation9 + $0x154] ss:$8 sps:$4 sm:$0xff]   ;;  %v6809_v63 = vld [vmem:[#allocation9 + $0x150] ss:$8 sps:$4 sm:$0xff]  }
 0x79b   : > { %6022 = vmatprep.subr.bf16.mxu1 %v6800_v25  ;;  %v6810_v39 = vld [vmem:[#allocation9 + $0x44] ss:$8 sps:$4 sm:$0xff]   ;;  %v6814_v34 = vld [vmem:[#allocation9 + $0x40] ss:$8 sps:$4 sm:$0xff]   ;;  %v6816_v51 = vld [vmem:[#allocation9 + $0x34] ss:$8 sps:$4 sm:$0xff]  }
 0x79c   : > { %v6812_v21 = vld [vmem:[#allocation9 + $0x144] ss:$8 sps:$4 sm:$0xff]   ;;  %v6815_v55 = vld [vmem:[#allocation9 + $0x140] ss:$8 sps:$4 sm:$0xff]   ;;  %v6818_v16 = vld [vmem:[#allocation9 + $0x134] ss:$8 sps:$4 sm:$0xff]  }
 0x79d   : > { %5982 = vmatpush1.bf16.msra.mxu0 %v6802_v47  ;;  %v6820_v60 = vld [vmem:[#allocation9 + $0x30] ss:$8 sps:$4 sm:$0xff]   ;;  %v6822_v32 = vld [vmem:[#allocation9 + $0x24] ss:$8 sps:$4 sm:$0xff]   ;;  %v6826_v29 = vld [vmem:[#allocation9 + $0x20] ss:$8 sps:$4 sm:$0xff]  }
 0x79e   : > { %6023 = vmatpush1.bf16.msra.mxu1 %v6803_v17  ;;  %5983 = vmatprep.subr.bf16.mxu0 %v6804_v6  ;;  %v6821_v41 = vld [vmem:[#allocation9 + $0x130] ss:$8 sps:$4 sm:$0xff]   ;;  %v6824_v44 = vld [vmem:[#allocation9 + $0x124] ss:$8 sps:$4 sm:$0xff]   ;;  %v6827_v48 = vld [vmem:[#allocation9 + $0x120] ss:$8 sps:$4 sm:$0xff]  }
 0x79f   : > { %6024 = vmatprep.subr.bf16.mxu1 %v6806_v15  ;;  %v6828_v33 = vld [vmem:[#allocation9 + $0x14] ss:$8 sps:$4 sm:$0xff]   ;;  %v6832_v35 = vld [vmem:[#allocation9 + $0x10] ss:$8 sps:$4 sm:$0xff]   ;;  %v6834_v53 = vld [vmem:[#allocation9 + $0x4] ss:$8 sps:$4 sm:$0xff]  }
 0x7a0   : > { %v6830_v14 = vld [vmem:[#allocation9 + $0x114] ss:$8 sps:$4 sm:$0xff]   ;;  %v6833_v58 = vld [vmem:[#allocation9 + $0x110] ss:$8 sps:$4 sm:$0xff]   ;;  %v6836_v36 = vld [vmem:[#allocation9 + $0x104] ss:$8 sps:$4 sm:$0xff]  }
 0x7a1   : > { %5984 = vmatpush1.bf16.msra.mxu0 %v6808_v22  ;;  %v6838_v56 = vld [vmem:[#allocation9] ss:$8 sps:$4 sm:$0xff]   ;;  %v6840_v2 = vld [vmem:[#allocation9 + $0xf4] ss:$8 sps:$4 sm:$0xff]   ;;  %v6844_v18 = vld [vmem:[#allocation9 + $0xf0] ss:$8 sps:$4 sm:$0xff]  }
 0x7a2   : > { %6025 = vmatpush1.bf16.msra.mxu1 %v6809_v63  ;;  %5985 = vmatprep.subr.bf16.mxu0 %v6810_v39  ;;  %v6839_v49 = vld [vmem:[#allocation9 + $0x100] ss:$8 sps:$4 sm:$0xff]   ;;  %v6842_v27 = vld [vmem:[#allocation9 + $0x1f4] ss:$8 sps:$4 sm:$0xff]   ;;  %v6845_v42 = vld [vmem:[#allocation9 + $0x1f0] ss:$8 sps:$4 sm:$0xff]  }
 0x7a3   : > { %6026 = vmatprep.subr.bf16.mxu1 %v6812_v21  ;;  %v6846_v46 = vld [vmem:[#allocation9 + $0xe4] ss:$8 sps:$4 sm:$0xff]   ;;  %v6850_v9 = vld [vmem:[#allocation9 + $0xe0] ss:$8 sps:$4 sm:$0xff]   ;;  %v6852_v19 = vld [vmem:[#allocation9 + $0xd4] ss:$8 sps:$4 sm:$0xff]  }
 0x7a4   : > { %v6848_v28 = vld [vmem:[#allocation9 + $0x1e4] ss:$8 sps:$4 sm:$0xff]   ;;  %v6851_v50 = vld [vmem:[#allocation9 + $0x1e0] ss:$8 sps:$4 sm:$0xff]   ;;  %v8687_v59 = vshrl.u32 %v5085_v13, 7  ;;  %v5076_v62 = vld [vmem:[#allocation2] sm:$0xff] }
 0x7a5   : > { %5986 = vmatpush1.bf16.msra.mxu0 %v6814_v34  ;;  %v6854_v52 = vld [vmem:[#allocation9 + $0x1d4] ss:$8 sps:$4 sm:$0xff]   ;;  %v6856_v3 = vld [vmem:[#allocation9 + $0xd0] ss:$8 sps:$4 sm:$0xff]   ;;  %v6858_v40 = vld [vmem:[#allocation9 + $0xc4] ss:$8 sps:$4 sm:$0xff]  }
 0x7a6   : > { %6027 = vmatpush1.bf16.msra.mxu1 %v6815_v55  ;;  %5987 = vmatprep.subr.bf16.mxu0 %v6816_v51  ;;  %v6857_v45 = vld [vmem:[#allocation9 + $0x1d0] ss:$8 sps:$4 sm:$0xff]   ;;  %v8690_v4 = vsub.s32 1, %v8687_v59  ;;  %v5099_v37 = vsub.s32 3, %v8687_v59  ;;  %v6860_v11 = vld [vmem:[#allocation9 + $0x1c4] ss:$8 sps:$4 sm:$0xff]  }
 0x7a7   : > { %6028 = vmatprep.subr.bf16.mxu1 %v6818_v16  ;;  %v8693_v38 = vld [vmem:[#allocation6] sm:$0xff]  ;;  %v8695_v1 = vld [vmem:[#allocation8] sm:$0xff]  ;;  %v5078_v12 = vld [vmem:[#allocation2 + $0x10] sm:$0xff]  ;;  %v8698_v43 = vsub.s32 0, %v8687_v59  ;;  %v5095_v54 = vsub.s32 2, %v8687_v59  ;;  %v5103_v23 = vsub.s32 4, %v8687_v59 }
 0x7a8   : > { %v6862_v7 = vld [vmem:[#allocation9 + $0xc0] ss:$8 sps:$4 sm:$0xff]   ;;  %v5092_v5 = vrot.slane %v8693_v38, %v8690_v4  ;;  %v5142_v10 = vrot.slane %v8695_v1, %v8690_v4  ;;  %v5100_v30 = vrot.slane %v8693_v38, %v5099_v37  ;;  %v6864_v24 = vld [vmem:[#allocation9 + $0xb4] ss:$8 sps:$4 sm:$0xff]   ;;  %v5150_v0 = vrot.slane %v8695_v1, %v5099_v37  ;;  %v6868_v31 = vld [vmem:[#allocation9 + $0xb0] ss:$8 sps:$4 sm:$0xff]  }
 0x7a9   : > { %5988 = vmatpush1.bf16.msra.mxu0 %v6820_v60  ;;  %v6863_v61 = vld [vmem:[#allocation9 + $0x1c0] ss:$8 sps:$4 sm:$0xff]   ;;  %v6866_v26 = vld [vmem:[#allocation9 + $0x1b4] ss:$8 sps:$4 sm:$0xff]   ;;  %v6869_v57 = vld [vmem:[#allocation9 + $0x1b0] ss:$8 sps:$4 sm:$0xff]   ;;  %v5088_v25 = vrot.slane %v8693_v38, %v8698_v43  ;;  %v5096_v47 = vrot.slane %v8693_v38, %v5095_v54  ;;  %v5138_v34 = vrot.slane %v8695_v1, %v8698_v43  ;;  %v8715_v55 = vrot.slane %v8693_v38, %v5103_v23 }
 0x7aa   : > { %6029 = vmatpush1.bf16.msra.mxu1 %v6821_v41  ;;  %5989 = vmatprep.subr.bf16.mxu0 %v6822_v32  ;;  %v5126_v8 = vmul.f32 %v5092_v5, %v5076_v62  ;;  %v5128_v20 = vmul.f32 %v5100_v30, %v5078_v12  ;;  %v5111_v17 = vsub.s32 6, %v8687_v59  ;;  %v5075_v22 = vld [vmem:[#allocation2 + $0x30] sm:$0xff]  ;;  %v5077_v63 = vld [vmem:[#allocation2 + $0x18] sm:$0xff]  ;;  %v5146_v60 = vrot.slane %v8695_v1, %v5095_v54  ;;  %v6902_v54 = vld [vmem:[#allocation9 + $0x254] ss:$8 sps:$4 sm:$0xff]  }
 0x7ab   : > { %6030 = vmatprep.subr.bf16.mxu1 %v6824_v44  ;;  %v6870_v39 = vld [vmem:[#allocation9 + $0xa4] ss:$8 sps:$4 sm:$0xff]   ;;  %v8719_v41 = vrot.slane %v8695_v1, %v5103_v23  ;;  %v5125_v32 = vmul.f32 %v5088_v25, %v5075_v22  ;;  %v5127_v44 = vmul.f32 %v5096_v47, %v5077_v63  ;;  %v6894_v62 = vld [vmem:[#allocation9 + $0x260] ss:$8 sps:$4 sm:$0xff]   ;;  %v6903_v5 = vld [vmem:[#allocation9 + $0x350] ss:$8 sps:$4 sm:$0xff]  }
 0x7ac   : > { %v5176_v6 = vadd.f32 %v5142_v10, %v5126_v8  ;;  %v5178_v15 = vadd.f32 %v5150_v0, %v5128_v20  ;;  %v6872_v21 = vld [vmem:[#allocation9 + $0x1a4] ss:$8 sps:$4 sm:$0xff]   ;;  %v6897_v12 = vld [vmem:[#allocation9 + $0x360] ss:$8 sps:$4 sm:$0xff]   ;;  %v6914_v0 = vld [vmem:[#allocation9 + $0x234] ss:$8 sps:$4 sm:$0xff]  }
 0x7ad   : > { %5990 = vmatpush1.bf16.msra.mxu0 %v6826_v29  ;;  %v8722_v29 = vrot.slane %v8693_v38, %v5111_v17  ;;  %v6896_v37 = vld [vmem:[#allocation9 + $0x264] ss:$8 sps:$4 sm:$0xff]   ;;  %v6917_v23 = vld [vmem:[#allocation9 + $0x334] ss:$8 sps:$4 sm:$0xff]   ;;  %v6912_v8 = vld [vmem:[#allocation9 + $0x230] ss:$8 sps:$4 sm:$0xff]  }
 0x7ae   : > { %6031 = vmatpush1.bf16.msra.mxu1 %v6827_v48  ;;  %5991 = vmatprep.subr.bf16.mxu0 %v6828_v33  ;;  %v5184_v51 = vmax.f32 %v5176_v6, 0.0  ;;  %v5186_v16 = vmax.f32 %v5178_v15, 0.0  ;;  %v8725_v48 = vrot.slane %v8695_v1, %v5111_v17  ;;  %v6874_v33 = vld [vmem:[#allocation9 + $0xa0] ss:$8 sps:$4 sm:$0xff]   ;;  %v6908_v10 = vld [vmem:[#allocation9 + $0x244] ss:$8 sps:$4 sm:$0xff]  }
 0x7af   : > { %6032 = vmatprep.subr.bf16.mxu1 %v6830_v14  ;;  %v6875_v14 = vld [vmem:[#allocation9 + $0x1a0] ss:$8 sps:$4 sm:$0xff]   ;;  %v6911_v30 = vld [vmem:[#allocation9 + $0x344] ss:$8 sps:$4 sm:$0xff]   ;;  %v6915_v20 = vld [vmem:[#allocation9 + $0x330] ss:$8 sps:$4 sm:$0xff]  }
 0x7b0   : > { %v6920_v25 = vld [vmem:[#allocation9 + $0x224] ss:$8 sps:$4 sm:$0xff]   ;;  %v6918_v17 = vld [vmem:[#allocation9 + $0x220] ss:$8 sps:$4 sm:$0xff]   ;;  %v6926_v63 = vld [vmem:[#allocation9 + $0x214] ss:$8 sps:$4 sm:$0xff]  }
 0x7b1   : > { %5992 = vmatpush1.bf16.msra.mxu0 %v6832_v35  ;;  %v5192_v35 = vpack.c.bf16 %v5184_v51, %v5184_v51  ;;  %v6923_v47 = vld [vmem:[#allocation9 + $0x324] ss:$8 sps:$4 sm:$0xff]   ;;  %v6921_v6 = vld [vmem:[#allocation9 + $0x320] ss:$8 sps:$4 sm:$0xff]   ;;  %vm6322_vm0 = vcmask 261120  }
 0x7b2   : > { %6033 = vmatpush1.bf16.msra.mxu1 %v6833_v58  ;;  %5993 = vmatprep.subr.bf16.mxu0 %v6834_v53  ;;  %v5194_v58 = vpack.c.bf16 %v5186_v16, %v5186_v16  ;;  %v6876_v53 = vld [vmem:[#allocation9 + $0x94] ss:$8 sps:$4 sm:$0xff]   ;;  %v6932_v16 = vld [vmem:[#allocation9 + $0x204] ss:$8 sps:$4 sm:$0xff]  }
 0x7b3   : > { %6034 = vmatprep.subr.bf16.mxu1 %v6836_v36  ;;  %v6878_v36 = vld [vmem:[#allocation9 + $0x194] ss:$8 sps:$4 sm:$0xff]   ;;  %6011 = vmatprep.mubr.bf16.mxu0 %v5192_v35 }
 0x7b4   : > { %6052 = vmatprep.mubr.bf16.mxu1 %v5194_v58  ;;  %v5079_v35 = vld [vmem:[#allocation2 + $0x8] sm:$0xff] }
 0x7b5   : > { %5994 = vmatpush1.bf16.msra.mxu0 %v6838_v56  ;;  %v5175_v56 = vadd.f32 %v5138_v34, %v5125_v32  ;;  %v6927_v34 = vld [vmem:[#allocation9 + $0x310] ss:$8 sps:$4 sm:$0xff]   ;;  %v5082_v32 = vld [vmem:[#allocation2 + $0x38] sm:$0xff]  ;;  %v5129_v58 = vmul.f32 %v8715_v55, %v5079_v35  ;;  %v6941_v55 = vld [vmem:[#allocation9 + $0x3f4] ss:$8 sps:$4 sm:$0xff]  }
 0x7b6   : > { %6035 = vmatpush1.bf16.msra.mxu1 %v6839_v49  ;;  %5995 = vmatprep.subr.bf16.mxu0 %v6840_v2  ;;  %v5177_v49 = vadd.f32 %v5146_v60, %v5127_v44  ;;  %v6880_v2 = vld [vmem:[#allocation9 + $0x90] ss:$8 sps:$4 sm:$0xff]   ;;  %v6935_v44 = vld [vmem:[#allocation9 + $0x304] ss:$8 sps:$4 sm:$0xff]  }
 0x7b7   : > { %6036 = vmatprep.subr.bf16.mxu1 %v6842_v27  ;;  %v6881_v27 = vld [vmem:[#allocation9 + $0x190] ss:$8 sps:$4 sm:$0xff]  }
 0x7b8   : > { %v5185_v13 = vmax.f32 %v5177_v49, 0.0  ;;  %v5080_v60 = vld [vmem:[#allocation2 + $0x20] sm:$0xff]  ;;  %v6996_v35 = vld [vmem:[%s8824_s6 + $0x48] sm:$0xff]  }
 0x7b9   : > { %5996 = vmatpush2.bf16.msra.mxu0 %v6844_v18  ;;  %v6882_v18 = vld [vmem:[#allocation9 + $0x84] ss:$8 sps:$4 sm:$0xff]  }
 0x7ba   : > { %6037 = vmatpush2.bf16.msra.mxu1 %v6845_v42  ;;  %5997 = vmatprep.subr.bf16.mxu0 %v6846_v46  ;;  %v6884_v42 = vld [vmem:[#allocation9 + $0x184] ss:$8 sps:$4 sm:$0xff]   ;;  %v5183_v46 = vmax.f32 %v5175_v56, 0.0  ;;  %v6933_v56 = vld [vmem:[#allocation9 + $0x300] ss:$8 sps:$4 sm:$0xff]  }
 0x7bb   : > { %6038 = vmatprep.subr.bf16.mxu1 %v6848_v28  ;;  %v6886_v28 = vld [vmem:[#allocation9 + $0x80] ss:$8 sps:$4 sm:$0xff]  }
 0x7bd   : > { %5998 = vmatpush2.bf16.msra.mxu0 %v6850_v9  ;;  %v6887_v9 = vld [vmem:[#allocation9 + $0x180] ss:$8 sps:$4 sm:$0xff]  }
 0x7be   : > { %6039 = vmatpush2.bf16.msra.mxu1 %v6851_v50  ;;  %5999 = vmatprep.subr.bf16.mxu0 %v6852_v19  ;;  %v6890_v50 = vld [vmem:[#allocation9 + $0x274] ss:$8 sps:$4 sm:$0xff]  }
 0x7bf   : > { %6040 = vmatprep.subr.bf16.mxu1 %v6854_v52  ;;  %v6893_v19 = vld [vmem:[#allocation9 + $0x374] ss:$8 sps:$4 sm:$0xff]   ;;  %v5191_v52 = vpack.c.bf16 %v5183_v46, %v5183_v46 }
 0x7c1   : > { %6000 = vmatpush2.bf16.msra.mxu0 %v6856_v3  ;;  %v5193_v3 = vpack.c.bf16 %v5185_v13, %v5185_v13  ;;  %v6936_v13 = vld [vmem:[#allocation9 + $0x2f0] ss:$8 sps:$4 sm:$0xff]  }
 0x7c2   : > { %6041 = vmatpush2.bf16.msra.mxu1 %v6857_v45  ;;  %6001 = vmatprep.subr.bf16.mxu0 %v6858_v40  ;;  %v6888_v45 = vld [vmem:[#allocation9 + $0x270] ss:$8 sps:$4 sm:$0xff]  }
 0x7c3   : > { %6042 = vmatprep.subr.bf16.mxu1 %v6860_v11  ;;  %v6891_v40 = vld [vmem:[#allocation9 + $0x370] ss:$8 sps:$4 sm:$0xff]   ;;  %v6899_v11 = vld [vmem:[#allocation9 + $0x364] ss:$8 sps:$4 sm:$0xff]  }
 0x7c5   : > { %6002 = vmatpush2.bf16.msra.mxu0 %v6862_v7  ;;  %v6905_v7 = vld [vmem:[#allocation9 + $0x354] ss:$8 sps:$4 sm:$0xff]  }
 0x7c6   : > { %6043 = vmatpush2.bf16.msra.mxu1 %v6863_v61  ;;  %6003 = vmatprep.subr.bf16.mxu0 %v6864_v24  ;;  %v6900_v61 = vld [vmem:[#allocation9 + $0x250] ss:$8 sps:$4 sm:$0xff]   ;;  %v6906_v24 = vld [vmem:[#allocation9 + $0x240] ss:$8 sps:$4 sm:$0xff]  }
 0x7c7   : > { %6044 = vmatprep.subr.bf16.mxu1 %v6866_v26  ;;  %v6909_v26 = vld [vmem:[#allocation9 + $0x340] ss:$8 sps:$4 sm:$0xff]  }
 0x7c9   : > { %6004 = vmatpush2.bf16.msra.mxu0 %v6868_v31  ;;  %v5107_v31 = vsub.s32 5, %v8687_v59 }
 0x7ca   : > { %6045 = vmatpush2.bf16.msra.mxu1 %v6869_v57  ;;  %6005 = vmatprep.subr.bf16.mxu0 %v6870_v39  ;;  %v5115_v57 = vsub.s32 7, %v8687_v59  ;;  %v6929_v39 = vld [vmem:[#allocation9 + $0x314] ss:$8 sps:$4 sm:$0xff]  }
 0x7cb   : > { %6046 = vmatprep.subr.bf16.mxu1 %v6872_v21  ;;  %v5108_v15 = vrot.slane %v8693_v38, %v5107_v31  ;;  %v6924_v21 = vld [vmem:[#allocation9 + $0x210] ss:$8 sps:$4 sm:$0xff]   ;;  %v5158_v59 = vrot.slane %v8695_v1, %v5107_v31 }
 0x7cc   : > { %v5116_v22 = vrot.slane %v8693_v38, %v5115_v57  ;;  %v5166_v51 = vrot.slane %v8695_v1, %v5115_v57  ;;  %v5081_v38 = vld [vmem:[#allocation2 + $0x28] sm:$0xff]  ;;  %v6983_v57 = vld [vmem:[#allocation9 + $0x384] ss:$8 sps:$4 sm:$0xff]  }
 0x7cd   : > { %6006 = vmatpush2.bf16.msra.mxu0 %v6874_v33  ;;  %v5130_v33 = vmul.f32 %v5108_v15, %v5080_v60  ;;  %v6972_v31 = vld [vmem:[#allocation9 + $0x290] ss:$8 sps:$4 sm:$0xff]  }
 0x7ce   : > { %6047 = vmatpush2.bf16.msra.mxu1 %v6875_v14  ;;  %6007 = vmatprep.subr.bf16.mxu0 %v6876_v53  ;;  %v5132_v14 = vmul.f32 %v5116_v22, %v5082_v32  ;;  %v5131_v53 = vmul.f32 %v8722_v29, %v5081_v38  ;;  %v6939_v29 = vld [vmem:[#allocation9 + $0x3f0] ss:$8 sps:$4 sm:$0xff]   ;;  %v6992_v32 = vld [vmem:[%s8824_s6 + $0x58] sm:$0xff]  }
 0x7cf   : > { %6048 = vmatprep.subr.bf16.mxu1 %v6878_v36  ;;  %v6930_v36 = vld [vmem:[#allocation9 + $0x200] ss:$8 sps:$4 sm:$0xff]   ;;  %v5180_v49 = vadd.f32 %v5158_v59, %v5130_v33  ;;  %v6988_v59 = vld [vmem:[%s8824_s6 + $0x68] sm:$0xff]   ;;  %v6991_v60 = vld [vmem:[%s8824_s6 + $0x20] sm:$0xff]  }
 0x7d0   : > { %v5182_v1 = vadd.f32 %v5166_v51, %v5132_v14  ;;  %v6989_v51 = vld [vmem:[%s8824_s6 + $0x28] sm:$0xff]   ;;  %v6994_v33 = vld [vmem:[%s8824_s6 + $0x50] sm:$0xff]  }
 0x7d1   : > { %6008 = vmatpush2.bf16.msra.mxu0 %v6880_v2  ;;  %v6938_v2 = vld [vmem:[#allocation9 + $0x2f4] ss:$8 sps:$4 sm:$0xff]   ;;  %v6995_v14 = vld [vmem:[%s8824_s6 + $0x10] sm:$0xff]  }
 0x7d2   : > { %6049 = vmatpush2.bf16.msra.mxu1 %v6881_v27  ;;  %6009 = vmatprep.subr.bf16.mxu0 %v6882_v18  ;;  %v8736_v27 = vadd.f32 %v8719_v41, %v5129_v58  ;;  %v8739_v18 = vadd.f32 %v8725_v48, %v5131_v53  ;;  %v5190_v46 = vmax.f32 %v5182_v1, 0.0  ;;  %v6942_v41 = vld [vmem:[#allocation9 + $0x2e0] ss:$8 sps:$4 sm:$0xff]   ;;  %v6997_v38 = vld [vmem:[%s8824_s6 + $0x8] sm:$0xff]   ;;  %v6998_v58 = vld [vmem:[%s8824_s6 + $0x40] sm:$0xff]  }
 0x7d3   : > { %6050 = vmatprep.subr.bf16.mxu1 %v6884_v42  ;;  %v5188_v42 = vmax.f32 %v5180_v49, 0.0  ;;  %v6945_v48 = vld [vmem:[#allocation9 + $0x3e0] ss:$8 sps:$4 sm:$0xff]   ;;  %v6999_v53 = vld [vmem:[%s8824_s6] sm:$0xff]  }
 0x7d5   : > { %6010 = vmatpush2.bf16.msra.mxu0 %v6886_v28  ;;  %v5196_v28 = vpack.c.bf16 %v5188_v42, %v5188_v42 }
 0x7d6   : > { %6051 = vmatpush2.bf16.msra.mxu1 %v6887_v9  ;;  %6061 = vmatprep.subr.bf16.mxu0 %v6890_v50  ;;  %v5198_v9 = vpack.c.bf16 %v5190_v46, %v5190_v46  ;;  %v6944_v50 = vld [vmem:[#allocation9 + $0x2e4] ss:$8 sps:$4 sm:$0xff]  }
 0x7d7   : > { %6102 = vmatprep.subr.bf16.mxu1 %v6893_v19  ;;  %v6947_v19 = vld [vmem:[#allocation9 + $0x3e4] ss:$8 sps:$4 sm:$0xff]  }
 0x7d8   : > { %6012 = vmatmul.mubr.bf16.vlgmr.msra.gmra.mxu0 %v5191_v52  ;;  %v6950_v52 = vld [vmem:[#allocation9 + $0x2d4] ss:$8 sps:$4 sm:$0xff]  }
 0x7d9   : > { %6053 = vmatmul.mubr.bf16.vlgmr.msra.gmra.mxu1 %v5193_v3  ;;  %6062 = vmatpush1.bf16.msra.mxu0 %v6888_v45  ;;  %v6953_v3 = vld [vmem:[#allocation9 + $0x3d4] ss:$8 sps:$4 sm:$0xff]   ;;  %v6948_v45 = vld [vmem:[#allocation9 + $0x2d0] ss:$8 sps:$4 sm:$0xff]  }
 0x7da   : > { %6103 = vmatpush1.bf16.msra.mxu1 %v6891_v40  ;;  %6063 = vmatprep.subr.bf16.mxu0 %v6896_v37  ;;  %v6951_v40 = vld [vmem:[#allocation9 + $0x3d0] ss:$8 sps:$4 sm:$0xff]   ;;  %v6956_v37 = vld [vmem:[#allocation9 + $0x2c4] ss:$8 sps:$4 sm:$0xff]  }
 0x7db   : > { %6104 = vmatprep.subr.bf16.mxu1 %v6899_v11  ;;  %6093 = vmatprep.mubr.bf16.mxu0 %v5196_v28  ;;  %v6959_v11 = vld [vmem:[#allocation9 + $0x3c4] ss:$8 sps:$4 sm:$0xff]  }
 0x7dc   : > { %6134 = vmatprep.mubr.bf16.mxu1 %v5198_v9 }
 0x7dd   : > { %6064 = vmatpush1.bf16.msra.mxu0 %v6894_v62  ;;  %v6954_v62 = vld [vmem:[#allocation9 + $0x2c0] ss:$8 sps:$4 sm:$0xff]  }
 0x7de   : > { %6105 = vmatpush1.bf16.msra.mxu1 %v6897_v12  ;;  %6065 = vmatprep.subr.bf16.mxu0 %v6902_v54  ;;  %v6957_v12 = vld [vmem:[#allocation9 + $0x3c0] ss:$8 sps:$4 sm:$0xff]   ;;  %v6962_v54 = vld [vmem:[#allocation9 + $0x2b4] ss:$8 sps:$4 sm:$0xff]  }
 0x7df   : > { %6106 = vmatprep.subr.bf16.mxu1 %v6905_v7  ;;  %v6965_v7 = vld [vmem:[#allocation9 + $0x3b4] ss:$8 sps:$4 sm:$0xff]  }
 0x7e1   : > { %6066 = vmatpush1.bf16.msra.mxu0 %v6900_v61  ;;  %v6960_v61 = vld [vmem:[#allocation9 + $0x2b0] ss:$8 sps:$4 sm:$0xff]  }
 0x7e2   : > { %6107 = vmatpush1.bf16.msra.mxu1 %v6903_v5  ;;  %6067 = vmatprep.subr.bf16.mxu0 %v6908_v10  ;;  %v6963_v5 = vld [vmem:[#allocation9 + $0x3b0] ss:$8 sps:$4 sm:$0xff]   ;;  %v6968_v10 = vld [vmem:[#allocation9 + $0x2a4] ss:$8 sps:$4 sm:$0xff]  }
 0x7e3   : > { %6108 = vmatprep.subr.bf16.mxu1 %v6911_v30  ;;  %v6971_v30 = vld [vmem:[#allocation9 + $0x3a4] ss:$8 sps:$4 sm:$0xff]  }
 0x7e5   : > { %6068 = vmatpush1.bf16.msra.mxu0 %v6906_v24  ;;  %v6966_v24 = vld [vmem:[#allocation9 + $0x2a0] ss:$8 sps:$4 sm:$0xff]  }
 0x7e6   : > { %6109 = vmatpush1.bf16.msra.mxu1 %v6909_v26  ;;  %6069 = vmatprep.subr.bf16.mxu0 %v6914_v0  ;;  %v6969_v26 = vld [vmem:[#allocation9 + $0x3a0] ss:$8 sps:$4 sm:$0xff]   ;;  %v6974_v0 = vld [vmem:[#allocation9 + $0x294] ss:$8 sps:$4 sm:$0xff]  }
 0x7e7   : > { %6110 = vmatprep.subr.bf16.mxu1 %v6917_v23  ;;  %v6977_v23 = vld [vmem:[#allocation9 + $0x394] ss:$8 sps:$4 sm:$0xff]  }
 0x7e9   : > { %6070 = vmatpush1.bf16.msra.mxu0 %v6912_v8  ;;  %v6975_v8 = vld [vmem:[#allocation9 + $0x390] ss:$8 sps:$4 sm:$0xff]  }
 0x7ea   : > { %6111 = vmatpush1.bf16.msra.mxu1 %v6915_v20  ;;  %6071 = vmatprep.subr.bf16.mxu0 %v6920_v25  ;;  %v6980_v20 = vld [vmem:[#allocation9 + $0x284] ss:$8 sps:$4 sm:$0xff]   ;;  %v5187_v25 = vmax.f32 %v8736_v27, 0.0 }
 0x7eb   : > { %6112 = vmatprep.subr.bf16.mxu1 %v6923_v47  ;;  %v5189_v47 = vmax.f32 %v8739_v18, 0.0 }
 0x7ec   : > { %v5195_v15 = vpack.c.bf16 %v5187_v25, %v5187_v25 }
 0x7ed   : > { %6072 = vmatpush1.bf16.msra.mxu0 %v6918_v17  ;;  %v6978_v17 = vld [vmem:[#allocation9 + $0x280] ss:$8 sps:$4 sm:$0xff]   ;;  %v5197_v22 = vpack.c.bf16 %v5189_v47, %v5189_v47 }
 0x7ee   : > { %6113 = vmatpush1.bf16.msra.mxu1 %v6921_v6  ;;  %6073 = vmatprep.subr.bf16.mxu0 %v6926_v63  ;;  %v6981_v6 = vld [vmem:[#allocation9 + $0x380] ss:$8 sps:$4 sm:$0xff]  }
 0x7ef   : > { %6114 = vmatprep.subr.bf16.mxu1 %v6929_v39  ;;  %v6984_v63 = vld [vmem:[%s8824_s6 + $0x78] sm:$0xff]  }
 0x7f0   : > { %v6985_v39 = vld [vmem:[%s8824_s6 + $0x38] sm:$0xff]  }
 0x7f1   : > { %6074 = vmatpush1.bf16.msra.mxu0 %v6924_v21  ;;  %v6986_v21 = vld [vmem:[%s8824_s6 + $0x70] sm:$0xff]  }
 0x7f2   : > { %6115 = vmatpush1.bf16.msra.mxu1 %v6927_v34  ;;  %6075 = vmatprep.subr.bf16.mxu0 %v6932_v16  ;;  %v6987_v34 = vld [vmem:[%s8824_s6 + $0x30] sm:$0xff]   ;;  %v6990_v16 = vld [vmem:[%s8824_s6 + $0x60] sm:$0xff]  }
 0x7f3   : > { %6116 = vmatprep.subr.bf16.mxu1 %v6935_v44  ;;  %v6993_v44 = vld [vmem:[%s8824_s6 + $0x18] sm:$0xff]  }
 0x7f5   : > { %6076 = vmatpush1.bf16.msra.mxu0 %v6930_v36  ;;  %v5327_v36 = vld [vmem:[#allocation11] sm:$0x3] }
 0x7f6   : > { %6117 = vmatpush1.bf16.msra.mxu1 %v6933_v56  ;;  %6077 = vmatprep.subr.bf16.mxu0 %v6938_v2  ;;  %v5332_v56 = vrot.slane %v5327_v36, %v8698_v43  ;;  %v5336_v28 = vrot.slane %v5327_v36, %v8690_v4 }
 0x7f7   : > { %6118 = vmatprep.subr.bf16.mxu1 %v6941_v55 }
 0x7f9   : > { %6078 = vmatpush2.bf16.msra.mxu0 %v6936_v13 }
 0x7fa   : > { %6119 = vmatpush2.bf16.msra.mxu1 %v6939_v29  ;;  %6079 = vmatprep.subr.bf16.mxu0 %v6944_v50 }
 0x7fb   : > { %6120 = vmatprep.subr.bf16.mxu1 %v6947_v19 }
 0x7fd   : > { %6080 = vmatpush2.bf16.msra.mxu0 %v6942_v41 }
 0x7fe   : > { %6121 = vmatpush2.bf16.msra.mxu1 %v6945_v48  ;;  %6081 = vmatprep.subr.bf16.mxu0 %v6950_v52 }
 0x7ff   : > { %6122 = vmatprep.subr.bf16.mxu1 %v6953_v3 }
 0x801   : > { %6082 = vmatpush2.bf16.msra.mxu0 %v6948_v45 }
 0x802   : > { %6123 = vmatpush2.bf16.msra.mxu1 %v6951_v40  ;;  %6083 = vmatprep.subr.bf16.mxu0 %v6956_v37 }
 0x803   : > { %6124 = vmatprep.subr.bf16.mxu1 %v6959_v11 }
 0x805   : > { %6084 = vmatpush2.bf16.msra.mxu0 %v6954_v62 }
 0x806   : > { %6125 = vmatpush2.bf16.msra.mxu1 %v6957_v12  ;;  %6085 = vmatprep.subr.bf16.mxu0 %v6962_v54 }
 0x807   : > { %6126 = vmatprep.subr.bf16.mxu1 %v6965_v7 }
 0x809   : > { %6086 = vmatpush2.bf16.msra.mxu0 %v6960_v61 }
 0x80a   : > { %6127 = vmatpush2.bf16.msra.mxu1 %v6963_v5  ;;  %6087 = vmatprep.subr.bf16.mxu0 %v6968_v10  ;;  %v6613_v10 = vld [vmem:[#allocation12] ss:$0 sm:$0xff] }
 0x80b   : > { %6128 = vmatprep.subr.bf16.mxu1 %v6971_v30 }
 0x80d   : > { %6088 = vmatpush2.bf16.msra.mxu0 %v6966_v24 }
 0x80e   : > { %6129 = vmatpush2.bf16.msra.mxu1 %v6969_v26  ;;  %6089 = vmatprep.subr.bf16.mxu0 %v6974_v0 }
 0x80f   : > { %6130 = vmatprep.subr.bf16.mxu1 %v6977_v23 }
 0x811   : > { %6090 = vmatpush2.bf16.msra.mxu0 %v6972_v31 }
 0x812   : > { %6131 = vmatpush2.bf16.msra.mxu1 %v6975_v8  ;;  %6091 = vmatprep.subr.bf16.mxu0 %v6980_v20 }
 0x813   : > { %6132 = vmatprep.subr.bf16.mxu1 %v6983_v57 }
 0x815   : > { %6092 = vmatpush2.bf16.msra.mxu0 %v6978_v17 }
 0x816   : > { %6133 = vmatpush2.bf16.msra.mxu1 %v6981_v6  ;;  %6637 = vmatprep.subr.bf16.mxu0 %v6984_v63 }
 0x818   : > { %6094 = vmatmul.mubr.bf16.vlgmr.msra.gmra.mxu0 %v5195_v15 }
 0x819   : > { %6135 = vmatmul.mubr.bf16.vlgmr.msra.gmra.mxu1 %v5197_v22  ;;  %6638 = vmatpush3.bf16.msra.mxu0 %v6985_v39 }
 0x81a   : > { %6639 = vmatprep.subr.bf16.mxu0 %v6986_v21 }
 0x81d   : > { %6640 = vmatpush3.bf16.msra.mxu0 %v6987_v34 }
 0x81e   : > { %6641 = vmatprep.subr.bf16.mxu0 %v6988_v59 }
 0x821   : > { %6642 = vmatpush3.bf16.msra.mxu0 %v6989_v51 }
 0x822   : > { %6643 = vmatprep.subr.bf16.mxu0 %v6990_v16 }
 0x825   : > { %6644 = vmatpush3.bf16.msra.mxu0 %v6991_v60 }
 0x826   : > { %6645 = vmatprep.subr.bf16.mxu0 %v6992_v32 }
 0x829   : > { %6646 = vmatpush3.bf16.msra.mxu0 %v6993_v44 }
 0x82a   : > { %6647 = vmatprep.subr.bf16.mxu0 %v6994_v33 }
 0x82d   : > { %6648 = vmatpush3.bf16.msra.mxu0 %v6995_v14 }
 0x82e   : > { %6649 = vmatprep.subr.bf16.mxu0 %v6996_v35 }
 0x831   : > { %6650 = vmatpush3.bf16.msra.mxu0 %v6997_v38 }
 0x832   : > { %6651 = vmatprep.subr.bf16.mxu0 %v6998_v58 }
 0x835   : > { %6652 = vmatpush3.bf16.msra.mxu0 %v6999_v53 }
 0x898   : > { %v6013_v49 = vpop.f32.mrf.mxu0 }
 0x899   : > { %v6054_v1 = vpop.f32.mrf.mxu1  ;;  %v6014_v2 = vadd.f32 %v6013_v49, %v5332_v56 }
 0x89a   : > { %v6015_v27 = vpop.f32.mrf.mxu0 }
 0x89b   : > { %v6056_v18 = vpop.f32.mrf.mxu1  ;;  %v6055_v42 = vadd.f32 %v6054_v1, %v6014_v2  ;;  %v6016_v9 = vadd.f32 %v6015_v27, %v5336_v28 }
 0x89c   : > { %v6017_v46 = vpop.f32.mrf.mxu0 }
 0x89d   : > { %v6058_v55 = vpop.f32.mrf.mxu1  ;;  %v6057_v41 = vadd.f32 %v6056_v18, %v6016_v9 }
 0x89e   : > { %v6018_v13 = vpop.f32.mrf.mxu0 }
 0x89f   : > { %v6059_v29 = vpop.f32.mrf.mxu1 }
 0x8d8   : > { %v6095_v50 = vpop.f32.mrf.mxu0 }
 0x8d9   : > { %v6136_v19 = vpop.f32.mrf.mxu1  ;;  %v6096_v48 = vadd.f32 %v6095_v50, %v6055_v42 }
 0x8da   : > { %v6097_v52 = vpop.f32.mrf.mxu0 }
 0x8db   : > { %v6138_v3 = vpop.f32.mrf.mxu1  ;;  %v6137_v43 = vadd.f32 %v6136_v19, %v6096_v48  ;;  %v6098_v45 = vadd.f32 %v6097_v52, %v6057_v41 }
 0x8dc   : > { %v6099_v40 = vpop.f32.mrf.mxu0 }
 0x8dd   : > { %v6140_v37 = vpop.f32.mrf.mxu1  ;;  %v6139_v11 = vadd.f32 %v6138_v3, %v6098_v45  ;;  %v6143_v62 = vmax.f32 %v6137_v43, 0.0 }
 0x8de   : > { %v6100_v12 = vpop.f32.mrf.mxu0 }
 0x8df   : > { %v6141_v54 = vpop.f32.mrf.mxu1  ;;  %v6144_v7 = vmax.f32 %v6139_v11, 0.0  ;;  %v6145_v5 = vpack.c.bf16 %v6143_v62, %v6143_v62 }
 0x8e1   : > { %v6146_v61 = vpack.c.bf16 %v6144_v7, %v6144_v7 }
 0x8e3   : > { %6314 = vmatprep.mubr.bf16.mxu0 %v6146_v61 }
 0x8e4   : > { %6315 = vmatmul.mubr.bf16.vlgmr.msra.gmra.mxu0 %v6145_v5 }
 0x9a4   : > { %v6653_v4 = vpop.f32.mrf.mxu0 }
 0x9a6   : > { %v6654_v30 = vpop.f32.mrf.mxu0 }
 0x9a7   : > { %v6655_v24 = vadd.f32 %v6654_v30, %v6653_v4 }
 0x9a8   : > { %v6656_v26 = vpop.f32.mrf.mxu0 }
 0x9a9   : > { %v6317_v0 = vadd.f32 %v6655_v24, %v6613_v10 }
 0x9aa   : > { %v6657_v23 = vpop.f32.mrf.mxu0 }
 0x9ab   : > { %6323 = vst.msk [vmem:[#allocation14] sm:$0xff] %vm6322_vm0, %v6317_v0 }
 0x9ac PF: > { %p6718_p9 = scmp.eq.s32.totalorder %s7313_s11, 3  ;;  %s7246_s27 = smov [#allocation14]  }
 0x9ad   : > { %s6331_s17 = sshll.u32 %s7246_s27, 4  ;;  %s6332_s17 = int_to_ptr.vmem [resolvable:$true] %s6331_s17 }
 0x9ae   : > { %s7158_s24 = scalar_lea.vmem %s6332_s17, 128  ;;  %p7165_p8 = scmp.lt.s32.totalorder %s6332_s17, %s6332_s17 }
 0x9af   : > { %p7159_p11 = scmp.ne.s32.totalorder %s6332_s17, %s7158_s24  ;;  %p7166_p4 = scmp.lt.s32.totalorder %s7158_s24, %s7158_s24 }
 0x9b1   : > { %p7160_p12 = pnand %p7159_p11, %p6718_p9  ;;  %p7167_p6 = por %p7166_p4, %p7165_p8 }
 0x9b3   : > { %p7161_p10 = pneg %p7160_p12 }
 0x9b5   : > { %p7168_p0 = pnand %p7167_p6, %p7161_p10 }
 0x9b7   : > { %7171 = shalt.err (!%p7168_p0)
}
 0x9b8   : > { %6684 = dma.vmem_to_hbm [thread:$0]  (%p6718_p9), %s6332_s17, 128, %s8826_s8, [#allocation5]  }
 0x9b9   : > { %7215 = dma.done.wait (%p6718_p9), [#allocation5], 128  }
 0x9ba   : > { %7217 = vsyncadd (%p6718_p9), [#allocation5], 4294967168 }
 0x9bb PF: > { %p22_p1 = scmp.ge.s32.totalorder %s7387_s18, 6   ;;  %s8845_s27 = smov %s7224_s28 }
 0x9bc   : > { %s8846_s28 = smov %s7228_s29  ;;  %s8847_s29 = smov %s7398_s10 }
 0x9bd   : > { %s8848_s30 = smov %s7387_s18  ;;  %24 = sbr.rel (!%p22_p1) target bundleno = 7 (0x7), region = 120 }
 0x9c2   :  { %6344 = vsyncpa [#allocation4], 1 }
 0x9c3   :  { %6346 = vsyncpa [#allocation4 + $0x1], 1 }
 0x9c4   :  { %6347 = vsyncpa [#allocation7], 1 }
 0x9c5   :  { %6348 = vsyncpa [#allocation10], 1 }
 0x9c6   :  { %6349 = vsyncpa [#allocation13], 1 }
 0x9c7   :  { %6350 = vsyncpa [#allocation5], 1 }
 0x9c8   :  { %6352 = vsyncpa [#allocation5 + $0x1], 1 }

</bundles_post_ra>
